<compile_context>
chip_gen: v5e
topology: v5e:2x2
jax: 0.10.0
libtpu: 0.0.40
codegen_flags: <defaults>
</compile_context>

<pallas_src>
import functools
import math

import jax
import jax.numpy as jnp
from jax.experimental import pallas as pl
from jax.experimental.pallas import tpu as pltpu


def _subtoken_kernel(flags_ref, idx_ref, len_ref, emb_ref, w_ref, out_ref,
                     acc_ref, *, kind, s, tv, mm_dtype):
    i_b = pl.program_id(0)
    kv = pl.program_id(1)
    n_kv = pl.num_programs(1)
    tb = acc_ref.shape[0]

    if kind in ("mean", "sum"):
        @pl.when(kv == 0)
        def _init():
            acc_ref[...] = jnp.zeros_like(acc_ref)
    else:  # max
        @pl.when(kv == 0)
        def _init():
            acc_ref[...] = jnp.full(acc_ref.shape, -jnp.inf, dtype=acc_ref.dtype)

    # Per-(batch-tile, vocab-tile) hit flag from SMEM: skip empty vocab tiles.
    flag = flags_ref[i_b, kv]

    @pl.when(flag != 0)
    def _accumulate():
        v_off = kv * tv
        # (1, tv) row iota; the compares broadcast it against (rows, 1).
        lane_iota = jax.lax.broadcasted_iota(jnp.int32, (1, tv), 1) + v_off
        emb_mm = emb_ref[...]                        # (tv, D), bf16 or f32

        if kind in ("mean", "sum"):
            idx = idx_ref[...]                       # (tb, S) int32, invalid = -1
            # C[b, v] = sum_t [idx[b, t] == v]; validity already folded into idx.
            counts = jnp.zeros((tb, tv), dtype=mm_dtype)
            for t in range(s):                       # short static unroll over S
                hit = idx[:, t:t + 1] == lane_iota   # (tb, tv)
                counts = counts + hit.astype(mm_dtype)
            acc_ref[...] += jnp.dot(counts, emb_mm,
                                    preferred_element_type=jnp.float32)
        else:  # max
            idx_col = idx_ref[...]                   # (S*tb, 1), t-major per batch tile
            onehot = (idx_col == lane_iota).astype(mm_dtype)        # (S*tb, tv)
            e_all = jnp.dot(onehot, emb_mm,
                            preferred_element_type=jnp.float32)     # (S*tb, D)
            in_tile = (idx_col >= v_off) & (idx_col < v_off + tv)   # (S*tb, 1)
            acc = acc_ref[...]
            for t in range(s):                       # cheap VPU maxima on (tb, D)
                lo, hi = t * tb, (t + 1) * tb
                acc = jnp.where(in_tile[lo:hi, :],
                                jnp.maximum(acc, e_all[lo:hi, :]), acc)
            acc_ref[...] = acc

    @pl.when(kv == n_kv - 1)
    def _finalize():
        pooled = acc_ref[...]
        if kind == "mean":
            pooled = pooled / (len_ref[...].astype(jnp.float32) + 1e-10)
        # Small (tb, D) @ (D, D) projection once per batch tile; kept in f32.
        out_ref[...] = jnp.dot(pooled, w_ref[...],
                               preferred_element_type=jnp.float32)


def subtoken_unit_embedder(token_idxs, lengths, emb_table, out_weight, *,
                           kind="mean", tb=256, tv=512, use_bf16_mxu=True,
                           vmem_limit_bytes=None):
    """Eval-mode forward of SubtokenUnitEmbedder (dropout = identity).

    use_bf16_mxu=True targets v6e/v7x (bf16-native MXU/VALU; halves the HBM
    table stream).  Set False on v5e or when the ~1e-3 table rounding matters.
    """
    assert kind in ("mean", "sum", "max")
    B, S = token_idxs.shape
    V, D = emb_table.shape
    if use_bf16_mxu:
        assert S <= 256, "bf16 counts are exact only for S <= 256"

    idx = token_idxs.astype(jnp.int32)
    lens = lengths.astype(jnp.int32)
    # Pre-mask invalid subtoken slots with a -1 sentinel (never matches a vocab
    # row or a vocab tile), so the kernel needs no per-t validity logic.
    valid = jnp.arange(S, dtype=jnp.int32)[None, :] < lens[:, None]
    idx = jnp.where(valid, idx, -1)

    Bp = pl.cdiv(B, tb) * tb
    Vp = pl.cdiv(V, tv) * tv
    if Bp != B:
        idx = jnp.pad(idx, ((0, Bp - B), (0, 0)), constant_values=-1)
        lens = jnp.pad(lens, (0, Bp - B), constant_values=1)
    table_dtype = jnp.bfloat16 if use_bf16_mxu else jnp.float32
    emb = emb_table.astype(table_dtype)
    if Vp != V:
        emb = jnp.pad(emb, ((0, Vp - V), (0, 0)))

    n_btiles = Bp // tb
    n_vtiles = Vp // tv

    # Per-(batch-tile, vocab-tile) hit flags (scalar prefetch): tiles with no
    # hits skip the count/one-hot loop + matmul, and their emb index_map points
    # at block 0 so consecutive skipped steps do not re-DMA the table.
    tile_ids = idx // tv                            # (Bp, S); -1 // tv == -1
    flags = (tile_ids.reshape(n_btiles, tb * S)[:, :, None] ==
             jnp.arange(n_vtiles, dtype=jnp.int32)[None, None, :]
             ).any(axis=1).astype(jnp.int32)        # (n_btiles, n_vtiles)

    lens_2d = lens.reshape(Bp, 1)
    w_t = out_weight.astype(jnp.float32).T          # nn.Linear [out,in] -> [in,out]

    if kind == "max":
        # t-major within each batch tile: row (i*S + t)*tb + b = idx[i*tb + b, t].
        # One big (S*tb, tv) @ (tv, D) gather matmul per vocab tile, contiguous
        # (tb, D) slices for the running maxima.
        idx_arg = (idx.reshape(n_btiles, tb, S).transpose(0, 2, 1)
                      .reshape(n_btiles * S * tb, 1))
        idx_spec = pl.BlockSpec((S * tb, 1), lambda i, kv, flg: (i, 0))
    else:
        idx_arg = idx
        idx_spec = pl.BlockSpec((tb, S), lambda i, kv, flg: (i, 0))

    kernel = functools.partial(
        _subtoken_kernel, kind=kind, s=S, tv=tv,
        mm_dtype=(jnp.bfloat16 if use_bf16_mxu else jnp.float32))

    compiler_kwargs = dict(dimension_semantics=("parallel", "arbitrary"))
    if vmem_limit_bytes is not None:
        compiler_kwargs["vmem_limit_bytes"] = vmem_limit_bytes

    out = pl.pallas_call(
        kernel,
        out_shape=jax.ShapeDtypeStruct((Bp, D), jnp.float32),
        grid_spec=pltpu.PrefetchScalarGridSpec(
            num_scalar_prefetch=1,
            grid=(n_btiles, n_vtiles),              # (batch tiles, vocab tiles)
            in_specs=[
                idx_spec,                                               # token ids
                pl.BlockSpec((tb, 1), lambda i, kv, flg: (i, 0)),       # lengths
                pl.BlockSpec((tv, D), lambda i, kv, flg: (kv * flg[i, kv], 0)),
                pl.BlockSpec((D, D), lambda i, kv, flg: (0, 0)),        # W^T (resident)
            ],
            out_specs=pl.BlockSpec((tb, D), lambda i, kv, flg: (i, 0)),
            scratch_shapes=[pltpu.VMEM((tb, D), jnp.float32)],          # pooled acc
        ),
        compiler_params=pltpu.CompilerParams(**compiler_kwargs),
    )(flags, idx_arg, lens_2d, emb, w_t)
    return out[:B]


def _reference(token_idxs, lengths, emb_table, out_weight, kind):
    B, S = token_idxs.shape
    e = emb_table[token_idxs]                                        # (B, S, D)
    mask = jnp.arange(S)[None, :] < lengths[:, None]                 # (B, S)
    if kind == "mean":
        p = (e * mask[:, :, None].astype(jnp.float32)).sum(axis=1)
        p = p / (lengths[:, None].astype(jnp.float32) + 1e-10)
    elif kind == "sum":
        p = (e * mask[:, :, None].astype(jnp.float32)).sum(axis=1)
    else:  # max
        p = jnp.where(mask[:, :, None], e, -jnp.inf).max(axis=1)
    return jnp.dot(p, out_weight.T, precision=jax.lax.Precision.HIGHEST)


if __name__ == "__main__":
    # Small-but-representative shapes: 2 batch tiles (tb=256) and 4 vocab tiles
    # (tv=512).  The two batch halves draw ids from disjoint ranges so some
    # vocab tiles have zero hits for a given batch tile, exercising the
    # scalar-prefetch skip path as well as the streamed vocab reduction.
    B, S, V, D = 512, 8, 2048, 128

    key = jax.random.PRNGKey(0)
    k_lo, k_hi, k_len, k_emb, k_w = jax.random.split(key, 5)

    idx_lo = jax.random.randint(k_lo, (B // 2, S), 0, 600, dtype=jnp.int32)
    idx_hi = jax.random.randint(k_hi, (B // 2, S), 900, 1500, dtype=jnp.int32)
    token_idxs = jnp.concatenate([idx_lo, idx_hi], axis=0)
    lengths = jax.random.randint(k_len, (B,), 1, S + 1, dtype=jnp.int32)

    # nn.init.uniform_ -> U(0, 1)
    emb_table = jax.random.uniform(k_emb, (V, D), dtype=jnp.float32)
    # nn.init.xavier_uniform_ for a [D, D] Linear weight
    bound = math.sqrt(6.0 / (D + D))
    out_weight = jax.random.uniform(k_w, (D, D), dtype=jnp.float32,
                                    minval=-bound, maxval=bound)

    # Default path ships the table as bf16; the one-hot / count operands are
    # exact, so compare against a reference built on the bf16-rounded table.
    emb_rounded = emb_table.astype(jnp.bfloat16).astype(jnp.float32)

    ok = True
    for kind in ("mean", "sum", "max"):
        out = subtoken_unit_embedder(token_idxs, lengths, emb_table, out_weight,
                                     kind=kind)
        out = jax.block_until_ready(out)
        ref = _reference(token_idxs, lengths, emb_rounded, out_weight, kind)
        if not jnp.allclose(out, ref, atol=2e-4, rtol=2e-4):
            ok = False
            print(f"MISMATCH for kind={kind}: "
                  f"max_err={float(jnp.abs(out - ref).max())}")

    if ok:
        print("KERNEL_OK")
</pallas_src>

<mosaic_0001>
module attributes {stable_mosaic.version = 11 : i64} {
  func.func @_subtoken_kernel(%arg0: i32, %arg1: i32, %arg2: memref<2x4xi32, #tpu.memory_space<smem>>, %arg3: memref<256x8xi32, #tpu.memory_space<vmem>>, %arg4: memref<256x1xi32, #tpu.memory_space<vmem>>, %arg5: memref<512x128xbf16, #tpu.memory_space<vmem>>, %arg6: memref<128x128xf32, #tpu.memory_space<vmem>>, %arg7: memref<256x128xf32, #tpu.memory_space<vmem>>, %arg8: memref<256x128xf32, #tpu.memory_space<vmem>>) attributes {dimension_semantics = [#tpu.dimension_semantics<parallel>, #tpu.dimension_semantics<arbitrary>], iteration_bounds = array<i64: 2, 4>, scalar_prefetch = 1 : i64, scratch_operands = 1 : i64, tpu.core_type = #tpu.core_type<tc>, window_params = [{transform_indices = @transform_0, window_bounds = array<i64: 256, 8>}, {transform_indices = @transform_1, window_bounds = array<i64: 256, 1>}, {transform_indices = @transform_2, window_bounds = array<i64: 512, 128>}, {pipeline_mode = #tpu.pipeline_mode<synchronous>, transform_indices = @transform_3, window_bounds = array<i64: 128, 128>}, {transform_indices = @transform_4, window_bounds = array<i64: 256, 128>}]} {
    %c0_i32 = arith.constant 0 : i32
    %0 = arith.cmpi eq, %arg1, %c0_i32 : i32
    %1 = arith.extui %0 : i1 to i32
    %c0_i32_0 = arith.constant 0 : i32
    %2 = arith.cmpi ne, %1, %c0_i32_0 : i32
    scf.if %2 {
      %cst = arith.constant 0.000000e+00 : f32
      %12 = vector.broadcast %cst : f32 to vector<256x128xf32>
      %c0 = arith.constant 0 : index
      %c0_4 = arith.constant 0 : index
      %13 = vector.load %arg8[%c0, %c0_4] : memref<256x128xf32, #tpu.memory_space<vmem>>, vector<256x128xf32>
      tpu.vector_store %arg8[%c0, %c0_4], %12 {strides = array<i32>} : memref<256x128xf32, #tpu.memory_space<vmem>>, vector<256x128xf32>,
    } else {
    }
    %3 = arith.index_cast %arg0 : i32 to index
    %4 = arith.index_cast %arg1 : i32 to index
    %5 = memref.load %arg2[%3, %4] : memref<2x4xi32, #tpu.memory_space<smem>>
    %c0_i32_1 = arith.constant 0 : i32
    %6 = arith.cmpi ne, %5, %c0_i32_1 : i32
    %7 = arith.extui %6 : i1 to i32
    %c0_i32_2 = arith.constant 0 : i32
    %8 = arith.cmpi ne, %7, %c0_i32_2 : i32
    scf.if %8 {
      %c512_i32 = arith.constant 512 : i32
      %12 = arith.muli %arg1, %c512_i32 : i32
      %13 = tpu.iota {dimensions = array<i32: 1>} : vector<1x512xi32>
      %14 = vector.broadcast %12 : i32 to vector<1x512xi32>
      %15 = arith.addi %13, %14 : vector<1x512xi32>
      %c0 = arith.constant 0 : index
      %c0_4 = arith.constant 0 : index
      %16 = vector.load %arg5[%c0, %c0_4] : memref<512x128xbf16, #tpu.memory_space<vmem>>, vector<512x128xbf16>
      %c0_5 = arith.constant 0 : index
      %c0_6 = arith.constant 0 : index
      %17 = vector.load %arg3[%c0_5, %c0_6] : memref<256x8xi32, #tpu.memory_space<vmem>>, vector<256x8xi32>
      %cst = arith.constant 0.000000e+00 : bf16
      %18 = vector.broadcast %cst : bf16 to vector<256x512xbf16>
      %19 = vector.extract_strided_slice %17 {offsets = [0, 0], sizes = [256, 1], strides = [1, 1]} : vector<256x8xi32> to vector<256x1xi32>
      %20 = vector.broadcast %19 : vector<256x1xi32> to vector<256x512xi32>
      %21 = vector.broadcast %15 : vector<1x512xi32> to vector<256x512xi32>
      %22 = arith.cmpi eq, %20, %21 : vector<256x512xi32>
      %23 = arith.extui %22 : vector<256x512xi1> to vector<256x512xi32>
      %24 = arith.sitofp %23 : vector<256x512xi32> to vector<256x512xf32>
      %25 = arith.truncf %24 : vector<256x512xf32> to vector<256x512xbf16>
      %26 = arith.addf %18, %25 : vector<256x512xbf16>
      %27 = vector.extract_strided_slice %17 {offsets = [0, 1], sizes = [256, 1], strides = [1, 1]} : vector<256x8xi32> to vector<256x1xi32>
      %28 = vector.broadcast %27 : vector<256x1xi32> to vector<256x512xi32>
      %29 = vector.broadcast %15 : vector<1x512xi32> to vector<256x512xi32>
      %30 = arith.cmpi eq, %28, %29 : vector<256x512xi32>
      %31 = arith.extui %30 : vector<256x512xi1> to vector<256x512xi32>
      %32 = arith.sitofp %31 : vector<256x512xi32> to vector<256x512xf32>
      %33 = arith.truncf %32 : vector<256x512xf32> to vector<256x512xbf16>
      %34 = arith.addf %26, %33 : vector<256x512xbf16>
      %35 = vector.extract_strided_slice %17 {offsets = [0, 2], sizes = [256, 1], strides = [1, 1]} : vector<256x8xi32> to vector<256x1xi32>
      %36 = vector.broadcast %35 : vector<256x1xi32> to vector<256x512xi32>
      %37 = vector.broadcast %15 : vector<1x512xi32> to vector<256x512xi32>
      %38 = arith.cmpi eq, %36, %37 : vector<256x512xi32>
      %39 = arith.extui %38 : vector<256x512xi1> to vector<256x512xi32>
      %40 = arith.sitofp %39 : vector<256x512xi32> to vector<256x512xf32>
      %41 = arith.truncf %40 : vector<256x512xf32> to vector<256x512xbf16>
      %42 = arith.addf %34, %41 : vector<256x512xbf16>
      %43 = vector.extract_strided_slice %17 {offsets = [0, 3], sizes = [256, 1], strides = [1, 1]} : vector<256x8xi32> to vector<256x1xi32>
      %44 = vector.broadcast %43 : vector<256x1xi32> to vector<256x512xi32>
      %45 = vector.broadcast %15 : vector<1x512xi32> to vector<256x512xi32>
      %46 = arith.cmpi eq, %44, %45 : vector<256x512xi32>
      %47 = arith.extui %46 : vector<256x512xi1> to vector<256x512xi32>
      %48 = arith.sitofp %47 : vector<256x512xi32> to vector<256x512xf32>
      %49 = arith.truncf %48 : vector<256x512xf32> to vector<256x512xbf16>
      %50 = arith.addf %42, %49 : vector<256x512xbf16>
      %51 = vector.extract_strided_slice %17 {offsets = [0, 4], sizes = [256, 1], strides = [1, 1]} : vector<256x8xi32> to vector<256x1xi32>
      %52 = vector.broadcast %51 : vector<256x1xi32> to vector<256x512xi32>
      %53 = vector.broadcast %15 : vector<1x512xi32> to vector<256x512xi32>
      %54 = arith.cmpi eq, %52, %53 : vector<256x512xi32>
      %55 = arith.extui %54 : vector<256x512xi1> to vector<256x512xi32>
      %56 = arith.sitofp %55 : vector<256x512xi32> to vector<256x512xf32>
      %57 = arith.truncf %56 : vector<256x512xf32> to vector<256x512xbf16>
      %58 = arith.addf %50, %57 : vector<256x512xbf16>
      %59 = vector.extract_strided_slice %17 {offsets = [0, 5], sizes = [256, 1], strides = [1, 1]} : vector<256x8xi32> to vector<256x1xi32>
      %60 = vector.broadcast %59 : vector<256x1xi32> to vector<256x512xi32>
      %61 = vector.broadcast %15 : vector<1x512xi32> to vector<256x512xi32>
      %62 = arith.cmpi eq, %60, %61 : vector<256x512xi32>
      %63 = arith.extui %62 : vector<256x512xi1> to vector<256x512xi32>
      %64 = arith.sitofp %63 : vector<256x512xi32> to vector<256x512xf32>
      %65 = arith.truncf %64 : vector<256x512xf32> to vector<256x512xbf16>
      %66 = arith.addf %58, %65 : vector<256x512xbf16>
      %67 = vector.extract_strided_slice %17 {offsets = [0, 6], sizes = [256, 1], strides = [1, 1]} : vector<256x8xi32> to vector<256x1xi32>
      %68 = vector.broadcast %67 : vector<256x1xi32> to vector<256x512xi32>
      %69 = vector.broadcast %15 : vector<1x512xi32> to vector<256x512xi32>
      %70 = arith.cmpi eq, %68, %69 : vector<256x512xi32>
      %71 = arith.extui %70 : vector<256x512xi1> to vector<256x512xi32>
      %72 = arith.sitofp %71 : vector<256x512xi32> to vector<256x512xf32>
      %73 = arith.truncf %72 : vector<256x512xf32> to vector<256x512xbf16>
      %74 = arith.addf %66, %73 : vector<256x512xbf16>
      %75 = vector.extract_strided_slice %17 {offsets = [0, 7], sizes = [256, 1], strides = [1, 1]} : vector<256x8xi32> to vector<256x1xi32>
      %76 = vector.broadcast %75 : vector<256x1xi32> to vector<256x512xi32>
      %77 = vector.broadcast %15 : vector<1x512xi32> to vector<256x512xi32>
      %78 = arith.cmpi eq, %76, %77 : vector<256x512xi32>
      %79 = arith.extui %78 : vector<256x512xi1> to vector<256x512xi32>
      %80 = arith.sitofp %79 : vector<256x512xi32> to vector<256x512xf32>
      %81 = arith.truncf %80 : vector<256x512xf32> to vector<256x512xbf16>
      %82 = arith.addf %74, %81 : vector<256x512xbf16>
      %c0_7 = arith.constant 0 : index
      %c0_8 = arith.constant 0 : index
      %83 = vector.load %arg8[%c0_7, %c0_8] : memref<256x128xf32, #tpu.memory_space<vmem>>, vector<256x128xf32>
      %cst_9 = arith.constant dense<0.000000e+00> : vector<256x128xf32>
      %84 = tpu.matmul %82, %16, %cst_9 {dimension_numbers = #tpu.dot_dimension_numbers<[1], [0], [0], [1], [0, 0, 1, 1], [], []>} : vector<256x512xbf16>, vector<512x128xbf16>, vector<256x128xf32> -> vector<256x128xf32>
      %85 = arith.addf %83, %84 : vector<256x128xf32>
      %c0_10 = arith.constant 0 : index
      %c0_11 = arith.constant 0 : index
      %86 = vector.load %arg8[%c0_10, %c0_11] : memref<256x128xf32, #tpu.memory_space<vmem>>, vector<256x128xf32>
      tpu.vector_store %arg8[%c0_10, %c0_11], %85 {strides = array<i32>} : memref<256x128xf32, #tpu.memory_space<vmem>>, vector<256x128xf32>,
    } else {
    }
    %c3_i32 = arith.constant 3 : i32
    %9 = arith.cmpi eq, %arg1, %c3_i32 : i32
    %10 = arith.extui %9 : i1 to i32
    %c0_i32_3 = arith.constant 0 : i32
    %11 = arith.cmpi ne, %10, %c0_i32_3 : i32
    scf.if %11 {
      %c0 = arith.constant 0 : index
      %c0_4 = arith.constant 0 : index
      %12 = vector.load %arg8[%c0, %c0_4] : memref<256x128xf32, #tpu.memory_space<vmem>>, vector<256x128xf32>
      %c0_5 = arith.constant 0 : index
      %c0_6 = arith.constant 0 : index
      %13 = vector.load %arg4[%c0_5, %c0_6] : memref<256x1xi32, #tpu.memory_space<vmem>>, vector<256x1xi32>
      %14 = arith.sitofp %13 : vector<256x1xi32> to vector<256x1xf32>
      %cst = arith.constant 1.000000e-10 : f32
      %15 = vector.broadcast %cst : f32 to vector<256x1xf32>
      %16 = arith.addf %14, %15 : vector<256x1xf32>
      %17 = vector.broadcast %16 : vector<256x1xf32> to vector<256x128xf32>
      %18 = arith.divf %12, %17 : vector<256x128xf32>
      %c0_7 = arith.constant 0 : index
      %c0_8 = arith.constant 0 : index
      %19 = vector.load %arg6[%c0_7, %c0_8] : memref<128x128xf32, #tpu.memory_space<vmem>>, vector<128x128xf32>
      %cst_9 = arith.constant dense<0.000000e+00> : vector<256x128xf32>
      %20 = tpu.matmul %18, %19, %cst_9 {dimension_numbers = #tpu.dot_dimension_numbers<[1], [0], [0], [1], [0, 0, 1, 1], [], []>} : vector<256x128xf32>, vector<128x128xf32>, vector<256x128xf32> -> vector<256x128xf32>
      %c0_10 = arith.constant 0 : index
      %c0_11 = arith.constant 0 : index
      %21 = vector.load %arg7[%c0_10, %c0_11] : memref<256x128xf32, #tpu.memory_space<vmem>>, vector<256x128xf32>
      tpu.vector_store %arg7[%c0_10, %c0_11], %20 {strides = array<i32>} : memref<256x128xf32, #tpu.memory_space<vmem>>, vector<256x128xf32>,
    } else {
    }
    return
  }
  func.func @transform_0(%arg0: i32, %arg1: i32, %arg2: memref<2x4xi32, #tpu.memory_space<smem>>) -> (i32, i32) {
    %c0_i32 = arith.constant 0 : i32
    %c0_i32_0 = arith.constant 0 : i32
    return %arg0, %c0_i32 : i32, i32
  }
  func.func @transform_1(%arg0: i32, %arg1: i32, %arg2: memref<2x4xi32, #tpu.memory_space<smem>>) -> (i32, i32) {
    %c0_i32 = arith.constant 0 : i32
    %c0_i32_0 = arith.constant 0 : i32
    return %arg0, %c0_i32 : i32, i32
  }
  func.func @transform_2(%arg0: i32, %arg1: i32, %arg2: memref<2x4xi32, #tpu.memory_space<smem>>) -> (i32, i32) {
    %0 = arith.index_cast %arg0 : i32 to index
    %1 = arith.index_cast %arg1 : i32 to index
    %2 = memref.load %arg2[%0, %1] : memref<2x4xi32, #tpu.memory_space<smem>>
    %3 = arith.muli %arg1, %2 : i32
    %c0_i32 = arith.constant 0 : i32
    %c0_i32_0 = arith.constant 0 : i32
    return %3, %c0_i32 : i32, i32
  }
  func.func @transform_3(%arg0: i32, %arg1: i32, %arg2: memref<2x4xi32, #tpu.memory_space<smem>>) -> (i32, i32) {
    %c0_i32 = arith.constant 0 : i32
    %c0_i32_0 = arith.constant 0 : i32
    %c0_i32_1 = arith.constant 0 : i32
    return %c0_i32, %c0_i32_0 : i32, i32
  }
  func.func @transform_4(%arg0: i32, %arg1: i32, %arg2: memref<2x4xi32, #tpu.memory_space<smem>>) -> (i32, i32) {
    %c0_i32 = arith.constant 0 : i32
    %c0_i32_0 = arith.constant 0 : i32
    return %arg0, %c0_i32 : i32, i32
  }
}

</mosaic_0001>

<bundles_post_ra>
// kernel: tpu_custom_call.1
= control target key start
LH: loop header
LB: loop body
LE: loop exit
PB: predicated region body
PF: predicated region fallthrough
CT: control target
= control target key end

     0   :  { %s11773_s21 = smov [#allocation4]   ;;  %s18124_s0 = inlined_call_operand.vmem [shape: s32[2,4], index: 0, kind: input, shape index: {}]   ;;  %s18125_s1 = inlined_call_operand.vmem [shape: s32[512,8], index: 1, kind: input, shape index: {}]   ;;  %s18126_s2 = inlined_call_operand.vmem [shape: s32[512,1], index: 2, kind: input, shape index: {}]   ;;  %s18127_s3 = inlined_call_operand.vmem [shape: bf16[2048,128], index: 3, kind: input, shape index: {}]   ;;  %s18128_s4 = inlined_call_operand.hbm [shape: f32[128,128], index: 4, kind: input, shape index: {}]   ;;  %s18129_s5 = inlined_call_operand.hbm [shape: f32[512,128], index: 5, kind: output, shape index: {}]  }
   0x1   :  { %18289 = sst [smem:[#allocation95_spill]] %s18128_s4  ;;  %s11_s20 = sshll.u32 %s18124_s0, 4  ;;  %s12_s20 = int_to_ptr.vmem [resolvable:$true] %s11_s20 }
   0x2   :  { %14 = dma.vmem_to_smem %s12_s20, 32, %s11773_s21, [#allocation3] }
   0x3   :  { %11731 = dma.done.wait [#allocation3], 32 }
   0x4   :  { %11732 = vsyncadd [#allocation3], 4294967264 }
   0x5   :  { %17 = sfence }
   0x6   :  { %18 = vsyncpa [#allocation6], 0 }
   0x7   :  { %19 = vsyncpa [#allocation7], 0 }
   0x8   :  { %21 = vsyncpa [#allocation7 + $0x1], 0  ;;  %s11823_s22 = smov 0   ;;  %s11825_s23 = smov 0  }
   0x9   :  { %s11827_s24 = smov 0   ;;  %s11829_s25 = smov 0  }
   0xa   :  { %s11831_s26 = smov 0   ;;  %s11833_s0 = smov 0  }
   0xb   :  { %s11835_s27 = smov 0   ;;  %s11837_s28 = smov 0  }
   0xc LB: > { %18290 = sst [smem:[#allocation12_spill]] %s11767_s27  ;;  %s10009_s29 = sadd.s32 4294967295, %s11771_s28   ;;  %s11771_s28 = sphi %s11837_s28, %s27_s28   ;;  %s11767_s27 = sphi %s11835_s27, %s19041_s27   ;;  %s11763_s0 = sphi %s11833_s0, %s19046_s0   ;;  %s11759_s26 = sphi %s11831_s26, %s19039_s26   ;;  %s11755_s25 = sphi %s11829_s25, %s19045_s25   ;;  %s11751_s24 = sphi %s11827_s24, %s19044_s24   ;;  %s11747_s23 = sphi %s11825_s23, %s19043_s23   ;;  %s11743_s22 = sphi %s11823_s22, %s19042_s22  }
   0xd   : > { %s10010_s30 = sadd.s32 4294967294, %s11771_s28   ;;  %s36_s6 = sadd.s32 1, %s11763_s0 }
   0xe   : > { %s39_s7 = sadd.s32 1, %s11767_s27  ;;  %p37_p0 = scmp.ge.s32.totalorder %s36_s6, 4 }
   0xf   : > { %s163_s8 = sadd.s32 1, %s11751_s24  ;;  %p173_p1 = scmp.ne.s32.totalorder %s11751_s24, %s11747_s23 }
  0x10   : > { %p174_p2 = scmp.eq.s32.totalorder %s10009_s29, 7  ;;  %s19048_s6 = smov (%p37_p0, %s36_s6), 0 }
  0x11   : > { %18291 = sst [smem:[#allocation13_spill]] %s19048_s6  ;;  %s19050_s7 = smov (!%p37_p0, %s39_s7), %s11767_s27 }
  0x12   : > { %p11873_p3 = por %p174_p2, %p173_p1  ;;  %p179_p4 = scmp.ne.s32.totalorder %s11747_s23, %s11743_s22 }
  0x13   : > { %p41_p5 = scmp.ge.s32.totalorder %s19050_s7, 2  ;;  %p180_p6 = scmp.eq.s32.totalorder %s10010_s30, 7 }
  0x14   : > { %p10013_p7 = scmp.ge.s32.totalorder %s11771_s28, 1  ;;  %p187_p8 = scmp.lt.s32.totalorder %s11771_s28, 9 }
  0x15   : > { %s19052_s7 = smov (%p41_p5, %s19050_s7), 0  ;;  %p11883_p9 = por %p180_p6, %p179_p4 }
  0x16   : > { %18293 = sst [smem:[#allocation14_spill]] %s19052_s7  ;;  %p11887_p10 = pnand %p10013_p7, %p187_p8 }
  0x17   : > { %s160_s12 = ssub.s32 %s11767_s27, %s19052_s7  ;;  %p11283_p13 = scmp.eq.s32.totalorder %s10009_s29, 0 }
  0x18   : > { %p161_p11 = scmp.eq.s32.totalorder %s160_s12, 0  ;;  %p11275_p12 = pneg %p11887_p10 }
  0x19   : > { %s18296_s4 = sld [smem:[#allocation95_spill]]  ;;  %s11774_s17 = smov [#allocation5]  }
  0x1a   : > { %s11899_s16 = scalar_select %p161_p11, %s11751_s24, %s163_s8  }
  0x1b   : > { %s200_s18 = sshll.u32 %s11774_s17, 4  ;;  %p11276_p0 = pnand %p11283_p13, %p11275_p12  ;;  %s201_s18 = int_to_ptr.vmem [resolvable:$true] %s200_s18 }
  0x1c   : > { %s11775_s19 = smov 128   ;;  %s11776_s20 = smov 8  }
  0x1d   : > { %261 = sbr.rel (%p11887_p10) target bundleno = 1842 (0x732), region = 36 }
  0x1f   : > { %s198_s15 = sshll.u32 %s18296_s4, 4  ;;  %s199_s15 = int_to_ptr.hbm [resolvable:$true] %s198_s15 }
  0x20   : > { %11278 = dma.hbm_to_vmem [thread:$0]  (!%p11276_p0), %s199_s15, 2048, %s201_s18, [#allocation6], %s11775_s19, %s11775_s19, %s11776_s20  }
  0x22   : > { %11734 = dma.done.wait (%p11283_p13), [#allocation6], 2048  }
  0x23   : > { %11736 = vsyncadd (%p11283_p13), [#allocation6], 4294965248  ;;  %s319_s21 = sshra.s32 %s11755_s25, 7  ;;  %s324_s29 = sand.u32 127, %s11755_s25 }
  0x24   : > { %s321_s30 = sadd.s32 %s11759_s26, %s319_s21  ;;  %s18131_s8 = sand.u32 1, %s11747_s23  }
  0x25   : > { %s10023_s12 = sshll.u32 %s321_s30, 7  ;;  %s10018_s13 = sshll.u32 %s18131_s8, 8 }
  0x26   : > { %s11909_s14 = sadd.s32 %s10023_s12, %s324_s29  ;;  %s10019_s15 = sshll.u32 %s11759_s26, 5 }
  0x27   : > { %s326_s11 = sld [smem:[#allocation4 + %s11909_s14]]  ;;  %p308_p1 = scmp.lt.s32.totalorder %s10019_s15, 63 }
  0x28   : > { %p10026_p4 = scmp.ne.s32.totalorder %s11755_s25, 0 }
  0x29   : > { %s19054_s15 = smov (!%p308_p1, %s10019_s15), 63 }
  0x2a   : > { %s10020_s17 = sshll.u32 %s19054_s15, 3 }
  0x2b   : > { %s11917_s4 = scalar_lea.vmem %s18125_s1, %s10020_s17  ;;  %s11922_s30 = scalar_lea.vmem %s18126_s2, %s10020_s17 }
  0x2d   : > { %s327_s18 = smul.u32 %s11755_s25, %s326_s11  ;;  %s11929_s11 = scalar_lea.vmem [#allocation8], %s10018_s13 }
  0x2f   : > { %s10024_s8 = sshll.u32 %s327_s18, 6 }
  0x30   : > { %p329_p2 = scmp.lt.s32.totalorder %s10024_s8, 255  ;;  %347 = sbr.rel (%p10026_p4) target bundleno = 86 (0x56), region = 44 }
  0x32   : > { %s19056_s8 = smov (!%p329_p2, %s10024_s8), 255 }
  0x33   : > { %s10025_s29 = sshll.u32 %s19056_s8, 2 }
  0x34   : > { %s11927_s27 = scalar_lea.vmem %s18127_s3, %s10025_s29 }
  0x35   : > { %v11777_v0 = vmov 0.0  }
  0x36   : > { %348 = vst [vmem:[#allocation2 + $0xb0] sm:$0xff] %v11777_v0 }
  0x37   : > { %349 = vst [vmem:[#allocation2] sm:$0xff] %v11777_v0 }
  0x38   : > { %350 = vst [vmem:[#allocation2 + $0xd8] sm:$0xff] %v11777_v0 }
  0x39   : > { %351 = vst [vmem:[#allocation2 + $0x18] sm:$0xff] %v11777_v0 }
  0x3a   : > { %352 = vst [vmem:[#allocation2 + $0x50] sm:$0xff] %v11777_v0 }
  0x3b   : > { %353 = vst [vmem:[#allocation2 + $0x68] sm:$0xff] %v11777_v0 }
  0x3c   : > { %354 = vst [vmem:[#allocation2 + $0x30] sm:$0xff] %v11777_v0 }
  0x3d   : > { %355 = vst [vmem:[#allocation2 + $0x48] sm:$0xff] %v11777_v0 }
  0x3e   : > { %356 = vst [vmem:[#allocation2 + $0x80] sm:$0xff] %v11777_v0 }
  0x3f   : > { %357 = vst [vmem:[#allocation2 + $0x88] sm:$0xff] %v11777_v0 }
  0x40   : > { %358 = vst [vmem:[#allocation2 + $0xe8] sm:$0xff] %v11777_v0 }
  0x41   : > { %359 = vst [vmem:[#allocation2 + $0xb8] sm:$0xff] %v11777_v0 }
  0x42   : > { %360 = vst [vmem:[#allocation2 + $0x60] sm:$0xff] %v11777_v0 }
  0x43   : > { %361 = vst [vmem:[#allocation2 + $0xf0] sm:$0xff] %v11777_v0 }
  0x44   : > { %362 = vst [vmem:[#allocation2 + $0x8] sm:$0xff] %v11777_v0 }
  0x45   : > { %363 = vst [vmem:[#allocation2 + $0x78] sm:$0xff] %v11777_v0 }
  0x46   : > { %364 = vst [vmem:[#allocation2 + $0x38] sm:$0xff] %v11777_v0 }
  0x47   : > { %365 = vst [vmem:[#allocation2 + $0x58] sm:$0xff] %v11777_v0 }
  0x48   : > { %366 = vst [vmem:[#allocation2 + $0x40] sm:$0xff] %v11777_v0 }
  0x49   : > { %367 = vst [vmem:[#allocation2 + $0xc8] sm:$0xff] %v11777_v0 }
  0x4a   : > { %368 = vst [vmem:[#allocation2 + $0xe0] sm:$0xff] %v11777_v0 }
  0x4b   : > { %369 = vst [vmem:[#allocation2 + $0x90] sm:$0xff] %v11777_v0 }
  0x4c   : > { %370 = vst [vmem:[#allocation2 + $0x70] sm:$0xff] %v11777_v0 }
  0x4d   : > { %371 = vst [vmem:[#allocation2 + $0xc0] sm:$0xff] %v11777_v0 }
  0x4e   : > { %372 = vst [vmem:[#allocation2 + $0xa8] sm:$0xff] %v11777_v0 }
  0x4f   : > { %373 = vst [vmem:[#allocation2 + $0xd0] sm:$0xff] %v11777_v0 }
  0x50   : > { %374 = vst [vmem:[#allocation2 + $0x10] sm:$0xff] %v11777_v0 }
  0x51   : > { %375 = vst [vmem:[#allocation2 + $0x28] sm:$0xff] %v11777_v0 }
  0x52   : > { %376 = vst [vmem:[#allocation2 + $0xa0] sm:$0xff] %v11777_v0 }
  0x53   : > { %377 = vst [vmem:[#allocation2 + $0xf8] sm:$0xff] %v11777_v0 }
  0x54   : > { %378 = vst [vmem:[#allocation2 + $0x20] sm:$0xff] %v11777_v0 }
  0x55   : > { %379 = vst [vmem:[#allocation2 + $0x98] sm:$0xff] %v11777_v0 }
  0x56 PF: > { %s387_s6 = sld [smem:[#allocation4 + %s11909_s14]] }
  0x5c   : > { %p10028_p5 = scmp.eq.s32.totalorder %s387_s6, 0 }
  0x5e   : > { %391 = sbr.rel (%p10028_p5) target bundleno = 1457 (0x5b1), region = 48 }
  0x63   : > { %v11934_v1 = vld [vmem:[%s11917_s4 + $0x20] sm:$0xff]  ;;  %v11937_v2 = vld [vmem:[%s11917_s4 + $0x10] sm:$0xff]  ;;  %v11778_v4 = vmov 0   ;;  %v11946_v5 = vld [vmem:[%s11917_s4 + $0x28] sm:$0xff]  ;;  %v11779_v34 = vmov 1   ;;  %v393_v38 = vlaneseq  ;;  %s10029_s7 = sshll.u32 %s11755_s25, 9 }
  0x64   : > { %v11940_v3 = vld [vmem:[%s11917_s4] sm:$0xff]  ;;  %11369 = vset.pattern.permute.xlu2 %v11778_v4  ;;  %11368 = vset.pattern.permute.xlu1 %v11778_v4  ;;  %v11949_v6 = vld [vmem:[%s11917_s4 + $0x18] sm:$0xff]  ;;  %v11952_v7 = vld [vmem:[%s11917_s4 + $0x8] sm:$0xff]  ;;  %v398_v46 = vstv %s10029_s7  ;;  %v18136_v54 = vmov 0.0  }
  0x65   : > { %11367 = vset.pattern.permute.xlu0 %v11778_v4  ;;  %512 = vperm.xlu2 %11369, %v11934_v1   ;;  %v11958_v8 = vld [vmem:[%s11917_s4 + $0x40] sm:$0xff]  ;;  %v11961_v9 = vld [vmem:[%s11917_s4 + $0x38] sm:$0xff]  ;;  %v11964_v10 = vld [vmem:[%s11917_s4 + $0x30] sm:$0xff]  ;;  %v394_v39 = vand.u32 127, %v393_v38 }
  0x66   : > { %506 = vperm.xlu1 %11368, %v11937_v2   ;;  %500 = vperm.xlu0 %11367, %v11940_v3   ;;  %v11970_v11 = vld [vmem:[%s11917_s4 + $0x58] sm:$0xff]  ;;  %v11973_v12 = vld [vmem:[%s11917_s4 + $0x50] sm:$0xff]  ;;  %v11976_v13 = vld [vmem:[%s11917_s4 + $0x48] sm:$0xff] }
  0x67   : > { %v11982_v14 = vld [vmem:[%s11917_s4 + $0x70] sm:$0xff]  ;;  %v11985_v15 = vld [vmem:[%s11917_s4 + $0x68] sm:$0xff]  ;;  %v11988_v16 = vld [vmem:[%s11917_s4 + $0x60] sm:$0xff]  ;;  %v395_v43 = vadd.s32 128, %v394_v39  ;;  %v396_v44 = vadd.s32 256, %v394_v39  ;;  %v397_v45 = vadd.s32 384, %v394_v39  ;;  %v12081_v47 = vadd.s32 %v398_v46, %v394_v39 }
  0x68   : > { %18297 = vst [vmem:[#allocation15_spill] sm:$0xff] %v11982_v14  ;;  %v11994_v17 = vld [vmem:[%s11917_s4 + $0x88] sm:$0xff]  ;;  %v11997_v18 = vld [vmem:[%s11917_s4 + $0x80] sm:$0xff]  ;;  %v12000_v19 = vld [vmem:[%s11917_s4 + $0x78] sm:$0xff] }
  0x69   : > { %18298 = vst [vmem:[#allocation16_spill] sm:$0xff] %v11985_v15  ;;  %v12006_v20 = vld [vmem:[%s11917_s4 + $0xa0] sm:$0xff]  ;;  %v12009_v21 = vld [vmem:[%s11917_s4 + $0x98] sm:$0xff]  ;;  %v12012_v22 = vld [vmem:[%s11917_s4 + $0x90] sm:$0xff]  ;;  %v12083_v48 = vadd.s32 %v398_v46, %v395_v43  ;;  %v12085_v49 = vadd.s32 %v398_v46, %v396_v44  ;;  %v12091_v51 = vadd.s32 %v398_v46, %v397_v45 }
  0x6a   : > { %18299 = vst [vmem:[#allocation17_spill] sm:$0xff] %v12012_v22  ;;  %v12018_v23 = vld [vmem:[%s11917_s4 + $0xb8] sm:$0xff]  ;;  %v12021_v24 = vld [vmem:[%s11917_s4 + $0xb0] sm:$0xff]  ;;  %v12024_v25 = vld [vmem:[%s11917_s4 + $0xa8] sm:$0xff] }
  0x6b   : > { %v12030_v26 = vld [vmem:[%s11917_s4 + $0xd0] sm:$0xff]  ;;  %v12033_v27 = vld [vmem:[%s11917_s4 + $0xc8] sm:$0xff]  ;;  %v12036_v28 = vld [vmem:[%s11917_s4 + $0xc0] sm:$0xff] }
  0x6c   : > { %v12042_v29 = vld [vmem:[%s11917_s4 + $0xe8] sm:$0xff]  ;;  %v12045_v30 = vld [vmem:[%s11917_s4 + $0xe0] sm:$0xff]  ;;  %v12048_v31 = vld [vmem:[%s11917_s4 + $0xd8] sm:$0xff] }
  0x6d   : > { %515 = vperm.xlu2 %11369, %v11946_v5   ;;  %v12054_v32 = vld [vmem:[%s11917_s4 + $0xf8] sm:$0xff]  ;;  %v12057_v33 = vld [vmem:[%s11917_s4 + $0xf0] sm:$0xff] }
  0x6e   : > { %509 = vperm.xlu1 %11368, %v11949_v6   ;;  %503 = vperm.xlu0 %11367, %v11952_v7  }
  0x75   : > { %524 = vperm.xlu2 %11369, %v11958_v8  }
  0x76   : > { %521 = vperm.xlu1 %11368, %v11961_v9   ;;  %518 = vperm.xlu0 %11367, %v11964_v10  }
  0x7d   : > { %533 = vperm.xlu2 %11369, %v11970_v11  }
  0x7e   : > { %530 = vperm.xlu1 %11368, %v11973_v12   ;;  %527 = vperm.xlu0 %11367, %v11976_v13  }
  0x85   : > { %542 = vperm.xlu2 %11369, %v11982_v14  }
  0x86   : > { %539 = vperm.xlu1 %11368, %v11985_v15   ;;  %536 = vperm.xlu0 %11367, %v11988_v16  }
  0x8d   : > { %551 = vperm.xlu2 %11369, %v11994_v17  }
  0x8e   : > { %548 = vperm.xlu1 %11368, %v11997_v18   ;;  %545 = vperm.xlu0 %11367, %v12000_v19  }
  0x95   : > { %560 = vperm.xlu2 %11369, %v12006_v20  }
  0x96   : > { %557 = vperm.xlu1 %11368, %v12009_v21   ;;  %554 = vperm.xlu0 %11367, %v12012_v22  }
  0x9d   : > { %569 = vperm.xlu2 %11369, %v12018_v23  }
  0x9e   : > { %566 = vperm.xlu1 %11368, %v12021_v24   ;;  %563 = vperm.xlu0 %11367, %v12024_v25  }
  0xa5   : > { %578 = vperm.xlu2 %11369, %v12030_v26  }
  0xa6   : > { %575 = vperm.xlu1 %11368, %v12033_v27   ;;  %572 = vperm.xlu0 %11367, %v12036_v28  }
  0xad   : > { %587 = vperm.xlu2 %11369, %v12042_v29  }
  0xae   : > { %584 = vperm.xlu1 %11368, %v12045_v30   ;;  %581 = vperm.xlu0 %11367, %v12048_v31  }
  0xb5   : > { %11370 = vset.pattern.permute.xlu2 %v11779_v34 }
  0xb6   : > { %593 = vperm.xlu1 %11368, %v12054_v32   ;;  %590 = vperm.xlu0 %11367, %v12057_v33  }
  0xb7   : > { %1364 = vperm.xlu2 %11370, %v11940_v3  }
  0xbe   : > { %11372 = vset.pattern.permute.xlu1 %v11779_v34  ;;  %11371 = vset.pattern.permute.xlu0 %v11779_v34 }
  0xbf   : > { %1370 = vperm.xlu1 %11372, %v11937_v2   ;;  %1373 = vperm.xlu2 %11370, %v11949_v6   ;;  %v513_v35 = vpop.permute.xlu2 %512 }
  0xc0   : > { %1367 = vperm.xlu0 %11371, %v11952_v7   ;;  %vm611_vm0 = vcmp.eq.s32.totalorder %v513_v35, %v12081_v47  ;;  %vm612_vm1 = vcmp.eq.s32.totalorder %v513_v35, %v12083_v48  ;;  %vm613_vm2 = vcmp.eq.s32.totalorder %v513_v35, %v12085_v49  ;;  %vm614_vm3 = vcmp.eq.s32.totalorder %v513_v35, %v12091_v51 }
  0xc1   : > { %v12108_v55 = vsel %vm611_vm0, 1.0, %v18136_v54  ;;  %v12111_v56 = vsel %vm612_vm1, 1.0, %v18136_v54  ;;  %v12114_v57 = vsel %vm613_vm2, 1.0, %v18136_v54  ;;  %v12118_v58 = vsel %vm614_vm3, 1.0, %v18136_v54 }
  0xc2   : > { %18300 = vst [vmem:[#allocation18_spill] sm:$0xff] %v12108_v55 }
  0xc3   : > { %18301 = vst [vmem:[#allocation19_spill] sm:$0xff] %v12111_v56 }
  0xc4   : > { %18302 = vst [vmem:[#allocation20_spill] sm:$0xff] %v12114_v57 }
  0xc5   : > { %18303 = vst [vmem:[#allocation21_spill] sm:$0xff] %v12118_v58 }
  0xc7   : > { %1376 = vperm.xlu1 %11372, %v11934_v1   ;;  %1379 = vperm.xlu2 %11370, %v11946_v5   ;;  %v516_v36 = vpop.permute.xlu2 %515 }
  0xc8   : > { %1382 = vperm.xlu0 %11371, %v11964_v10   ;;  %vm615_vm4 = vcmp.eq.s32.totalorder %v516_v36, %v12081_v47  ;;  %vm616_vm5 = vcmp.eq.s32.totalorder %v516_v36, %v12083_v48  ;;  %vm617_vm6 = vcmp.eq.s32.totalorder %v516_v36, %v12085_v49  ;;  %vm618_vm7 = vcmp.eq.s32.totalorder %v516_v36, %v12091_v51 }
  0xc9   : > { %v12121_v59 = vsel %vm615_vm4, 1.0, %v18136_v54  ;;  %v12124_v60 = vsel %vm616_vm5, 1.0, %v18136_v54  ;;  %v12128_v61 = vsel %vm617_vm6, 1.0, %v18136_v54  ;;  %v12131_v62 = vsel %vm618_vm7, 1.0, %v18136_v54 }
  0xcf   : > { %1385 = vperm.xlu1 %11372, %v11961_v9   ;;  %1388 = vperm.xlu2 %11370, %v11958_v8   ;;  %v525_v37 = vpop.permute.xlu2 %524 }
  0xd0   : > { %1391 = vperm.xlu0 %11371, %v11976_v13   ;;  %vm627_vm8 = vcmp.eq.s32.totalorder %v525_v37, %v12081_v47  ;;  %vm628_vm9 = vcmp.eq.s32.totalorder %v525_v37, %v12083_v48  ;;  %vm629_vm10 = vcmp.eq.s32.totalorder %v525_v37, %v12085_v49  ;;  %vm630_vm11 = vcmp.eq.s32.totalorder %v525_v37, %v12091_v51 }
  0xd1   : > { %v12135_v63 = vsel %vm627_vm8, 1.0, %v18136_v54  ;;  %v12138_v0 = vsel %vm628_vm9, 1.0, %v18136_v54  ;;  %v12151_v34 = vsel %vm629_vm10, 1.0, %v18136_v54 }
  0xd7   : > { %1394 = vperm.xlu1 %11372, %v11973_v12   ;;  %1397 = vperm.xlu2 %11370, %v11970_v11   ;;  %v12073_v40 = vpop.permute.xlu2 %533 }
  0xd8   : > { %1400 = vperm.xlu0 %11371, %v11988_v16   ;;  %v12076_v41 = vpop.permute.xlu1 %506  ;;  %v12078_v42 = vpop.permute.xlu0 %500  ;;  %vm639_vm12 = vcmp.eq.s32.totalorder %v12073_v40, %v12081_v47  ;;  %vm640_vm13 = vcmp.eq.s32.totalorder %v12073_v40, %v12083_v48  ;;  %vm641_vm14 = vcmp.eq.s32.totalorder %v12073_v40, %v12085_v49  ;;  %vm642_vm15 = vcmp.eq.s32.totalorder %v12073_v40, %v12091_v51 }
  0xd9   : > { %vm603_vm0 = vcmp.eq.s32.totalorder %v12076_v41, %v12081_v47  ;;  %vm604_vm1 = vcmp.eq.s32.totalorder %v12076_v41, %v12083_v48  ;;  %vm605_vm2 = vcmp.eq.s32.totalorder %v12076_v41, %v12085_v49  ;;  %vm606_vm3 = vcmp.eq.s32.totalorder %v12076_v41, %v12091_v51 }
  0xda   : > { %vm595_vm4 = vcmp.eq.s32.totalorder %v12078_v42, %v12081_v47  ;;  %v12179_v36 = vsel %vm639_vm12, 1.0, %v18136_v54  ;;  %v12185_v37 = vsel %vm640_vm13, 1.0, %v18136_v54  ;;  %v12191_v38 = vsel %vm641_vm14, 1.0, %v18136_v54 }
  0xdb   : > { %vm596_vm5 = vcmp.eq.s32.totalorder %v12078_v42, %v12083_v48  ;;  %v12196_v39 = vsel %vm642_vm15, 1.0, %v18136_v54  ;;  %v12199_v41 = vsel %vm603_vm0, 1.0, %v18136_v54  ;;  %v12202_v43 = vsel %vm604_vm1, 1.0, %v18136_v54 }
  0xdc   : > { %vm597_vm6 = vcmp.eq.s32.totalorder %v12078_v42, %v12085_v49  ;;  %v12207_v44 = vsel %vm605_vm2, 1.0, %v18136_v54  ;;  %v12210_v40 = vsel %vm606_vm3, 1.0, %v18136_v54  ;;  %vm598_vm7 = vcmp.eq.s32.totalorder %v12078_v42, %v12091_v51 }
  0xdd   : > { %v12215_v45 = vsel %vm595_vm4, 1.0, %v18136_v54  ;;  %v12218_v46 = vsel %vm596_vm5, 1.0, %v18136_v54  ;;  %v12227_v58 = vsel %vm597_vm6, 1.0, %v18136_v54  ;;  %v12236_v42 = vsel %vm598_vm7, 1.0, %v18136_v54 }
  0xdf   : > { %1403 = vperm.xlu1 %11372, %v11985_v15   ;;  %1406 = vperm.xlu2 %11370, %v11982_v14   ;;  %v12089_v50 = vpop.permute.xlu2 %542 }
  0xe0   : > { %1409 = vperm.xlu0 %11371, %v12000_v19   ;;  %v12094_v52 = vpop.permute.xlu1 %509  ;;  %v12096_v53 = vpop.permute.xlu0 %503  ;;  %vm651_vm8 = vcmp.eq.s32.totalorder %v12089_v50, %v12081_v47  ;;  %vm652_vm9 = vcmp.eq.s32.totalorder %v12089_v50, %v12083_v48  ;;  %vm653_vm10 = vcmp.eq.s32.totalorder %v12089_v50, %v12085_v49 }
  0xe1   : > { %vm607_vm12 = vcmp.eq.s32.totalorder %v12094_v52, %v12081_v47  ;;  %vm608_vm13 = vcmp.eq.s32.totalorder %v12094_v52, %v12083_v48  ;;  %vm609_vm14 = vcmp.eq.s32.totalorder %v12094_v52, %v12085_v49  ;;  %vm610_vm15 = vcmp.eq.s32.totalorder %v12094_v52, %v12091_v51 }
  0xe2   : > { %vm599_vm0 = vcmp.eq.s32.totalorder %v12096_v53, %v12081_v47  ;;  %v12247_v56 = vsel %vm651_vm8, 1.0, %v18136_v54  ;;  %v12250_v55 = vsel %vm652_vm9, 1.0, %v18136_v54  ;;  %vm600_vm1 = vcmp.eq.s32.totalorder %v12096_v53, %v12083_v48 }
  0xe3   : > { %18304 = vst [vmem:[#allocation22_spill] sm:$0xff] %v12247_v56  ;;  %vm601_vm2 = vcmp.eq.s32.totalorder %v12096_v53, %v12085_v49  ;;  %vm602_vm3 = vcmp.eq.s32.totalorder %v12096_v53, %v12091_v51 }
  0xe4   : > { %18305 = vst [vmem:[#allocation23_spill] sm:$0xff] %v12250_v55  ;;  %v12301_v55 = vsel %vm600_vm1, 1.0, %v18136_v54  ;;  %v12310_v52 = vsel %vm601_vm2, 1.0, %v18136_v54  ;;  %v12313_v56 = vsel %vm602_vm3, 1.0, %v18136_v54 }
  0xe5   : > { %18309 = vst [vmem:[#allocation27_spill] sm:$0xff] %v12301_v55 }
  0xe6   : > { %18310 = vst [vmem:[#allocation28_spill] sm:$0xff] %v12310_v52 }
  0xe7   : > { %1412 = vperm.xlu1 %11372, %v11997_v18   ;;  %1415 = vperm.xlu2 %11370, %v11994_v17   ;;  %v12148_v4 = vpop.permute.xlu2 %551  ;;  %v12167_v17 = vsel %vm630_vm11, 1.0, %v18136_v54  ;;  %vm654_vm11 = vcmp.eq.s32.totalorder %v12089_v50, %v12091_v51  ;;  %v12286_v50 = vsel %vm609_vm14, 1.0, %v18136_v54  ;;  %18311 = vst [vmem:[#allocation29_spill] sm:$0xff] %v12313_v56 }
  0xe8   : > { %1418 = vperm.xlu0 %11371, %v12012_v22   ;;  %v12160_v35 = vpop.permute.xlu1 %521  ;;  %v12162_v18 = vpop.permute.xlu0 %518  ;;  %v12253_v22 = vsel %vm653_vm10, 1.0, %v18136_v54  ;;  %vm663_vm4 = vcmp.eq.s32.totalorder %v12148_v4, %v12081_v47  ;;  %vm664_vm5 = vcmp.eq.s32.totalorder %v12148_v4, %v12083_v48  ;;  %vm665_vm6 = vcmp.eq.s32.totalorder %v12148_v4, %v12085_v49 }
  0xe9   : > { %18306 = vst [vmem:[#allocation24_spill] sm:$0xff] %v12253_v22  ;;  %v12298_v22 = vsel %vm599_vm0, 1.0, %v18136_v54  ;;  %vm666_vm7 = vcmp.eq.s32.totalorder %v12148_v4, %v12091_v51  ;;  %vm623_vm8 = vcmp.eq.s32.totalorder %v12160_v35, %v12081_v47  ;;  %vm624_vm9 = vcmp.eq.s32.totalorder %v12160_v35, %v12083_v48 }
  0xea   : > { %18308 = vst [vmem:[#allocation26_spill] sm:$0xff] %v12298_v22  ;;  %vm625_vm10 = vcmp.eq.s32.totalorder %v12160_v35, %v12085_v49  ;;  %v12328_v53 = vsel %vm663_vm4, 1.0, %v18136_v54  ;;  %v12331_v4 = vsel %vm664_vm5, 1.0, %v18136_v54  ;;  %v12334_v56 = vsel %vm665_vm6, 1.0, %v18136_v54 }
  0xeb   : > { %18312 = vst [vmem:[#allocation30_spill] sm:$0xff] %v12328_v53  ;;  %v12339_v52 = vsel %vm666_vm7, 1.0, %v18136_v54  ;;  %vm621_vm14 = vcmp.eq.s32.totalorder %v12162_v18, %v12085_v49  ;;  %v12354_v53 = vsel %vm625_vm10, 1.0, %v18136_v54 }
  0xec   : > { %18313 = vst [vmem:[#allocation31_spill] sm:$0xff] %v12331_v4  ;;  %v12351_v4 = vsel %vm624_vm9, 1.0, %v18136_v54 }
  0xed   : > { %18314 = vst [vmem:[#allocation32_spill] sm:$0xff] %v12334_v56 }
  0xee   : > { %18315 = vst [vmem:[#allocation33_spill] sm:$0xff] %v12339_v52 }
  0xef   : > { %1421 = vperm.xlu1 %11372, %v12009_v21   ;;  %1424 = vperm.xlu2 %11370, %v12006_v20   ;;  %v561_v57 = vpop.permute.xlu2 %560  ;;  %v12264_v20 = vsel %vm654_vm11, 1.0, %v18136_v54  ;;  %v12270_v21 = vsel %vm607_vm12, 1.0, %v18136_v54  ;;  %vm626_vm11 = vcmp.eq.s32.totalorder %v12160_v35, %v12091_v51  ;;  %vm619_vm12 = vcmp.eq.s32.totalorder %v12162_v18, %v12081_v47  ;;  %18317 = vst [vmem:[#allocation35_spill] sm:$0xff] %v12351_v4 }
  0xf0   : > { %1427 = vperm.xlu0 %11371, %v12024_v25   ;;  %v531_v14 = vpop.permute.xlu1 %530  ;;  %v12258_v15 = vpop.permute.xlu0 %527  ;;  %18307 = vst [vmem:[#allocation25_spill] sm:$0xff] %v12264_v20  ;;  %v12280_v25 = vsel %vm608_vm13, 1.0, %v18136_v54  ;;  %v12292_v20 = vsel %vm610_vm15, 1.0, %v18136_v54  ;;  %vm620_vm13 = vcmp.eq.s32.totalorder %v12162_v18, %v12083_v48  ;;  %v12342_v35 = vsel %vm623_vm8, 1.0, %v18136_v54 }
  0xf1   : > { %18316 = vst [vmem:[#allocation34_spill] sm:$0xff] %v12342_v35  ;;  %vm622_vm15 = vcmp.eq.s32.totalorder %v12162_v18, %v12091_v51  ;;  %v12357_v52 = vsel %vm626_vm11, 1.0, %v18136_v54  ;;  %v12360_v35 = vsel %vm619_vm12, 1.0, %v18136_v54  ;;  %vm675_vm0 = vcmp.eq.s32.totalorder %v561_v57, %v12081_v47 }
  0xf2   : > { %18318 = vst [vmem:[#allocation36_spill] sm:$0xff] %v12354_v53  ;;  %vm676_vm1 = vcmp.eq.s32.totalorder %v561_v57, %v12083_v48  ;;  %vm677_vm2 = vcmp.eq.s32.totalorder %v561_v57, %v12085_v49  ;;  %vm678_vm3 = vcmp.eq.s32.totalorder %v561_v57, %v12091_v51  ;;  %vm635_vm4 = vcmp.eq.s32.totalorder %v531_v14, %v12081_v47 }
  0xf3   : > { %18319 = vst [vmem:[#allocation37_spill] sm:$0xff] %v12357_v52  ;;  %vm636_vm5 = vcmp.eq.s32.totalorder %v531_v14, %v12083_v48  ;;  %vm637_vm6 = vcmp.eq.s32.totalorder %v531_v14, %v12085_v49  ;;  %vm638_vm7 = vcmp.eq.s32.totalorder %v531_v14, %v12091_v51  ;;  %v12389_v52 = vsel %vm675_vm0, 1.0, %v18136_v54 }
  0xf4   : > { %18320 = vst [vmem:[#allocation38_spill] sm:$0xff] %v12389_v52  ;;  %v12392_v53 = vsel %vm676_vm1, 1.0, %v18136_v54  ;;  %v12395_v18 = vsel %vm677_vm2, 1.0, %v18136_v54  ;;  %vm631_vm8 = vcmp.eq.s32.totalorder %v12258_v15, %v12081_v47  ;;  %v12400_v57 = vsel %vm678_vm3, 1.0, %v18136_v54 }
  0xf5   : > { %18321 = vst [vmem:[#allocation39_spill] sm:$0xff] %v12392_v53  ;;  %v12403_v4 = vsel %vm635_vm4, 1.0, %v18136_v54  ;;  %vm632_vm9 = vcmp.eq.s32.totalorder %v12258_v15, %v12083_v48  ;;  %vm633_vm10 = vcmp.eq.s32.totalorder %v12258_v15, %v12085_v49  ;;  %v12410_v14 = vsel %vm636_vm5, 1.0, %v18136_v54 }
  0xf6   : > { %18322 = vst [vmem:[#allocation40_spill] sm:$0xff] %v12395_v18  ;;  %v12413_v18 = vsel %vm637_vm6, 1.0, %v18136_v54  ;;  %v12416_v53 = vsel %vm638_vm7, 1.0, %v18136_v54  ;;  %vm634_vm11 = vcmp.eq.s32.totalorder %v12258_v15, %v12091_v51 }
  0xf7   : > { %1430 = vperm.xlu1 %11372, %v12021_v24   ;;  %1433 = vperm.xlu2 %11370, %v12018_v23   ;;  %v570_v56 = vpop.permute.xlu2 %569  ;;  %v12366_v23 = vsel %vm620_vm13, 1.0, %v18136_v54  ;;  %v12375_v24 = vsel %vm621_vm14, 1.0, %v18136_v54  ;;  %18323 = vst [vmem:[#allocation41_spill] sm:$0xff] %v12400_v57  ;;  %v12421_v57 = vsel %vm631_vm8, 1.0, %v18136_v54 }
  0xf8   : > { %1436 = vperm.xlu0 %11371, %v12036_v28   ;;  %v540_v55 = vpop.permute.xlu1 %539  ;;  %v12363_v22 = vpop.permute.xlu0 %536  ;;  %v12381_v28 = vsel %vm622_vm15, 1.0, %v18136_v54  ;;  %18324 = vst [vmem:[#allocation42_spill] sm:$0xff] %v12403_v4  ;;  %vm687_vm12 = vcmp.eq.s32.totalorder %v570_v56, %v12081_v47  ;;  %vm688_vm13 = vcmp.eq.s32.totalorder %v570_v56, %v12083_v48  ;;  %vm689_vm14 = vcmp.eq.s32.totalorder %v570_v56, %v12085_v49 }
  0xf9   : > { %18325 = vst [vmem:[#allocation43_spill] sm:$0xff] %v12410_v14  ;;  %vm690_vm15 = vcmp.eq.s32.totalorder %v570_v56, %v12091_v51  ;;  %vm647_vm0 = vcmp.eq.s32.totalorder %v540_v55, %v12081_v47  ;;  %v12438_v4 = vsel %vm634_vm11, 1.0, %v18136_v54  ;;  %vm648_vm1 = vcmp.eq.s32.totalorder %v540_v55, %v12083_v48 }
  0xfa   : > { %18326 = vst [vmem:[#allocation44_spill] sm:$0xff] %v12413_v18  ;;  %v12429_v18 = vsel %vm632_vm9, 1.0, %v18136_v54  ;;  %vm649_vm2 = vcmp.eq.s32.totalorder %v540_v55, %v12085_v49  ;;  %vm650_vm3 = vcmp.eq.s32.totalorder %v540_v55, %v12091_v51  ;;  %vm643_vm4 = vcmp.eq.s32.totalorder %v12363_v22, %v12081_v47 }
  0xfb   : > { %18327 = vst [vmem:[#allocation45_spill] sm:$0xff] %v12416_v53  ;;  %v12432_v53 = vsel %vm633_vm10, 1.0, %v18136_v54  ;;  %v12461_v55 = vsel %vm690_vm15, 1.0, %v18136_v54  ;;  %vm644_vm5 = vcmp.eq.s32.totalorder %v12363_v22, %v12083_v48  ;;  %vm645_vm6 = vcmp.eq.s32.totalorder %v12363_v22, %v12085_v49 }
  0xfc   : > { %18328 = vst [vmem:[#allocation46_spill] sm:$0xff] %v12438_v4  ;;  %v12464_v4 = vsel %vm647_vm0, 1.0, %v18136_v54  ;;  %v12474_v56 = vsel %vm649_vm2, 1.0, %v18136_v54  ;;  %vm646_vm7 = vcmp.eq.s32.totalorder %v12363_v22, %v12091_v51 }
  0xfd   : > { %18332 = vst [vmem:[#allocation50_spill] sm:$0xff] %v12461_v55  ;;  %v12482_v55 = vsel %vm643_vm4, 1.0, %v18136_v54  ;;  %v12496_v22 = vsel %vm646_vm7, 1.0, %v18136_v54 }
  0xfe   : > { %18333 = vst [vmem:[#allocation51_spill] sm:$0xff] %v12464_v4 }
  0xff   : > { %1439 = vperm.xlu1 %11372, %v12033_v27   ;;  %1442 = vperm.xlu2 %11370, %v12030_v26   ;;  %v579_v52 = vpop.permute.xlu2 %578  ;;  %v12446_v26 = vsel %vm687_vm12, 1.0, %v18136_v54  ;;  %v12451_v27 = vsel %vm688_vm13, 1.0, %v18136_v54  ;;  %18335 = vst [vmem:[#allocation53_spill] sm:$0xff] %v12474_v56  ;;  %v12491_v56 = vsel %vm645_vm6, 1.0, %v18136_v54 }
 0x100   : > { %1445 = vperm.xlu0 %11371, %v12048_v31   ;;  %v549_v15 = vpop.permute.xlu1 %548  ;;  %v546_v14 = vpop.permute.xlu0 %545  ;;  %18329 = vst [vmem:[#allocation47_spill] sm:$0xff] %v12446_v26  ;;  %v12456_v31 = vsel %vm689_vm14, 1.0, %v18136_v54  ;;  %vm699_vm8 = vcmp.eq.s32.totalorder %v579_v52, %v12081_v47  ;;  %vm700_vm9 = vcmp.eq.s32.totalorder %v579_v52, %v12083_v48  ;;  %vm701_vm10 = vcmp.eq.s32.totalorder %v579_v52, %v12085_v49 }
 0x101   : > { %18330 = vst [vmem:[#allocation48_spill] sm:$0xff] %v12451_v27  ;;  %v12471_v27 = vsel %vm648_vm1, 1.0, %v18136_v54  ;;  %v12488_v26 = vsel %vm644_vm5, 1.0, %v18136_v54  ;;  %vm702_vm11 = vcmp.eq.s32.totalorder %v579_v52, %v12091_v51  ;;  %vm659_vm12 = vcmp.eq.s32.totalorder %v549_v15, %v12081_v47 }
 0x102   : > { %18331 = vst [vmem:[#allocation49_spill] sm:$0xff] %v12456_v31  ;;  %v12477_v31 = vsel %vm650_vm3, 1.0, %v18136_v54  ;;  %vm660_vm13 = vcmp.eq.s32.totalorder %v549_v15, %v12083_v48  ;;  %vm661_vm14 = vcmp.eq.s32.totalorder %v549_v15, %v12085_v49  ;;  %vm662_vm15 = vcmp.eq.s32.totalorder %v549_v15, %v12091_v51 }
 0x103   : > { %18334 = vst [vmem:[#allocation52_spill] sm:$0xff] %v12471_v27  ;;  %v12504_v27 = vsel %vm699_vm8, 1.0, %v18136_v54  ;;  %v12507_v4 = vsel %vm700_vm9, 1.0, %v18136_v54  ;;  %vm655_vm0 = vcmp.eq.s32.totalorder %v546_v14, %v12081_v47  ;;  %vm656_vm1 = vcmp.eq.s32.totalorder %v546_v14, %v12083_v48 }
 0x104   : > { %18336 = vst [vmem:[#allocation54_spill] sm:$0xff] %v12477_v31  ;;  %vm657_vm2 = vcmp.eq.s32.totalorder %v546_v14, %v12085_v49  ;;  %vm658_vm3 = vcmp.eq.s32.totalorder %v546_v14, %v12091_v51  ;;  %v12535_v52 = vsel %vm661_vm14, 1.0, %v18136_v54  ;;  %v12543_v14 = vsel %vm655_vm0, 1.0, %v18136_v54 }
 0x105   : > { %18337 = vst [vmem:[#allocation55_spill] sm:$0xff] %v12488_v26 }
 0x106   : > { %18338 = vst [vmem:[#allocation56_spill] sm:$0xff] %v12491_v56  ;;  %v12510_v56 = vsel %vm701_vm10, 1.0, %v18136_v54 }
 0x107   : > { %18339 = vst [vmem:[#allocation57_spill] sm:$0xff] %v12496_v22  ;;  %1448 = vperm.xlu1 %11372, %v12045_v30   ;;  %1451 = vperm.xlu2 %11370, %v12042_v29   ;;  %v588_v31 = vpop.permute.xlu2 %587  ;;  %v12517_v29 = vsel %vm702_vm11, 1.0, %v18136_v54  ;;  %v12525_v30 = vsel %vm659_vm12, 1.0, %v18136_v54 }
 0x108   : > { %18340 = vst [vmem:[#allocation58_spill] sm:$0xff] %v12504_v27  ;;  %1454 = vperm.xlu0 %11371, %v12057_v33   ;;  %v558_v22 = vpop.permute.xlu1 %557  ;;  %v555_v26 = vpop.permute.xlu0 %554  ;;  %v12530_v33 = vsel %vm660_vm13, 1.0, %v18136_v54  ;;  %vm711_vm4 = vcmp.eq.s32.totalorder %v588_v31, %v12081_v47  ;;  %vm712_vm5 = vcmp.eq.s32.totalorder %v588_v31, %v12083_v48  ;;  %vm713_vm6 = vcmp.eq.s32.totalorder %v588_v31, %v12085_v49 }
 0x109   : > { %18341 = vst [vmem:[#allocation59_spill] sm:$0xff] %v12507_v4  ;;  %v12552_v4 = vsel %vm657_vm2, 1.0, %v18136_v54  ;;  %v12555_v27 = vsel %vm658_vm3, 1.0, %v18136_v54  ;;  %vm714_vm7 = vcmp.eq.s32.totalorder %v588_v31, %v12091_v51  ;;  %vm671_vm8 = vcmp.eq.s32.totalorder %v558_v22, %v12081_v47 }
 0x10a   : > { %18342 = vst [vmem:[#allocation60_spill] sm:$0xff] %v12510_v56  ;;  %v12549_v56 = vsel %vm656_vm1, 1.0, %v18136_v54  ;;  %vm672_vm9 = vcmp.eq.s32.totalorder %v558_v22, %v12083_v48  ;;  %vm673_vm10 = vcmp.eq.s32.totalorder %v558_v22, %v12085_v49  ;;  %vm674_vm11 = vcmp.eq.s32.totalorder %v558_v22, %v12091_v51 }
 0x10b   : > { %18343 = vst [vmem:[#allocation61_spill] sm:$0xff] %v12517_v29  ;;  %v12540_v29 = vsel %vm662_vm15, 1.0, %v18136_v54  ;;  %v12563_v15 = vsel %vm711_vm4, 1.0, %v18136_v54  ;;  %vm667_vm12 = vcmp.eq.s32.totalorder %v555_v26, %v12081_v47  ;;  %v12573_v31 = vsel %vm714_vm7, 1.0, %v18136_v54 }
 0x10c   : > { %18344 = vst [vmem:[#allocation62_spill] sm:$0xff] %v12525_v30  ;;  %vm668_vm13 = vcmp.eq.s32.totalorder %v555_v26, %v12083_v48  ;;  %vm669_vm14 = vcmp.eq.s32.totalorder %v555_v26, %v12085_v49  ;;  %vm670_vm15 = vcmp.eq.s32.totalorder %v555_v26, %v12091_v51  ;;  %v11781_v22 = vmov 2  }
 0x10d   : > { %18345 = vst [vmem:[#allocation63_spill] sm:$0xff] %v12530_v33 }
 0x10e   : > { %18346 = vst [vmem:[#allocation64_spill] sm:$0xff] %v12535_v52  ;;  %v12569_v52 = vsel %vm713_vm6, 1.0, %v18136_v54 }
 0x10f   : > { %18347 = vst [vmem:[#allocation65_spill] sm:$0xff] %v12540_v29  ;;  %v12566_v29 = vsel %vm712_vm5, 1.0, %v18136_v54  ;;  %1457 = vperm.xlu1 %11372, %v12054_v32   ;;  %11373 = vset.pattern.permute.xlu2 %v11781_v22 }
 0x110   : > { %18348 = vst [vmem:[#allocation66_spill] sm:$0xff] %v12555_v27  ;;  %11374 = vset.pattern.permute.xlu0 %v11781_v22  ;;  %v567_v33 = vpop.permute.xlu1 %566  ;;  %2356 = vperm.xlu2 %11373, %v11940_v3   ;;  %v564_v30 = vpop.permute.xlu0 %563  ;;  %v12605_v3 = vsel %vm668_vm13, 1.0, %v18136_v54 }
 0x111   : > { %18349 = vst [vmem:[#allocation67_spill] sm:$0xff] %v12563_v15  ;;  %v12586_v15 = vsel %vm673_vm10, 1.0, %v18136_v54  ;;  %vm683_vm0 = vcmp.eq.s32.totalorder %v567_v33, %v12081_v47  ;;  %vm684_vm1 = vcmp.eq.s32.totalorder %v567_v33, %v12083_v48  ;;  %vm685_vm2 = vcmp.eq.s32.totalorder %v567_v33, %v12085_v49  ;;  %2359 = vperm.xlu0 %11374, %v11952_v7   ;;  %v1365_v32 = vpop.permute.xlu2 %1364 }
 0x112   : > { %18350 = vst [vmem:[#allocation68_spill] sm:$0xff] %v12566_v29  ;;  %v12580_v29 = vsel %vm671_vm8, 1.0, %v18136_v54  ;;  %vm686_vm3 = vcmp.eq.s32.totalorder %v567_v33, %v12091_v51  ;;  %v12615_v7 = vsel %vm670_vm15, 1.0, %v18136_v54  ;;  %v12618_v33 = vsel %vm683_vm0, 1.0, %v18136_v54 }
 0x113   : > { %18351 = vst [vmem:[#allocation69_spill] sm:$0xff] %v12569_v52  ;;  %v12583_v52 = vsel %vm672_vm9, 1.0, %v18136_v54  ;;  %vm679_vm4 = vcmp.eq.s32.totalorder %v564_v30, %v12081_v47  ;;  %vm680_vm5 = vcmp.eq.s32.totalorder %v564_v30, %v12083_v48  ;;  %vm681_vm6 = vcmp.eq.s32.totalorder %v564_v30, %v12085_v49 }
 0x114   : > { %18352 = vst [vmem:[#allocation70_spill] sm:$0xff] %v12573_v31  ;;  %v12589_v31 = vsel %vm674_vm11, 1.0, %v18136_v54  ;;  %vm682_vm7 = vcmp.eq.s32.totalorder %v564_v30, %v12091_v51  ;;  %vm1459_vm8 = vcmp.eq.s32.totalorder %v1365_v32, %v12081_v47  ;;  %vm1460_vm9 = vcmp.eq.s32.totalorder %v1365_v32, %v12083_v48 }
 0x115   : > { %18353 = vst [vmem:[#allocation71_spill] sm:$0xff] %v12580_v29  ;;  %v12624_v29 = vsel %vm685_vm2, 1.0, %v18136_v54  ;;  %vm1461_vm10 = vcmp.eq.s32.totalorder %v1365_v32, %v12085_v49  ;;  %vm1462_vm11 = vcmp.eq.s32.totalorder %v1365_v32, %v12091_v51  ;;  %v10158_v26 = vsel %vm1459_vm8, 1.0, %v18136_v54 }
 0x116   : > { %18354 = vst [vmem:[#allocation72_spill] sm:$0xff] %v12583_v52  ;;  %v12621_v52 = vsel %vm684_vm1, 1.0, %v18136_v54  ;;  %v12648_v32 = vsel %vm679_vm4, 1.0, %v18136_v54  ;;  %v12653_v27 = vsel %vm680_vm5, 1.0, %v18136_v54 }
 0x117   : > { %18355 = vst [vmem:[#allocation73_spill] sm:$0xff] %v12586_v15  ;;  %v12610_v15 = vsel %vm669_vm14, 1.0, %v18136_v54  ;;  %11375 = vset.pattern.permute.xlu1 %v11781_v22 }
 0x118   : > { %18356 = vst [vmem:[#allocation74_spill] sm:$0xff] %v12589_v31  ;;  %v12600_v31 = vsel %vm667_vm12, 1.0, %v18136_v54  ;;  %2362 = vperm.xlu1 %11375, %v11937_v2   ;;  %2365 = vperm.xlu2 %11373, %v11949_v6  }
 0x119   : > { %18357 = vst [vmem:[#allocation75_spill] sm:$0xff] %v12600_v31  ;;  %2374 = vperm.xlu0 %11374, %v11964_v10   ;;  %v1374_v22 = vpop.permute.xlu2 %1373 }
 0x11a   : > { %18358 = vst [vmem:[#allocation76_spill] sm:$0xff] %v12605_v3  ;;  %v12627_v3 = vsel %vm686_vm3, 1.0, %v18136_v54  ;;  %vm1471_vm4 = vcmp.eq.s32.totalorder %v1374_v22, %v12081_v47  ;;  %vm1472_vm5 = vcmp.eq.s32.totalorder %v1374_v22, %v12083_v48 }
 0x11b   : > { %18359 = vst [vmem:[#allocation77_spill] sm:$0xff] %v12610_v15 }
 0x11c   : > { %18360 = vst [vmem:[#allocation78_spill] sm:$0xff] %v12615_v7 }
 0x11d   : > { %18361 = vst [vmem:[#allocation79_spill] sm:$0xff] %v12618_v33  ;;  %v2163_v33 = vadd.f32 %v10158_v26, %v12215_v45  ;;  %v12658_v45 = vsel %vm681_vm6, 1.0, %v18136_v54  ;;  %vm1473_vm6 = vcmp.eq.s32.totalorder %v1374_v22, %v12085_v49  ;;  %v10171_v26 = vsel %vm1472_vm5, 1.0, %v18136_v54 }
 0x11e   : > { %18362 = vst [vmem:[#allocation80_spill] sm:$0xff] %v12621_v52  ;;  %v10161_v52 = vsel %vm1462_vm11, 1.0, %v18136_v54 }
 0x11f   : > { %18363 = vst [vmem:[#allocation81_spill] sm:$0xff] %v12624_v29  ;;  %v10160_v29 = vsel %vm1461_vm10, 1.0, %v18136_v54  ;;  %v2166_v31 = vadd.f32 %v10161_v52, %v12236_v42  ;;  %v573_v42 = vpop.permute.xlu0 %572 }
 0x120   : > { %18364 = vst [vmem:[#allocation82_spill] sm:$0xff] %v12627_v3  ;;  %v10159_v3 = vsel %vm1460_vm9, 1.0, %v18136_v54  ;;  %v2165_v15 = vadd.f32 %v10160_v29, %v12227_v58  ;;  %v12663_v58 = vsel %vm682_vm7, 1.0, %v18136_v54  ;;  %vm691_vm0 = vcmp.eq.s32.totalorder %v573_v42, %v12081_v47  ;;  %2368 = vperm.xlu1 %11375, %v11934_v1   ;;  %2371 = vperm.xlu2 %11373, %v11946_v5  }
 0x121   : > { %v2164_v7 = vadd.f32 %v10159_v3, %v12218_v46  ;;  %v576_v46 = vpop.permute.xlu1 %575  ;;  %vm692_vm1 = vcmp.eq.s32.totalorder %v573_v42, %v12083_v48  ;;  %vm693_vm2 = vcmp.eq.s32.totalorder %v573_v42, %v12085_v49  ;;  %vm694_vm3 = vcmp.eq.s32.totalorder %v573_v42, %v12091_v51  ;;  %2383 = vperm.xlu0 %11374, %v11976_v13  }
 0x122   : > { %v12669_v52 = vpack.c.bf16 %v2166_v31, %v2165_v15  ;;  %vm695_vm12 = vcmp.eq.s32.totalorder %v576_v46, %v12081_v47  ;;  %vm696_vm13 = vcmp.eq.s32.totalorder %v576_v46, %v12083_v48  ;;  %vm697_vm14 = vcmp.eq.s32.totalorder %v576_v46, %v12085_v49 }
 0x123   : > { %v12667_v29 = vpack.c.bf16 %v2164_v7, %v2163_v33  ;;  %vm698_vm15 = vcmp.eq.s32.totalorder %v576_v46, %v12091_v51  ;;  %v12677_v2 = vsel %vm695_vm12, 1.0, %v18136_v54  ;;  %v12680_v6 = vsel %vm696_vm13, 1.0, %v18136_v54 }
 0x124   : > { %18365 = vst [vmem:[#allocation83_spill] sm:$0xff] %v12677_v2  ;;  %v12683_v30 = vsel %vm697_vm14, 1.0, %v18136_v54  ;;  %v12686_v15 = vsel %vm698_vm15, 1.0, %v18136_v54  ;;  %v12693_v10 = vsel %vm691_vm0, 1.0, %v18136_v54  ;;  %v12696_v31 = vsel %vm692_vm1, 1.0, %v18136_v54 }
 0x125   : > { %18366 = vst [vmem:[#allocation84_spill] sm:$0xff] %v12680_v6  ;;  %v12699_v3 = vsel %vm693_vm2, 1.0, %v18136_v54  ;;  %v12702_v7 = vsel %vm694_vm3, 1.0, %v18136_v54  ;;  %vm1474_vm7 = vcmp.eq.s32.totalorder %v1374_v22, %v12091_v51  ;;  %v10170_v33 = vsel %vm1471_vm4, 1.0, %v18136_v54 }
 0x126   : > { %18367 = vst [vmem:[#allocation85_spill] sm:$0xff] %v12683_v30  ;;  %v10172_v46 = vsel %vm1473_vm6, 1.0, %v18136_v54  ;;  %v10173_v42 = vsel %vm1474_vm7, 1.0, %v18136_v54  ;;  %v2176_v30 = vadd.f32 %v10171_v26, %v12280_v25 }
 0x127   : > { %18368 = vst [vmem:[#allocation86_spill] sm:$0xff] %v12686_v15  ;;  %v2175_v15 = vadd.f32 %v10170_v33, %v12270_v21  ;;  %v2177_v6 = vadd.f32 %v10172_v46, %v12286_v50  ;;  %v2178_v2 = vadd.f32 %v10173_v42, %v12292_v20  ;;  %v582_v22 = vpop.permute.xlu0 %581  ;;  %v1380_v20 = vpop.permute.xlu2 %1379 }
 0x128   : > { %18369 = vst [vmem:[#allocation87_spill] sm:$0xff] %v12693_v10  ;;  %vm703_vm12 = vcmp.eq.s32.totalorder %v582_v22, %v12081_v47  ;;  %vm704_vm13 = vcmp.eq.s32.totalorder %v582_v22, %v12083_v48  ;;  %vm705_vm14 = vcmp.eq.s32.totalorder %v582_v22, %v12085_v49  ;;  %vm706_vm15 = vcmp.eq.s32.totalorder %v582_v22, %v12091_v51 }
 0x129   : > { %18370 = vst [vmem:[#allocation88_spill] sm:$0xff] %v12696_v31  ;;  %v12720_v10 = vpack.c.bf16 %v2176_v30, %v2175_v15  ;;  %v12726_v1 = vpack.c.bf16 %v2178_v2, %v2177_v6  ;;  %v12746_v13 = vsel %vm703_vm12, 1.0, %v18136_v54  ;;  %v12749_v2 = vsel %vm704_vm13, 1.0, %v18136_v54  ;;  %2377 = vperm.xlu1 %11375, %v11961_v9   ;;  %2380 = vperm.xlu2 %11373, %v11958_v8  }
 0x12a   : > { %18371 = vst [vmem:[#allocation89_spill] sm:$0xff] %v12699_v3  ;;  %v12752_v6 = vsel %vm705_vm14, 1.0, %v18136_v54  ;;  %v12755_v30 = vsel %vm706_vm15, 1.0, %v18136_v54  ;;  %vm1479_vm0 = vcmp.eq.s32.totalorder %v1380_v20, %v12081_v47  ;;  %vm1480_vm1 = vcmp.eq.s32.totalorder %v1380_v20, %v12083_v48  ;;  %2392 = vperm.xlu0 %11374, %v11988_v16  }
 0x12b   : > { %18372 = vst [vmem:[#allocation90_spill] sm:$0xff] %v12702_v7  ;;  %v585_v7 = vpop.permute.xlu1 %584  ;;  %vm1481_vm2 = vcmp.eq.s32.totalorder %v1380_v20, %v12085_v49  ;;  %vm1482_vm3 = vcmp.eq.s32.totalorder %v1380_v20, %v12091_v51  ;;  %v10178_v15 = vsel %vm1479_vm0, 1.0, %v18136_v54 }
 0x12c   : > { %vm707_vm8 = vcmp.eq.s32.totalorder %v585_v7, %v12081_v47  ;;  %vm708_vm9 = vcmp.eq.s32.totalorder %v585_v7, %v12083_v48  ;;  %vm709_vm10 = vcmp.eq.s32.totalorder %v585_v7, %v12085_v49  ;;  %vm710_vm11 = vcmp.eq.s32.totalorder %v585_v7, %v12091_v51 }
 0x12d   : > { %v12730_v5 = vsel %vm707_vm8, 1.0, %v18136_v54  ;;  %v12733_v21 = vsel %vm708_vm9, 1.0, %v18136_v54  ;;  %v12736_v25 = vsel %vm709_vm10, 1.0, %v18136_v54  ;;  %v12739_v50 = vsel %vm710_vm11, 1.0, %v18136_v54 }
 0x12e   : > { %18373 = vst [vmem:[#allocation91_spill] sm:$0xff] %v12733_v21  ;;  %v10179_v7 = vsel %vm1480_vm1, 1.0, %v18136_v54  ;;  %v10180_v33 = vsel %vm1481_vm2, 1.0, %v18136_v54  ;;  %v10181_v26 = vsel %vm1482_vm3, 1.0, %v18136_v54  ;;  %v2183_v46 = vadd.f32 %v10178_v15, %v12121_v59 }
 0x12f   : > { %18374 = vst [vmem:[#allocation92_spill] sm:$0xff] %v12736_v25  ;;  %v2184_v42 = vadd.f32 %v10179_v7, %v12124_v60  ;;  %v2185_v22 = vadd.f32 %v10180_v33, %v12128_v61  ;;  %v2186_v31 = vadd.f32 %v10181_v26, %v12131_v62  ;;  %v591_v20 = vpop.permute.xlu0 %590  ;;  %v1389_v59 = vpop.permute.xlu2 %1388 }
 0x130   : > { %18375 = vst [vmem:[#allocation93_spill] sm:$0xff] %v12739_v50  ;;  %vm715_vm8 = vcmp.eq.s32.totalorder %v591_v20, %v12081_v47  ;;  %vm716_vm9 = vcmp.eq.s32.totalorder %v591_v20, %v12083_v48  ;;  %vm717_vm10 = vcmp.eq.s32.totalorder %v591_v20, %v12085_v49  ;;  %vm718_vm11 = vcmp.eq.s32.totalorder %v591_v20, %v12091_v51  ;;  %v18396_v50 = vld [vmem:[#allocation25_spill] sm:$0xff] }
 0x131   : > { %v12773_v21 = vpack.c.bf16 %v2184_v42, %v2183_v46  ;;  %v12779_v9 = vpack.c.bf16 %v2186_v31, %v2185_v22  ;;  %v12799_v16 = vsel %vm715_vm8, 1.0, %v18136_v54  ;;  %v12802_v31 = vsel %vm716_vm9, 1.0, %v18136_v54  ;;  %2386 = vperm.xlu1 %11375, %v11973_v12   ;;  %2389 = vperm.xlu2 %11373, %v11970_v11  }
 0x132   : > { %v12808_v15 = vsel %vm718_vm11, 1.0, %v18136_v54  ;;  %vm1491_vm12 = vcmp.eq.s32.totalorder %v1389_v59, %v12081_v47  ;;  %vm1492_vm13 = vcmp.eq.s32.totalorder %v1389_v59, %v12083_v48  ;;  %vm1493_vm14 = vcmp.eq.s32.totalorder %v1389_v59, %v12085_v49  ;;  %2401 = vperm.xlu0 %11374, %v12000_v19  }
 0x133   : > { %v594_v3 = vpop.permute.xlu1 %593  ;;  %vm1494_vm15 = vcmp.eq.s32.totalorder %v1389_v59, %v12091_v51  ;;  %v10190_v7 = vsel %vm1491_vm12, 1.0, %v18136_v54  ;;  %v10191_v33 = vsel %vm1492_vm13, 1.0, %v18136_v54  ;;  %v10192_v26 = vsel %vm1493_vm14, 1.0, %v18136_v54 }
 0x134   : > { %vm719_vm4 = vcmp.eq.s32.totalorder %v594_v3, %v12081_v47  ;;  %vm720_vm5 = vcmp.eq.s32.totalorder %v594_v3, %v12083_v48  ;;  %vm721_vm6 = vcmp.eq.s32.totalorder %v594_v3, %v12085_v49  ;;  %vm722_vm7 = vcmp.eq.s32.totalorder %v594_v3, %v12091_v51 }
 0x135   : > { %v12783_v8 = vsel %vm719_vm4, 1.0, %v18136_v54  ;;  %v12786_v60 = vsel %vm720_vm5, 1.0, %v18136_v54  ;;  %v12789_v61 = vsel %vm721_vm6, 1.0, %v18136_v54  ;;  %v12792_v62 = vsel %vm722_vm7, 1.0, %v18136_v54 }
 0x136   : > { %18376 = vst [vmem:[#allocation94_spill] sm:$0xff] %v12792_v62  ;;  %v12805_v3 = vsel %vm717_vm10, 1.0, %v18136_v54  ;;  %v10193_v46 = vsel %vm1494_vm15, 1.0, %v18136_v54  ;;  %v2195_v42 = vadd.f32 %v10190_v7, %v12135_v63  ;;  %v2196_v22 = vadd.f32 %v10191_v33, %v12138_v0 }
 0x137   : > { %v2197_v20 = vadd.f32 %v10192_v26, %v12151_v34  ;;  %v2198_v25 = vadd.f32 %v10193_v46, %v12167_v17  ;;  %v1398_v11 = vpop.permute.xlu2 %1397  ;;  %v18377_v12 = vmov 0.0  }
 0x138   : > { %v12826_v62 = vpack.c.bf16 %v2196_v22, %v2195_v42  ;;  %vm1503_vm4 = vcmp.eq.s32.totalorder %v1398_v11, %v12081_v47  ;;  %vm1504_vm5 = vcmp.eq.s32.totalorder %v1398_v11, %v12083_v48  ;;  %vm1505_vm6 = vcmp.eq.s32.totalorder %v1398_v11, %v12085_v49 }
 0x139   : > { %v12832_v17 = vpack.c.bf16 %v2198_v25, %v2197_v20  ;;  %vm1506_vm7 = vcmp.eq.s32.totalorder %v1398_v11, %v12091_v51  ;;  %v10202_v34 = vsel %vm1503_vm4, 1.0, %v18377_v12  ;;  %v18378_v11 = vld [vmem:[#allocation16_spill] sm:$0xff] }
 0x13a   : > { %2395 = vperm.xlu1 %11375, %v18378_v11   ;;  %v18385_v11 = vld [vmem:[#allocation28_spill] sm:$0xff] }
 0x13b   : > { %v1371_v54 = vpop.permute.xlu1 %1370 }
 0x13c   : > { %vm1467_vm0 = vcmp.eq.s32.totalorder %v1371_v54, %v12081_v47  ;;  %vm1468_vm1 = vcmp.eq.s32.totalorder %v1371_v54, %v12083_v48  ;;  %vm1469_vm2 = vcmp.eq.s32.totalorder %v1371_v54, %v12085_v49  ;;  %vm1470_vm3 = vcmp.eq.s32.totalorder %v1371_v54, %v12091_v51  ;;  %v1368_v54 = vpop.permute.xlu0 %1367 }
 0x13d   : > { %v10166_v19 = vsel %vm1467_vm0, 1.0, %v18377_v12  ;;  %v10167_v7 = vsel %vm1468_vm1, 1.0, %v18377_v12  ;;  %v10168_v33 = vsel %vm1469_vm2, 1.0, %v18377_v12  ;;  %v10169_v26 = vsel %vm1470_vm3, 1.0, %v18377_v12 }
 0x13e   : > { %v2171_v25 = vadd.f32 %v10166_v19, %v12199_v41  ;;  %v2172_v46 = vadd.f32 %v10167_v7, %v12202_v43  ;;  %v2173_v42 = vadd.f32 %v10168_v33, %v12207_v44  ;;  %v2174_v22 = vadd.f32 %v10169_v26, %v12210_v40 }
 0x13f   : > { %v10203_v41 = vsel %vm1504_vm5, 1.0, %v18377_v12  ;;  %v10204_v44 = vsel %vm1505_vm6, 1.0, %v18377_v12  ;;  %v10205_v40 = vsel %vm1506_vm7, 1.0, %v18377_v12  ;;  %v2207_v19 = vadd.f32 %v10202_v34, %v12179_v36  ;;  %v18380_v36 = vld [vmem:[#allocation17_spill] sm:$0xff] }
 0x140   : > { %v12849_v20 = vpack.c.bf16 %v2172_v46, %v2171_v25  ;;  %v12854_v43 = vpack.c.bf16 %v2174_v22, %v2173_v42  ;;  %v2208_v7 = vadd.f32 %v10203_v41, %v12185_v37  ;;  %v2209_v33 = vadd.f32 %v10204_v44, %v12191_v38  ;;  %v18379_v46 = vld [vmem:[#allocation15_spill] sm:$0xff]  ;;  %2410 = vperm.xlu0 %11374, %v18380_v36   ;;  %v18383_v41 = vld [vmem:[#allocation26_spill] sm:$0xff] }
 0x141   : > { %v2210_v26 = vadd.f32 %v10205_v40, %v12196_v39  ;;  %vm1463_vm8 = vcmp.eq.s32.totalorder %v1368_v54, %v12081_v47  ;;  %vm1464_vm9 = vcmp.eq.s32.totalorder %v1368_v54, %v12083_v48  ;;  %vm1465_vm10 = vcmp.eq.s32.totalorder %v1368_v54, %v12085_v49  ;;  %2398 = vperm.xlu2 %11373, %v18379_v46   ;;  %v18386_v46 = vld [vmem:[#allocation29_spill] sm:$0xff] }
 0x142   : > { %vm1466_vm11 = vcmp.eq.s32.totalorder %v1368_v54, %v12091_v51  ;;  %v10162_v25 = vsel %vm1463_vm8, 1.0, %v18377_v12  ;;  %v12870_v38 = vpack.c.bf16 %v2208_v7, %v2207_v19  ;;  %v10163_v34 = vsel %vm1464_vm9, 1.0, %v18377_v12  ;;  %v18384_v54 = vld [vmem:[#allocation27_spill] sm:$0xff]  ;;  %v1407_v19 = vpop.permute.xlu2 %1406 }
 0x143   : > { %v1377_v37 = vpop.permute.xlu1 %1376  ;;  %v12872_v39 = vpack.c.bf16 %v2210_v26, %v2209_v33  ;;  %v10164_v42 = vsel %vm1465_vm10, 1.0, %v18377_v12  ;;  %v10165_v22 = vsel %vm1466_vm11, 1.0, %v18377_v12  ;;  %v2167_v44 = vadd.f32 %v10162_v25, %v18383_v41  ;;  %v18388_v41 = vld [vmem:[#allocation19_spill] sm:$0xff] }
 0x144   : > { %18381 = vst [vmem:[#allocation16_spill] sm:$0xff] %v12870_v38  ;;  %v2168_v40 = vadd.f32 %v10163_v34, %v18384_v54  ;;  %v2169_v0 = vadd.f32 %v10164_v42, %v18385_v11  ;;  %v2170_v63 = vadd.f32 %v10165_v22, %v18386_v46  ;;  %vm1475_vm12 = vcmp.eq.s32.totalorder %v1377_v37, %v12081_v47  ;;  %v18387_v42 = vld [vmem:[#allocation18_spill] sm:$0xff]  ;;  %v18390_v11 = vld [vmem:[#allocation21_spill] sm:$0xff]  ;;  %v1383_v46 = vpop.permute.xlu0 %1382 }
 0x145   : > { %18382 = vst [vmem:[#allocation15_spill] sm:$0xff] %v12872_v39  ;;  %vm1476_vm13 = vcmp.eq.s32.totalorder %v1377_v37, %v12083_v48  ;;  %vm1477_vm14 = vcmp.eq.s32.totalorder %v1377_v37, %v12085_v49  ;;  %vm1478_vm15 = vcmp.eq.s32.totalorder %v1377_v37, %v12091_v51  ;;  %v10174_v33 = vsel %vm1475_vm12, 1.0, %v18377_v12 }
 0x146   : > { %v12884_v7 = vpack.c.bf16 %v2168_v40, %v2167_v44  ;;  %v10175_v26 = vsel %vm1476_vm13, 1.0, %v18377_v12  ;;  %v12889_v25 = vpack.c.bf16 %v2170_v63, %v2169_v0  ;;  %v10176_v36 = vsel %vm1477_vm14, 1.0, %v18377_v12  ;;  %v18389_v44 = vld [vmem:[#allocation20_spill] sm:$0xff]  ;;  %v12903_v0 = vld [vmem:[%s11917_s4 + $0x80] sm:$0xff] }
 0x147   : > { %v10177_v34 = vsel %vm1478_vm15, 1.0, %v18377_v12  ;;  %v2179_v22 = vadd.f32 %v10174_v33, %v18387_v42  ;;  %v2180_v54 = vadd.f32 %v10175_v26, %v18388_v41  ;;  %v2181_v40 = vadd.f32 %v10176_v36, %v18389_v44  ;;  %2404 = vperm.xlu1 %11375, %v12903_v0   ;;  %v12913_v42 = vld [vmem:[%s11917_s4 + $0x88] sm:$0xff]  ;;  %v18393_v44 = vld [vmem:[#allocation22_spill] sm:$0xff] }
 0x148   : > { %v2182_v37 = vadd.f32 %v10177_v34, %v18390_v11  ;;  %vm1515_vm0 = vcmp.eq.s32.totalorder %v1407_v19, %v12081_v47  ;;  %vm1516_vm1 = vcmp.eq.s32.totalorder %v1407_v19, %v12083_v48  ;;  %vm1517_vm2 = vcmp.eq.s32.totalorder %v1407_v19, %v12085_v49  ;;  %v12917_v41 = vld [vmem:[%s11917_s4 + $0xa8] sm:$0xff] }
 0x149   : > { %vm1518_vm3 = vcmp.eq.s32.totalorder %v1407_v19, %v12091_v51  ;;  %v10214_v63 = vsel %vm1515_vm0, 1.0, %v18377_v12  ;;  %v12906_v33 = vpack.c.bf16 %v2180_v54, %v2179_v22  ;;  %v10215_v36 = vsel %vm1516_vm1, 1.0, %v18377_v12  ;;  %2407 = vperm.xlu2 %11373, %v12913_v42   ;;  %2419 = vperm.xlu0 %11374, %v12917_v41   ;;  %v18394_v22 = vld [vmem:[#allocation23_spill] sm:$0xff] }
 0x14a   : > { %v12908_v26 = vpack.c.bf16 %v2182_v37, %v2181_v40  ;;  %v10216_v34 = vsel %vm1517_vm2, 1.0, %v18377_v12  ;;  %v10217_v19 = vsel %vm1518_vm3, 1.0, %v18377_v12  ;;  %v2219_v11 = vadd.f32 %v10214_v63, %v18393_v44  ;;  %v18395_v40 = vld [vmem:[#allocation24_spill] sm:$0xff] }
 0x14b   : > { %18391 = vst [vmem:[#allocation17_spill] sm:$0xff] %v12906_v33  ;;  %v2220_v54 = vadd.f32 %v10215_v36, %v18394_v22  ;;  %v2221_v37 = vadd.f32 %v10216_v34, %v18395_v40  ;;  %v2222_v59 = vadd.f32 %v10217_v19, %v18396_v50  ;;  %vm1483_vm4 = vcmp.eq.s32.totalorder %v1383_v46, %v12081_v47  ;;  %v18401_v40 = vld [vmem:[#allocation34_spill] sm:$0xff] }
 0x14c   : > { %18392 = vst [vmem:[#allocation26_spill] sm:$0xff] %v12908_v26  ;;  %vm1484_vm5 = vcmp.eq.s32.totalorder %v1383_v46, %v12083_v48  ;;  %vm1485_vm6 = vcmp.eq.s32.totalorder %v1383_v46, %v12085_v49  ;;  %v1386_v26 = vpop.permute.xlu1 %1385  ;;  %vm1486_vm7 = vcmp.eq.s32.totalorder %v1383_v46, %v12091_v51  ;;  %v10182_v39 = vsel %vm1483_vm4, 1.0, %v18377_v12  ;;  %v1416_v46 = vpop.permute.xlu2 %1415 }
 0x14d   : > { %v12928_v33 = vpack.c.bf16 %v2220_v54, %v2219_v11  ;;  %v10183_v63 = vsel %vm1484_vm5, 1.0, %v18377_v12  ;;  %v12933_v36 = vpack.c.bf16 %v2222_v59, %v2221_v37  ;;  %v10184_v34 = vsel %vm1485_vm6, 1.0, %v18377_v12  ;;  %v18402_v37 = vld [vmem:[#allocation35_spill] sm:$0xff] }
 0x14e   : > { %v10185_v50 = vsel %vm1486_vm7, 1.0, %v18377_v12  ;;  %v2187_v19 = vadd.f32 %v10182_v39, %v12360_v35  ;;  %v2188_v44 = vadd.f32 %v10183_v63, %v12366_v23  ;;  %v2189_v11 = vadd.f32 %v10184_v34, %v12375_v24  ;;  %v12953_v39 = vld [vmem:[%s11917_s4 + $0x98] sm:$0xff]  ;;  %v18403_v34 = vld [vmem:[#allocation36_spill] sm:$0xff] }
 0x14f   : > { %18397 = vst [vmem:[#allocation27_spill] sm:$0xff] %v12928_v33  ;;  %v2190_v22 = vadd.f32 %v10185_v50, %v12381_v28  ;;  %vm1487_vm8 = vcmp.eq.s32.totalorder %v1386_v26, %v12081_v47  ;;  %vm1488_vm9 = vcmp.eq.s32.totalorder %v1386_v26, %v12083_v48  ;;  %vm1489_vm10 = vcmp.eq.s32.totalorder %v1386_v26, %v12085_v49  ;;  %v18408_v33 = vld [vmem:[#allocation31_spill] sm:$0xff] }
 0x150   : > { %18398 = vst [vmem:[#allocation28_spill] sm:$0xff] %v12933_v36  ;;  %vm1490_vm11 = vcmp.eq.s32.totalorder %v1386_v26, %v12091_v51  ;;  %v10186_v59 = vsel %vm1487_vm8, 1.0, %v18377_v12  ;;  %v12946_v35 = vpack.c.bf16 %v2188_v44, %v2187_v19  ;;  %v10187_v24 = vsel %vm1488_vm9, 1.0, %v18377_v12  ;;  %2413 = vperm.xlu1 %11375, %v12953_v39   ;;  %v1392_v19 = vpop.permute.xlu0 %1391  ;;  %v12961_v44 = vld [vmem:[%s11917_s4 + $0xa0] sm:$0xff] }
 0x151   : > { %v12948_v23 = vpack.c.bf16 %v2190_v22, %v2189_v11  ;;  %v10188_v28 = vsel %vm1489_vm10, 1.0, %v18377_v12  ;;  %v10189_v54 = vsel %vm1490_vm11, 1.0, %v18377_v12  ;;  %v2191_v26 = vadd.f32 %v10186_v59, %v18401_v40  ;;  %2416 = vperm.xlu2 %11373, %v12961_v44   ;;  %v12965_v11 = vld [vmem:[%s11917_s4 + $0xc0] sm:$0xff]  ;;  %v18404_v22 = vld [vmem:[#allocation37_spill] sm:$0xff] }
 0x152   : > { %18399 = vst [vmem:[#allocation29_spill] sm:$0xff] %v12946_v35  ;;  %v2192_v63 = vadd.f32 %v10187_v24, %v18402_v37  ;;  %v2193_v50 = vadd.f32 %v10188_v28, %v18403_v34  ;;  %2428 = vperm.xlu0 %11374, %v12965_v11   ;;  %v2194_v36 = vadd.f32 %v10189_v54, %v18404_v22  ;;  %v18407_v34 = vld [vmem:[#allocation30_spill] sm:$0xff]  ;;  %v18409_v35 = vld [vmem:[#allocation32_spill] sm:$0xff] }
 0x153   : > { %18400 = vst [vmem:[#allocation18_spill] sm:$0xff] %v12948_v23  ;;  %vm1527_vm12 = vcmp.eq.s32.totalorder %v1416_v46, %v12081_v47  ;;  %vm1528_vm13 = vcmp.eq.s32.totalorder %v1416_v46, %v12083_v48  ;;  %vm1529_vm14 = vcmp.eq.s32.totalorder %v1416_v46, %v12085_v49  ;;  %vm1530_vm15 = vcmp.eq.s32.totalorder %v1416_v46, %v12091_v51 }
 0x154   : > { %v12972_v59 = vpack.c.bf16 %v2192_v63, %v2191_v26  ;;  %v10226_v24 = vsel %vm1527_vm12, 1.0, %v18377_v12  ;;  %v10227_v28 = vsel %vm1528_vm13, 1.0, %v18377_v12  ;;  %v12977_v40 = vpack.c.bf16 %v2194_v36, %v2193_v50  ;;  %v18410_v26 = vld [vmem:[#allocation33_spill] sm:$0xff]  ;;  %v1395_v46 = vpop.permute.xlu1 %1394 }
 0x155   : > { %v10228_v37 = vsel %vm1529_vm14, 1.0, %v18377_v12  ;;  %v10229_v54 = vsel %vm1530_vm15, 1.0, %v18377_v12  ;;  %v2231_v22 = vadd.f32 %v10226_v24, %v18407_v34  ;;  %v2232_v23 = vadd.f32 %v10227_v28, %v18408_v33  ;;  %v13001_v34 = vld [vmem:[%s11917_s4 + $0xb0] sm:$0xff] }
 0x156   : > { %18405 = vst [vmem:[#allocation19_spill] sm:$0xff] %v12972_v59  ;;  %v2233_v38 = vadd.f32 %v10228_v37, %v18409_v35  ;;  %v2234_v63 = vadd.f32 %v10229_v54, %v18410_v26  ;;  %vm1495_vm0 = vcmp.eq.s32.totalorder %v1392_v19, %v12081_v47  ;;  %vm1496_vm1 = vcmp.eq.s32.totalorder %v1392_v19, %v12083_v48  ;;  %v13009_v26 = vld [vmem:[%s11917_s4 + $0xb8] sm:$0xff] }
 0x157   : > { %18406 = vst [vmem:[#allocation20_spill] sm:$0xff] %v12977_v40  ;;  %vm1497_vm2 = vcmp.eq.s32.totalorder %v1392_v19, %v12085_v49  ;;  %vm1498_vm3 = vcmp.eq.s32.totalorder %v1392_v19, %v12091_v51  ;;  %v10194_v36 = vsel %vm1495_vm0, 1.0, %v18377_v12  ;;  %v12990_v50 = vpack.c.bf16 %v2232_v23, %v2231_v22  ;;  %v18413_v23 = vld [vmem:[#allocation46_spill] sm:$0xff]  ;;  %v1425_v22 = vpop.permute.xlu2 %1424  ;;  %v18420_v40 = vld [vmem:[#allocation45_spill] sm:$0xff] }
 0x158   : > { %v12992_v33 = vpack.c.bf16 %v2234_v63, %v2233_v38  ;;  %v10195_v35 = vsel %vm1496_vm1, 1.0, %v18377_v12  ;;  %v10196_v24 = vsel %vm1497_vm2, 1.0, %v18377_v12  ;;  %v10197_v28 = vsel %vm1498_vm3, 1.0, %v18377_v12  ;;  %2422 = vperm.xlu1 %11375, %v13001_v34   ;;  %18414 = vst [vmem:[#allocation23_spill] sm:$0xff] %v13009_v26  ;;  %v13018_v63 = vld [vmem:[%s11917_s4 + $0xd8] sm:$0xff] }
 0x159   : > { %18411 = vst [vmem:[#allocation21_spill] sm:$0xff] %v12990_v50  ;;  %v2199_v37 = vadd.f32 %v10194_v36, %v12421_v57  ;;  %v2200_v54 = vadd.f32 %v10195_v35, %v12429_v18  ;;  %v2201_v19 = vadd.f32 %v10196_v24, %v12432_v53  ;;  %v2202_v38 = vadd.f32 %v10197_v28, %v18413_v23  ;;  %v18417_v28 = vld [vmem:[#allocation42_spill] sm:$0xff] }
 0x15a   : > { %18412 = vst [vmem:[#allocation22_spill] sm:$0xff] %v12992_v33  ;;  %vm1499_vm4 = vcmp.eq.s32.totalorder %v1395_v46, %v12081_v47  ;;  %vm1500_vm5 = vcmp.eq.s32.totalorder %v1395_v46, %v12083_v48  ;;  %vm1501_vm6 = vcmp.eq.s32.totalorder %v1395_v46, %v12085_v49  ;;  %2425 = vperm.xlu2 %11373, %v13009_v26  }
 0x15b   : > { %v13012_v18 = vpack.c.bf16 %v2200_v54, %v2199_v37  ;;  %vm1502_vm7 = vcmp.eq.s32.totalorder %v1395_v46, %v12091_v51  ;;  %v10198_v53 = vsel %vm1499_vm4, 1.0, %v18377_v12  ;;  %v10199_v57 = vsel %vm1500_vm5, 1.0, %v18377_v12  ;;  %2437 = vperm.xlu0 %11374, %v13018_v63   ;;  %v1401_v37 = vpop.permute.xlu0 %1400  ;;  %v18418_v54 = vld [vmem:[#allocation43_spill] sm:$0xff]  ;;  %v18419_v46 = vld [vmem:[#allocation44_spill] sm:$0xff] }
 0x15c   : > { %v13021_v36 = vpack.c.bf16 %v2202_v38, %v2201_v19  ;;  %v10200_v35 = vsel %vm1501_vm6, 1.0, %v18377_v12  ;;  %v10201_v24 = vsel %vm1502_vm7, 1.0, %v18377_v12  ;;  %v2203_v23 = vadd.f32 %v10198_v53, %v18417_v28 }
 0x15d   : > { %18415 = vst [vmem:[#allocation24_spill] sm:$0xff] %v13012_v18  ;;  %v2204_v33 = vadd.f32 %v10199_v57, %v18418_v54  ;;  %v2205_v50 = vadd.f32 %v10200_v35, %v18419_v46  ;;  %v2206_v59 = vadd.f32 %v10201_v24, %v18420_v40  ;;  %vm1539_vm8 = vcmp.eq.s32.totalorder %v1425_v22, %v12081_v47  ;;  %v18423_v24 = vld [vmem:[#allocation38_spill] sm:$0xff]  ;;  %v18424_v54 = vld [vmem:[#allocation39_spill] sm:$0xff] }
 0x15e   : > { %18416 = vst [vmem:[#allocation25_spill] sm:$0xff] %v13021_v36  ;;  %vm1540_vm9 = vcmp.eq.s32.totalorder %v1425_v22, %v12083_v48  ;;  %vm1541_vm10 = vcmp.eq.s32.totalorder %v1425_v22, %v12085_v49  ;;  %vm1542_vm11 = vcmp.eq.s32.totalorder %v1425_v22, %v12091_v51  ;;  %v10238_v19 = vsel %vm1539_vm8, 1.0, %v18377_v12  ;;  %v18425_v36 = vld [vmem:[#allocation40_spill] sm:$0xff]  ;;  %v18426_v22 = vld [vmem:[#allocation41_spill] sm:$0xff] }
 0x15f   : > { %v13034_v38 = vpack.c.bf16 %v2204_v33, %v2203_v23  ;;  %v13036_v53 = vpack.c.bf16 %v2206_v59, %v2205_v50  ;;  %v10239_v57 = vsel %vm1540_vm9, 1.0, %v18377_v12  ;;  %v10240_v35 = vsel %vm1541_vm10, 1.0, %v18377_v12  ;;  %v1404_v59 = vpop.permute.xlu1 %1403  ;;  %v13049_v50 = vld [vmem:[%s11917_s4 + $0xc8] sm:$0xff] }
 0x160   : > { %v10241_v40 = vsel %vm1542_vm11, 1.0, %v18377_v12  ;;  %v2243_v28 = vadd.f32 %v10238_v19, %v18423_v24  ;;  %v2244_v46 = vadd.f32 %v10239_v57, %v18424_v54  ;;  %v2245_v18 = vadd.f32 %v10240_v35, %v18425_v36  ;;  %2431 = vperm.xlu1 %11375, %v13049_v50   ;;  %v13058_v19 = vld [vmem:[%s11917_s4 + $0xd0] sm:$0xff] }
 0x161   : > { %18421 = vst [vmem:[#allocation34_spill] sm:$0xff] %v13034_v38  ;;  %v2246_v26 = vadd.f32 %v10241_v40, %v18426_v22  ;;  %vm1507_vm12 = vcmp.eq.s32.totalorder %v1401_v37, %v12081_v47  ;;  %vm1508_vm13 = vcmp.eq.s32.totalorder %v1401_v37, %v12083_v48  ;;  %vm1509_vm14 = vcmp.eq.s32.totalorder %v1401_v37, %v12085_v49 }
 0x162   : > { %18422 = vst [vmem:[#allocation35_spill] sm:$0xff] %v13036_v53  ;;  %v13052_v33 = vpack.c.bf16 %v2244_v46, %v2243_v28  ;;  %vm1510_vm15 = vcmp.eq.s32.totalorder %v1401_v37, %v12091_v51  ;;  %v10206_v36 = vsel %vm1507_vm12, 1.0, %v18377_v12  ;;  %v10207_v23 = vsel %vm1508_vm13, 1.0, %v18377_v12  ;;  %2434 = vperm.xlu2 %11373, %v13058_v19   ;;  %v13067_v28 = vld [vmem:[%s11917_s4 + $0xf0] sm:$0xff]  ;;  %v18431_v37 = vld [vmem:[#allocation55_spill] sm:$0xff]  ;;  %v18432_v46 = vld [vmem:[#allocation56_spill] sm:$0xff] }
 0x163   : > { %18428 = vst [vmem:[#allocation37_spill] sm:$0xff] %v13058_v19  ;;  %v13061_v57 = vpack.c.bf16 %v2246_v26, %v2245_v18  ;;  %v10208_v35 = vsel %vm1509_vm14, 1.0, %v18377_v12  ;;  %v10209_v40 = vsel %vm1510_vm15, 1.0, %v18377_v12  ;;  %v2211_v24 = vadd.f32 %v10206_v36, %v12482_v55  ;;  %2446 = vperm.xlu0 %11374, %v13067_v28   ;;  %v1434_v26 = vpop.permute.xlu2 %1433 }
 0x164   : > { %18427 = vst [vmem:[#allocation36_spill] sm:$0xff] %v13052_v33  ;;  %v2212_v54 = vadd.f32 %v10207_v23, %v18431_v37  ;;  %v2213_v22 = vadd.f32 %v10208_v35, %v18432_v46  ;;  %v18433_v33 = vld [vmem:[#allocation57_spill] sm:$0xff]  ;;  %vm1511_vm0 = vcmp.eq.s32.totalorder %v1404_v59, %v12081_v47  ;;  %vm1512_vm1 = vcmp.eq.s32.totalorder %v1404_v59, %v12083_v48  ;;  %v1410_v35 = vpop.permute.xlu0 %1409  ;;  %v18436_v37 = vld [vmem:[#allocation51_spill] sm:$0xff] }
 0x165   : > { %18429 = vst [vmem:[#allocation30_spill] sm:$0xff] %v13061_v57  ;;  %v2214_v53 = vadd.f32 %v10209_v40, %v18433_v33  ;;  %vm1513_vm2 = vcmp.eq.s32.totalorder %v1404_v59, %v12085_v49  ;;  %vm1514_vm3 = vcmp.eq.s32.totalorder %v1404_v59, %v12091_v51  ;;  %v10210_v55 = vsel %vm1511_vm0, 1.0, %v18377_v12  ;;  %v18437_v57 = vld [vmem:[#allocation52_spill] sm:$0xff]  ;;  %v18438_v59 = vld [vmem:[#allocation53_spill] sm:$0xff] }
 0x166   : > { %18430 = vst [vmem:[#allocation31_spill] sm:$0xff] %v13067_v28  ;;  %v13078_v18 = vpack.c.bf16 %v2212_v54, %v2211_v24  ;;  %v10211_v23 = vsel %vm1512_vm1, 1.0, %v18377_v12  ;;  %v10212_v33 = vsel %vm1513_vm2, 1.0, %v18377_v12  ;;  %v10213_v40 = vsel %vm1514_vm3, 1.0, %v18377_v12  ;;  %v18439_v28 = vld [vmem:[#allocation54_spill] sm:$0xff] }
 0x167   : > { %v13080_v36 = vpack.c.bf16 %v2214_v53, %v2213_v22  ;;  %v2215_v46 = vadd.f32 %v10210_v55, %v18436_v37  ;;  %v2216_v38 = vadd.f32 %v10211_v23, %v18437_v57  ;;  %v2217_v19 = vadd.f32 %v10212_v33, %v18438_v59  ;;  %v13098_v57 = vld [vmem:[%s11917_s4 + $0xe0] sm:$0xff] }
 0x168   : > { %18434 = vst [vmem:[#allocation32_spill] sm:$0xff] %v13078_v18  ;;  %v2218_v24 = vadd.f32 %v10213_v40, %v18439_v28  ;;  %vm1551_vm4 = vcmp.eq.s32.totalorder %v1434_v26, %v12081_v47  ;;  %vm1552_vm5 = vcmp.eq.s32.totalorder %v1434_v26, %v12083_v48  ;;  %vm1553_vm6 = vcmp.eq.s32.totalorder %v1434_v26, %v12085_v49  ;;  %v18442_v33 = vld [vmem:[#allocation47_spill] sm:$0xff]  ;;  %v18460_v18 = vld [vmem:[#allocation61_spill] sm:$0xff] }
 0x169   : > { %18435 = vst [vmem:[#allocation33_spill] sm:$0xff] %v13080_v36  ;;  %v13092_v53 = vpack.c.bf16 %v2216_v38, %v2215_v46  ;;  %vm1554_vm7 = vcmp.eq.s32.totalorder %v1434_v26, %v12091_v51  ;;  %v10250_v54 = vsel %vm1551_vm4, 1.0, %v18377_v12  ;;  %v10251_v22 = vsel %vm1552_vm5, 1.0, %v18377_v12  ;;  %2440 = vperm.xlu1 %11375, %v13098_v57   ;;  %v13107_v38 = vld [vmem:[%s11917_s4 + $0xe8] sm:$0xff]  ;;  %v18444_v46 = vld [vmem:[#allocation49_spill] sm:$0xff] }
 0x16a   : > { %v13101_v55 = vpack.c.bf16 %v2218_v24, %v2217_v19  ;;  %v10252_v28 = vsel %vm1553_vm6, 1.0, %v18377_v12  ;;  %v10253_v23 = vsel %vm1554_vm7, 1.0, %v18377_v12  ;;  %v2255_v40 = vadd.f32 %v10250_v54, %v18442_v33  ;;  %2443 = vperm.xlu2 %11373, %v13107_v38   ;;  %v18443_v26 = vld [vmem:[#allocation48_spill] sm:$0xff]  ;;  %v1413_v24 = vpop.permute.xlu1 %1412 }
 0x16b   : > { %18440 = vst [vmem:[#allocation46_spill] sm:$0xff] %v13092_v53  ;;  %v2256_v37 = vadd.f32 %v10251_v22, %v18443_v26  ;;  %v2257_v59 = vadd.f32 %v10252_v28, %v18444_v46  ;;  %v18445_v53 = vld [vmem:[#allocation50_spill] sm:$0xff]  ;;  %vm1519_vm8 = vcmp.eq.s32.totalorder %v1410_v35, %v12081_v47  ;;  %vm1520_vm9 = vcmp.eq.s32.totalorder %v1410_v35, %v12083_v48 }
 0x16c   : > { %18441 = vst [vmem:[#allocation42_spill] sm:$0xff] %v13101_v55  ;;  %v2258_v36 = vadd.f32 %v10253_v23, %v18445_v53  ;;  %vm1521_vm10 = vcmp.eq.s32.totalorder %v1410_v35, %v12085_v49  ;;  %vm1522_vm11 = vcmp.eq.s32.totalorder %v1410_v35, %v12091_v51  ;;  %v10218_v19 = vsel %vm1519_vm8, 1.0, %v18377_v12  ;;  %v18448_v46 = vld [vmem:[#allocation66_spill] sm:$0xff] }
 0x16d   : > { %v13118_v54 = vpack.c.bf16 %v2256_v37, %v2255_v40  ;;  %v10219_v22 = vsel %vm1520_vm9, 1.0, %v18377_v12  ;;  %v10220_v28 = vsel %vm1521_vm10, 1.0, %v18377_v12  ;;  %v10221_v53 = vsel %vm1522_vm11, 1.0, %v18377_v12  ;;  %v1419_v37 = vpop.permute.xlu0 %1418 }
 0x16e   : > { %v13120_v33 = vpack.c.bf16 %v2258_v36, %v2257_v59  ;;  %v2223_v23 = vadd.f32 %v10218_v19, %v12543_v14  ;;  %v2224_v26 = vadd.f32 %v10219_v22, %v12549_v56  ;;  %v2225_v35 = vadd.f32 %v10220_v28, %v12552_v4  ;;  %v1443_v36 = vpop.permute.xlu2 %1442  ;;  %v18451_v22 = vld [vmem:[#allocation62_spill] sm:$0xff] }
 0x16f   : > { %18446 = vst [vmem:[#allocation43_spill] sm:$0xff] %v13118_v54  ;;  %v2226_v55 = vadd.f32 %v10221_v53, %v18448_v46  ;;  %vm1523_vm12 = vcmp.eq.s32.totalorder %v1413_v24, %v12081_v47  ;;  %vm1524_vm13 = vcmp.eq.s32.totalorder %v1413_v24, %v12083_v48  ;;  %vm1525_vm14 = vcmp.eq.s32.totalorder %v1413_v24, %v12085_v49  ;;  %v13143_v53 = vld [vmem:[%s11917_s4 + $0xf8] sm:$0xff] }
 0x170   : > { %18447 = vst [vmem:[#allocation44_spill] sm:$0xff] %v13120_v33  ;;  %v13132_v40 = vpack.c.bf16 %v2224_v26, %v2223_v23  ;;  %vm1526_vm15 = vcmp.eq.s32.totalorder %v1413_v24, %v12091_v51  ;;  %v10222_v14 = vsel %vm1523_vm12, 1.0, %v18377_v12  ;;  %v10223_v56 = vsel %vm1524_vm13, 1.0, %v18377_v12  ;;  %v18452_v23 = vld [vmem:[#allocation63_spill] sm:$0xff]  ;;  %v18453_v24 = vld [vmem:[#allocation64_spill] sm:$0xff]  ;;  %v18454_v33 = vld [vmem:[#allocation65_spill] sm:$0xff] }
 0x171   : > { %v13137_v59 = vpack.c.bf16 %v2226_v55, %v2225_v35  ;;  %v10224_v4 = vsel %vm1525_vm14, 1.0, %v18377_v12  ;;  %v10225_v19 = vsel %vm1526_vm15, 1.0, %v18377_v12  ;;  %v2227_v28 = vadd.f32 %v10222_v14, %v18451_v22  ;;  %2449 = vperm.xlu1 %11375, %v13143_v53  }
 0x172   : > { %18449 = vst [vmem:[#allocation45_spill] sm:$0xff] %v13132_v40  ;;  %v2228_v26 = vadd.f32 %v10223_v56, %v18452_v23  ;;  %v2229_v46 = vadd.f32 %v10224_v4, %v18453_v24  ;;  %v2230_v54 = vadd.f32 %v10225_v19, %v18454_v33  ;;  %vm1563_vm0 = vcmp.eq.s32.totalorder %v1443_v36, %v12081_v47  ;;  %v18457_v19 = vld [vmem:[#allocation58_spill] sm:$0xff]  ;;  %v18458_v23 = vld [vmem:[#allocation59_spill] sm:$0xff] }
 0x173   : > { %18450 = vst [vmem:[#allocation38_spill] sm:$0xff] %v13137_v59  ;;  %vm1564_vm1 = vcmp.eq.s32.totalorder %v1443_v36, %v12083_v48  ;;  %vm1565_vm2 = vcmp.eq.s32.totalorder %v1443_v36, %v12085_v49  ;;  %vm1566_vm3 = vcmp.eq.s32.totalorder %v1443_v36, %v12091_v51  ;;  %v10262_v55 = vsel %vm1563_vm0, 1.0, %v18377_v12  ;;  %v18459_v59 = vld [vmem:[#allocation60_spill] sm:$0xff] }
 0x174   : > { %v13154_v35 = vpack.c.bf16 %v2228_v26, %v2227_v28  ;;  %v13156_v14 = vpack.c.bf16 %v2230_v54, %v2229_v46  ;;  %v10263_v56 = vsel %vm1564_vm1, 1.0, %v18377_v12  ;;  %v10264_v4 = vsel %vm1565_vm2, 1.0, %v18377_v12  ;;  %v1422_v46 = vpop.permute.xlu1 %1421 }
 0x175   : > { %v10265_v33 = vsel %vm1566_vm3, 1.0, %v18377_v12  ;;  %v2267_v22 = vadd.f32 %v10262_v55, %v18457_v19  ;;  %v2268_v24 = vadd.f32 %v10263_v56, %v18458_v23  ;;  %v2269_v40 = vadd.f32 %v10264_v4, %v18459_v59  ;;  %v18463_v56 = vld [vmem:[#allocation75_spill] sm:$0xff] }
 0x176   : > { %18455 = vst [vmem:[#allocation39_spill] sm:$0xff] %v13154_v35  ;;  %v2270_v36 = vadd.f32 %v10265_v33, %v18460_v18  ;;  %vm1531_vm4 = vcmp.eq.s32.totalorder %v1419_v37, %v12081_v47  ;;  %vm1532_vm5 = vcmp.eq.s32.totalorder %v1419_v37, %v12083_v48  ;;  %vm1533_vm6 = vcmp.eq.s32.totalorder %v1419_v37, %v12085_v49  ;;  %v18464_v33 = vld [vmem:[#allocation76_spill] sm:$0xff] }
 0x177   : > { %18456 = vst [vmem:[#allocation40_spill] sm:$0xff] %v13156_v14  ;;  %v13168_v54 = vpack.c.bf16 %v2268_v24, %v2267_v22  ;;  %vm1534_vm7 = vcmp.eq.s32.totalorder %v1419_v37, %v12091_v51  ;;  %v10230_v28 = vsel %vm1531_vm4, 1.0, %v18377_v12  ;;  %v10231_v26 = vsel %vm1532_vm5, 1.0, %v18377_v12  ;;  %v18465_v22 = vld [vmem:[#allocation77_spill] sm:$0xff]  ;;  %v18466_v24 = vld [vmem:[#allocation78_spill] sm:$0xff] }
 0x178   : > { %v13173_v55 = vpack.c.bf16 %v2270_v36, %v2269_v40  ;;  %v10232_v59 = vsel %vm1533_vm6, 1.0, %v18377_v12  ;;  %v10233_v18 = vsel %vm1534_vm7, 1.0, %v18377_v12  ;;  %v2235_v4 = vadd.f32 %v10230_v28, %v18463_v56  ;;  %v1452_v40 = vpop.permute.xlu2 %1451  ;;  %v1428_v36 = vpop.permute.xlu0 %1427  ;;  %v11454_v56 = vld [vmem:[%s11917_s4 + $0x8] sm:$0xff] }
 0x179   : > { %18461 = vst [vmem:[#allocation41_spill] sm:$0xff] %v13168_v54  ;;  %v2236_v19 = vadd.f32 %v10231_v26, %v18464_v33  ;;  %v2237_v23 = vadd.f32 %v10232_v59, %v18465_v22  ;;  %v2238_v37 = vadd.f32 %v10233_v18, %v18466_v24  ;;  %v11782_v54 = vmov 3   ;;  %v18468_v24 = vld [vmem:[#allocation71_spill] sm:$0xff] }
 0x17a   : > { %18462 = vst [vmem:[#allocation55_spill] sm:$0xff] %v13173_v55  ;;  %11377 = vset.pattern.permute.xlu0 %v11782_v54  ;;  %vm1535_vm8 = vcmp.eq.s32.totalorder %v1422_v46, %v12081_v47  ;;  %vm1536_vm9 = vcmp.eq.s32.totalorder %v1422_v46, %v12083_v48  ;;  %vm1537_vm10 = vcmp.eq.s32.totalorder %v1422_v46, %v12085_v49  ;;  %v18469_v55 = vld [vmem:[#allocation72_spill] sm:$0xff] }
 0x17b   : > { %vm1538_vm11 = vcmp.eq.s32.totalorder %v1422_v46, %v12091_v51  ;;  %v13185_v28 = vpack.c.bf16 %v2236_v19, %v2235_v4  ;;  %v13187_v26 = vpack.c.bf16 %v2238_v37, %v2237_v23  ;;  %v10234_v59 = vsel %vm1535_vm8, 1.0, %v18377_v12  ;;  %3351 = vperm.xlu0 %11377, %v11454_v56   ;;  %11376 = vset.pattern.permute.xlu2 %v11782_v54  ;;  %v11455_v4 = vld [vmem:[%s11917_s4] sm:$0xff]  ;;  %v18470_v19 = vld [vmem:[#allocation73_spill] sm:$0xff]  ;;  %v18471_v37 = vld [vmem:[#allocation74_spill] sm:$0xff] }
 0x17c   : > { %v10235_v18 = vsel %vm1536_vm9, 1.0, %v18377_v12  ;;  %v10236_v33 = vsel %vm1537_vm10, 1.0, %v18377_v12  ;;  %v10237_v22 = vsel %vm1538_vm11, 1.0, %v18377_v12  ;;  %v2239_v46 = vadd.f32 %v10234_v59, %v18468_v24  ;;  %3348 = vperm.xlu2 %11376, %v11455_v4   ;;  %11378 = vset.pattern.permute.xlu1 %v11782_v54  ;;  %v11456_v56 = vld [vmem:[%s11917_s4 + $0x10] sm:$0xff]  ;;  %v18473_v4 = vld [vmem:[#allocation68_spill] sm:$0xff] }
 0x17d   : > { %18467 = vst [vmem:[#allocation56_spill] sm:$0xff] %v13187_v26  ;;  %v2240_v14 = vadd.f32 %v10235_v18, %v18469_v55  ;;  %v2241_v23 = vadd.f32 %v10236_v33, %v18470_v19  ;;  %v2242_v35 = vadd.f32 %v10237_v22, %v18471_v37  ;;  %vm1575_vm12 = vcmp.eq.s32.totalorder %v1452_v40, %v12081_v47  ;;  %v18472_v22 = vld [vmem:[#allocation67_spill] sm:$0xff]  ;;  %v18475_v37 = vld [vmem:[#allocation70_spill] sm:$0xff] }
 0x17e   : > { %vm1576_vm13 = vcmp.eq.s32.totalorder %v1452_v40, %v12083_v48  ;;  %3354 = vperm.xlu1 %11378, %v11456_v56   ;;  %vm1577_vm14 = vcmp.eq.s32.totalorder %v1452_v40, %v12085_v49  ;;  %vm1578_vm15 = vcmp.eq.s32.totalorder %v1452_v40, %v12091_v51  ;;  %v10274_v55 = vsel %vm1575_vm12, 1.0, %v18377_v12 }
 0x17f   : > { %v13202_v26 = vpack.c.bf16 %v2240_v14, %v2239_v46  ;;  %v13207_v59 = vpack.c.bf16 %v2242_v35, %v2241_v23  ;;  %v10275_v54 = vsel %vm1576_vm13, 1.0, %v18377_v12  ;;  %v10276_v18 = vsel %vm1577_vm14, 1.0, %v18377_v12  ;;  %v18474_v14 = vld [vmem:[#allocation69_spill] sm:$0xff]  ;;  %v1431_v35 = vpop.permute.xlu1 %1430 }
 0x180   : > { %v10277_v33 = vsel %vm1578_vm15, 1.0, %v18377_v12  ;;  %v2279_v24 = vadd.f32 %v10274_v55, %v18472_v22  ;;  %v2280_v19 = vadd.f32 %v10275_v54, %v18473_v4  ;;  %v2281_v46 = vadd.f32 %v10276_v18, %v18474_v14  ;;  %v11457_v4 = vld [vmem:[%s11917_s4 + $0x30] sm:$0xff]  ;;  %v1437_v14 = vpop.permute.xlu0 %1436 }
 0x181   : > { %v2282_v56 = vadd.f32 %v10277_v33, %v18475_v37  ;;  %vm1543_vm0 = vcmp.eq.s32.totalorder %v1428_v36, %v12081_v47  ;;  %vm1544_vm1 = vcmp.eq.s32.totalorder %v1428_v36, %v12083_v48  ;;  %vm1545_vm2 = vcmp.eq.s32.totalorder %v1428_v36, %v12085_v49  ;;  %v11459_v37 = vld [vmem:[%s11917_s4 + $0x20] sm:$0xff] }
 0x182   : > { %vm1546_vm3 = vcmp.eq.s32.totalorder %v1428_v36, %v12091_v51  ;;  %v13220_v40 = vpack.c.bf16 %v2280_v19, %v2279_v24  ;;  %v10242_v55 = vsel %vm1543_vm0, 1.0, %v18377_v12  ;;  %v10243_v54 = vsel %vm1544_vm1, 1.0, %v18377_v12 }
 0x183   : > { %v13222_v23 = vpack.c.bf16 %v2282_v56, %v2281_v46  ;;  %v10244_v18 = vsel %vm1545_vm2, 1.0, %v18377_v12  ;;  %v10245_v33 = vsel %vm1546_vm3, 1.0, %v18377_v12  ;;  %v13229_v22 = vadd.f32 %v10242_v55, %v12648_v32  ;;  %3366 = vperm.xlu0 %11377, %v11457_v4   ;;  %v11458_v46 = vld [vmem:[%s11917_s4 + $0x18] sm:$0xff]  ;;  %v18478_v55 = vld [vmem:[#allocation79_spill] sm:$0xff]  ;;  %v18480_v4 = vld [vmem:[#allocation81_spill] sm:$0xff] }
 0x184   : > { %18476 = vst [vmem:[#allocation57_spill] sm:$0xff] %v13220_v40  ;;  %v13232_v36 = vadd.f32 %v10243_v54, %v12653_v27  ;;  %v13236_v24 = vadd.f32 %v10244_v18, %v12658_v45  ;;  %v13239_v19 = vadd.f32 %v10245_v33, %v12663_v58  ;;  %vm1547_vm4 = vcmp.eq.s32.totalorder %v1431_v35, %v12081_v47  ;;  %v2357_v45 = vpop.permute.xlu2 %2356  ;;  %v18479_v18 = vld [vmem:[#allocation80_spill] sm:$0xff] }
 0x185   : > { %18477 = vst [vmem:[#allocation51_spill] sm:$0xff] %v13222_v23  ;;  %vm1548_vm5 = vcmp.eq.s32.totalorder %v1431_v35, %v12083_v48  ;;  %3357 = vperm.xlu2 %11376, %v11458_v46   ;;  %vm1549_vm6 = vcmp.eq.s32.totalorder %v1431_v35, %v12085_v49  ;;  %vm1550_vm7 = vcmp.eq.s32.totalorder %v1431_v35, %v12091_v51  ;;  %v10246_v27 = vsel %vm1547_vm4, 1.0, %v18377_v12  ;;  %v18481_v23 = vld [vmem:[#allocation82_spill] sm:$0xff] }
 0x186   : > { %v10247_v32 = vsel %vm1548_vm5, 1.0, %v18377_v12  ;;  %3360 = vperm.xlu1 %11378, %v11459_v37   ;;  %v10248_v58 = vsel %vm1549_vm6, 1.0, %v18377_v12  ;;  %v10249_v56 = vsel %vm1550_vm7, 1.0, %v18377_v12  ;;  %v2251_v54 = vadd.f32 %v10246_v27, %v18478_v55 }
 0x187   : > { %v2252_v33 = vadd.f32 %v10247_v32, %v18479_v18  ;;  %v2253_v46 = vadd.f32 %v10248_v58, %v18480_v4  ;;  %v2254_v40 = vadd.f32 %v10249_v56, %v18481_v23  ;;  %vm1555_vm8 = vcmp.eq.s32.totalorder %v1437_v14, %v12081_v47  ;;  %v18484_v56 = vld [vmem:[#allocation87_spill] sm:$0xff] }
 0x188   : > { %vm1556_vm9 = vcmp.eq.s32.totalorder %v1437_v14, %v12083_v48  ;;  %vm1557_vm10 = vcmp.eq.s32.totalorder %v1437_v14, %v12085_v49  ;;  %vm1558_vm11 = vcmp.eq.s32.totalorder %v1437_v14, %v12091_v51  ;;  %v10254_v37 = vsel %vm1555_vm8, 1.0, %v18377_v12  ;;  %v18490_v14 = vld [vmem:[#allocation90_spill] sm:$0xff] }
 0x189   : > { %v13257_v35 = vpack.c.bf16 %v2252_v33, %v2251_v54  ;;  %v13262_v27 = vpack.c.bf16 %v2254_v40, %v2253_v46  ;;  %v10255_v32 = vsel %vm1556_vm9, 1.0, %v18377_v12  ;;  %v10256_v58 = vsel %vm1557_vm10, 1.0, %v18377_v12  ;;  %v18486_v54 = vld [vmem:[#allocation88_spill] sm:$0xff]  ;;  %v18488_v33 = vld [vmem:[#allocation89_spill] sm:$0xff]  ;;  %v1440_v40 = vpop.permute.xlu1 %1439 }
 0x18a   : > { %v10257_v23 = vsel %vm1558_vm11, 1.0, %v18377_v12  ;;  %v13268_v55 = vadd.f32 %v10254_v37, %v18484_v56  ;;  %v13271_v18 = vadd.f32 %v10255_v32, %v18486_v54  ;;  %v13274_v4 = vadd.f32 %v10256_v58, %v18488_v33  ;;  %v11460_v46 = vld [vmem:[%s11917_s4 + $0x48] sm:$0xff] }
 0x18b   : > { %18482 = vst [vmem:[#allocation52_spill] sm:$0xff] %v13257_v35  ;;  %v13277_v35 = vadd.f32 %v10257_v23, %v18490_v14  ;;  %vm2451_vm12 = vcmp.eq.s32.totalorder %v2357_v45, %v12081_v47  ;;  %vm2452_vm13 = vcmp.eq.s32.totalorder %v2357_v45, %v12083_v48  ;;  %vm2453_vm14 = vcmp.eq.s32.totalorder %v2357_v45, %v12085_v49  ;;  %v11461_v56 = vld [vmem:[%s11917_s4 + $0x28] sm:$0xff] }
 0x18c   : > { %18483 = vst [vmem:[#allocation53_spill] sm:$0xff] %v13262_v27  ;;  %vm2454_vm15 = vcmp.eq.s32.totalorder %v2357_v45, %v12091_v51  ;;  %3375 = vperm.xlu0 %11377, %v11460_v46   ;;  %v10286_v37 = vsel %vm2451_vm12, 1.0, %v18377_v12  ;;  %v10287_v32 = vsel %vm2452_vm13, 1.0, %v18377_v12  ;;  %v10288_v58 = vsel %vm2453_vm14, 1.0, %v18377_v12 }
 0x18d   : > { %18485 = vst [vmem:[#allocation54_spill] sm:$0xff] %v13268_v55  ;;  %v10289_v23 = vsel %vm2454_vm15, 1.0, %v18377_v12  ;;  %3363 = vperm.xlu2 %11376, %v11461_v56   ;;  %v18492_v54 = vunpack.c.l.bf16 %v12667_v29  ;;  %v18493_v14 = vunpack.c.h.bf16 %v12667_v29  ;;  %v18494_v45 = vunpack.c.l.bf16 %v12669_v52 }
 0x18e   : > { %18487 = vst [vmem:[#allocation47_spill] sm:$0xff] %v13271_v18  ;;  %v18495_v46 = vunpack.c.h.bf16 %v12669_v52  ;;  %v11462_v18 = vld [vmem:[%s11917_s4 + $0x38] sm:$0xff]  ;;  %vm1559_vm0 = vcmp.eq.s32.totalorder %v1440_v40, %v12081_v47  ;;  %vm1560_vm1 = vcmp.eq.s32.totalorder %v1440_v40, %v12083_v48  ;;  %vm1561_vm2 = vcmp.eq.s32.totalorder %v1440_v40, %v12085_v49 }
 0x18f   : > { %18489 = vst [vmem:[#allocation48_spill] sm:$0xff] %v13274_v4  ;;  %v3155_v33 = vadd.f32 %v10286_v37, %v18492_v54  ;;  %v3156_v27 = vadd.f32 %v10287_v32, %v18493_v14  ;;  %3369 = vperm.xlu1 %11378, %v11462_v18   ;;  %vm1562_vm3 = vcmp.eq.s32.totalorder %v1440_v40, %v12091_v51  ;;  %v1446_v37 = vpop.permute.xlu0 %1445  ;;  %v10258_v32 = vsel %vm1559_vm0, 1.0, %v18377_v12  ;;  %v18496_v54 = vld [vmem:[#allocation83_spill] sm:$0xff]  ;;  %v18498_v40 = vld [vmem:[#allocation85_spill] sm:$0xff] }
 0x190   : > { %18491 = vst [vmem:[#allocation49_spill] sm:$0xff] %v13277_v35  ;;  %v3157_v35 = vadd.f32 %v10288_v58, %v18494_v45  ;;  %v3158_v4 = vadd.f32 %v10289_v23, %v18495_v46  ;;  %v10259_v52 = vsel %vm1560_vm1, 1.0, %v18377_v12  ;;  %v2366_v58 = vpop.permute.xlu2 %2365  ;;  %v10260_v18 = vsel %vm1561_vm2, 1.0, %v18377_v12  ;;  %v18497_v45 = vld [vmem:[#allocation84_spill] sm:$0xff] }
 0x191   : > { %v13302_v56 = vpack.c.bf16 %v3156_v27, %v3155_v33  ;;  %v10261_v23 = vsel %vm1562_vm3, 1.0, %v18377_v12  ;;  %v2263_v14 = vadd.f32 %v10258_v32, %v18496_v54  ;;  %v2264_v46 = vadd.f32 %v10259_v52, %v18497_v45  ;;  %v18499_v27 = vld [vmem:[#allocation86_spill] sm:$0xff]  ;;  %v11463_v54 = vld [vmem:[%s11917_s4 + $0x60] sm:$0xff] }
 0x192   : > { %v13304_v29 = vpack.c.bf16 %v3158_v4, %v3157_v35  ;;  %v2265_v55 = vadd.f32 %v10260_v18, %v18498_v40  ;;  %v2266_v33 = vadd.f32 %v10261_v23, %v18499_v27  ;;  %vm1567_vm4 = vcmp.eq.s32.totalorder %v1446_v37, %v12081_v47  ;;  %v11465_v40 = vld [vmem:[%s11917_s4 + $0x50] sm:$0xff] }
 0x193   : > { %vm1568_vm5 = vcmp.eq.s32.totalorder %v1446_v37, %v12083_v48  ;;  %v13316_v35 = vpack.c.bf16 %v2264_v46, %v2263_v14  ;;  %vm1569_vm6 = vcmp.eq.s32.totalorder %v1446_v37, %v12085_v49  ;;  %vm1570_vm7 = vcmp.eq.s32.totalorder %v1446_v37, %v12091_v51  ;;  %v11464_v46 = vld [vmem:[%s11917_s4 + $0x40] sm:$0xff] }
 0x194   : > { %v10266_v4 = vsel %vm1567_vm4, 1.0, %v18377_v12  ;;  %v13321_v32 = vpack.c.bf16 %v2266_v33, %v2265_v55  ;;  %v10267_v52 = vsel %vm1568_vm5, 1.0, %v18377_v12  ;;  %v10268_v18 = vsel %vm1569_vm6, 1.0, %v18377_v12  ;;  %3384 = vperm.xlu0 %11377, %v11463_v54  }
 0x195   : > { %v10269_v23 = vsel %vm1570_vm7, 1.0, %v18377_v12  ;;  %v13328_v14 = vadd.f32 %v10266_v4, %v12746_v13  ;;  %v13331_v45 = vadd.f32 %v10267_v52, %v12749_v2  ;;  %v13334_v37 = vadd.f32 %v10268_v18, %v12752_v6  ;;  %3372 = vperm.xlu2 %11376, %v11464_v46   ;;  %v1449_v13 = vpop.permute.xlu1 %1448 }
 0x196   : > { %18500 = vst [vmem:[#allocation50_spill] sm:$0xff] %v13321_v32  ;;  %v13337_v55 = vadd.f32 %v10269_v23, %v12755_v30  ;;  %vm2463_vm8 = vcmp.eq.s32.totalorder %v2366_v58, %v12081_v47  ;;  %vm2464_vm9 = vcmp.eq.s32.totalorder %v2366_v58, %v12083_v48  ;;  %vm2465_vm10 = vcmp.eq.s32.totalorder %v2366_v58, %v12085_v49 }
 0x197   : > { %vm2466_vm11 = vcmp.eq.s32.totalorder %v2366_v58, %v12091_v51  ;;  %3378 = vperm.xlu1 %11378, %v11465_v40   ;;  %v10298_v2 = vsel %vm2463_vm8, 1.0, %v18377_v12  ;;  %v10299_v6 = vsel %vm2464_vm9, 1.0, %v18377_v12  ;;  %v10300_v30 = vsel %vm2465_vm10, 1.0, %v18377_v12  ;;  %v1455_v40 = vpop.permute.xlu0 %1454 }
 0x198   : > { %v10301_v27 = vsel %vm2466_vm11, 1.0, %v18377_v12  ;;  %v18501_v33 = vunpack.c.l.bf16 %v12720_v10  ;;  %v18502_v52 = vunpack.c.h.bf16 %v12720_v10  ;;  %v18503_v23 = vunpack.c.l.bf16 %v12726_v1 }
 0x199   : > { %v18504_v54 = vunpack.c.h.bf16 %v12726_v1  ;;  %vm1571_vm12 = vcmp.eq.s32.totalorder %v1449_v13, %v12081_v47  ;;  %vm1572_vm13 = vcmp.eq.s32.totalorder %v1449_v13, %v12083_v48  ;;  %vm1573_vm14 = vcmp.eq.s32.totalorder %v1449_v13, %v12085_v49  ;;  %v2372_v1 = vpop.permute.xlu2 %2371 }
 0x19a   : > { %v3167_v4 = vadd.f32 %v10298_v2, %v18501_v33  ;;  %v3168_v18 = vadd.f32 %v10299_v6, %v18502_v52  ;;  %v3169_v58 = vadd.f32 %v10300_v30, %v18503_v23  ;;  %vm1574_vm15 = vcmp.eq.s32.totalorder %v1449_v13, %v12091_v51  ;;  %v18507_v23 = vld [vmem:[#allocation91_spill] sm:$0xff]  ;;  %v18508_v13 = vld [vmem:[#allocation92_spill] sm:$0xff] }
 0x19b   : > { %v3170_v46 = vadd.f32 %v10301_v27, %v18504_v54  ;;  %v10270_v6 = vsel %vm1571_vm12, 1.0, %v18377_v12  ;;  %v10271_v30 = vsel %vm1572_vm13, 1.0, %v18377_v12  ;;  %v10272_v27 = vsel %vm1573_vm14, 1.0, %v18377_v12 }
 0x19c   : > { %v13361_v2 = vpack.c.bf16 %v3168_v18, %v3167_v4  ;;  %v10273_v33 = vsel %vm1574_vm15, 1.0, %v18377_v12  ;;  %v2275_v52 = vadd.f32 %v10270_v6, %v12730_v5  ;;  %v2276_v54 = vadd.f32 %v10271_v30, %v18507_v23  ;;  %v18509_v4 = vld [vmem:[#allocation93_spill] sm:$0xff]  ;;  %v11467_v6 = vld [vmem:[%s11917_s4 + $0x58] sm:$0xff] }
 0x19d   : > { %v13363_v10 = vpack.c.bf16 %v3170_v46, %v3169_v58  ;;  %v2277_v32 = vadd.f32 %v10272_v27, %v18508_v13  ;;  %v2278_v18 = vadd.f32 %v10273_v33, %v18509_v4  ;;  %vm1579_vm0 = vcmp.eq.s32.totalorder %v1455_v40, %v12081_v47  ;;  %v11466_v58 = vld [vmem:[%s11917_s4 + $0x78] sm:$0xff]  ;;  %3381 = vperm.xlu2 %11376, %v11467_v6   ;;  %v11468_v13 = vld [vmem:[%s11917_s4 + $0x68] sm:$0xff]  ;;  %v1458_v4 = vpop.permute.xlu1 %1457 }
 0x19e   : > { %18505 = vst [vmem:[#allocation66_spill] sm:$0xff] %v13361_v2  ;;  %vm1580_vm1 = vcmp.eq.s32.totalorder %v1455_v40, %v12083_v48  ;;  %3393 = vperm.xlu0 %11377, %v11466_v58   ;;  %v13376_v46 = vpack.c.bf16 %v2276_v54, %v2275_v52  ;;  %vm1581_vm2 = vcmp.eq.s32.totalorder %v1455_v40, %v12085_v49  ;;  %v10278_v5 = vsel %vm1579_vm0, 1.0, %v18377_v12 }
 0x19f   : > { %18506 = vst [vmem:[#allocation62_spill] sm:$0xff] %v13363_v10  ;;  %vm1582_vm3 = vcmp.eq.s32.totalorder %v1455_v40, %v12091_v51  ;;  %v13382_v30 = vpack.c.bf16 %v2278_v18, %v2277_v32  ;;  %v10279_v27 = vsel %vm1580_vm1, 1.0, %v18377_v12  ;;  %v10280_v33 = vsel %vm1581_vm2, 1.0, %v18377_v12  ;;  %3387 = vperm.xlu1 %11378, %v11468_v13   ;;  %v11470_v10 = vld [vmem:[%s11917_s4 + $0x70] sm:$0xff] }
 0x1a0   : > { %18510 = vst [vmem:[#allocation63_spill] sm:$0xff] %v13376_v46  ;;  %v10281_v23 = vsel %vm1582_vm3, 1.0, %v18377_v12  ;;  %v13389_v52 = vadd.f32 %v10278_v5, %v12799_v16  ;;  %v13392_v54 = vadd.f32 %v10279_v27, %v12802_v31  ;;  %v13395_v40 = vadd.f32 %v10280_v33, %v12805_v3  ;;  %v11469_v46 = vld [vmem:[%s11917_s4 + $0x90] sm:$0xff] }
 0x1a1   : > { %18511 = vst [vmem:[#allocation64_spill] sm:$0xff] %v13382_v30  ;;  %v13398_v32 = vadd.f32 %v10281_v23, %v12808_v15  ;;  %vm2471_vm4 = vcmp.eq.s32.totalorder %v2372_v1, %v12081_v47  ;;  %vm2472_vm5 = vcmp.eq.s32.totalorder %v2372_v1, %v12083_v48  ;;  %vm2473_vm6 = vcmp.eq.s32.totalorder %v2372_v1, %v12085_v49  ;;  %v2381_v30 = vpop.permute.xlu2 %2380 }
 0x1a2   : > { %vm2474_vm7 = vcmp.eq.s32.totalorder %v2372_v1, %v12091_v51  ;;  %v10306_v16 = vsel %vm2471_vm4, 1.0, %v18377_v12  ;;  %v10307_v31 = vsel %vm2472_vm5, 1.0, %v18377_v12  ;;  %v10308_v3 = vsel %vm2473_vm6, 1.0, %v18377_v12 }
 0x1a3   : > { %v10309_v18 = vsel %vm2474_vm7, 1.0, %v18377_v12  ;;  %v2920_v15 = vunpack.c.h.bf16 %v12773_v21  ;;  %v2921_v58 = vunpack.c.l.bf16 %v12779_v9  ;;  %v2922_v5 = vunpack.c.h.bf16 %v12779_v9 }
 0x1a4   : > { %v18512_v6 = vunpack.c.l.bf16 %v12773_v21  ;;  %vm1583_vm8 = vcmp.eq.s32.totalorder %v1458_v4, %v12081_v47  ;;  %vm1584_vm9 = vcmp.eq.s32.totalorder %v1458_v4, %v12083_v48  ;;  %vm1585_vm10 = vcmp.eq.s32.totalorder %v1458_v4, %v12085_v49 }
 0x1a5   : > { %vm1586_vm11 = vcmp.eq.s32.totalorder %v1458_v4, %v12091_v51  ;;  %v3176_v1 = vadd.f32 %v10307_v31, %v2920_v15  ;;  %v3177_v33 = vadd.f32 %v10308_v3, %v2921_v58  ;;  %v3178_v23 = vadd.f32 %v10309_v18, %v2922_v5  ;;  %3390 = vperm.xlu2 %11376, %v11470_v10  }
 0x1a6   : > { %v3175_v27 = vadd.f32 %v10306_v16, %v18512_v6  ;;  %v10282_v13 = vsel %vm1583_vm8, 1.0, %v18377_v12  ;;  %3402 = vperm.xlu0 %11377, %v11469_v46   ;;  %v10283_v21 = vsel %vm1584_vm9, 1.0, %v18377_v12  ;;  %v10284_v9 = vsel %vm1585_vm10, 1.0, %v18377_v12  ;;  %v18513_v46 = vld [vmem:[#allocation94_spill] sm:$0xff] }
 0x1a7   : > { %v10285_v16 = vsel %vm1586_vm11, 1.0, %v18377_v12  ;;  %v2287_v6 = vadd.f32 %v10282_v13, %v12783_v8  ;;  %v13426_v4 = vpack.c.bf16 %v3178_v23, %v3177_v33  ;;  %v2288_v31 = vadd.f32 %v10283_v21, %v12786_v60  ;;  %3396 = vperm.xlu1 %11378, %v12903_v0   ;;  %v2360_v8 = vpop.permute.xlu0 %2359 }
 0x1a8   : > { %v13424_v2 = vpack.c.bf16 %v3176_v1, %v3175_v27  ;;  %v2289_v3 = vadd.f32 %v10284_v9, %v12789_v61  ;;  %v2290_v18 = vadd.f32 %v10285_v16, %v18513_v46  ;;  %vm2483_vm12 = vcmp.eq.s32.totalorder %v2381_v30, %v12081_v47  ;;  %v2363_v16 = vpop.permute.xlu1 %2362 }
 0x1a9   : > { %vm2484_vm13 = vcmp.eq.s32.totalorder %v2381_v30, %v12083_v48  ;;  %vm2485_vm14 = vcmp.eq.s32.totalorder %v2381_v30, %v12085_v49  ;;  %v13435_v10 = vpack.c.bf16 %v2288_v31, %v2287_v6  ;;  %vm2486_vm15 = vcmp.eq.s32.totalorder %v2381_v30, %v12091_v51 }
 0x1aa   : > { %v10318_v15 = vsel %vm2483_vm12, 1.0, %v18377_v12  ;;  %v10319_v60 = vsel %vm2484_vm13, 1.0, %v18377_v12  ;;  %v13440_v61 = vpack.c.bf16 %v2290_v18, %v2289_v3  ;;  %v10320_v0 = vsel %vm2485_vm14, 1.0, %v18377_v12 }
 0x1ab   : > { %v10321_v58 = vsel %vm2486_vm15, 1.0, %v18377_v12  ;;  %v2931_v5 = vunpack.c.l.bf16 %v12826_v62  ;;  %v2932_v27 = vunpack.c.h.bf16 %v12826_v62  ;;  %v2933_v1 = vunpack.c.l.bf16 %v12832_v17 }
 0x1ac   : > { %v2934_v33 = vunpack.c.h.bf16 %v12832_v17  ;;  %vm2455_vm0 = vcmp.eq.s32.totalorder %v2360_v8, %v12081_v47  ;;  %vm2456_vm1 = vcmp.eq.s32.totalorder %v2360_v8, %v12083_v48  ;;  %vm2457_vm2 = vcmp.eq.s32.totalorder %v2360_v8, %v12085_v49 }
 0x1ad   : > { %v3187_v30 = vadd.f32 %v10318_v15, %v2931_v5  ;;  %vm2458_vm3 = vcmp.eq.s32.totalorder %v2360_v8, %v12091_v51  ;;  %v3188_v23 = vadd.f32 %v10319_v60, %v2932_v27  ;;  %v3189_v13 = vadd.f32 %v10320_v0, %v2933_v1  ;;  %3399 = vperm.xlu2 %11376, %v12913_v42  }
 0x1ae   : > { %v3190_v21 = vadd.f32 %v10321_v58, %v2934_v33  ;;  %v10290_v9 = vsel %vm2455_vm0, 1.0, %v18377_v12  ;;  %3411 = vperm.xlu0 %11377, %v12917_v41   ;;  %v10291_v62 = vsel %vm2456_vm1, 1.0, %v18377_v12  ;;  %v10292_v17 = vsel %vm2457_vm2, 1.0, %v18377_v12 }
 0x1af   : > { %v10293_v6 = vsel %vm2458_vm3, 1.0, %v18377_v12  ;;  %v2903_v31 = vunpack.c.l.bf16 %v12884_v7  ;;  %v13459_v3 = vpack.c.bf16 %v3188_v23, %v3187_v30  ;;  %v2904_v18 = vunpack.c.h.bf16 %v12884_v7  ;;  %3405 = vperm.xlu1 %11378, %v12953_v39   ;;  %v2390_v7 = vpop.permute.xlu2 %2389 }
 0x1b0   : > { %v13461_v46 = vpack.c.bf16 %v3190_v21, %v3189_v13  ;;  %v2905_v8 = vunpack.c.l.bf16 %v12889_v25  ;;  %v2906_v41 = vunpack.c.h.bf16 %v12889_v25  ;;  %vm2459_vm4 = vcmp.eq.s32.totalorder %v2363_v16, %v12081_v47 }
 0x1b1   : > { %v13467_v15 = vadd.f32 %v10290_v9, %v2903_v31  ;;  %vm2460_vm5 = vcmp.eq.s32.totalorder %v2363_v16, %v12083_v48  ;;  %v13471_v60 = vadd.f32 %v10291_v62, %v2904_v18  ;;  %vm2461_vm6 = vcmp.eq.s32.totalorder %v2363_v16, %v12085_v49  ;;  %v2375_v9 = vpop.permute.xlu0 %2374  ;;  %v18514_v31 = vld [vmem:[#allocation16_spill] sm:$0xff] }
 0x1b2   : > { %v13473_v42 = vadd.f32 %v10292_v17, %v2905_v8  ;;  %vm2462_vm7 = vcmp.eq.s32.totalorder %v2363_v16, %v12091_v51  ;;  %v13477_v0 = vadd.f32 %v10293_v6, %v2906_v41  ;;  %v10294_v39 = vsel %vm2459_vm4, 1.0, %v18377_v12  ;;  %v18515_v41 = vld [vmem:[#allocation15_spill] sm:$0xff] }
 0x1b3   : > { %v10295_v25 = vsel %vm2460_vm5, 1.0, %v18377_v12  ;;  %v10296_v58 = vsel %vm2461_vm6, 1.0, %v18377_v12  ;;  %v10297_v5 = vsel %vm2462_vm7, 1.0, %v18377_v12  ;;  %v2907_v27 = vunpack.c.l.bf16 %v12849_v20 }
 0x1b4   : > { %v2908_v1 = vunpack.c.h.bf16 %v12849_v20  ;;  %v2909_v33 = vunpack.c.l.bf16 %v12854_v43  ;;  %v2910_v30 = vunpack.c.h.bf16 %v12854_v43  ;;  %vm2495_vm8 = vcmp.eq.s32.totalorder %v2390_v7, %v12081_v47 }
 0x1b5   : > { %vm2496_vm9 = vcmp.eq.s32.totalorder %v2390_v7, %v12083_v48  ;;  %vm2497_vm10 = vcmp.eq.s32.totalorder %v2390_v7, %v12085_v49  ;;  %v3163_v23 = vadd.f32 %v10294_v39, %v2907_v27  ;;  %vm2498_vm11 = vcmp.eq.s32.totalorder %v2390_v7, %v12091_v51  ;;  %3408 = vperm.xlu2 %11376, %v12961_v44   ;;  %v2369_v27 = vpop.permute.xlu1 %2368 }
 0x1b6   : > { %v3164_v13 = vadd.f32 %v10295_v25, %v2908_v1  ;;  %v3165_v21 = vadd.f32 %v10296_v58, %v2909_v33  ;;  %3420 = vperm.xlu0 %11377, %v12965_v11   ;;  %v3166_v16 = vadd.f32 %v10297_v5, %v2910_v30  ;;  %v10330_v20 = vsel %vm2495_vm8, 1.0, %v18377_v12 }
 0x1b7   : > { %v10331_v62 = vsel %vm2496_vm9, 1.0, %v18377_v12  ;;  %v10332_v43 = vsel %vm2497_vm10, 1.0, %v18377_v12  ;;  %v10333_v6 = vsel %vm2498_vm11, 1.0, %v18377_v12  ;;  %v2943_v18 = vunpack.c.l.bf16 %v18514_v31  ;;  %3414 = vperm.xlu1 %11378, %v13001_v34  }
 0x1b8   : > { %v13496_v17 = vpack.c.bf16 %v3164_v13, %v3163_v23  ;;  %v2944_v8 = vunpack.c.h.bf16 %v18514_v31  ;;  %v13502_v11 = vpack.c.bf16 %v3166_v16, %v3165_v21  ;;  %v2945_v7 = vunpack.c.l.bf16 %v18515_v41  ;;  %v18517_v21 = vld [vmem:[#allocation29_spill] sm:$0xff] }
 0x1b9   : > { %v2946_v39 = vunpack.c.h.bf16 %v18515_v41  ;;  %vm2475_vm12 = vcmp.eq.s32.totalorder %v2375_v9, %v12081_v47  ;;  %v3199_v25 = vadd.f32 %v10330_v20, %v2943_v18  ;;  %vm2476_vm13 = vcmp.eq.s32.totalorder %v2375_v9, %v12083_v48  ;;  %v18519_v41 = vld [vmem:[#allocation23_spill] sm:$0xff] }
 0x1ba   : > { %v3200_v44 = vadd.f32 %v10331_v62, %v2944_v8  ;;  %vm2477_vm14 = vcmp.eq.s32.totalorder %v2375_v9, %v12085_v49  ;;  %v3201_v58 = vadd.f32 %v10332_v43, %v2945_v7  ;;  %vm2478_vm15 = vcmp.eq.s32.totalorder %v2375_v9, %v12091_v51  ;;  %v18518_v62 = vld [vmem:[#allocation18_spill] sm:$0xff]  ;;  %v2399_v8 = vpop.permute.xlu2 %2398 }
 0x1bb   : > { %v3202_v5 = vadd.f32 %v10333_v6, %v2946_v39  ;;  %v10310_v34 = vsel %vm2475_vm12, 1.0, %v18377_v12  ;;  %v10311_v33 = vsel %vm2476_vm13, 1.0, %v18377_v12  ;;  %v10312_v30 = vsel %vm2477_vm14, 1.0, %v18377_v12 }
 0x1bc   : > { %v13511_v1 = vpack.c.bf16 %v3200_v44, %v3199_v25  ;;  %v10313_v23 = vsel %vm2478_vm15, 1.0, %v18377_v12  ;;  %v2923_v16 = vunpack.c.l.bf16 %v18517_v21  ;;  %v2924_v20 = vunpack.c.h.bf16 %v18517_v21 }
 0x1bd   : > { %v13516_v13 = vpack.c.bf16 %v3202_v5, %v3201_v58  ;;  %v2925_v43 = vunpack.c.l.bf16 %v18518_v62  ;;  %v2926_v9 = vunpack.c.h.bf16 %v18518_v62  ;;  %vm2467_vm0 = vcmp.eq.s32.totalorder %v2369_v27, %v12081_v47  ;;  %3417 = vperm.xlu2 %11376, %v18519_v41   ;;  %v18520_v58 = vld [vmem:[#allocation17_spill] sm:$0xff] }
 0x1be   : > { %vm2468_vm1 = vcmp.eq.s32.totalorder %v2369_v27, %v12083_v48  ;;  %vm2469_vm2 = vcmp.eq.s32.totalorder %v2369_v27, %v12085_v49  ;;  %3429 = vperm.xlu0 %11377, %v13018_v63   ;;  %v13526_v6 = vadd.f32 %v10310_v34, %v2923_v16  ;;  %v13528_v31 = vadd.f32 %v10311_v33, %v2924_v20 }
 0x1bf   : > { %18516 = vst [vmem:[#allocation65_spill] sm:$0xff] %v13516_v13  ;;  %v13530_v18 = vadd.f32 %v10312_v30, %v2925_v43  ;;  %vm2470_vm3 = vcmp.eq.s32.totalorder %v2369_v27, %v12091_v51  ;;  %v13534_v7 = vadd.f32 %v10313_v23, %v2926_v9  ;;  %v10302_v39 = vsel %vm2467_vm0, 1.0, %v18377_v12  ;;  %3423 = vperm.xlu1 %11378, %v13049_v50   ;;  %v18521_v27 = vld [vmem:[#allocation26_spill] sm:$0xff]  ;;  %v2384_v50 = vpop.permute.xlu0 %2383 }
 0x1c0   : > { %v10303_v25 = vsel %vm2468_vm1, 1.0, %v18377_v12  ;;  %v10304_v44 = vsel %vm2469_vm2, 1.0, %v18377_v12  ;;  %v10305_v63 = vsel %vm2470_vm3, 1.0, %v18377_v12  ;;  %v2915_v5 = vunpack.c.l.bf16 %v18520_v58 }
 0x1c1   : > { %v2916_v34 = vunpack.c.h.bf16 %v18520_v58  ;;  %v2917_v33 = vunpack.c.l.bf16 %v18521_v27  ;;  %v2918_v30 = vunpack.c.h.bf16 %v18521_v27  ;;  %vm2507_vm4 = vcmp.eq.s32.totalorder %v2399_v8, %v12081_v47  ;;  %v18523_v27 = vld [vmem:[#allocation27_spill] sm:$0xff] }
 0x1c2   : > { %vm2508_vm5 = vcmp.eq.s32.totalorder %v2399_v8, %v12083_v48  ;;  %vm2509_vm6 = vcmp.eq.s32.totalorder %v2399_v8, %v12085_v49  ;;  %v3171_v23 = vadd.f32 %v10302_v39, %v2915_v5  ;;  %vm2510_vm7 = vcmp.eq.s32.totalorder %v2399_v8, %v12091_v51  ;;  %v18526_v5 = vld [vmem:[#allocation31_spill] sm:$0xff] }
 0x1c3   : > { %v3172_v21 = vadd.f32 %v10303_v25, %v2916_v34  ;;  %v3173_v16 = vadd.f32 %v10304_v44, %v2917_v33  ;;  %v3174_v20 = vadd.f32 %v10305_v63, %v2918_v30  ;;  %v10342_v62 = vsel %vm2507_vm4, 1.0, %v18377_v12  ;;  %v18525_v44 = vld [vmem:[#allocation28_spill] sm:$0xff]  ;;  %v18527_v30 = vld [vmem:[#allocation37_spill] sm:$0xff] }
 0x1c4   : > { %v10343_v43 = vsel %vm2508_vm5, 1.0, %v18377_v12  ;;  %v10344_v9 = vsel %vm2509_vm6, 1.0, %v18377_v12  ;;  %v10345_v58 = vsel %vm2510_vm7, 1.0, %v18377_v12  ;;  %v2955_v13 = vunpack.c.l.bf16 %v18523_v27 }
 0x1c5   : > { %v13552_v41 = vpack.c.bf16 %v3172_v21, %v3171_v23  ;;  %v2956_v39 = vunpack.c.h.bf16 %v18523_v27  ;;  %v13557_v25 = vpack.c.bf16 %v3174_v20, %v3173_v16  ;;  %v2957_v8 = vunpack.c.l.bf16 %v18525_v44  ;;  %3426 = vperm.xlu2 %11376, %v18527_v30   ;;  %v2378_v20 = vpop.permute.xlu1 %2377 }
 0x1c6   : > { %v2958_v63 = vunpack.c.h.bf16 %v18525_v44  ;;  %vm2487_vm8 = vcmp.eq.s32.totalorder %v2384_v50, %v12081_v47  ;;  %3438 = vperm.xlu0 %11377, %v18526_v5   ;;  %v3211_v34 = vadd.f32 %v10342_v62, %v2955_v13  ;;  %vm2488_vm9 = vcmp.eq.s32.totalorder %v2384_v50, %v12083_v48  ;;  %v18530_v44 = vld [vmem:[#allocation24_spill] sm:$0xff] }
 0x1c7   : > { %18522 = vst [vmem:[#allocation58_spill] sm:$0xff] %v13552_v41  ;;  %v3212_v33 = vadd.f32 %v10343_v43, %v2956_v39  ;;  %vm2489_vm10 = vcmp.eq.s32.totalorder %v2384_v50, %v12085_v49  ;;  %v3213_v23 = vadd.f32 %v10344_v9, %v2957_v8  ;;  %vm2490_vm11 = vcmp.eq.s32.totalorder %v2384_v50, %v12091_v51  ;;  %v18531_v50 = vld [vmem:[#allocation25_spill] sm:$0xff] }
 0x1c8   : > { %18524 = vst [vmem:[#allocation59_spill] sm:$0xff] %v13557_v25  ;;  %v3214_v21 = vadd.f32 %v10345_v58, %v2958_v63  ;;  %v10322_v16 = vsel %vm2487_vm8, 1.0, %v18377_v12  ;;  %3432 = vperm.xlu1 %11378, %v13098_v57   ;;  %v10323_v13 = vsel %vm2488_vm9, 1.0, %v18377_v12  ;;  %v10324_v62 = vsel %vm2489_vm10, 1.0, %v18377_v12 }
 0x1c9   : > { %v13569_v27 = vpack.c.bf16 %v3212_v33, %v3211_v34  ;;  %v10325_v43 = vsel %vm2490_vm11, 1.0, %v18377_v12  ;;  %v2935_v9 = vunpack.c.l.bf16 %v18530_v44  ;;  %v2936_v58 = vunpack.c.h.bf16 %v18530_v44  ;;  %v2408_v33 = vpop.permute.xlu2 %2407 }
 0x1ca   : > { %v13574_v39 = vpack.c.bf16 %v3214_v21, %v3213_v23  ;;  %v2937_v8 = vunpack.c.l.bf16 %v18531_v50  ;;  %v2938_v63 = vunpack.c.h.bf16 %v18531_v50  ;;  %vm2479_vm12 = vcmp.eq.s32.totalorder %v2378_v20, %v12081_v47 }
 0x1cb   : > { %18528 = vst [vmem:[#allocation60_spill] sm:$0xff] %v13569_v27  ;;  %vm2480_vm13 = vcmp.eq.s32.totalorder %v2378_v20, %v12083_v48  ;;  %vm2481_vm14 = vcmp.eq.s32.totalorder %v2378_v20, %v12085_v49  ;;  %v13583_v57 = vadd.f32 %v10322_v16, %v2935_v9  ;;  %v13585_v5 = vadd.f32 %v10323_v13, %v2936_v58  ;;  %v18534_v9 = vld [vmem:[#allocation20_spill] sm:$0xff] }
 0x1cc   : > { %18529 = vst [vmem:[#allocation61_spill] sm:$0xff] %v13574_v39  ;;  %v13587_v34 = vadd.f32 %v10324_v62, %v2937_v8  ;;  %vm2482_vm15 = vcmp.eq.s32.totalorder %v2378_v20, %v12091_v51  ;;  %v13590_v30 = vadd.f32 %v10325_v43, %v2938_v63  ;;  %v10314_v23 = vsel %vm2479_vm12, 1.0, %v18377_v12  ;;  %v18533_v39 = vld [vmem:[#allocation19_spill] sm:$0xff]  ;;  %v2393_v63 = vpop.permute.xlu0 %2392 }
 0x1cd   : > { %v10315_v21 = vsel %vm2480_vm13, 1.0, %v18377_v12  ;;  %v10316_v44 = vsel %vm2481_vm14, 1.0, %v18377_v12  ;;  %v10317_v50 = vsel %vm2482_vm15, 1.0, %v18377_v12  ;;  %v2927_v16 = vunpack.c.l.bf16 %v18533_v39  ;;  %3435 = vperm.xlu2 %11376, %v13107_v38   ;;  %v18536_v38 = vld [vmem:[#allocation21_spill] sm:$0xff] }
 0x1ce   : > { %18532 = vst [vmem:[#allocation75_spill] sm:$0xff] %v13590_v30  ;;  %v2928_v13 = vunpack.c.h.bf16 %v18533_v39  ;;  %v2929_v62 = vunpack.c.l.bf16 %v18534_v9  ;;  %v2930_v58 = vunpack.c.h.bf16 %v18534_v9  ;;  %vm2519_vm0 = vcmp.eq.s32.totalorder %v2408_v33, %v12081_v47 }
 0x1cf   : > { %vm2520_vm1 = vcmp.eq.s32.totalorder %v2408_v33, %v12083_v48  ;;  %vm2521_vm2 = vcmp.eq.s32.totalorder %v2408_v33, %v12085_v49  ;;  %v3183_v20 = vadd.f32 %v10314_v23, %v2927_v16  ;;  %vm2522_vm3 = vcmp.eq.s32.totalorder %v2408_v33, %v12091_v51  ;;  %v18538_v33 = vld [vmem:[#allocation22_spill] sm:$0xff] }
 0x1d0   : > { %v3184_v43 = vadd.f32 %v10315_v21, %v2928_v13  ;;  %v3185_v8 = vadd.f32 %v10316_v44, %v2929_v62  ;;  %3441 = vperm.xlu1 %11378, %v13143_v53   ;;  %v3186_v39 = vadd.f32 %v10317_v50, %v2930_v58  ;;  %v10354_v27 = vsel %vm2519_vm0, 1.0, %v18377_v12 }
 0x1d1   : > { %v10355_v9 = vsel %vm2520_vm1, 1.0, %v18377_v12  ;;  %v10356_v25 = vsel %vm2521_vm2, 1.0, %v18377_v12  ;;  %v10357_v30 = vsel %vm2522_vm3, 1.0, %v18377_v12  ;;  %v2967_v23 = vunpack.c.l.bf16 %v18536_v38 }
 0x1d2   : > { %v13609_v41 = vpack.c.bf16 %v3184_v43, %v3183_v20  ;;  %v2968_v21 = vunpack.c.h.bf16 %v18536_v38  ;;  %v13614_v44 = vpack.c.bf16 %v3186_v39, %v3185_v8  ;;  %v2969_v16 = vunpack.c.l.bf16 %v18538_v33  ;;  %v2387_v43 = vpop.permute.xlu1 %2386 }
 0x1d3   : > { %v2970_v53 = vunpack.c.h.bf16 %v18538_v33  ;;  %vm2499_vm4 = vcmp.eq.s32.totalorder %v2393_v63, %v12081_v47  ;;  %v3223_v50 = vadd.f32 %v10354_v27, %v2967_v23  ;;  %vm2500_vm5 = vcmp.eq.s32.totalorder %v2393_v63, %v12083_v48  ;;  %v18541_v23 = vld [vmem:[#allocation32_spill] sm:$0xff] }
 0x1d4   : > { %18535 = vst [vmem:[#allocation76_spill] sm:$0xff] %v13609_v41  ;;  %v3224_v13 = vadd.f32 %v10355_v9, %v2968_v21  ;;  %vm2501_vm6 = vcmp.eq.s32.totalorder %v2393_v63, %v12085_v49  ;;  %v3225_v62 = vadd.f32 %v10356_v25, %v2969_v16  ;;  %vm2502_vm7 = vcmp.eq.s32.totalorder %v2393_v63, %v12091_v51 }
 0x1d5   : > { %18537 = vst [vmem:[#allocation77_spill] sm:$0xff] %v13614_v44  ;;  %v3226_v58 = vadd.f32 %v10357_v30, %v2970_v53  ;;  %v10334_v20 = vsel %vm2499_vm4, 1.0, %v18377_v12  ;;  %v10335_v39 = vsel %vm2500_vm5, 1.0, %v18377_v12  ;;  %v10336_v38 = vsel %vm2501_vm6, 1.0, %v18377_v12  ;;  %v18542_v30 = vld [vmem:[#allocation33_spill] sm:$0xff] }
 0x1d6   : > { %v13623_v8 = vpack.c.bf16 %v3224_v13, %v3223_v50  ;;  %v10337_v27 = vsel %vm2502_vm7, 1.0, %v18377_v12  ;;  %v2947_v21 = vunpack.c.l.bf16 %v18541_v23  ;;  %v2948_v25 = vunpack.c.h.bf16 %v18541_v23  ;;  %v2417_v13 = vpop.permute.xlu2 %2416 }
 0x1d7   : > { %v13628_v9 = vpack.c.bf16 %v3226_v58, %v3225_v62  ;;  %v2949_v33 = vunpack.c.l.bf16 %v18542_v30  ;;  %v2950_v63 = vunpack.c.h.bf16 %v18542_v30  ;;  %vm2491_vm8 = vcmp.eq.s32.totalorder %v2387_v43, %v12081_v47 }
 0x1d8   : > { %18539 = vst [vmem:[#allocation78_spill] sm:$0xff] %v13623_v8  ;;  %vm2492_vm9 = vcmp.eq.s32.totalorder %v2387_v43, %v12083_v48  ;;  %vm2493_vm10 = vcmp.eq.s32.totalorder %v2387_v43, %v12085_v49  ;;  %v13637_v16 = vadd.f32 %v10334_v20, %v2947_v21  ;;  %v13639_v53 = vadd.f32 %v10335_v39, %v2948_v25  ;;  %v18547_v8 = vld [vmem:[#allocation34_spill] sm:$0xff]  ;;  %v18548_v21 = vld [vmem:[#allocation35_spill] sm:$0xff] }
 0x1d9   : > { %18540 = vst [vmem:[#allocation71_spill] sm:$0xff] %v13628_v9  ;;  %v13641_v50 = vadd.f32 %v10336_v38, %v2949_v33  ;;  %vm2494_vm11 = vcmp.eq.s32.totalorder %v2387_v43, %v12091_v51  ;;  %v13644_v62 = vadd.f32 %v10337_v27, %v2950_v63  ;;  %v10326_v58 = vsel %vm2491_vm8, 1.0, %v18377_v12  ;;  %v2402_v63 = vpop.permute.xlu0 %2401 }
 0x1da   : > { %18543 = vst [vmem:[#allocation72_spill] sm:$0xff] %v13637_v16  ;;  %v10327_v23 = vsel %vm2492_vm9, 1.0, %v18377_v12  ;;  %v10328_v30 = vsel %vm2493_vm10, 1.0, %v18377_v12  ;;  %v10329_v9 = vsel %vm2494_vm11, 1.0, %v18377_v12  ;;  %v2939_v20 = vunpack.c.l.bf16 %v18547_v8 }
 0x1db   : > { %18544 = vst [vmem:[#allocation73_spill] sm:$0xff] %v13639_v53  ;;  %v2940_v39 = vunpack.c.h.bf16 %v18547_v8  ;;  %v2941_v38 = vunpack.c.l.bf16 %v18548_v21  ;;  %v2942_v25 = vunpack.c.h.bf16 %v18548_v21  ;;  %vm2531_vm12 = vcmp.eq.s32.totalorder %v2417_v13, %v12081_v47  ;;  %v18550_v53 = vld [vmem:[#allocation36_spill] sm:$0xff] }
 0x1dc   : > { %18545 = vst [vmem:[#allocation74_spill] sm:$0xff] %v13641_v50  ;;  %vm2532_vm13 = vcmp.eq.s32.totalorder %v2417_v13, %v12083_v48  ;;  %vm2533_vm14 = vcmp.eq.s32.totalorder %v2417_v13, %v12085_v49  ;;  %v3195_v43 = vadd.f32 %v10326_v58, %v2939_v20  ;;  %vm2534_vm15 = vcmp.eq.s32.totalorder %v2417_v13, %v12091_v51 }
 0x1dd   : > { %18546 = vst [vmem:[#allocation67_spill] sm:$0xff] %v13644_v62  ;;  %v3196_v27 = vadd.f32 %v10327_v23, %v2940_v39  ;;  %v3197_v33 = vadd.f32 %v10328_v30, %v2941_v38  ;;  %v3198_v44 = vadd.f32 %v10329_v9, %v2942_v25  ;;  %v10366_v41 = vsel %vm2531_vm12, 1.0, %v18377_v12  ;;  %v18552_v30 = vld [vmem:[#allocation30_spill] sm:$0xff] }
 0x1de   : > { %v10367_v8 = vsel %vm2532_vm13, 1.0, %v18377_v12  ;;  %v10368_v62 = vsel %vm2533_vm14, 1.0, %v18377_v12  ;;  %v10369_v50 = vsel %vm2534_vm15, 1.0, %v18377_v12  ;;  %v2979_v16 = vunpack.c.l.bf16 %v18550_v53 }
 0x1df   : > { %v13661_v21 = vpack.c.bf16 %v3196_v27, %v3195_v43  ;;  %v2980_v58 = vunpack.c.h.bf16 %v18550_v53  ;;  %v13666_v23 = vpack.c.bf16 %v3198_v44, %v3197_v33  ;;  %v2981_v13 = vunpack.c.l.bf16 %v18552_v30  ;;  %v2396_v44 = vpop.permute.xlu1 %2395 }
 0x1e0   : > { %v2982_v9 = vunpack.c.h.bf16 %v18552_v30  ;;  %vm2511_vm0 = vcmp.eq.s32.totalorder %v2402_v63, %v12081_v47  ;;  %v3235_v20 = vadd.f32 %v10366_v41, %v2979_v16  ;;  %vm2512_vm1 = vcmp.eq.s32.totalorder %v2402_v63, %v12083_v48 }
 0x1e1   : > { %18549 = vst [vmem:[#allocation68_spill] sm:$0xff] %v13661_v21  ;;  %v3236_v39 = vadd.f32 %v10367_v8, %v2980_v58  ;;  %vm2513_vm2 = vcmp.eq.s32.totalorder %v2402_v63, %v12085_v49  ;;  %v3237_v38 = vadd.f32 %v10368_v62, %v2981_v13  ;;  %vm2514_vm3 = vcmp.eq.s32.totalorder %v2402_v63, %v12091_v51  ;;  %v18555_v8 = vld [vmem:[#allocation45_spill] sm:$0xff] }
 0x1e2   : > { %18551 = vst [vmem:[#allocation69_spill] sm:$0xff] %v13666_v23  ;;  %v3238_v25 = vadd.f32 %v10369_v50, %v2982_v9  ;;  %v10346_v53 = vsel %vm2511_vm0, 1.0, %v18377_v12  ;;  %v10347_v27 = vsel %vm2512_vm1, 1.0, %v18377_v12  ;;  %v10348_v33 = vsel %vm2513_vm2, 1.0, %v18377_v12  ;;  %v18556_v50 = vld [vmem:[#allocation38_spill] sm:$0xff] }
 0x1e3   : > { %v13675_v43 = vpack.c.bf16 %v3236_v39, %v3235_v20  ;;  %v10349_v41 = vsel %vm2514_vm3, 1.0, %v18377_v12  ;;  %v2959_v58 = vunpack.c.l.bf16 %v18555_v8  ;;  %v2960_v62 = vunpack.c.h.bf16 %v18555_v8  ;;  %v2426_v39 = vpop.permute.xlu2 %2425 }
 0x1e4   : > { %v13680_v16 = vpack.c.bf16 %v3238_v25, %v3237_v38  ;;  %v2961_v30 = vunpack.c.l.bf16 %v18556_v50  ;;  %v2962_v63 = vunpack.c.h.bf16 %v18556_v50  ;;  %vm2503_vm4 = vcmp.eq.s32.totalorder %v2396_v44, %v12081_v47 }
 0x1e5   : > { %18553 = vst [vmem:[#allocation70_spill] sm:$0xff] %v13675_v43  ;;  %vm2504_vm5 = vcmp.eq.s32.totalorder %v2396_v44, %v12083_v48  ;;  %vm2505_vm6 = vcmp.eq.s32.totalorder %v2396_v44, %v12085_v49  ;;  %v13689_v13 = vadd.f32 %v10346_v53, %v2959_v58  ;;  %v13691_v9 = vadd.f32 %v10347_v27, %v2960_v62  ;;  %v18561_v43 = vld [vmem:[#allocation46_spill] sm:$0xff] }
 0x1e6   : > { %18554 = vst [vmem:[#allocation79_spill] sm:$0xff] %v13680_v16  ;;  %v13693_v20 = vadd.f32 %v10348_v33, %v2961_v30  ;;  %vm2506_vm7 = vcmp.eq.s32.totalorder %v2396_v44, %v12091_v51  ;;  %v13696_v38 = vadd.f32 %v10349_v41, %v2962_v63  ;;  %v10338_v25 = vsel %vm2503_vm4, 1.0, %v18377_v12  ;;  %v18562_v58 = vld [vmem:[#allocation42_spill] sm:$0xff]  ;;  %v2411_v63 = vpop.permute.xlu0 %2410 }
 0x1e7   : > { %18557 = vst [vmem:[#allocation80_spill] sm:$0xff] %v13689_v13  ;;  %v10339_v8 = vsel %vm2504_vm5, 1.0, %v18377_v12  ;;  %v10340_v50 = vsel %vm2505_vm6, 1.0, %v18377_v12  ;;  %v10341_v16 = vsel %vm2506_vm7, 1.0, %v18377_v12  ;;  %v2951_v53 = vunpack.c.l.bf16 %v18561_v43 }
 0x1e8   : > { %18558 = vst [vmem:[#allocation81_spill] sm:$0xff] %v13691_v9  ;;  %v2952_v27 = vunpack.c.h.bf16 %v18561_v43  ;;  %v2953_v33 = vunpack.c.l.bf16 %v18562_v58  ;;  %v2954_v62 = vunpack.c.h.bf16 %v18562_v58  ;;  %vm2543_vm8 = vcmp.eq.s32.totalorder %v2426_v39, %v12081_v47  ;;  %v18564_v9 = vld [vmem:[#allocation43_spill] sm:$0xff] }
 0x1e9   : > { %18559 = vst [vmem:[#allocation82_spill] sm:$0xff] %v13693_v20  ;;  %vm2544_vm9 = vcmp.eq.s32.totalorder %v2426_v39, %v12083_v48  ;;  %vm2545_vm10 = vcmp.eq.s32.totalorder %v2426_v39, %v12085_v49  ;;  %v3207_v44 = vadd.f32 %v10338_v25, %v2951_v53  ;;  %vm2546_vm11 = vcmp.eq.s32.totalorder %v2426_v39, %v12091_v51 }
 0x1ea   : > { %18560 = vst [vmem:[#allocation87_spill] sm:$0xff] %v13696_v38  ;;  %v3208_v41 = vadd.f32 %v10339_v8, %v2952_v27  ;;  %v3209_v30 = vadd.f32 %v10340_v50, %v2953_v33  ;;  %v3210_v23 = vadd.f32 %v10341_v16, %v2954_v62  ;;  %v10378_v21 = vsel %vm2543_vm8, 1.0, %v18377_v12  ;;  %v18566_v50 = vld [vmem:[#allocation44_spill] sm:$0xff] }
 0x1eb   : > { %v10379_v43 = vsel %vm2544_vm9, 1.0, %v18377_v12  ;;  %v10380_v38 = vsel %vm2545_vm10, 1.0, %v18377_v12  ;;  %v10381_v20 = vsel %vm2546_vm11, 1.0, %v18377_v12  ;;  %v2991_v13 = vunpack.c.l.bf16 %v18564_v9 }
 0x1ec   : > { %v13713_v58 = vpack.c.bf16 %v3208_v41, %v3207_v44  ;;  %v2992_v25 = vunpack.c.h.bf16 %v18564_v9  ;;  %v13718_v8 = vpack.c.bf16 %v3210_v23, %v3209_v30  ;;  %v2993_v39 = vunpack.c.l.bf16 %v18566_v50  ;;  %v2405_v23 = vpop.permute.xlu1 %2404 }
 0x1ed   : > { %v2994_v16 = vunpack.c.h.bf16 %v18566_v50  ;;  %vm2523_vm12 = vcmp.eq.s32.totalorder %v2411_v63, %v12081_v47  ;;  %v3247_v53 = vadd.f32 %v10378_v21, %v2991_v13  ;;  %vm2524_vm13 = vcmp.eq.s32.totalorder %v2411_v63, %v12083_v48 }
 0x1ee   : > { %18563 = vst [vmem:[#allocation88_spill] sm:$0xff] %v13713_v58  ;;  %v3248_v27 = vadd.f32 %v10379_v43, %v2992_v25  ;;  %vm2525_vm14 = vcmp.eq.s32.totalorder %v2411_v63, %v12085_v49  ;;  %v3249_v33 = vadd.f32 %v10380_v38, %v2993_v39  ;;  %vm2526_vm15 = vcmp.eq.s32.totalorder %v2411_v63, %v12091_v51  ;;  %v2420_v58 = vpop.permute.xlu0 %2419 }
 0x1ef   : > { %18565 = vst [vmem:[#allocation89_spill] sm:$0xff] %v13718_v8  ;;  %v3250_v62 = vadd.f32 %v10381_v20, %v2994_v16  ;;  %v10358_v9 = vsel %vm2523_vm12, 1.0, %v18377_v12  ;;  %v10359_v41 = vsel %vm2524_vm13, 1.0, %v18377_v12  ;;  %v10360_v30 = vsel %vm2525_vm14, 1.0, %v18377_v12  ;;  %v18569_v20 = vld [vmem:[#allocation56_spill] sm:$0xff] }
 0x1f0   : > { %v13727_v44 = vpack.c.bf16 %v3248_v27, %v3247_v53  ;;  %v10361_v21 = vsel %vm2526_vm15, 1.0, %v18377_v12  ;;  %v2971_v43 = vunpack.c.l.bf16 %v13185_v28  ;;  %v2972_v38 = vunpack.c.h.bf16 %v13185_v28  ;;  %v2435_v28 = vpop.permute.xlu2 %2434 }
 0x1f1   : > { %v13732_v13 = vpack.c.bf16 %v3250_v62, %v3249_v33  ;;  %v2973_v63 = vunpack.c.l.bf16 %v18569_v20  ;;  %v2974_v25 = vunpack.c.h.bf16 %v18569_v20  ;;  %vm2515_vm0 = vcmp.eq.s32.totalorder %v2405_v23, %v12081_v47 }
 0x1f2   : > { %18567 = vst [vmem:[#allocation90_spill] sm:$0xff] %v13727_v44  ;;  %vm2516_vm1 = vcmp.eq.s32.totalorder %v2405_v23, %v12083_v48  ;;  %v13740_v50 = vadd.f32 %v10358_v9, %v2971_v43  ;;  %v13742_v39 = vadd.f32 %v10359_v41, %v2972_v38  ;;  %v11783_v53 = vmov 4   ;;  %v11471_v9 = vld [vmem:[%s11917_s4 + $0x8] sm:$0xff]  ;;  %v18571_v43 = vld [vmem:[#allocation39_spill] sm:$0xff] }
 0x1f3   : > { %18568 = vst [vmem:[#allocation83_spill] sm:$0xff] %v13732_v13  ;;  %v13744_v16 = vadd.f32 %v10360_v30, %v2973_v63  ;;  %11380 = vset.pattern.permute.xlu0 %v11783_v53  ;;  %vm2517_vm2 = vcmp.eq.s32.totalorder %v2405_v23, %v12085_v49  ;;  %v13747_v27 = vadd.f32 %v10361_v21, %v2974_v25  ;;  %v10350_v33 = vsel %vm2515_vm0, 1.0, %v18377_v12  ;;  %v11472_v21 = vld [vmem:[%s11917_s4] sm:$0xff] }
 0x1f4   : > { %vm2518_vm3 = vcmp.eq.s32.totalorder %v2405_v23, %v12091_v51  ;;  %v10351_v62 = vsel %vm2516_vm1, 1.0, %v18377_v12  ;;  %4343 = vperm.xlu0 %11380, %v11471_v9   ;;  %11379 = vset.pattern.permute.xlu2 %v11783_v53  ;;  %v10352_v41 = vsel %vm2517_vm2, 1.0, %v18377_v12  ;;  %v2963_v38 = vunpack.c.l.bf16 %v18571_v43  ;;  %v18572_v23 = vld [vmem:[#allocation40_spill] sm:$0xff]  ;;  %v11473_v9 = vld [vmem:[%s11917_s4 + $0x10] sm:$0xff] }
 0x1f5   : > { %18570 = vst [vmem:[#allocation84_spill] sm:$0xff] %v13747_v27  ;;  %v10353_v30 = vsel %vm2518_vm3, 1.0, %v18377_v12  ;;  %v2964_v20 = vunpack.c.h.bf16 %v18571_v43  ;;  %4340 = vperm.xlu2 %11379, %v11472_v21   ;;  %11381 = vset.pattern.permute.xlu1 %v11783_v53  ;;  %v2965_v63 = vunpack.c.l.bf16 %v18572_v23  ;;  %v2966_v25 = vunpack.c.h.bf16 %v18572_v23 }
 0x1f6   : > { %vm2555_vm4 = vcmp.eq.s32.totalorder %v2435_v28, %v12081_v47  ;;  %vm2556_vm5 = vcmp.eq.s32.totalorder %v2435_v28, %v12083_v48  ;;  %4346 = vperm.xlu1 %11381, %v11473_v9   ;;  %v3219_v13 = vadd.f32 %v10350_v33, %v2963_v38  ;;  %vm2557_vm6 = vcmp.eq.s32.totalorder %v2435_v28, %v12085_v49  ;;  %v18574_v33 = vld [vmem:[#allocation41_spill] sm:$0xff] }
 0x1f7   : > { %v3220_v44 = vadd.f32 %v10351_v62, %v2964_v20  ;;  %vm2558_vm7 = vcmp.eq.s32.totalorder %v2435_v28, %v12091_v51  ;;  %v3221_v43 = vadd.f32 %v10352_v41, %v2965_v63  ;;  %v3222_v8 = vadd.f32 %v10353_v30, %v2966_v25  ;;  %v18576_v41 = vld [vmem:[#allocation55_spill] sm:$0xff] }
 0x1f8   : > { %v10390_v53 = vsel %vm2555_vm4, 1.0, %v18377_v12  ;;  %v10391_v21 = vsel %vm2556_vm5, 1.0, %v18377_v12  ;;  %v10392_v27 = vsel %vm2557_vm6, 1.0, %v18377_v12  ;;  %v10393_v9 = vsel %vm2558_vm7, 1.0, %v18377_v12 }
 0x1f9   : > { %v13767_v23 = vpack.c.bf16 %v3220_v44, %v3219_v13  ;;  %v3003_v62 = vunpack.c.l.bf16 %v18574_v33  ;;  %v13772_v38 = vpack.c.bf16 %v3222_v8, %v3221_v43  ;;  %v3004_v28 = vunpack.c.h.bf16 %v18574_v33  ;;  %v2414_v33 = vpop.permute.xlu1 %2413 }
 0x1fa   : > { %v3005_v30 = vunpack.c.l.bf16 %v18576_v41  ;;  %v3006_v20 = vunpack.c.h.bf16 %v18576_v41  ;;  %v2333_v44 = vpack.c.bf16 %v13232_v36, %v13229_v22  ;;  %v2334_v13 = vpack.c.bf16 %v13239_v19, %v13236_v24  ;;  %v11475_v24 = vld [vmem:[%s11917_s4 + $0x18] sm:$0xff] }
 0x1fb   : > { %18573 = vst [vmem:[#allocation85_spill] sm:$0xff] %v13767_v23  ;;  %v13777_v63 = vadd.f32 %v10390_v53, %v3003_v62  ;;  %vm2535_vm8 = vcmp.eq.s32.totalorder %v2420_v58, %v12081_v47  ;;  %v13784_v25 = vadd.f32 %v10391_v21, %v3004_v28  ;;  %vm2536_vm9 = vcmp.eq.s32.totalorder %v2420_v58, %v12083_v48  ;;  %v11474_v53 = vld [vmem:[%s11917_s4 + $0x30] sm:$0xff]  ;;  %v11476_v62 = vld [vmem:[%s11917_s4 + $0x20] sm:$0xff] }
 0x1fc   : > { %18575 = vst [vmem:[#allocation86_spill] sm:$0xff] %v13772_v38  ;;  %v13786_v8 = vadd.f32 %v10392_v27, %v3005_v30  ;;  %v13788_v43 = vadd.f32 %v10393_v9, %v3006_v20  ;;  %4358 = vperm.xlu0 %11380, %v11474_v53   ;;  %vm2537_vm10 = vcmp.eq.s32.totalorder %v2420_v58, %v12085_v49  ;;  %v10370_v22 = vsel %vm2535_vm8, 1.0, %v18377_v12  ;;  %v18587_v38 = vld [vmem:[#allocation48_spill] sm:$0xff]  ;;  %v18588_v23 = vld [vmem:[#allocation49_spill] sm:$0xff] }
 0x1fd   : > { %18577 = vst [vmem:[#allocation91_spill] sm:$0xff] %v13777_v63  ;;  %vm2538_vm11 = vcmp.eq.s32.totalorder %v2420_v58, %v12091_v51  ;;  %v10371_v36 = vsel %vm2536_vm9, 1.0, %v18377_v12  ;;  %4349 = vperm.xlu2 %11379, %v11475_v24   ;;  %v10372_v19 = vsel %vm2537_vm10, 1.0, %v18377_v12  ;;  %v2983_v21 = vunpack.c.l.bf16 %v2333_v44 }
 0x1fe   : > { %18578 = vst [vmem:[#allocation92_spill] sm:$0xff] %v13784_v25  ;;  %v10373_v27 = vsel %vm2538_vm11, 1.0, %v18377_v12  ;;  %v2984_v9 = vunpack.c.h.bf16 %v2333_v44  ;;  %4352 = vperm.xlu1 %11381, %v11476_v62   ;;  %v2985_v28 = vunpack.c.l.bf16 %v2334_v13  ;;  %v2986_v41 = vunpack.c.h.bf16 %v2334_v13  ;;  %v2444_v62 = vpop.permute.xlu2 %2443 }
 0x1ff   : > { %18579 = vst [vmem:[#allocation93_spill] sm:$0xff] %v13786_v8  ;;  %vm2527_vm12 = vcmp.eq.s32.totalorder %v2414_v33, %v12081_v47  ;;  %vm2528_vm13 = vcmp.eq.s32.totalorder %v2414_v33, %v12083_v48  ;;  %v3239_v58 = vadd.f32 %v10370_v22, %v2983_v21  ;;  %vm2529_vm14 = vcmp.eq.s32.totalorder %v2414_v33, %v12085_v49 }
 0x200   : > { %18580 = vst [vmem:[#allocation94_spill] sm:$0xff] %v13788_v43  ;;  %v3240_v30 = vadd.f32 %v10371_v36, %v2984_v9  ;;  %vm2530_vm15 = vcmp.eq.s32.totalorder %v2414_v33, %v12091_v51  ;;  %v3241_v20 = vadd.f32 %v10372_v19, %v2985_v28  ;;  %v3242_v53 = vadd.f32 %v10373_v27, %v2986_v41  ;;  %v11477_v9 = vld [vmem:[%s11917_s4 + $0x48] sm:$0xff] }
 0x201   : > { %v10362_v24 = vsel %vm2527_vm12, 1.0, %v18377_v12  ;;  %v10363_v44 = vsel %vm2528_vm13, 1.0, %v18377_v12  ;;  %v10364_v13 = vsel %vm2529_vm14, 1.0, %v18377_v12  ;;  %v10365_v8 = vsel %vm2530_vm15, 1.0, %v18377_v12 }
 0x202   : > { %v13806_v43 = vpack.c.bf16 %v3240_v30, %v3239_v58  ;;  %v2975_v22 = vunpack.c.l.bf16 %v13202_v26  ;;  %v13811_v36 = vpack.c.bf16 %v3242_v53, %v3241_v20  ;;  %v2976_v33 = vunpack.c.h.bf16 %v13202_v26  ;;  %v2429_v26 = vpop.permute.xlu0 %2428  ;;  %v11478_v30 = vld [vmem:[%s11917_s4 + $0x28] sm:$0xff] }
 0x203   : > { %v2977_v19 = vunpack.c.l.bf16 %v13207_v59  ;;  %v2978_v27 = vunpack.c.h.bf16 %v13207_v59  ;;  %vm2567_vm0 = vcmp.eq.s32.totalorder %v2444_v62, %v12081_v47  ;;  %vm2568_vm1 = vcmp.eq.s32.totalorder %v2444_v62, %v12083_v48 }
 0x204   : > { %18581 = vst [vmem:[#allocation16_spill] sm:$0xff] %v13806_v43  ;;  %v3231_v21 = vadd.f32 %v10362_v24, %v2975_v22  ;;  %vm2569_vm2 = vcmp.eq.s32.totalorder %v2444_v62, %v12085_v49  ;;  %4367 = vperm.xlu0 %11380, %v11477_v9   ;;  %v3232_v28 = vadd.f32 %v10363_v44, %v2976_v33  ;;  %v10402_v59 = vsel %vm2567_vm0, 1.0, %v18377_v12  ;;  %v11479_v22 = vld [vmem:[%s11917_s4 + $0x38] sm:$0xff]  ;;  %v18584_v33 = vld [vmem:[#allocation51_spill] sm:$0xff] }
 0x205   : > { %18582 = vst [vmem:[#allocation15_spill] sm:$0xff] %v13811_v36  ;;  %v3233_v41 = vadd.f32 %v10364_v13, %v2977_v19  ;;  %v3234_v58 = vadd.f32 %v10365_v8, %v2978_v27  ;;  %vm2570_vm3 = vcmp.eq.s32.totalorder %v2444_v62, %v12091_v51  ;;  %4355 = vperm.xlu2 %11379, %v11478_v30   ;;  %v10403_v20 = vsel %vm2568_vm1, 1.0, %v18377_v12  ;;  %v18583_v8 = vld [vmem:[#allocation57_spill] sm:$0xff]  ;;  %v18585_v9 = vld [vmem:[#allocation54_spill] sm:$0xff]  ;;  %v18586_v30 = vld [vmem:[#allocation47_spill] sm:$0xff] }
 0x206   : > { %v10404_v53 = vsel %vm2569_vm2, 1.0, %v18377_v12  ;;  %v10405_v24 = vsel %vm2570_vm3, 1.0, %v18377_v12  ;;  %4361 = vperm.xlu1 %11381, %v11479_v22   ;;  %v13827_v25 = vpack.c.bf16 %v3232_v28, %v3231_v21  ;;  %v3015_v13 = vunpack.c.l.bf16 %v18583_v8 }
 0x207   : > { %v13829_v44 = vpack.c.bf16 %v3234_v58, %v3233_v41  ;;  %v3016_v62 = vunpack.c.h.bf16 %v18583_v8  ;;  %v3017_v19 = vunpack.c.l.bf16 %v18584_v33  ;;  %v3018_v27 = vunpack.c.h.bf16 %v18584_v33  ;;  %v2423_v58 = vpop.permute.xlu1 %2422 }
 0x208   : > { %v2339_v63 = vpack.c.bf16 %v18586_v30, %v18585_v9  ;;  %v2340_v36 = vpack.c.bf16 %v18588_v23, %v18587_v38  ;;  %v13839_v43 = vadd.f32 %v10402_v59, %v3015_v13  ;;  %vm2547_vm4 = vcmp.eq.s32.totalorder %v2429_v26, %v12081_v47  ;;  %v11480_v13 = vld [vmem:[%s11917_s4 + $0x60] sm:$0xff]  ;;  %v11482_v9 = vld [vmem:[%s11917_s4 + $0x50] sm:$0xff] }
 0x209   : > { %v13841_v21 = vadd.f32 %v10403_v20, %v3016_v62  ;;  %vm2548_vm5 = vcmp.eq.s32.totalorder %v2429_v26, %v12083_v48  ;;  %v13845_v28 = vadd.f32 %v10404_v53, %v3017_v19  ;;  %v13847_v41 = vadd.f32 %v10405_v24, %v3018_v27 }
 0x20a   : > { %vm2549_vm6 = vcmp.eq.s32.totalorder %v2429_v26, %v12085_v49  ;;  %vm2550_vm7 = vcmp.eq.s32.totalorder %v2429_v26, %v12091_v51  ;;  %v10382_v23 = vsel %vm2547_vm4, 1.0, %v18377_v12  ;;  %v10383_v38 = vsel %vm2548_vm5, 1.0, %v18377_v12  ;;  %v11481_v26 = vld [vmem:[%s11917_s4 + $0x40] sm:$0xff] }
 0x20b   : > { %18589 = vst [vmem:[#allocation29_spill] sm:$0xff] %v13845_v28  ;;  %v10384_v59 = vsel %vm2549_vm6, 1.0, %v18377_v12  ;;  %v10385_v20 = vsel %vm2550_vm7, 1.0, %v18377_v12  ;;  %v2995_v22 = vunpack.c.l.bf16 %v2339_v63  ;;  %v2996_v53 = vunpack.c.h.bf16 %v2339_v63 }
 0x20c   : > { %18590 = vst [vmem:[#allocation18_spill] sm:$0xff] %v13847_v41  ;;  %v2997_v8 = vunpack.c.l.bf16 %v2340_v36  ;;  %v2998_v24 = vunpack.c.h.bf16 %v2340_v36  ;;  %4376 = vperm.xlu0 %11380, %v11480_v13   ;;  %vm2539_vm8 = vcmp.eq.s32.totalorder %v2423_v58, %v12081_v47  ;;  %vm2540_vm9 = vcmp.eq.s32.totalorder %v2423_v58, %v12083_v48  ;;  %v2438_v41 = vpop.permute.xlu0 %2437 }
 0x20d   : > { %vm2541_vm10 = vcmp.eq.s32.totalorder %v2423_v58, %v12085_v49  ;;  %vm2542_vm11 = vcmp.eq.s32.totalorder %v2423_v58, %v12091_v51  ;;  %4364 = vperm.xlu2 %11379, %v11481_v26   ;;  %v3251_v62 = vadd.f32 %v10382_v23, %v2995_v22  ;;  %v3252_v33 = vadd.f32 %v10383_v38, %v2996_v53  ;;  %v18591_v26 = vld [vmem:[#allocation52_spill] sm:$0xff] }
 0x20e   : > { %v3253_v19 = vadd.f32 %v10384_v59, %v2997_v8  ;;  %v3254_v27 = vadd.f32 %v10385_v20, %v2998_v24  ;;  %4370 = vperm.xlu1 %11381, %v11482_v9   ;;  %v10374_v63 = vsel %vm2539_vm8, 1.0, %v18377_v12  ;;  %v10375_v36 = vsel %vm2540_vm9, 1.0, %v18377_v12  ;;  %v18592_v59 = vld [vmem:[#allocation53_spill] sm:$0xff] }
 0x20f   : > { %v10376_v30 = vsel %vm2541_vm10, 1.0, %v18377_v12  ;;  %v10377_v13 = vsel %vm2542_vm11, 1.0, %v18377_v12  ;;  %v13866_v28 = vpack.c.bf16 %v3252_v33, %v3251_v62  ;;  %v2987_v23 = vunpack.c.l.bf16 %v18591_v26 }
 0x210   : > { %v13868_v58 = vpack.c.bf16 %v3254_v27, %v3253_v19  ;;  %v2988_v38 = vunpack.c.h.bf16 %v18591_v26  ;;  %v2989_v20 = vunpack.c.l.bf16 %v18592_v59  ;;  %v2990_v22 = vunpack.c.h.bf16 %v18592_v59  ;;  %v3349_v27 = vpop.permute.xlu2 %3348  ;;  %v11484_v26 = vld [vmem:[%s11917_s4 + $0x58] sm:$0xff] }
 0x211   : > { %v2345_v53 = vpack.c.bf16 %v13331_v45, %v13328_v14  ;;  %v2346_v8 = vpack.c.bf16 %v13337_v55, %v13334_v37  ;;  %v3243_v24 = vadd.f32 %v10374_v63, %v2987_v23  ;;  %vm2559_vm12 = vcmp.eq.s32.totalorder %v2438_v41, %v12081_v47  ;;  %v11483_v55 = vld [vmem:[%s11917_s4 + $0x78] sm:$0xff] }
 0x212   : > { %v3244_v62 = vadd.f32 %v10375_v36, %v2988_v38  ;;  %vm2560_vm13 = vcmp.eq.s32.totalorder %v2438_v41, %v12083_v48  ;;  %v3245_v33 = vadd.f32 %v10376_v30, %v2989_v20  ;;  %v3246_v19 = vadd.f32 %v10377_v13, %v2990_v22  ;;  %v11485_v38 = vld [vmem:[%s11917_s4 + $0x68] sm:$0xff] }
 0x213   : > { %vm2561_vm14 = vcmp.eq.s32.totalorder %v2438_v41, %v12085_v49  ;;  %vm2562_vm15 = vcmp.eq.s32.totalorder %v2438_v41, %v12091_v51  ;;  %v10394_v14 = vsel %vm2559_vm12, 1.0, %v18377_v12  ;;  %v10395_v45 = vsel %vm2560_vm13, 1.0, %v18377_v12 }
 0x214   : > { %v13882_v9 = vpack.c.bf16 %v3244_v62, %v3243_v24  ;;  %v10396_v37 = vsel %vm2561_vm14, 1.0, %v18377_v12  ;;  %4385 = vperm.xlu0 %11380, %v11483_v55   ;;  %v13888_v63 = vpack.c.bf16 %v3246_v19, %v3245_v33  ;;  %v10397_v36 = vsel %vm2562_vm15, 1.0, %v18377_v12  ;;  %v2432_v33 = vpop.permute.xlu1 %2431 }
 0x215   : > { %v3007_v30 = vunpack.c.l.bf16 %v2345_v53  ;;  %v3008_v13 = vunpack.c.h.bf16 %v2345_v53  ;;  %4373 = vperm.xlu2 %11379, %v11484_v26   ;;  %v3009_v41 = vunpack.c.l.bf16 %v2346_v8  ;;  %v3010_v23 = vunpack.c.h.bf16 %v2346_v8 }
 0x216   : > { %vm3443_vm0 = vcmp.eq.s32.totalorder %v3349_v27, %v12081_v47  ;;  %vm3444_vm1 = vcmp.eq.s32.totalorder %v3349_v27, %v12083_v48  ;;  %4379 = vperm.xlu1 %11381, %v11485_v38   ;;  %vm3445_vm2 = vcmp.eq.s32.totalorder %v3349_v27, %v12085_v49  ;;  %vm3446_vm3 = vcmp.eq.s32.totalorder %v3349_v27, %v12091_v51 }
 0x217   : > { %v3263_v59 = vadd.f32 %v10394_v14, %v3007_v30  ;;  %v3264_v20 = vadd.f32 %v10395_v45, %v3008_v13  ;;  %v3265_v22 = vadd.f32 %v10396_v37, %v3009_v41  ;;  %v3266_v24 = vadd.f32 %v10397_v36, %v3010_v23 }
 0x218   : > { %v10414_v53 = vsel %vm3443_vm0, 1.0, %v18377_v12  ;;  %v10415_v62 = vsel %vm3444_vm1, 1.0, %v18377_v12  ;;  %v10416_v19 = vsel %vm3445_vm2, 1.0, %v18377_v12  ;;  %v10417_v55 = vsel %vm3446_vm3, 1.0, %v18377_v12 }
 0x219   : > { %v13899_v8 = vpack.c.bf16 %v3264_v20, %v3263_v59  ;;  %v3891_v14 = vunpack.c.l.bf16 %v13302_v56  ;;  %v13904_v45 = vpack.c.bf16 %v3266_v24, %v3265_v22  ;;  %v3892_v27 = vunpack.c.h.bf16 %v13302_v56  ;;  %v2447_v56 = vpop.permute.xlu0 %2446  ;;  %v11487_v22 = vld [vmem:[%s11917_s4 + $0x70] sm:$0xff] }
 0x21a   : > { %v3893_v37 = vunpack.c.l.bf16 %v13304_v29  ;;  %v3894_v36 = vunpack.c.h.bf16 %v13304_v29  ;;  %vm2551_vm4 = vcmp.eq.s32.totalorder %v2432_v33, %v12081_v47  ;;  %vm2552_vm5 = vcmp.eq.s32.totalorder %v2432_v33, %v12083_v48  ;;  %v11486_v29 = vld [vmem:[%s11917_s4 + $0x90] sm:$0xff] }
 0x21b   : > { %v13909_v30 = vadd.f32 %v10414_v53, %v3891_v14  ;;  %vm2553_vm6 = vcmp.eq.s32.totalorder %v2432_v33, %v12085_v49  ;;  %v13914_v13 = vadd.f32 %v10415_v62, %v3892_v27  ;;  %vm2554_vm7 = vcmp.eq.s32.totalorder %v2432_v33, %v12091_v51  ;;  %v18593_v62 = vld [vmem:[#allocation50_spill] sm:$0xff] }
 0x21c   : > { %v13916_v26 = vadd.f32 %v10416_v19, %v3893_v37  ;;  %v13918_v41 = vadd.f32 %v10417_v55, %v3894_v36  ;;  %4394 = vperm.xlu0 %11380, %v11486_v29   ;;  %v10386_v23 = vsel %vm2551_vm4, 1.0, %v18377_v12  ;;  %v10387_v38 = vsel %vm2552_vm5, 1.0, %v18377_v12  ;;  %v11488_v55 = vld [vmem:[%s11917_s4 + $0x80] sm:$0xff]  ;;  %v3358_v37 = vpop.permute.xlu2 %3357 }
 0x21d   : > { %v10388_v59 = vsel %vm2553_vm6, 1.0, %v18377_v12  ;;  %v10389_v20 = vsel %vm2554_vm7, 1.0, %v18377_v12  ;;  %4382 = vperm.xlu2 %11379, %v11487_v22   ;;  %v2999_v24 = vunpack.c.l.bf16 %v13316_v35  ;;  %v3000_v53 = vunpack.c.h.bf16 %v13316_v35 }
 0x21e   : > { %v3001_v19 = vunpack.c.l.bf16 %v18593_v62  ;;  %v3002_v33 = vunpack.c.h.bf16 %v18593_v62  ;;  %4388 = vperm.xlu1 %11381, %v11488_v55   ;;  %v2351_v14 = vpack.c.bf16 %v13392_v54, %v13389_v52  ;;  %v2352_v27 = vpack.c.bf16 %v13398_v32, %v13395_v40 }
 0x21f   : > { %vm2571_vm8 = vcmp.eq.s32.totalorder %v2447_v56, %v12081_v47  ;;  %vm2572_vm9 = vcmp.eq.s32.totalorder %v2447_v56, %v12083_v48  ;;  %v13938_v36 = vadd.f32 %v10386_v23, %v2999_v24  ;;  %v13940_v35 = vadd.f32 %v10387_v38, %v3000_v53 }
 0x220   : > { %v13942_v29 = vadd.f32 %v10388_v59, %v3001_v19  ;;  %v13944_v22 = vadd.f32 %v10389_v20, %v3002_v33  ;;  %vm2573_vm10 = vcmp.eq.s32.totalorder %v2447_v56, %v12085_v49  ;;  %vm2574_vm11 = vcmp.eq.s32.totalorder %v2447_v56, %v12091_v51  ;;  %v11489_v56 = vld [vmem:[%s11917_s4 + $0xa8] sm:$0xff] }
 0x221   : > { %18594 = vst [vmem:[#allocation23_spill] sm:$0xff] %v13940_v35  ;;  %v10406_v52 = vsel %vm2571_vm8, 1.0, %v18377_v12  ;;  %v10407_v54 = vsel %vm2572_vm9, 1.0, %v18377_v12  ;;  %v10408_v40 = vsel %vm2573_vm10, 1.0, %v18377_v12  ;;  %v10409_v32 = vsel %vm2574_vm11, 1.0, %v18377_v12 }
 0x222   : > { %18595 = vst [vmem:[#allocation17_spill] sm:$0xff] %v13942_v29  ;;  %v3019_v23 = vunpack.c.l.bf16 %v2351_v14  ;;  %v3020_v38 = vunpack.c.h.bf16 %v2351_v14  ;;  %v3021_v59 = vunpack.c.l.bf16 %v2352_v27  ;;  %v3022_v24 = vunpack.c.h.bf16 %v2352_v27  ;;  %v2441_v14 = vpop.permute.xlu1 %2440  ;;  %v11490_v27 = vld [vmem:[%s11917_s4 + $0x88] sm:$0xff] }
 0x223   : > { %18596 = vst [vmem:[#allocation26_spill] sm:$0xff] %v13944_v22  ;;  %vm3455_vm12 = vcmp.eq.s32.totalorder %v3358_v37, %v12081_v47  ;;  %vm3456_vm13 = vcmp.eq.s32.totalorder %v3358_v37, %v12083_v48  ;;  %vm3457_vm14 = vcmp.eq.s32.totalorder %v3358_v37, %v12085_v49  ;;  %vm3458_vm15 = vcmp.eq.s32.totalorder %v3358_v37, %v12091_v51  ;;  %v11491_v37 = vld [vmem:[%s11917_s4 + $0x98] sm:$0xff] }
 0x224   : > { %v3275_v20 = vadd.f32 %v10406_v52, %v3019_v23  ;;  %v3276_v53 = vadd.f32 %v10407_v54, %v3020_v38  ;;  %4403 = vperm.xlu0 %11380, %v11489_v56   ;;  %v3277_v62 = vadd.f32 %v10408_v40, %v3021_v59  ;;  %v3278_v19 = vadd.f32 %v10409_v32, %v3022_v24  ;;  %v18597_v23 = vld [vmem:[#allocation66_spill] sm:$0xff] }
 0x225   : > { %v10426_v33 = vsel %vm3455_vm12, 1.0, %v18377_v12  ;;  %v10427_v55 = vsel %vm3456_vm13, 1.0, %v18377_v12  ;;  %4391 = vperm.xlu2 %11379, %v11490_v27   ;;  %v10428_v52 = vsel %vm3457_vm14, 1.0, %v18377_v12  ;;  %v10429_v54 = vsel %vm3458_vm15, 1.0, %v18377_v12  ;;  %v18598_v32 = vld [vmem:[#allocation62_spill] sm:$0xff] }
 0x226   : > { %v13960_v22 = vpack.c.bf16 %v3276_v53, %v3275_v20  ;;  %v3903_v38 = vunpack.c.l.bf16 %v18597_v23  ;;  %4397 = vperm.xlu1 %11381, %v11491_v37   ;;  %v13966_v56 = vpack.c.bf16 %v3278_v19, %v3277_v62  ;;  %v3904_v40 = vunpack.c.h.bf16 %v18597_v23  ;;  %v3364_v19 = vpop.permute.xlu2 %3363  ;;  %v18603_v37 = vld [vmem:[#allocation63_spill] sm:$0xff] }
 0x227   : > { %v3905_v59 = vunpack.c.l.bf16 %v18598_v32  ;;  %v3906_v24 = vunpack.c.h.bf16 %v18598_v32  ;;  %vm2563_vm0 = vcmp.eq.s32.totalorder %v2441_v14, %v12081_v47  ;;  %vm2564_vm1 = vcmp.eq.s32.totalorder %v2441_v14, %v12083_v48 }
 0x228   : > { %v13971_v29 = vadd.f32 %v10426_v33, %v3903_v38  ;;  %vm2565_vm2 = vcmp.eq.s32.totalorder %v2441_v14, %v12085_v49  ;;  %v13976_v20 = vadd.f32 %v10427_v55, %v3904_v40  ;;  %vm2566_vm3 = vcmp.eq.s32.totalorder %v2441_v14, %v12091_v51  ;;  %v18604_v40 = vld [vmem:[#allocation64_spill] sm:$0xff]  ;;  %v11492_v14 = vld [vmem:[%s11917_s4 + $0xc0] sm:$0xff] }
 0x229   : > { %v13978_v53 = vadd.f32 %v10428_v52, %v3905_v59  ;;  %v13980_v62 = vadd.f32 %v10429_v54, %v3906_v24  ;;  %v10398_v27 = vsel %vm2563_vm0, 1.0, %v18377_v12  ;;  %v10399_v33 = vsel %vm2564_vm1, 1.0, %v18377_v12 }
 0x22a   : > { %18599 = vst [vmem:[#allocation27_spill] sm:$0xff] %v13971_v29  ;;  %v10400_v23 = vsel %vm2565_vm2, 1.0, %v18377_v12  ;;  %v10401_v38 = vsel %vm2566_vm3, 1.0, %v18377_v12  ;;  %v3011_v55 = vunpack.c.l.bf16 %v18603_v37  ;;  %v3012_v52 = vunpack.c.h.bf16 %v18603_v37 }
 0x22b   : > { %18600 = vst [vmem:[#allocation28_spill] sm:$0xff] %v13976_v20  ;;  %v3013_v32 = vunpack.c.l.bf16 %v18604_v40  ;;  %v3014_v54 = vunpack.c.h.bf16 %v18604_v40  ;;  %vm3463_vm4 = vcmp.eq.s32.totalorder %v3364_v19, %v12081_v47  ;;  %vm3464_vm5 = vcmp.eq.s32.totalorder %v3364_v19, %v12083_v48  ;;  %v3352_v40 = vpop.permute.xlu0 %3351 }
 0x22c   : > { %18601 = vst [vmem:[#allocation31_spill] sm:$0xff] %v13978_v53  ;;  %vm3465_vm6 = vcmp.eq.s32.totalorder %v3364_v19, %v12085_v49  ;;  %vm3466_vm7 = vcmp.eq.s32.totalorder %v3364_v19, %v12091_v51  ;;  %4412 = vperm.xlu0 %11380, %v11492_v14   ;;  %v13996_v59 = vadd.f32 %v10398_v27, %v3011_v55  ;;  %v11493_v53 = vld [vmem:[%s11917_s4 + $0xa0] sm:$0xff]  ;;  %v10434_v20 = vsel %vm3463_vm4, 1.0, %v18377_v12  ;;  %v11494_v14 = vld [vmem:[%s11917_s4 + $0xb0] sm:$0xff] }
 0x22d   : > { %18602 = vst [vmem:[#allocation37_spill] sm:$0xff] %v13980_v62  ;;  %v13998_v24 = vadd.f32 %v10399_v33, %v3012_v52  ;;  %v14000_v37 = vadd.f32 %v10400_v23, %v3013_v32  ;;  %v14002_v62 = vadd.f32 %v10401_v38, %v3014_v54  ;;  %4400 = vperm.xlu2 %11379, %v11493_v53   ;;  %v10435_v29 = vsel %vm3464_vm5, 1.0, %v18377_v12 }
 0x22e   : > { %v10436_v35 = vsel %vm3465_vm6, 1.0, %v18377_v12  ;;  %v10437_v19 = vsel %vm3466_vm7, 1.0, %v18377_v12  ;;  %4406 = vperm.xlu1 %11381, %v11494_v14   ;;  %v3911_v27 = vunpack.c.l.bf16 %v13424_v2  ;;  %v3912_v33 = vunpack.c.h.bf16 %v13424_v2 }
 0x22f   : > { %v3913_v23 = vunpack.c.l.bf16 %v13426_v4  ;;  %v3914_v38 = vunpack.c.h.bf16 %v13426_v4  ;;  %v3285_v53 = vpack.c.bf16 %v13471_v60, %v13467_v15  ;;  %v3286_v55 = vpack.c.bf16 %v13477_v0, %v13473_v42  ;;  %v2450_v4 = vpop.permute.xlu1 %2449 }
 0x230   : > { %vm3447_vm8 = vcmp.eq.s32.totalorder %v3352_v40, %v12081_v47  ;;  %vm3448_vm9 = vcmp.eq.s32.totalorder %v3352_v40, %v12083_v48  ;;  %v14020_v52 = vadd.f32 %v10434_v20, %v3911_v27  ;;  %v14022_v32 = vadd.f32 %v10435_v29, %v3912_v33  ;;  %v11496_v33 = vld [vmem:[%s11917_s4 + $0xb8] sm:$0xff] }
 0x231   : > { %v14024_v2 = vadd.f32 %v10436_v35, %v3913_v23  ;;  %v14026_v54 = vadd.f32 %v10437_v19, %v3914_v38  ;;  %vm3449_vm10 = vcmp.eq.s32.totalorder %v3352_v40, %v12085_v49  ;;  %vm3450_vm11 = vcmp.eq.s32.totalorder %v3352_v40, %v12091_v51  ;;  %v11495_v19 = vld [vmem:[%s11917_s4 + $0xd8] sm:$0xff] }
 0x232   : > { %18605 = vst [vmem:[#allocation24_spill] sm:$0xff] %v14022_v32  ;;  %v10418_v15 = vsel %vm3447_vm8, 1.0, %v18377_v12  ;;  %v10419_v60 = vsel %vm3448_vm9, 1.0, %v18377_v12  ;;  %v10420_v42 = vsel %vm3449_vm10, 1.0, %v18377_v12  ;;  %v10421_v0 = vsel %vm3450_vm11, 1.0, %v18377_v12 }
 0x233   : > { %18606 = vst [vmem:[#allocation25_spill] sm:$0xff] %v14024_v2  ;;  %v3895_v29 = vunpack.c.l.bf16 %v3285_v53  ;;  %v3896_v20 = vunpack.c.h.bf16 %v3285_v53  ;;  %v3897_v35 = vunpack.c.l.bf16 %v3286_v55  ;;  %v3898_v14 = vunpack.c.h.bf16 %v3286_v55  ;;  %v11497_v2 = vld [vmem:[%s11917_s4 + $0xc8] sm:$0xff] }
 0x234   : > { %18607 = vst [vmem:[#allocation19_spill] sm:$0xff] %v14026_v54  ;;  %vm2575_vm12 = vcmp.eq.s32.totalorder %v2450_v4, %v12081_v47  ;;  %vm2576_vm13 = vcmp.eq.s32.totalorder %v2450_v4, %v12083_v48  ;;  %4421 = vperm.xlu0 %11380, %v11495_v19   ;;  %vm2577_vm14 = vcmp.eq.s32.totalorder %v2450_v4, %v12085_v49  ;;  %v3373_v54 = vpop.permute.xlu2 %3372 }
 0x235   : > { %v4151_v40 = vadd.f32 %v10418_v15, %v3895_v29  ;;  %v4152_v27 = vadd.f32 %v10419_v60, %v3896_v20  ;;  %vm2578_vm15 = vcmp.eq.s32.totalorder %v2450_v4, %v12091_v51  ;;  %4409 = vperm.xlu2 %11379, %v11496_v33   ;;  %v4153_v23 = vadd.f32 %v10420_v42, %v3897_v35 }
 0x236   : > { %v4154_v38 = vadd.f32 %v10421_v0, %v3898_v14  ;;  %v10410_v53 = vsel %vm2575_vm12, 1.0, %v18377_v12  ;;  %v10411_v55 = vsel %vm2576_vm13, 1.0, %v18377_v12  ;;  %4415 = vperm.xlu1 %11381, %v11497_v2   ;;  %v10412_v15 = vsel %vm2577_vm14, 1.0, %v18377_v12 }
 0x237   : > { %v14043_v32 = vpack.c.bf16 %v4152_v27, %v4151_v40  ;;  %v10413_v60 = vsel %vm2578_vm15, 1.0, %v18377_v12  ;;  %v3023_v29 = vunpack.c.l.bf16 %v13435_v10  ;;  %v3024_v42 = vunpack.c.h.bf16 %v13435_v10  ;;  %v3367_v10 = vpop.permute.xlu0 %3366 }
 0x238   : > { %v14048_v4 = vpack.c.bf16 %v4154_v38, %v4153_v23  ;;  %v3025_v0 = vunpack.c.l.bf16 %v13440_v61  ;;  %v3026_v20 = vunpack.c.h.bf16 %v13440_v61  ;;  %vm3475_vm0 = vcmp.eq.s32.totalorder %v3373_v54, %v12081_v47 }
 0x239   : > { %v14053_v35 = vadd.f32 %v10410_v53, %v3023_v29  ;;  %vm3476_vm1 = vcmp.eq.s32.totalorder %v3373_v54, %v12083_v48  ;;  %vm3477_vm2 = vcmp.eq.s32.totalorder %v3373_v54, %v12085_v49  ;;  %v14058_v2 = vadd.f32 %v10411_v55, %v3024_v42  ;;  %v11499_v29 = vld [vmem:[%s11917_s4 + $0xd0] sm:$0xff] }
 0x23a   : > { %v14060_v14 = vadd.f32 %v10412_v15, %v3025_v0  ;;  %v14062_v19 = vadd.f32 %v10413_v60, %v3026_v20  ;;  %vm3478_vm3 = vcmp.eq.s32.totalorder %v3373_v54, %v12091_v51  ;;  %v10446_v61 = vsel %vm3475_vm0, 1.0, %v18377_v12  ;;  %v11498_v54 = vld [vmem:[%s11917_s4 + $0xf0] sm:$0xff]  ;;  %v3355_v20 = vpop.permute.xlu1 %3354 }
 0x23b   : > { %v10447_v40 = vsel %vm3476_vm1, 1.0, %v18377_v12  ;;  %v10448_v27 = vsel %vm3477_vm2, 1.0, %v18377_v12  ;;  %v10449_v33 = vsel %vm3478_vm3, 1.0, %v18377_v12  ;;  %v3923_v23 = vunpack.c.l.bf16 %v13459_v3 }
 0x23c   : > { %v3924_v38 = vunpack.c.h.bf16 %v13459_v3  ;;  %v3925_v53 = vunpack.c.l.bf16 %v13461_v46  ;;  %v3926_v55 = vunpack.c.h.bf16 %v13461_v46  ;;  %4430 = vperm.xlu0 %11380, %v11498_v54   ;;  %v3295_v15 = vpack.c.bf16 %v13528_v31, %v13526_v6  ;;  %v11500_v54 = vld [vmem:[%s11917_s4 + $0xe0] sm:$0xff] }
 0x23d   : > { %v3296_v60 = vpack.c.bf16 %v13534_v7, %v13530_v18  ;;  %vm3467_vm4 = vcmp.eq.s32.totalorder %v3367_v10, %v12081_v47  ;;  %vm3468_vm5 = vcmp.eq.s32.totalorder %v3367_v10, %v12083_v48  ;;  %4418 = vperm.xlu2 %11379, %v11499_v29   ;;  %v14081_v3 = vadd.f32 %v10446_v61, %v3923_v23 }
 0x23e   : > { %v14083_v42 = vadd.f32 %v10447_v40, %v3924_v38  ;;  %v14085_v0 = vadd.f32 %v10448_v27, %v3925_v53  ;;  %v14087_v46 = vadd.f32 %v10449_v33, %v3926_v55  ;;  %4424 = vperm.xlu1 %11381, %v11500_v54   ;;  %vm3469_vm6 = vcmp.eq.s32.totalorder %v3367_v10, %v12085_v49 }
 0x23f   : > { %vm3470_vm7 = vcmp.eq.s32.totalorder %v3367_v10, %v12091_v51  ;;  %v10438_v6 = vsel %vm3467_vm4, 1.0, %v18377_v12  ;;  %v10439_v31 = vsel %vm3468_vm5, 1.0, %v18377_v12  ;;  %v10440_v18 = vsel %vm3469_vm6, 1.0, %v18377_v12 }
 0x240   : > { %v10441_v7 = vsel %vm3470_vm7, 1.0, %v18377_v12  ;;  %v3915_v61 = vunpack.c.l.bf16 %v3295_v15  ;;  %v3916_v40 = vunpack.c.h.bf16 %v3295_v15  ;;  %v3917_v27 = vunpack.c.l.bf16 %v3296_v60  ;;  %v3382_v15 = vpop.permute.xlu2 %3381 }
 0x241   : > { %v3918_v33 = vunpack.c.h.bf16 %v3296_v60  ;;  %vm3451_vm8 = vcmp.eq.s32.totalorder %v3355_v20, %v12081_v47  ;;  %vm3452_vm9 = vcmp.eq.s32.totalorder %v3355_v20, %v12083_v48  ;;  %vm3453_vm10 = vcmp.eq.s32.totalorder %v3355_v20, %v12085_v49 }
 0x242   : > { %v4171_v23 = vadd.f32 %v10438_v6, %v3915_v61  ;;  %v4172_v38 = vadd.f32 %v10439_v31, %v3916_v40  ;;  %vm3454_vm11 = vcmp.eq.s32.totalorder %v3355_v20, %v12091_v51  ;;  %v4173_v10 = vadd.f32 %v10440_v18, %v3917_v27  ;;  %v11501_v40 = vld [vmem:[%s11917_s4 + $0xe8] sm:$0xff] }
 0x243   : > { %v4174_v53 = vadd.f32 %v10441_v7, %v3918_v33  ;;  %v10422_v55 = vsel %vm3451_vm8, 1.0, %v18377_v12  ;;  %v10423_v29 = vsel %vm3452_vm9, 1.0, %v18377_v12  ;;  %v10424_v54 = vsel %vm3453_vm10, 1.0, %v18377_v12  ;;  %v11502_v33 = vld [vmem:[%s11917_s4 + $0xf8] sm:$0xff] }
 0x244   : > { %v14102_v60 = vpack.c.bf16 %v4172_v38, %v4171_v23  ;;  %v10425_v6 = vsel %vm3454_vm11, 1.0, %v18377_v12  ;;  %v3899_v31 = vunpack.c.l.bf16 %v13496_v17  ;;  %v3900_v20 = vunpack.c.h.bf16 %v13496_v17 }
 0x245   : > { %v14107_v61 = vpack.c.bf16 %v4174_v53, %v4173_v10  ;;  %v3901_v18 = vunpack.c.l.bf16 %v13502_v11  ;;  %v3902_v7 = vunpack.c.h.bf16 %v13502_v11  ;;  %4427 = vperm.xlu2 %11379, %v11501_v40   ;;  %vm3487_vm12 = vcmp.eq.s32.totalorder %v3382_v15, %v12081_v47  ;;  %v3376_v11 = vpop.permute.xlu0 %3375 }
 0x246   : > { %v14113_v27 = vadd.f32 %v10422_v55, %v3899_v31  ;;  %vm3488_vm13 = vcmp.eq.s32.totalorder %v3382_v15, %v12083_v48  ;;  %vm3489_vm14 = vcmp.eq.s32.totalorder %v3382_v15, %v12085_v49  ;;  %4433 = vperm.xlu1 %11381, %v11502_v33   ;;  %v14119_v23 = vadd.f32 %v10423_v29, %v3900_v20  ;;  %v18612_v20 = vld [vmem:[#allocation65_spill] sm:$0xff] }
 0x247   : > { %v14121_v38 = vadd.f32 %v10424_v54, %v3901_v18  ;;  %v14123_v17 = vadd.f32 %v10425_v6, %v3902_v7  ;;  %vm3490_vm15 = vcmp.eq.s32.totalorder %v3382_v15, %v12091_v51  ;;  %v10458_v10 = vsel %vm3487_vm12, 1.0, %v18377_v12  ;;  %v18613_v18 = vld [vmem:[#allocation75_spill] sm:$0xff] }
 0x248   : > { %18608 = vst [vmem:[#allocation20_spill] sm:$0xff] %v14113_v27  ;;  %v10459_v53 = vsel %vm3488_vm13, 1.0, %v18377_v12  ;;  %v10460_v55 = vsel %vm3489_vm14, 1.0, %v18377_v12  ;;  %v10461_v31 = vsel %vm3490_vm15, 1.0, %v18377_v12  ;;  %v3935_v40 = vunpack.c.l.bf16 %v13511_v1 }
 0x249   : > { %18609 = vst [vmem:[#allocation21_spill] sm:$0xff] %v14119_v23  ;;  %v3936_v29 = vunpack.c.h.bf16 %v13511_v1  ;;  %v3937_v54 = vunpack.c.l.bf16 %v18612_v20  ;;  %v3938_v6 = vunpack.c.h.bf16 %v18612_v20  ;;  %v3301_v15 = vpack.c.bf16 %v13585_v5, %v13583_v57  ;;  %v3361_v23 = vpop.permute.xlu1 %3360 }
 0x24a   : > { %18610 = vst [vmem:[#allocation22_spill] sm:$0xff] %v14121_v38  ;;  %v3302_v7 = vpack.c.bf16 %v18613_v18, %v13587_v34  ;;  %vm3479_vm0 = vcmp.eq.s32.totalorder %v3376_v11, %v12081_v47  ;;  %vm3480_vm1 = vcmp.eq.s32.totalorder %v3376_v11, %v12083_v48  ;;  %v14140_v33 = vadd.f32 %v10458_v10, %v3935_v40 }
 0x24b   : > { %18611 = vst [vmem:[#allocation32_spill] sm:$0xff] %v14123_v17  ;;  %v14142_v17 = vadd.f32 %v10459_v53, %v3936_v29  ;;  %v14144_v38 = vadd.f32 %v10460_v55, %v3937_v54  ;;  %v14146_v1 = vadd.f32 %v10461_v31, %v3938_v6  ;;  %vm3481_vm2 = vcmp.eq.s32.totalorder %v3376_v11, %v12085_v49 }
 0x24c   : > { %18614 = vst [vmem:[#allocation33_spill] sm:$0xff] %v14140_v33  ;;  %vm3482_vm3 = vcmp.eq.s32.totalorder %v3376_v11, %v12091_v51  ;;  %v10450_v57 = vsel %vm3479_vm0, 1.0, %v18377_v12  ;;  %v10451_v5 = vsel %vm3480_vm1, 1.0, %v18377_v12  ;;  %v10452_v34 = vsel %vm3481_vm2, 1.0, %v18377_v12 }
 0x24d   : > { %18615 = vst [vmem:[#allocation34_spill] sm:$0xff] %v14142_v17  ;;  %v10453_v10 = vsel %vm3482_vm3, 1.0, %v18377_v12  ;;  %v3927_v40 = vunpack.c.l.bf16 %v3301_v15  ;;  %v3928_v53 = vunpack.c.h.bf16 %v3301_v15  ;;  %v3929_v29 = vunpack.c.l.bf16 %v3302_v7  ;;  %v18618_v17 = vld [vmem:[#allocation58_spill] sm:$0xff] }
 0x24e   : > { %18616 = vst [vmem:[#allocation35_spill] sm:$0xff] %v14144_v38  ;;  %v3930_v55 = vunpack.c.h.bf16 %v3302_v7  ;;  %vm3459_vm4 = vcmp.eq.s32.totalorder %v3361_v23, %v12081_v47  ;;  %vm3460_vm5 = vcmp.eq.s32.totalorder %v3361_v23, %v12083_v48  ;;  %vm3461_vm6 = vcmp.eq.s32.totalorder %v3361_v23, %v12085_v49 }
 0x24f   : > { %18617 = vst [vmem:[#allocation36_spill] sm:$0xff] %v14146_v1  ;;  %v4183_v31 = vadd.f32 %v10450_v57, %v3927_v40  ;;  %v4184_v20 = vadd.f32 %v10451_v5, %v3928_v53  ;;  %vm3462_vm7 = vcmp.eq.s32.totalorder %v3361_v23, %v12091_v51  ;;  %v4185_v11 = vadd.f32 %v10452_v34, %v3929_v29  ;;  %v3391_v1 = vpop.permute.xlu2 %3390  ;;  %v18620_v23 = vld [vmem:[#allocation59_spill] sm:$0xff] }
 0x250   : > { %v4186_v54 = vadd.f32 %v10453_v10, %v3930_v55  ;;  %v10430_v6 = vsel %vm3459_vm4, 1.0, %v18377_v12  ;;  %v10431_v18 = vsel %vm3460_vm5, 1.0, %v18377_v12  ;;  %v10432_v7 = vsel %vm3461_vm6, 1.0, %v18377_v12 }
 0x251   : > { %v14160_v15 = vpack.c.bf16 %v4184_v20, %v4183_v31  ;;  %v10433_v38 = vsel %vm3462_vm7, 1.0, %v18377_v12  ;;  %v3907_v57 = vunpack.c.l.bf16 %v18618_v17  ;;  %v3908_v40 = vunpack.c.h.bf16 %v18618_v17  ;;  %v3385_v17 = vpop.permute.xlu0 %3384 }
 0x252   : > { %v14165_v5 = vpack.c.bf16 %v4186_v54, %v4185_v11  ;;  %v3909_v34 = vunpack.c.l.bf16 %v18620_v23  ;;  %v3910_v10 = vunpack.c.h.bf16 %v18620_v23  ;;  %vm3499_vm8 = vcmp.eq.s32.totalorder %v3391_v1, %v12081_v47 }
 0x253   : > { %v14170_v53 = vadd.f32 %v10430_v6, %v3907_v57  ;;  %vm3500_vm9 = vcmp.eq.s32.totalorder %v3391_v1, %v12083_v48  ;;  %vm3501_vm10 = vcmp.eq.s32.totalorder %v3391_v1, %v12085_v49  ;;  %v14175_v29 = vadd.f32 %v10431_v18, %v3908_v40  ;;  %v18625_v57 = vld [vmem:[#allocation60_spill] sm:$0xff]  ;;  %v18626_v40 = vld [vmem:[#allocation61_spill] sm:$0xff] }
 0x254   : > { %18619 = vst [vmem:[#allocation30_spill] sm:$0xff] %v14165_v5  ;;  %v14177_v55 = vadd.f32 %v10432_v7, %v3909_v34  ;;  %v14179_v31 = vadd.f32 %v10433_v38, %v3910_v10  ;;  %vm3502_vm11 = vcmp.eq.s32.totalorder %v3391_v1, %v12091_v51  ;;  %v10470_v20 = vsel %vm3499_vm8, 1.0, %v18377_v12  ;;  %v18627_v34 = vld [vmem:[#allocation72_spill] sm:$0xff]  ;;  %v18628_v10 = vld [vmem:[#allocation73_spill] sm:$0xff]  ;;  %v3370_v5 = vpop.permute.xlu1 %3369 }
 0x255   : > { %18621 = vst [vmem:[#allocation45_spill] sm:$0xff] %v14170_v53  ;;  %v10471_v11 = vsel %vm3500_vm9, 1.0, %v18377_v12  ;;  %v10472_v54 = vsel %vm3501_vm10, 1.0, %v18377_v12  ;;  %v10473_v6 = vsel %vm3502_vm11, 1.0, %v18377_v12  ;;  %v3947_v23 = vunpack.c.l.bf16 %v18625_v57 }
 0x256   : > { %18622 = vst [vmem:[#allocation38_spill] sm:$0xff] %v14175_v29  ;;  %v3948_v18 = vunpack.c.h.bf16 %v18625_v57  ;;  %v3949_v7 = vunpack.c.l.bf16 %v18626_v40  ;;  %v3950_v38 = vunpack.c.h.bf16 %v18626_v40  ;;  %v3307_v1 = vpack.c.bf16 %v18628_v10, %v18627_v34 }
 0x257   : > { %18623 = vst [vmem:[#allocation46_spill] sm:$0xff] %v14177_v55  ;;  %v18630_v55 = vld [vmem:[#allocation67_spill] sm:$0xff]  ;;  %vm3491_vm12 = vcmp.eq.s32.totalorder %v3385_v17, %v12081_v47  ;;  %vm3492_vm13 = vcmp.eq.s32.totalorder %v3385_v17, %v12083_v48  ;;  %v14196_v53 = vadd.f32 %v10470_v20, %v3947_v23  ;;  %vm3493_vm14 = vcmp.eq.s32.totalorder %v3385_v17, %v12085_v49 }
 0x258   : > { %18624 = vst [vmem:[#allocation42_spill] sm:$0xff] %v14179_v31  ;;  %v18629_v31 = vld [vmem:[#allocation74_spill] sm:$0xff]  ;;  %v14198_v33 = vadd.f32 %v10471_v11, %v3948_v18  ;;  %v14200_v27 = vadd.f32 %v10472_v54, %v3949_v7  ;;  %v14202_v57 = vadd.f32 %v10473_v6, %v3950_v38  ;;  %vm3494_vm15 = vcmp.eq.s32.totalorder %v3385_v17, %v12091_v51 }
 0x259   : > { %v3308_v29 = vpack.c.bf16 %v18630_v55, %v18629_v31  ;;  %18631 = vst [vmem:[#allocation43_spill] sm:$0xff] %v14196_v53  ;;  %v10462_v40 = vsel %vm3491_vm12, 1.0, %v18377_v12  ;;  %v10463_v55 = vsel %vm3492_vm13, 1.0, %v18377_v12  ;;  %v10464_v31 = vsel %vm3493_vm14, 1.0, %v18377_v12 }
 0x25a   : > { %18632 = vst [vmem:[#allocation44_spill] sm:$0xff] %v14198_v33  ;;  %v10465_v20 = vsel %vm3494_vm15, 1.0, %v18377_v12  ;;  %v3939_v23 = vunpack.c.l.bf16 %v3307_v1  ;;  %v3940_v11 = vunpack.c.h.bf16 %v3307_v1  ;;  %vm3471_vm0 = vcmp.eq.s32.totalorder %v3370_v5, %v12081_v47  ;;  %v18636_v33 = vld [vmem:[#allocation76_spill] sm:$0xff] }
 0x25b   : > { %18633 = vst [vmem:[#allocation56_spill] sm:$0xff] %v14200_v27  ;;  %v3941_v18 = vunpack.c.l.bf16 %v3308_v29  ;;  %v3942_v54 = vunpack.c.h.bf16 %v3308_v29  ;;  %vm3472_vm1 = vcmp.eq.s32.totalorder %v3370_v5, %v12083_v48  ;;  %vm3473_vm2 = vcmp.eq.s32.totalorder %v3370_v5, %v12085_v49 }
 0x25c   : > { %18634 = vst [vmem:[#allocation39_spill] sm:$0xff] %v14202_v57  ;;  %v4195_v6 = vadd.f32 %v10462_v40, %v3939_v23  ;;  %v4196_v7 = vadd.f32 %v10463_v55, %v3940_v11  ;;  %vm3474_vm3 = vcmp.eq.s32.totalorder %v3370_v5, %v12091_v51  ;;  %v10442_v34 = vsel %vm3471_vm0, 1.0, %v18377_v12  ;;  %v3400_v57 = vpop.permute.xlu2 %3399  ;;  %v18638_v5 = vld [vmem:[#allocation77_spill] sm:$0xff] }
 0x25d   : > { %v4197_v17 = vadd.f32 %v10464_v31, %v3941_v18  ;;  %v4198_v38 = vadd.f32 %v10465_v20, %v3942_v54  ;;  %v10443_v10 = vsel %vm3472_vm1, 1.0, %v18377_v12  ;;  %v10444_v29 = vsel %vm3473_vm2, 1.0, %v18377_v12 }
 0x25e   : > { %v14216_v1 = vpack.c.bf16 %v4196_v7, %v4195_v6  ;;  %v10445_v27 = vsel %vm3474_vm3, 1.0, %v18377_v12  ;;  %v3919_v40 = vunpack.c.l.bf16 %v18636_v33  ;;  %v3920_v23 = vunpack.c.h.bf16 %v18636_v33  ;;  %v3394_v33 = vpop.permute.xlu0 %3393 }
 0x25f   : > { %v14221_v55 = vpack.c.bf16 %v4198_v38, %v4197_v17  ;;  %v3921_v31 = vunpack.c.l.bf16 %v18638_v5  ;;  %v3922_v20 = vunpack.c.h.bf16 %v18638_v5  ;;  %vm3511_vm4 = vcmp.eq.s32.totalorder %v3400_v57, %v12081_v47 }
 0x260   : > { %18635 = vst [vmem:[#allocation40_spill] sm:$0xff] %v14216_v1  ;;  %v14226_v11 = vadd.f32 %v10442_v34, %v3919_v40  ;;  %vm3512_vm5 = vcmp.eq.s32.totalorder %v3400_v57, %v12083_v48  ;;  %vm3513_vm6 = vcmp.eq.s32.totalorder %v3400_v57, %v12085_v49  ;;  %v14231_v18 = vadd.f32 %v10443_v10, %v3920_v23  ;;  %v18643_v40 = vld [vmem:[#allocation78_spill] sm:$0xff]  ;;  %v18644_v23 = vld [vmem:[#allocation71_spill] sm:$0xff]  ;;  %v3379_v1 = vpop.permute.xlu1 %3378 }
 0x261   : > { %18637 = vst [vmem:[#allocation41_spill] sm:$0xff] %v14221_v55  ;;  %v14233_v54 = vadd.f32 %v10444_v29, %v3921_v31  ;;  %v14235_v6 = vadd.f32 %v10445_v27, %v3922_v20  ;;  %vm3514_vm7 = vcmp.eq.s32.totalorder %v3400_v57, %v12091_v51  ;;  %v10482_v7 = vsel %vm3511_vm4, 1.0, %v18377_v12  ;;  %v18645_v31 = vld [vmem:[#allocation80_spill] sm:$0xff]  ;;  %v18646_v20 = vld [vmem:[#allocation81_spill] sm:$0xff] }
 0x262   : > { %18639 = vst [vmem:[#allocation55_spill] sm:$0xff] %v14226_v11  ;;  %v10483_v17 = vsel %vm3512_vm5, 1.0, %v18377_v12  ;;  %v10484_v38 = vsel %vm3513_vm6, 1.0, %v18377_v12  ;;  %v10485_v34 = vsel %vm3514_vm7, 1.0, %v18377_v12  ;;  %v3959_v5 = vunpack.c.l.bf16 %v18643_v40 }
 0x263   : > { %18640 = vst [vmem:[#allocation57_spill] sm:$0xff] %v14231_v18  ;;  %v3960_v10 = vunpack.c.h.bf16 %v18643_v40  ;;  %v3961_v29 = vunpack.c.l.bf16 %v18644_v23  ;;  %v3962_v27 = vunpack.c.h.bf16 %v18644_v23  ;;  %v3313_v57 = vpack.c.bf16 %v18646_v20, %v18645_v31 }
 0x264   : > { %18641 = vst [vmem:[#allocation51_spill] sm:$0xff] %v14233_v54  ;;  %v18648_v54 = vld [vmem:[#allocation87_spill] sm:$0xff]  ;;  %vm3503_vm8 = vcmp.eq.s32.totalorder %v3394_v33, %v12081_v47  ;;  %vm3504_vm9 = vcmp.eq.s32.totalorder %v3394_v33, %v12083_v48  ;;  %v14252_v11 = vadd.f32 %v10482_v7, %v3959_v5  ;;  %vm3505_vm10 = vcmp.eq.s32.totalorder %v3394_v33, %v12085_v49 }
 0x265   : > { %18642 = vst [vmem:[#allocation54_spill] sm:$0xff] %v14235_v6  ;;  %v18647_v6 = vld [vmem:[#allocation82_spill] sm:$0xff]  ;;  %v14254_v53 = vadd.f32 %v10483_v17, %v3960_v10  ;;  %v14256_v55 = vadd.f32 %v10484_v38, %v3961_v29  ;;  %v14258_v40 = vadd.f32 %v10485_v34, %v3962_v27  ;;  %vm3506_vm11 = vcmp.eq.s32.totalorder %v3394_v33, %v12091_v51 }
 0x266   : > { %v3314_v18 = vpack.c.bf16 %v18648_v54, %v18647_v6  ;;  %18649 = vst [vmem:[#allocation47_spill] sm:$0xff] %v14252_v11  ;;  %v10474_v23 = vsel %vm3503_vm8, 1.0, %v18377_v12  ;;  %v10475_v54 = vsel %vm3504_vm9, 1.0, %v18377_v12  ;;  %v10476_v6 = vsel %vm3505_vm10, 1.0, %v18377_v12 }
 0x267   : > { %18650 = vst [vmem:[#allocation48_spill] sm:$0xff] %v14254_v53  ;;  %v10477_v7 = vsel %vm3506_vm11, 1.0, %v18377_v12  ;;  %v3951_v5 = vunpack.c.l.bf16 %v3313_v57  ;;  %v3952_v17 = vunpack.c.h.bf16 %v3313_v57  ;;  %vm3483_vm12 = vcmp.eq.s32.totalorder %v3379_v1, %v12081_v47  ;;  %v18654_v53 = vld [vmem:[#allocation68_spill] sm:$0xff] }
 0x268   : > { %18651 = vst [vmem:[#allocation49_spill] sm:$0xff] %v14256_v55  ;;  %v3953_v10 = vunpack.c.l.bf16 %v3314_v18  ;;  %v3954_v38 = vunpack.c.h.bf16 %v3314_v18  ;;  %vm3484_vm13 = vcmp.eq.s32.totalorder %v3379_v1, %v12083_v48  ;;  %vm3485_vm14 = vcmp.eq.s32.totalorder %v3379_v1, %v12085_v49 }
 0x269   : > { %18652 = vst [vmem:[#allocation52_spill] sm:$0xff] %v14258_v40  ;;  %v4207_v34 = vadd.f32 %v10474_v23, %v3951_v5  ;;  %v4208_v29 = vadd.f32 %v10475_v54, %v3952_v17  ;;  %vm3486_vm15 = vcmp.eq.s32.totalorder %v3379_v1, %v12091_v51  ;;  %v10454_v31 = vsel %vm3483_vm12, 1.0, %v18377_v12  ;;  %v3409_v40 = vpop.permute.xlu2 %3408  ;;  %v18656_v1 = vld [vmem:[#allocation69_spill] sm:$0xff] }
 0x26a   : > { %v4209_v33 = vadd.f32 %v10476_v6, %v3953_v10  ;;  %v4210_v27 = vadd.f32 %v10477_v7, %v3954_v38  ;;  %v10455_v20 = vsel %vm3484_vm13, 1.0, %v18377_v12  ;;  %v10456_v18 = vsel %vm3485_vm14, 1.0, %v18377_v12 }
 0x26b   : > { %v14272_v57 = vpack.c.bf16 %v4208_v29, %v4207_v34  ;;  %v10457_v55 = vsel %vm3486_vm15, 1.0, %v18377_v12  ;;  %v3931_v23 = vunpack.c.l.bf16 %v18654_v53  ;;  %v3932_v5 = vunpack.c.h.bf16 %v18654_v53  ;;  %v3403_v53 = vpop.permute.xlu0 %3402 }
 0x26c   : > { %v14277_v54 = vpack.c.bf16 %v4210_v27, %v4209_v33  ;;  %v3933_v6 = vunpack.c.l.bf16 %v18656_v1  ;;  %v3934_v7 = vunpack.c.h.bf16 %v18656_v1  ;;  %vm3523_vm0 = vcmp.eq.s32.totalorder %v3409_v40, %v12081_v47 }
 0x26d   : > { %18653 = vst [vmem:[#allocation53_spill] sm:$0xff] %v14272_v57  ;;  %v14282_v17 = vadd.f32 %v10454_v31, %v3931_v23  ;;  %vm3524_vm1 = vcmp.eq.s32.totalorder %v3409_v40, %v12083_v48  ;;  %vm3525_vm2 = vcmp.eq.s32.totalorder %v3409_v40, %v12085_v49  ;;  %v14287_v10 = vadd.f32 %v10455_v20, %v3932_v5  ;;  %v18661_v23 = vld [vmem:[#allocation70_spill] sm:$0xff]  ;;  %v18662_v5 = vld [vmem:[#allocation79_spill] sm:$0xff]  ;;  %v18687_v57 = vld [vmem:[#allocation85_spill] sm:$0xff] }
 0x26e   : > { %18655 = vst [vmem:[#allocation50_spill] sm:$0xff] %v14277_v54  ;;  %v14289_v38 = vadd.f32 %v10456_v18, %v3933_v6  ;;  %v14291_v34 = vadd.f32 %v10457_v55, %v3934_v7  ;;  %vm3526_vm3 = vcmp.eq.s32.totalorder %v3409_v40, %v12091_v51  ;;  %v10494_v29 = vsel %vm3523_vm0, 1.0, %v18377_v12  ;;  %v18663_v6 = vld [vmem:[#allocation84_spill] sm:$0xff] }
 0x26f   : > { %18657 = vst [vmem:[#allocation66_spill] sm:$0xff] %v14282_v17  ;;  %v10495_v33 = vsel %vm3524_vm1, 1.0, %v18377_v12  ;;  %v10496_v27 = vsel %vm3525_vm2, 1.0, %v18377_v12  ;;  %v10497_v31 = vsel %vm3526_vm3, 1.0, %v18377_v12  ;;  %v3971_v1 = vunpack.c.l.bf16 %v18661_v23  ;;  %v3388_v17 = vpop.permute.xlu1 %3387 }
 0x270   : > { %18658 = vst [vmem:[#allocation62_spill] sm:$0xff] %v14287_v10  ;;  %v3972_v20 = vunpack.c.h.bf16 %v18661_v23  ;;  %v3973_v18 = vunpack.c.l.bf16 %v18662_v5  ;;  %v3974_v55 = vunpack.c.h.bf16 %v18662_v5  ;;  %v3319_v40 = vpack.c.bf16 %v13742_v39, %v13740_v50 }
 0x271   : > { %18659 = vst [vmem:[#allocation63_spill] sm:$0xff] %v14289_v38  ;;  %v3320_v7 = vpack.c.bf16 %v18663_v6, %v13744_v16  ;;  %vm3515_vm4 = vcmp.eq.s32.totalorder %v3403_v53, %v12081_v47  ;;  %vm3516_vm5 = vcmp.eq.s32.totalorder %v3403_v53, %v12083_v48  ;;  %vm3517_vm6 = vcmp.eq.s32.totalorder %v3403_v53, %v12085_v49  ;;  %v3418_v6 = vpop.permute.xlu2 %3417 }
 0x272   : > { %18660 = vst [vmem:[#allocation64_spill] sm:$0xff] %v14291_v34  ;;  %v14308_v34 = vadd.f32 %v10494_v29, %v3971_v1  ;;  %v14310_v38 = vadd.f32 %v10495_v33, %v3972_v20  ;;  %v14312_v10 = vadd.f32 %v10496_v27, %v3973_v18  ;;  %v14314_v23 = vadd.f32 %v10497_v31, %v3974_v55 }
 0x273   : > { %vm3518_vm7 = vcmp.eq.s32.totalorder %v3403_v53, %v12091_v51  ;;  %v10486_v50 = vsel %vm3515_vm4, 1.0, %v18377_v12  ;;  %v10487_v39 = vsel %vm3516_vm5, 1.0, %v18377_v12  ;;  %v10488_v16 = vsel %vm3517_vm6, 1.0, %v18377_v12 }
 0x274   : > { %18664 = vst [vmem:[#allocation65_spill] sm:$0xff] %v14308_v34  ;;  %v10489_v29 = vsel %vm3518_vm7, 1.0, %v18377_v12  ;;  %v3963_v1 = vunpack.c.l.bf16 %v3319_v40  ;;  %v3964_v33 = vunpack.c.h.bf16 %v3319_v40  ;;  %v3965_v27 = vunpack.c.l.bf16 %v3320_v7 }
 0x275   : > { %18665 = vst [vmem:[#allocation75_spill] sm:$0xff] %v14310_v38  ;;  %v3966_v20 = vunpack.c.h.bf16 %v3320_v7  ;;  %vm3495_vm8 = vcmp.eq.s32.totalorder %v3388_v17, %v12081_v47  ;;  %v18205_v18 = vmov 5   ;;  %vm3496_vm9 = vcmp.eq.s32.totalorder %v3388_v17, %v12083_v48  ;;  %v14329_v7 = vld [vmem:[%s11917_s4 + $0x8] sm:$0xff] }
 0x276   : > { %18666 = vst [vmem:[#allocation58_spill] sm:$0xff] %v14312_v10  ;;  %v4219_v31 = vadd.f32 %v10486_v50, %v3963_v1  ;;  %v4220_v5 = vadd.f32 %v10487_v39, %v3964_v33  ;;  %11383 = vset.pattern.permute.xlu0 %v18205_v18  ;;  %vm3497_vm10 = vcmp.eq.s32.totalorder %v3388_v17, %v12085_v49  ;;  %v10466_v40 = vsel %vm3495_vm8, 1.0, %v18377_v12  ;;  %v18670_v33 = vld [vmem:[#allocation88_spill] sm:$0xff] }
 0x277   : > { %18667 = vst [vmem:[#allocation59_spill] sm:$0xff] %v14314_v23  ;;  %v4221_v53 = vadd.f32 %v10488_v16, %v3965_v27  ;;  %v4222_v55 = vadd.f32 %v10489_v29, %v3966_v20  ;;  %vm3498_vm11 = vcmp.eq.s32.totalorder %v3388_v17, %v12091_v51  ;;  %5335 = vperm.xlu0 %11383, %v14329_v7   ;;  %v10467_v39 = vsel %vm3496_vm9, 1.0, %v18377_v12  ;;  %v14339_v29 = vld [vmem:[%s11917_s4] sm:$0xff]  ;;  %v11505_v23 = vld [vmem:[%s11917_s4 + $0x10] sm:$0xff] }
 0x278   : > { %11382 = vset.pattern.permute.xlu2 %v18205_v18  ;;  %v14333_v50 = vpack.c.bf16 %v4220_v5, %v4219_v31  ;;  %v10468_v1 = vsel %vm3497_vm10, 1.0, %v18377_v12  ;;  %v10469_v16 = vsel %vm3498_vm11, 1.0, %v18377_v12  ;;  %11384 = vset.pattern.permute.xlu1 %v18205_v18  ;;  %v3943_v27 = vunpack.c.l.bf16 %v18670_v33  ;;  %v18671_v31 = vld [vmem:[#allocation89_spill] sm:$0xff] }
 0x279   : > { %5332 = vperm.xlu2 %11382, %v14339_v29   ;;  %v14343_v17 = vpack.c.bf16 %v4222_v55, %v4221_v53  ;;  %v3944_v20 = vunpack.c.h.bf16 %v18670_v33  ;;  %v3945_v5 = vunpack.c.l.bf16 %v18671_v31  ;;  %5338 = vperm.xlu1 %11384, %v11505_v23   ;;  %v3946_v10 = vunpack.c.h.bf16 %v18671_v31  ;;  %v3412_v33 = vpop.permute.xlu0 %3411 }
 0x27a   : > { %18668 = vst [vmem:[#allocation60_spill] sm:$0xff] %v14333_v50  ;;  %vm3535_vm12 = vcmp.eq.s32.totalorder %v3418_v6, %v12081_v47  ;;  %vm3536_vm13 = vcmp.eq.s32.totalorder %v3418_v6, %v12083_v48  ;;  %vm3537_vm14 = vcmp.eq.s32.totalorder %v3418_v6, %v12085_v49  ;;  %v14353_v38 = vadd.f32 %v10466_v40, %v3943_v27  ;;  %v18676_v40 = vld [vmem:[#allocation90_spill] sm:$0xff] }
 0x27b   : > { %18669 = vst [vmem:[#allocation61_spill] sm:$0xff] %v14343_v17  ;;  %v14355_v53 = vadd.f32 %v10467_v39, %v3944_v20  ;;  %v14357_v55 = vadd.f32 %v10468_v1, %v3945_v5  ;;  %vm3538_vm15 = vcmp.eq.s32.totalorder %v3418_v6, %v12091_v51  ;;  %v14360_v18 = vadd.f32 %v10469_v16, %v3946_v10  ;;  %v18677_v1 = vld [vmem:[#allocation83_spill] sm:$0xff] }
 0x27c   : > { %18672 = vst [vmem:[#allocation72_spill] sm:$0xff] %v14353_v38  ;;  %v10506_v23 = vsel %vm3535_vm12, 1.0, %v18377_v12  ;;  %v10507_v31 = vsel %vm3536_vm13, 1.0, %v18377_v12  ;;  %v10508_v34 = vsel %vm3537_vm14, 1.0, %v18377_v12  ;;  %v10509_v17 = vsel %vm3538_vm15, 1.0, %v18377_v12 }
 0x27d   : > { %18673 = vst [vmem:[#allocation73_spill] sm:$0xff] %v14355_v53  ;;  %v3983_v27 = vunpack.c.l.bf16 %v18676_v40  ;;  %v3984_v39 = vunpack.c.h.bf16 %v18676_v40  ;;  %v3985_v20 = vunpack.c.l.bf16 %v18677_v1  ;;  %v3986_v6 = vunpack.c.h.bf16 %v18677_v1  ;;  %v3397_v40 = vpop.permute.xlu1 %3396 }
 0x27e   : > { %18674 = vst [vmem:[#allocation74_spill] sm:$0xff] %v14357_v55  ;;  %vm3527_vm0 = vcmp.eq.s32.totalorder %v3412_v33, %v12081_v47  ;;  %vm3528_vm1 = vcmp.eq.s32.totalorder %v3412_v33, %v12083_v48  ;;  %vm3529_vm2 = vcmp.eq.s32.totalorder %v3412_v33, %v12085_v49  ;;  %vm3530_vm3 = vcmp.eq.s32.totalorder %v3412_v33, %v12091_v51 }
 0x27f   : > { %18675 = vst [vmem:[#allocation67_spill] sm:$0xff] %v14360_v18  ;;  %v14373_v10 = vadd.f32 %v10506_v23, %v3983_v27  ;;  %v14375_v16 = vadd.f32 %v10507_v31, %v3984_v39  ;;  %v14377_v5 = vadd.f32 %v10508_v34, %v3985_v20  ;;  %v11506_v18 = vld [vmem:[%s11917_s4 + $0x30] sm:$0xff]  ;;  %v14381_v55 = vadd.f32 %v10509_v17, %v3986_v6  ;;  %v14387_v23 = vld [vmem:[%s11917_s4 + $0x18] sm:$0xff]  ;;  %v18683_v31 = vld [vmem:[#allocation16_spill] sm:$0xff] }
 0x280   : > { %5350 = vperm.xlu0 %11383, %v11506_v18   ;;  %v10498_v1 = vsel %vm3527_vm0, 1.0, %v18377_v12  ;;  %v10499_v53 = vsel %vm3528_vm1, 1.0, %v18377_v12  ;;  %v10500_v38 = vsel %vm3529_vm2, 1.0, %v18377_v12  ;;  %18682 = vst [vmem:[#allocation80_spill] sm:$0xff] %v14387_v23  ;;  %v10501_v34 = vsel %vm3530_vm3, 1.0, %v18377_v12  ;;  %v18684_v39 = vld [vmem:[#allocation15_spill] sm:$0xff] }
 0x281   : > { %18678 = vst [vmem:[#allocation76_spill] sm:$0xff] %v14373_v10  ;;  %5341 = vperm.xlu2 %11382, %v14387_v23   ;;  %v3975_v27 = vunpack.c.l.bf16 %v18683_v31  ;;  %v3976_v33 = vunpack.c.h.bf16 %v18683_v31  ;;  %v3977_v18 = vunpack.c.l.bf16 %v18684_v39  ;;  %v14395_v17 = vld [vmem:[%s11917_s4 + $0x20] sm:$0xff]  ;;  %v3978_v20 = vunpack.c.h.bf16 %v18684_v39  ;;  %v3427_v39 = vpop.permute.xlu2 %3426 }
 0x282   : > { %18679 = vst [vmem:[#allocation77_spill] sm:$0xff] %v14375_v16  ;;  %5344 = vperm.xlu1 %11384, %v14395_v17   ;;  %vm3507_vm4 = vcmp.eq.s32.totalorder %v3397_v40, %v12081_v47  ;;  %vm3508_vm5 = vcmp.eq.s32.totalorder %v3397_v40, %v12083_v48  ;;  %vm3509_vm6 = vcmp.eq.s32.totalorder %v3397_v40, %v12085_v49 }
 0x283   : > { %18680 = vst [vmem:[#allocation78_spill] sm:$0xff] %v14377_v5  ;;  %v4231_v6 = vadd.f32 %v10498_v1, %v3975_v27  ;;  %v4233_v5 = vadd.f32 %v10500_v38, %v3977_v18  ;;  %vm3510_vm7 = vcmp.eq.s32.totalorder %v3397_v40, %v12091_v51  ;;  %v4234_v31 = vadd.f32 %v10501_v34, %v3978_v20  ;;  %v18688_v40 = vld [vmem:[#allocation86_spill] sm:$0xff]  ;;  %v18689_v27 = vld [vmem:[#allocation91_spill] sm:$0xff] }
 0x284   : > { %18681 = vst [vmem:[#allocation71_spill] sm:$0xff] %v14381_v55  ;;  %v4232_v55 = vadd.f32 %v10499_v53, %v3976_v33  ;;  %v10478_v16 = vsel %vm3507_vm4, 1.0, %v18377_v12  ;;  %v10479_v10 = vsel %vm3508_vm5, 1.0, %v18377_v12  ;;  %v10480_v50 = vsel %vm3509_vm6, 1.0, %v18377_v12  ;;  %v18690_v33 = vld [vmem:[#allocation92_spill] sm:$0xff] }
 0x285   : > { %18685 = vst [vmem:[#allocation81_spill] sm:$0xff] %v14395_v17  ;;  %v10481_v54 = vsel %vm3510_vm7, 1.0, %v18377_v12  ;;  %v3955_v17 = vunpack.c.l.bf16 %v18687_v57  ;;  %v3956_v53 = vunpack.c.h.bf16 %v18687_v57  ;;  %v14411_v38 = vpack.c.bf16 %v4234_v31, %v4233_v5  ;;  %v11509_v57 = vld [vmem:[%s11917_s4 + $0x48] sm:$0xff] }
 0x286   : > { %v14406_v11 = vpack.c.bf16 %v4232_v55, %v4231_v6  ;;  %v3957_v1 = vunpack.c.l.bf16 %v18688_v40  ;;  %v3958_v34 = vunpack.c.h.bf16 %v18688_v40  ;;  %v3335_v18 = vpack.c.bf16 %v18690_v33, %v18689_v27  ;;  %v18691_v6 = vld [vmem:[#allocation93_spill] sm:$0xff]  ;;  %v11511_v40 = vld [vmem:[%s11917_s4 + $0x38] sm:$0xff] }
 0x287   : > { %v14417_v20 = vadd.f32 %v10478_v16, %v3955_v17  ;;  %v14419_v55 = vadd.f32 %v10479_v10, %v3956_v53  ;;  %vm3547_vm8 = vcmp.eq.s32.totalorder %v3427_v39, %v12081_v47  ;;  %vm3548_vm9 = vcmp.eq.s32.totalorder %v3427_v39, %v12083_v48  ;;  %v3421_v16 = vpop.permute.xlu0 %3420  ;;  %v11510_v17 = vld [vmem:[%s11917_s4 + $0x28] sm:$0xff] }
 0x288   : > { %18686 = vst [vmem:[#allocation82_spill] sm:$0xff] %v14406_v11  ;;  %v18692_v11 = vld [vmem:[#allocation94_spill] sm:$0xff]  ;;  %5359 = vperm.xlu0 %11383, %v11509_v57   ;;  %v14425_v5 = vadd.f32 %v10480_v50, %v3957_v1  ;;  %v14427_v31 = vadd.f32 %v10481_v54, %v3958_v34  ;;  %vm3549_vm10 = vcmp.eq.s32.totalorder %v3427_v39, %v12085_v49  ;;  %v10518_v10 = vsel %vm3547_vm8, 1.0, %v18377_v12  ;;  %v3406_v57 = vpop.permute.xlu1 %3405 }
 0x289   : > { %v3336_v23 = vpack.c.bf16 %v18692_v11, %v18691_v6  ;;  %5347 = vperm.xlu2 %11382, %v11510_v17   ;;  %vm3550_vm11 = vcmp.eq.s32.totalorder %v3427_v39, %v12091_v51  ;;  %v10519_v11 = vsel %vm3548_vm9, 1.0, %v18377_v12  ;;  %v10520_v53 = vsel %vm3549_vm10, 1.0, %v18377_v12 }
 0x28a   : > { %18693 = vst [vmem:[#allocation87_spill] sm:$0xff] %v14425_v5  ;;  %5353 = vperm.xlu1 %11384, %v11511_v40   ;;  %v10521_v54 = vsel %vm3550_vm11, 1.0, %v18377_v12  ;;  %v3995_v50 = vunpack.c.l.bf16 %v3335_v18  ;;  %v3996_v1 = vunpack.c.h.bf16 %v3335_v18  ;;  %vm3539_vm12 = vcmp.eq.s32.totalorder %v3421_v16, %v12081_v47 }
 0x28b   : > { %18694 = vst [vmem:[#allocation68_spill] sm:$0xff] %v14427_v31  ;;  %v3997_v34 = vunpack.c.l.bf16 %v3336_v23  ;;  %v3998_v27 = vunpack.c.h.bf16 %v3336_v23  ;;  %vm3540_vm13 = vcmp.eq.s32.totalorder %v3421_v16, %v12083_v48  ;;  %vm3541_vm14 = vcmp.eq.s32.totalorder %v3421_v16, %v12085_v49 }
 0x28c   : > { %v4251_v39 = vadd.f32 %v10518_v10, %v3995_v50  ;;  %v4252_v33 = vadd.f32 %v10519_v11, %v3996_v1  ;;  %vm3542_vm15 = vcmp.eq.s32.totalorder %v3421_v16, %v12091_v51  ;;  %v10510_v40 = vsel %vm3539_vm12, 1.0, %v18377_v12  ;;  %v11512_v50 = vld [vmem:[%s11917_s4 + $0x60] sm:$0xff] }
 0x28d   : > { %v4253_v6 = vadd.f32 %v10520_v53, %v3997_v34  ;;  %v4254_v17 = vadd.f32 %v10521_v54, %v3998_v27  ;;  %v10511_v18 = vsel %vm3540_vm13, 1.0, %v18377_v12  ;;  %v10512_v23 = vsel %vm3541_vm14, 1.0, %v18377_v12  ;;  %v11513_v27 = vld [vmem:[%s11917_s4 + $0x40] sm:$0xff] }
 0x28e   : > { %v14445_v31 = vpack.c.bf16 %v4252_v33, %v4251_v39  ;;  %v10513_v5 = vsel %vm3542_vm15, 1.0, %v18377_v12  ;;  %v3987_v10 = vunpack.c.l.bf16 %v13866_v28  ;;  %v3988_v11 = vunpack.c.h.bf16 %v13866_v28 }
 0x28f   : > { %v14450_v53 = vpack.c.bf16 %v4254_v17, %v4253_v6  ;;  %v3989_v16 = vunpack.c.l.bf16 %v13868_v58  ;;  %v3990_v54 = vunpack.c.h.bf16 %v13868_v58  ;;  %vm3519_vm0 = vcmp.eq.s32.totalorder %v3406_v57, %v12081_v47  ;;  %v3436_v6 = vpop.permute.xlu2 %3435  ;;  %v11514_v58 = vld [vmem:[%s11917_s4 + $0x50] sm:$0xff] }
 0x290   : > { %5368 = vperm.xlu0 %11383, %v11512_v50   ;;  %v4243_v1 = vadd.f32 %v10510_v40, %v3987_v10  ;;  %v4244_v34 = vadd.f32 %v10511_v18, %v3988_v11  ;;  %vm3520_vm1 = vcmp.eq.s32.totalorder %v3406_v57, %v12083_v48  ;;  %vm3521_vm2 = vcmp.eq.s32.totalorder %v3406_v57, %v12085_v49  ;;  %v18695_v50 = vld [vmem:[#allocation29_spill] sm:$0xff] }
 0x291   : > { %5356 = vperm.xlu2 %11382, %v11513_v27   ;;  %v4245_v28 = vadd.f32 %v10512_v23, %v3989_v16  ;;  %v4246_v39 = vadd.f32 %v10513_v5, %v3990_v54  ;;  %vm3522_vm3 = vcmp.eq.s32.totalorder %v3406_v57, %v12091_v51  ;;  %v10490_v33 = vsel %vm3519_vm0, 1.0, %v18377_v12  ;;  %v3430_v27 = vpop.permute.xlu0 %3429 }
 0x292   : > { %5362 = vperm.xlu1 %11384, %v11514_v58   ;;  %v14462_v17 = vpack.c.bf16 %v4244_v34, %v4243_v1  ;;  %v10491_v40 = vsel %vm3520_vm1, 1.0, %v18377_v12  ;;  %v10492_v18 = vsel %vm3521_vm2, 1.0, %v18377_v12  ;;  %v10493_v10 = vsel %vm3522_vm3, 1.0, %v18377_v12  ;;  %v18696_v1 = vld [vmem:[#allocation18_spill] sm:$0xff] }
 0x293   : > { %v14467_v11 = vpack.c.bf16 %v4246_v39, %v4245_v28  ;;  %v3967_v23 = vunpack.c.l.bf16 %v13827_v25  ;;  %v3968_v5 = vunpack.c.h.bf16 %v13827_v25  ;;  %v3969_v57 = vunpack.c.l.bf16 %v13829_v44 }
 0x294   : > { %v3970_v16 = vunpack.c.h.bf16 %v13829_v44  ;;  %v3341_v54 = vpack.c.bf16 %v13841_v21, %v13839_v43  ;;  %v3342_v34 = vpack.c.bf16 %v18696_v1, %v18695_v50  ;;  %vm3559_vm4 = vcmp.eq.s32.totalorder %v3436_v6, %v12081_v47 }
 0x295   : > { %v14478_v28 = vadd.f32 %v10490_v33, %v3967_v23  ;;  %v14480_v39 = vadd.f32 %v10491_v40, %v3968_v5  ;;  %v14482_v58 = vadd.f32 %v10492_v18, %v3969_v57  ;;  %vm3560_vm5 = vcmp.eq.s32.totalorder %v3436_v6, %v12083_v48  ;;  %v11515_v18 = vld [vmem:[%s11917_s4 + $0x78] sm:$0xff] }
 0x296   : > { %v14485_v25 = vadd.f32 %v10493_v10, %v3970_v16  ;;  %vm3561_vm6 = vcmp.eq.s32.totalorder %v3436_v6, %v12085_v49  ;;  %vm3562_vm7 = vcmp.eq.s32.totalorder %v3436_v6, %v12091_v51  ;;  %v10530_v43 = vsel %vm3559_vm4, 1.0, %v18377_v12  ;;  %v11516_v57 = vld [vmem:[%s11917_s4 + $0x58] sm:$0xff]  ;;  %v11517_v16 = vld [vmem:[%s11917_s4 + $0x68] sm:$0xff] }
 0x297   : > { %18697 = vst [vmem:[#allocation69_spill] sm:$0xff] %v14480_v39  ;;  %v10531_v44 = vsel %vm3560_vm5, 1.0, %v18377_v12  ;;  %v10532_v21 = vsel %vm3561_vm6, 1.0, %v18377_v12  ;;  %v10533_v33 = vsel %vm3562_vm7, 1.0, %v18377_v12  ;;  %v4007_v40 = vunpack.c.l.bf16 %v3341_v54 }
 0x298   : > { %18698 = vst [vmem:[#allocation70_spill] sm:$0xff] %v14482_v58  ;;  %5377 = vperm.xlu0 %11383, %v11515_v18   ;;  %v4008_v23 = vunpack.c.h.bf16 %v3341_v54  ;;  %v4009_v5 = vunpack.c.l.bf16 %v3342_v34  ;;  %v4010_v10 = vunpack.c.h.bf16 %v3342_v34  ;;  %vm3551_vm8 = vcmp.eq.s32.totalorder %v3430_v27, %v12081_v47  ;;  %v3415_v18 = vpop.permute.xlu1 %3414 }
 0x299   : > { %18699 = vst [vmem:[#allocation79_spill] sm:$0xff] %v14485_v25  ;;  %5365 = vperm.xlu2 %11382, %v11516_v57   ;;  %v4263_v6 = vadd.f32 %v10530_v43, %v4007_v40  ;;  %vm3552_vm9 = vcmp.eq.s32.totalorder %v3430_v27, %v12083_v48  ;;  %vm3553_vm10 = vcmp.eq.s32.totalorder %v3430_v27, %v12085_v49  ;;  %v10522_v54 = vsel %vm3551_vm8, 1.0, %v18377_v12 }
 0x29a   : > { %vm3554_vm11 = vcmp.eq.s32.totalorder %v3430_v27, %v12091_v51  ;;  %5371 = vperm.xlu1 %11384, %v11517_v16   ;;  %v4264_v50 = vadd.f32 %v10531_v44, %v4008_v23  ;;  %v4265_v1 = vadd.f32 %v10532_v21, %v4009_v5  ;;  %v4266_v25 = vadd.f32 %v10533_v33, %v4010_v10  ;;  %v11518_v16 = vld [vmem:[%s11917_s4 + $0x90] sm:$0xff] }
 0x29b   : > { %v10523_v34 = vsel %vm3552_vm9, 1.0, %v18377_v12  ;;  %v10524_v58 = vsel %vm3553_vm10, 1.0, %v18377_v12  ;;  %v10525_v43 = vsel %vm3554_vm11, 1.0, %v18377_v12  ;;  %v3999_v40 = vunpack.c.l.bf16 %v13899_v8 }
 0x29c   : > { %v14505_v57 = vpack.c.bf16 %v4264_v50, %v4263_v6  ;;  %v14507_v39 = vpack.c.bf16 %v4266_v25, %v4265_v1  ;;  %v4000_v27 = vunpack.c.h.bf16 %v13899_v8  ;;  %v4001_v44 = vunpack.c.l.bf16 %v13904_v45  ;;  %v3439_v25 = vpop.permute.xlu0 %3438 }
 0x29d   : > { %v4002_v21 = vunpack.c.h.bf16 %v13904_v45  ;;  %v4255_v33 = vadd.f32 %v10522_v54, %v3999_v40  ;;  %vm3531_vm12 = vcmp.eq.s32.totalorder %v3415_v18, %v12081_v47  ;;  %vm3532_vm13 = vcmp.eq.s32.totalorder %v3415_v18, %v12083_v48 }
 0x29e   : > { %v4256_v23 = vadd.f32 %v10523_v34, %v4000_v27  ;;  %v4257_v5 = vadd.f32 %v10524_v58, %v4001_v44  ;;  %vm3533_vm14 = vcmp.eq.s32.totalorder %v3415_v18, %v12085_v49  ;;  %vm3534_vm15 = vcmp.eq.s32.totalorder %v3415_v18, %v12091_v51  ;;  %v11519_v18 = vld [vmem:[%s11917_s4 + $0x70] sm:$0xff]  ;;  %v11520_v27 = vld [vmem:[%s11917_s4 + $0x80] sm:$0xff] }
 0x29f   : > { %v4258_v10 = vadd.f32 %v10525_v43, %v4002_v21  ;;  %v10502_v8 = vsel %vm3531_vm12, 1.0, %v18377_v12  ;;  %v10503_v6 = vsel %vm3532_vm13, 1.0, %v18377_v12  ;;  %v10504_v45 = vsel %vm3533_vm14, 1.0, %v18377_v12 }
 0x2a0   : > { %5386 = vperm.xlu0 %11383, %v11518_v16   ;;  %v14520_v50 = vpack.c.bf16 %v4256_v23, %v4255_v33  ;;  %v10505_v1 = vsel %vm3534_vm15, 1.0, %v18377_v12  ;;  %v3979_v58 = vunpack.c.l.bf16 %v13882_v9  ;;  %v3980_v54 = vunpack.c.h.bf16 %v13882_v9  ;;  %v4341_v23 = vpop.permute.xlu2 %4340 }
 0x2a1   : > { %5374 = vperm.xlu2 %11382, %v11519_v18   ;;  %v14526_v34 = vpack.c.bf16 %v4258_v10, %v4257_v5  ;;  %v3981_v43 = vunpack.c.l.bf16 %v13888_v63  ;;  %v3982_v40 = vunpack.c.h.bf16 %v13888_v63  ;;  %vm3563_vm0 = vcmp.eq.s32.totalorder %v3439_v25, %v12081_v47 }
 0x2a2   : > { %5380 = vperm.xlu1 %11384, %v11520_v27   ;;  %v14532_v44 = vadd.f32 %v10502_v8, %v3979_v58  ;;  %v14534_v21 = vadd.f32 %v10503_v6, %v3980_v54  ;;  %vm3564_vm1 = vcmp.eq.s32.totalorder %v3439_v25, %v12083_v48  ;;  %vm3565_vm2 = vcmp.eq.s32.totalorder %v3439_v25, %v12085_v49 }
 0x2a3   : > { %v14538_v9 = vadd.f32 %v10504_v45, %v3981_v43  ;;  %v14540_v33 = vadd.f32 %v10505_v1, %v3982_v40  ;;  %vm3566_vm3 = vcmp.eq.s32.totalorder %v3439_v25, %v12091_v51  ;;  %v10534_v63 = vsel %vm3563_vm0, 1.0, %v18377_v12  ;;  %v11521_v40 = vld [vmem:[%s11917_s4 + $0xa8] sm:$0xff] }
 0x2a4   : > { %18700 = vst [vmem:[#allocation84_spill] sm:$0xff] %v14534_v21  ;;  %v10535_v5 = vsel %vm3564_vm1, 1.0, %v18377_v12  ;;  %v10536_v10 = vsel %vm3565_vm2, 1.0, %v18377_v12  ;;  %v10537_v8 = vsel %vm3566_vm3, 1.0, %v18377_v12  ;;  %v4011_v6 = vunpack.c.l.bf16 %v13960_v22 }
 0x2a5   : > { %18701 = vst [vmem:[#allocation88_spill] sm:$0xff] %v14538_v9  ;;  %v4012_v16 = vunpack.c.h.bf16 %v13960_v22  ;;  %v4013_v45 = vunpack.c.l.bf16 %v13966_v56  ;;  %v4014_v1 = vunpack.c.h.bf16 %v13966_v56  ;;  %v4275_v25 = vpack.c.bf16 %v13914_v13, %v13909_v30  ;;  %v11522_v56 = vld [vmem:[%s11917_s4 + $0x88] sm:$0xff]  ;;  %v18705_v9 = vld [vmem:[#allocation26_spill] sm:$0xff] }
 0x2a6   : > { %18702 = vst [vmem:[#allocation89_spill] sm:$0xff] %v14540_v33  ;;  %v4267_v58 = vadd.f32 %v10534_v63, %v4011_v6  ;;  %v4276_v54 = vpack.c.bf16 %v13918_v41, %v13916_v26  ;;  %vm4435_vm4 = vcmp.eq.s32.totalorder %v4341_v23, %v12081_v47  ;;  %vm4436_vm5 = vcmp.eq.s32.totalorder %v4341_v23, %v12083_v48  ;;  %v3424_v41 = vpop.permute.xlu1 %3423  ;;  %v18704_v33 = vld [vmem:[#allocation17_spill] sm:$0xff] }
 0x2a7   : > { %v4268_v18 = vadd.f32 %v10535_v5, %v4012_v16  ;;  %v4269_v43 = vadd.f32 %v10536_v10, %v4013_v45  ;;  %v4270_v22 = vadd.f32 %v10537_v8, %v4014_v1  ;;  %vm4437_vm6 = vcmp.eq.s32.totalorder %v4341_v23, %v12085_v49  ;;  %v11523_v8 = vld [vmem:[%s11917_s4 + $0x98] sm:$0xff]  ;;  %v18703_v45 = vld [vmem:[#allocation23_spill] sm:$0xff] }
 0x2a8   : > { %5395 = vperm.xlu0 %11383, %v11521_v40   ;;  %vm4438_vm7 = vcmp.eq.s32.totalorder %v4341_v23, %v12091_v51  ;;  %v10542_v30 = vsel %vm4435_vm4, 1.0, %v18377_v12  ;;  %v10543_v13 = vsel %vm4436_vm5, 1.0, %v18377_v12  ;;  %v10544_v26 = vsel %vm4437_vm6, 1.0, %v18377_v12 }
 0x2a9   : > { %5383 = vperm.xlu2 %11382, %v11522_v56   ;;  %v14564_v27 = vpack.c.bf16 %v4268_v18, %v4267_v58  ;;  %v14566_v63 = vpack.c.bf16 %v4270_v22, %v4269_v43  ;;  %v10545_v5 = vsel %vm4438_vm7, 1.0, %v18377_v12  ;;  %v4883_v10 = vunpack.c.l.bf16 %v4275_v25  ;;  %v4350_v22 = vpop.permute.xlu2 %4349 }
 0x2aa   : > { %5389 = vperm.xlu1 %11384, %v11523_v8   ;;  %v4884_v6 = vunpack.c.h.bf16 %v4275_v25  ;;  %v4885_v23 = vunpack.c.l.bf16 %v4276_v54  ;;  %v4886_v16 = vunpack.c.h.bf16 %v4276_v54  ;;  %v3333_v1 = vpack.c.bf16 %v18703_v45, %v13938_v36 }
 0x2ab   : > { %v5139_v40 = vadd.f32 %v10542_v30, %v4883_v10  ;;  %v3334_v21 = vpack.c.bf16 %v18705_v9, %v18704_v33  ;;  %vm3543_vm8 = vcmp.eq.s32.totalorder %v3424_v41, %v12081_v47  ;;  %vm3544_vm9 = vcmp.eq.s32.totalorder %v3424_v41, %v12083_v48  ;;  %v18707_v10 = vld [vmem:[#allocation28_spill] sm:$0xff] }
 0x2ac   : > { %v5140_v58 = vadd.f32 %v10543_v13, %v4884_v6  ;;  %v5141_v18 = vadd.f32 %v10544_v26, %v4885_v23  ;;  %v5142_v43 = vadd.f32 %v10545_v5, %v4886_v16  ;;  %vm3545_vm10 = vcmp.eq.s32.totalorder %v3424_v41, %v12085_v49  ;;  %v18708_v23 = vld [vmem:[#allocation31_spill] sm:$0xff]  ;;  %v18709_v16 = vld [vmem:[#allocation37_spill] sm:$0xff] }
 0x2ad   : > { %vm3546_vm11 = vcmp.eq.s32.totalorder %v3424_v41, %v12091_v51  ;;  %v10514_v25 = vsel %vm3543_vm8, 1.0, %v18377_v12  ;;  %v10515_v36 = vsel %vm3544_vm9, 1.0, %v18377_v12  ;;  %v10516_v54 = vsel %vm3545_vm10, 1.0, %v18377_v12  ;;  %v18706_v41 = vld [vmem:[#allocation27_spill] sm:$0xff] }
 0x2ae   : > { %v14581_v9 = vpack.c.bf16 %v5140_v58, %v5139_v40  ;;  %v14583_v33 = vpack.c.bf16 %v5142_v43, %v5141_v18  ;;  %v10517_v30 = vsel %vm3546_vm11, 1.0, %v18377_v12  ;;  %v3991_v13 = vunpack.c.l.bf16 %v3333_v1  ;;  %v11524_v40 = vld [vmem:[%s11917_s4 + $0xa0] sm:$0xff] }
 0x2af   : > { %v3992_v26 = vunpack.c.h.bf16 %v3333_v1  ;;  %v3993_v56 = vunpack.c.l.bf16 %v3334_v21  ;;  %v3994_v5 = vunpack.c.h.bf16 %v3334_v21  ;;  %v4281_v8 = vpack.c.bf16 %v18707_v10, %v18706_v41  ;;  %v4344_v1 = vpop.permute.xlu0 %4343  ;;  %v11525_v21 = vld [vmem:[%s11917_s4 + $0xb0] sm:$0xff] }
 0x2b0   : > { %v4247_v6 = vadd.f32 %v10514_v25, %v3991_v13  ;;  %v4282_v45 = vpack.c.bf16 %v18709_v16, %v18708_v23  ;;  %vm4447_vm12 = vcmp.eq.s32.totalorder %v4350_v22, %v12081_v47  ;;  %vm4448_vm13 = vcmp.eq.s32.totalorder %v4350_v22, %v12083_v48 }
 0x2b1   : > { %5392 = vperm.xlu2 %11382, %v11524_v40   ;;  %v4248_v58 = vadd.f32 %v10515_v36, %v3992_v26  ;;  %v4249_v18 = vadd.f32 %v10516_v54, %v3993_v56  ;;  %v4250_v43 = vadd.f32 %v10517_v30, %v3994_v5  ;;  %vm4449_vm14 = vcmp.eq.s32.totalorder %v4350_v22, %v12085_v49 }
 0x2b2   : > { %5398 = vperm.xlu1 %11384, %v11525_v21   ;;  %vm4450_vm15 = vcmp.eq.s32.totalorder %v4350_v22, %v12091_v51  ;;  %v10554_v25 = vsel %vm4447_vm12, 1.0, %v18377_v12  ;;  %v10555_v13 = vsel %vm4448_vm13, 1.0, %v18377_v12  ;;  %v10556_v41 = vsel %vm4449_vm14, 1.0, %v18377_v12 }
 0x2b3   : > { %v14599_v10 = vpack.c.bf16 %v4248_v58, %v4247_v6  ;;  %v14601_v23 = vpack.c.bf16 %v4250_v43, %v4249_v18  ;;  %v10557_v36 = vsel %vm4450_vm15, 1.0, %v18377_v12  ;;  %v4895_v54 = vunpack.c.l.bf16 %v4281_v8  ;;  %v3433_v43 = vpop.permute.xlu1 %3432 }
 0x2b4   : > { %v4896_v30 = vunpack.c.h.bf16 %v4281_v8  ;;  %v4897_v26 = vunpack.c.l.bf16 %v4282_v45  ;;  %v4898_v56 = vunpack.c.h.bf16 %v4282_v45  ;;  %vm4439_vm0 = vcmp.eq.s32.totalorder %v4344_v1, %v12081_v47 }
 0x2b5   : > { %v5151_v5 = vadd.f32 %v10554_v25, %v4895_v54  ;;  %vm4440_vm1 = vcmp.eq.s32.totalorder %v4344_v1, %v12083_v48  ;;  %vm4441_vm2 = vcmp.eq.s32.totalorder %v4344_v1, %v12085_v49  ;;  %vm4442_vm3 = vcmp.eq.s32.totalorder %v4344_v1, %v12091_v51 }
 0x2b6   : > { %v5152_v22 = vadd.f32 %v10555_v13, %v4896_v30  ;;  %v5153_v6 = vadd.f32 %v10556_v41, %v4897_v26  ;;  %v5154_v16 = vadd.f32 %v10557_v36, %v4898_v56  ;;  %v10546_v40 = vsel %vm4439_vm0, 1.0, %v18377_v12  ;;  %v11526_v41 = vld [vmem:[%s11917_s4 + $0xb8] sm:$0xff] }
 0x2b7   : > { %v10547_v58 = vsel %vm4440_vm1, 1.0, %v18377_v12  ;;  %v10548_v8 = vsel %vm4441_vm2, 1.0, %v18377_v12  ;;  %v10549_v45 = vsel %vm4442_vm3, 1.0, %v18377_v12  ;;  %v4887_v18 = vunpack.c.l.bf16 %v14043_v32 }
 0x2b8   : > { %v14613_v21 = vpack.c.bf16 %v5152_v22, %v5151_v5  ;;  %v14615_v25 = vpack.c.bf16 %v5154_v16, %v5153_v6  ;;  %v4888_v1 = vunpack.c.h.bf16 %v14043_v32  ;;  %v4889_v13 = vunpack.c.l.bf16 %v14048_v4  ;;  %v4356_v22 = vpop.permute.xlu2 %4355 }
 0x2b9   : > { %5401 = vperm.xlu2 %11382, %v11526_v41   ;;  %v4890_v36 = vunpack.c.h.bf16 %v14048_v4  ;;  %v5143_v54 = vadd.f32 %v10546_v40, %v4887_v18  ;;  %v3339_v30 = vpack.c.bf16 %v13998_v24, %v13996_v59  ;;  %v3340_v26 = vpack.c.bf16 %v14002_v62, %v14000_v37 }
 0x2ba   : > { %v5144_v56 = vadd.f32 %v10547_v58, %v4888_v1  ;;  %v5145_v5 = vadd.f32 %v10548_v8, %v4889_v13  ;;  %vm3555_vm4 = vcmp.eq.s32.totalorder %v3433_v43, %v12081_v47  ;;  %vm3556_vm5 = vcmp.eq.s32.totalorder %v3433_v43, %v12083_v48  ;;  %v18712_v1 = vld [vmem:[#allocation19_spill] sm:$0xff] }
 0x2bb   : > { %v5146_v32 = vadd.f32 %v10549_v45, %v4890_v36  ;;  %vm3557_vm6 = vcmp.eq.s32.totalorder %v3433_v43, %v12085_v49  ;;  %vm3558_vm7 = vcmp.eq.s32.totalorder %v3433_v43, %v12091_v51  ;;  %v10526_v4 = vsel %vm3555_vm4, 1.0, %v18377_v12  ;;  %v18710_v45 = vld [vmem:[#allocation24_spill] sm:$0xff]  ;;  %v18711_v43 = vld [vmem:[#allocation25_spill] sm:$0xff] }
 0x2bc   : > { %v14630_v6 = vpack.c.bf16 %v5144_v56, %v5143_v54  ;;  %v10527_v59 = vsel %vm3556_vm5, 1.0, %v18377_v12  ;;  %v10528_v62 = vsel %vm3557_vm6, 1.0, %v18377_v12  ;;  %v10529_v24 = vsel %vm3558_vm7, 1.0, %v18377_v12 }
 0x2bd   : > { %v14635_v37 = vpack.c.bf16 %v5146_v32, %v5145_v5  ;;  %v4003_v16 = vunpack.c.l.bf16 %v3339_v30  ;;  %v4004_v40 = vunpack.c.h.bf16 %v3339_v30  ;;  %v4005_v58 = vunpack.c.l.bf16 %v3340_v26 }
 0x2be   : > { %v4006_v8 = vunpack.c.h.bf16 %v3340_v26  ;;  %v4285_v18 = vpack.c.bf16 %v18710_v45, %v14020_v52  ;;  %v4286_v13 = vpack.c.bf16 %v18712_v1, %v18711_v43  ;;  %vm4455_vm8 = vcmp.eq.s32.totalorder %v4356_v22, %v12081_v47  ;;  %v4359_v26 = vpop.permute.xlu0 %4358 }
 0x2bf   : > { %v4259_v41 = vadd.f32 %v10526_v4, %v4003_v16  ;;  %v4260_v36 = vadd.f32 %v10527_v59, %v4004_v40  ;;  %v4261_v54 = vadd.f32 %v10528_v62, %v4005_v58  ;;  %vm4456_vm9 = vcmp.eq.s32.totalorder %v4356_v22, %v12083_v48 }
 0x2c0   : > { %v4262_v56 = vadd.f32 %v10529_v24, %v4006_v8  ;;  %vm4457_vm10 = vcmp.eq.s32.totalorder %v4356_v22, %v12085_v49  ;;  %vm4458_vm11 = vcmp.eq.s32.totalorder %v4356_v22, %v12091_v51  ;;  %v10562_v30 = vsel %vm4455_vm8, 1.0, %v18377_v12 }
 0x2c1   : > { %v14646_v5 = vpack.c.bf16 %v4260_v36, %v4259_v41  ;;  %v10563_v52 = vsel %vm4456_vm9, 1.0, %v18377_v12  ;;  %v10564_v32 = vsel %vm4457_vm10, 1.0, %v18377_v12  ;;  %v10565_v4 = vsel %vm4458_vm11, 1.0, %v18377_v12  ;;  %v3442_v41 = vpop.permute.xlu1 %3441 }
 0x2c2   : > { %v14651_v59 = vpack.c.bf16 %v4262_v56, %v4261_v54  ;;  %v4903_v62 = vunpack.c.l.bf16 %v4285_v18  ;;  %v4904_v16 = vunpack.c.h.bf16 %v4285_v18  ;;  %v4905_v24 = vunpack.c.l.bf16 %v4286_v13 }
 0x2c3   : > { %v4906_v40 = vunpack.c.h.bf16 %v4286_v13  ;;  %vm4459_vm12 = vcmp.eq.s32.totalorder %v4359_v26, %v12081_v47  ;;  %vm4460_vm13 = vcmp.eq.s32.totalorder %v4359_v26, %v12083_v48  ;;  %vm4461_vm14 = vcmp.eq.s32.totalorder %v4359_v26, %v12085_v49 }
 0x2c4   : > { %v5159_v22 = vadd.f32 %v10562_v30, %v4903_v62  ;;  %v5160_v58 = vadd.f32 %v10563_v52, %v4904_v16  ;;  %v5161_v8 = vadd.f32 %v10564_v32, %v4905_v24  ;;  %vm4462_vm15 = vcmp.eq.s32.totalorder %v4359_v26, %v12091_v51 }
 0x2c5   : > { %v5162_v45 = vadd.f32 %v10565_v4, %v4906_v40  ;;  %v10566_v43 = vsel %vm4459_vm12, 1.0, %v18377_v12  ;;  %v10567_v1 = vsel %vm4460_vm13, 1.0, %v18377_v12  ;;  %v10568_v18 = vsel %vm4461_vm14, 1.0, %v18377_v12 }
 0x2c6   : > { %v14660_v13 = vpack.c.bf16 %v5160_v58, %v5159_v22  ;;  %v10569_v36 = vsel %vm4462_vm15, 1.0, %v18377_v12  ;;  %v4907_v54 = vunpack.c.l.bf16 %v14102_v60  ;;  %v4908_v56 = vunpack.c.h.bf16 %v14102_v60 }
 0x2c7   : > { %v14665_v30 = vpack.c.bf16 %v5162_v45, %v5161_v8  ;;  %v4909_v26 = vunpack.c.l.bf16 %v14107_v61  ;;  %v4910_v52 = vunpack.c.h.bf16 %v14107_v61  ;;  %v3345_v32 = vpack.c.bf16 %v14058_v2, %v14053_v35  ;;  %v4365_v2 = vpop.permute.xlu2 %4364 }
 0x2c8   : > { %v5163_v4 = vadd.f32 %v10566_v43, %v4907_v54  ;;  %v5164_v62 = vadd.f32 %v10567_v1, %v4908_v56  ;;  %v3346_v16 = vpack.c.bf16 %v14062_v19, %v14060_v14  ;;  %vm3567_vm0 = vcmp.eq.s32.totalorder %v3442_v41, %v12081_v47 }
 0x2c9   : > { %v5165_v24 = vadd.f32 %v10568_v18, %v4909_v26  ;;  %v5166_v40 = vadd.f32 %v10569_v36, %v4910_v52  ;;  %vm3568_vm1 = vcmp.eq.s32.totalorder %v3442_v41, %v12083_v48  ;;  %vm3569_vm2 = vcmp.eq.s32.totalorder %v3442_v41, %v12085_v49  ;;  %v4368_v26 = vpop.permute.xlu0 %4367 }
 0x2ca   : > { %v14676_v60 = vpack.c.bf16 %v5164_v62, %v5163_v4  ;;  %vm3570_vm3 = vcmp.eq.s32.totalorder %v3442_v41, %v12091_v51  ;;  %v10538_v61 = vsel %vm3567_vm0, 1.0, %v18377_v12  ;;  %v10539_v35 = vsel %vm3568_vm1, 1.0, %v18377_v12 }
 0x2cb   : > { %v14681_v22 = vpack.c.bf16 %v5166_v40, %v5165_v24  ;;  %v10540_v14 = vsel %vm3569_vm2, 1.0, %v18377_v12  ;;  %v10541_v19 = vsel %vm3570_vm3, 1.0, %v18377_v12  ;;  %v4015_v58 = vunpack.c.l.bf16 %v3345_v32 }
 0x2cc   : > { %v4016_v8 = vunpack.c.h.bf16 %v3345_v32  ;;  %v4017_v45 = vunpack.c.l.bf16 %v3346_v16  ;;  %v4018_v43 = vunpack.c.h.bf16 %v3346_v16  ;;  %v4291_v1 = vpack.c.bf16 %v14083_v42, %v14081_v3 }
 0x2cd   : > { %v4271_v18 = vadd.f32 %v10538_v61, %v4015_v58  ;;  %v4292_v41 = vpack.c.bf16 %v14087_v46, %v14085_v0  ;;  %vm4467_vm4 = vcmp.eq.s32.totalorder %v4365_v2, %v12081_v47  ;;  %vm4468_vm5 = vcmp.eq.s32.totalorder %v4365_v2, %v12083_v48 }
 0x2ce   : > { %v4272_v36 = vadd.f32 %v10539_v35, %v4016_v8  ;;  %v4273_v54 = vadd.f32 %v10540_v14, %v4017_v45  ;;  %v4274_v56 = vadd.f32 %v10541_v19, %v4018_v43  ;;  %vm4469_vm6 = vcmp.eq.s32.totalorder %v4365_v2, %v12085_v49  ;;  %v4347_v43 = vpop.permute.xlu1 %4346 }
 0x2cf   : > { %vm4470_vm7 = vcmp.eq.s32.totalorder %v4365_v2, %v12091_v51  ;;  %v10574_v52 = vsel %vm4467_vm4, 1.0, %v18377_v12  ;;  %v10575_v3 = vsel %vm4468_vm5, 1.0, %v18377_v12  ;;  %v10576_v42 = vsel %vm4469_vm6, 1.0, %v18377_v12 }
 0x2d0   : > { %v14696_v32 = vpack.c.bf16 %v4272_v36, %v4271_v18  ;;  %v14698_v0 = vpack.c.bf16 %v4274_v56, %v4273_v54  ;;  %v10577_v46 = vsel %vm4470_vm7, 1.0, %v18377_v12  ;;  %v4915_v4 = vunpack.c.l.bf16 %v4291_v1  ;;  %v18714_v36 = vld [vmem:[#allocation30_spill] sm:$0xff] }
 0x2d1   : > { %v4916_v62 = vunpack.c.h.bf16 %v4291_v1  ;;  %v4917_v16 = vunpack.c.l.bf16 %v4292_v41  ;;  %v4918_v24 = vunpack.c.h.bf16 %v4292_v41  ;;  %vm4471_vm8 = vcmp.eq.s32.totalorder %v4368_v26, %v12081_v47 }
 0x2d2   : > { %v5171_v40 = vadd.f32 %v10574_v52, %v4915_v4  ;;  %vm4472_vm9 = vcmp.eq.s32.totalorder %v4368_v26, %v12083_v48  ;;  %vm4473_vm10 = vcmp.eq.s32.totalorder %v4368_v26, %v12085_v49  ;;  %vm4474_vm11 = vcmp.eq.s32.totalorder %v4368_v26, %v12091_v51  ;;  %v18715_v52 = vld [vmem:[#allocation20_spill] sm:$0xff] }
 0x2d3   : > { %v5172_v61 = vadd.f32 %v10575_v3, %v4916_v62  ;;  %v5173_v35 = vadd.f32 %v10576_v42, %v4917_v16  ;;  %v5174_v2 = vadd.f32 %v10577_v46, %v4918_v24  ;;  %v10578_v14 = vsel %vm4471_vm8, 1.0, %v18377_v12  ;;  %v18716_v3 = vld [vmem:[#allocation21_spill] sm:$0xff]  ;;  %v18717_v16 = vld [vmem:[#allocation22_spill] sm:$0xff]  ;;  %v18718_v24 = vld [vmem:[#allocation32_spill] sm:$0xff] }
 0x2d4   : > { %v10579_v19 = vsel %vm4472_vm9, 1.0, %v18377_v12  ;;  %v10580_v58 = vsel %vm4473_vm10, 1.0, %v18377_v12  ;;  %v10581_v8 = vsel %vm4474_vm11, 1.0, %v18377_v12  ;;  %v4919_v45 = vunpack.c.l.bf16 %v14160_v15 }
 0x2d5   : > { %v14710_v1 = vpack.c.bf16 %v5172_v61, %v5171_v40  ;;  %v14712_v18 = vpack.c.bf16 %v5174_v2, %v5173_v35  ;;  %v4920_v41 = vunpack.c.h.bf16 %v14160_v15  ;;  %v4921_v54 = vunpack.c.l.bf16 %v18714_v36 }
 0x2d6   : > { %v4922_v56 = vunpack.c.h.bf16 %v18714_v36  ;;  %v5175_v26 = vadd.f32 %v10578_v14, %v4919_v45  ;;  %v4279_v42 = vpack.c.bf16 %v18716_v3, %v18715_v52  ;;  %v18214_v62 = vmov 6   ;;  %v18719_v36 = vld [vmem:[#allocation33_spill] sm:$0xff]  ;;  %v18722_v52 = vld [vmem:[#allocation36_spill] sm:$0xff] }
 0x2d7   : > { %18713 = vst [vmem:[#allocation90_spill] sm:$0xff] %v14712_v18  ;;  %v5176_v46 = vadd.f32 %v10579_v19, %v4920_v41  ;;  %v5177_v4 = vadd.f32 %v10580_v58, %v4921_v54  ;;  %11385 = vset.pattern.permute.xlu0 %v18214_v62  ;;  %v4280_v40 = vpack.c.bf16 %v18718_v24, %v18717_v16  ;;  %v4374_v19 = vpop.permute.xlu2 %4373  ;;  %v18720_v54 = vld [vmem:[#allocation34_spill] sm:$0xff] }
 0x2d8   : > { %vm4443_vm12 = vcmp.eq.s32.totalorder %v4347_v43, %v12081_v47  ;;  %v5178_v61 = vadd.f32 %v10581_v8, %v4922_v56  ;;  %vm4444_vm13 = vcmp.eq.s32.totalorder %v4347_v43, %v12083_v48  ;;  %vm4445_vm14 = vcmp.eq.s32.totalorder %v4347_v43, %v12085_v49  ;;  %6324 = vperm.xlu0 %11385, %v14339_v29  }
 0x2d9   : > { %vm4446_vm15 = vcmp.eq.s32.totalorder %v4347_v43, %v12091_v51  ;;  %v14727_v15 = vpack.c.bf16 %v5176_v46, %v5175_v26  ;;  %v10550_v35 = vsel %vm4443_vm12, 1.0, %v18377_v12  ;;  %v10551_v2 = vsel %vm4444_vm13, 1.0, %v18377_v12  ;;  %11386 = vset.pattern.permute.xlu1 %v18214_v62  ;;  %v18721_v26 = vld [vmem:[#allocation35_spill] sm:$0xff] }
 0x2da   : > { %v10552_v14 = vsel %vm4445_vm14, 1.0, %v18377_v12  ;;  %v14733_v58 = vpack.c.bf16 %v5178_v61, %v5177_v4  ;;  %v10553_v8 = vsel %vm4446_vm15, 1.0, %v18377_v12  ;;  %v4891_v45 = vunpack.c.l.bf16 %v4279_v42  ;;  %6327 = vperm.xlu1 %11386, %v14329_v7   ;;  %v4377_v7 = vpop.permute.xlu0 %4376 }
 0x2db   : > { %v4892_v41 = vunpack.c.h.bf16 %v4279_v42  ;;  %v4893_v29 = vunpack.c.l.bf16 %v4280_v40  ;;  %v4894_v43 = vunpack.c.h.bf16 %v4280_v40  ;;  %v4297_v56 = vpack.c.bf16 %v18720_v54, %v18719_v36 }
 0x2dc   : > { %v4298_v3 = vpack.c.bf16 %v18722_v52, %v18721_v26  ;;  %v5147_v46 = vadd.f32 %v10550_v35, %v4891_v45  ;;  %vm4479_vm0 = vcmp.eq.s32.totalorder %v4374_v19, %v12081_v47  ;;  %vm4480_vm1 = vcmp.eq.s32.totalorder %v4374_v19, %v12083_v48 }
 0x2dd   : > { %v5148_v16 = vadd.f32 %v10551_v2, %v4892_v41  ;;  %v5149_v4 = vadd.f32 %v10552_v14, %v4893_v29  ;;  %v5150_v24 = vadd.f32 %v10553_v8, %v4894_v43  ;;  %vm4481_vm2 = vcmp.eq.s32.totalorder %v4374_v19, %v12085_v49 }
 0x2de   : > { %vm4482_vm3 = vcmp.eq.s32.totalorder %v4374_v19, %v12091_v51  ;;  %v10586_v40 = vsel %vm4479_vm0, 1.0, %v18377_v12  ;;  %v10587_v61 = vsel %vm4480_vm1, 1.0, %v18377_v12  ;;  %v10588_v35 = vsel %vm4481_vm2, 1.0, %v18377_v12  ;;  %v18725_v19 = vld [vmem:[#allocation80_spill] sm:$0xff] }
 0x2df   : > { %v14745_v42 = vpack.c.bf16 %v5148_v16, %v5147_v46  ;;  %v14750_v2 = vpack.c.bf16 %v5150_v24, %v5149_v4  ;;  %v10589_v45 = vsel %vm4482_vm3, 1.0, %v18377_v12  ;;  %v4927_v41 = vunpack.c.l.bf16 %v4297_v56  ;;  %v4353_v46 = vpop.permute.xlu1 %4352  ;;  %v18727_v24 = vld [vmem:[#allocation40_spill] sm:$0xff] }
 0x2e0   : > { %v4928_v14 = vunpack.c.h.bf16 %v4297_v56  ;;  %v4929_v8 = vunpack.c.l.bf16 %v4298_v3  ;;  %v4930_v29 = vunpack.c.h.bf16 %v4298_v3  ;;  %vm4483_vm4 = vcmp.eq.s32.totalorder %v4377_v7, %v12081_v47  ;;  %6333 = vperm.xlu0 %11385, %v18725_v19  }
 0x2e1   : > { %18723 = vst [vmem:[#allocation83_spill] sm:$0xff] %v14745_v42  ;;  %vm4484_vm5 = vcmp.eq.s32.totalorder %v4377_v7, %v12083_v48  ;;  %v5183_v43 = vadd.f32 %v10586_v40, %v4927_v41  ;;  %vm4485_vm6 = vcmp.eq.s32.totalorder %v4377_v7, %v12085_v49  ;;  %vm4486_vm7 = vcmp.eq.s32.totalorder %v4377_v7, %v12091_v51  ;;  %v18729_v7 = vld [vmem:[#allocation41_spill] sm:$0xff] }
 0x2e2   : > { %18724 = vst [vmem:[#allocation16_spill] sm:$0xff] %v14750_v2  ;;  %v5184_v36 = vadd.f32 %v10587_v61, %v4928_v14  ;;  %v5185_v54 = vadd.f32 %v10588_v35, %v4929_v8  ;;  %v5186_v26 = vadd.f32 %v10589_v45, %v4930_v29  ;;  %v10590_v52 = vsel %vm4483_vm4, 1.0, %v18377_v12  ;;  %v18730_v8 = vld [vmem:[#allocation45_spill] sm:$0xff]  ;;  %v18731_v29 = vld [vmem:[#allocation38_spill] sm:$0xff] }
 0x2e3   : > { %v10591_v56 = vsel %vm4484_vm5, 1.0, %v18377_v12  ;;  %v10592_v16 = vsel %vm4485_vm6, 1.0, %v18377_v12  ;;  %v10593_v4 = vsel %vm4486_vm7, 1.0, %v18377_v12  ;;  %v4931_v40 = vunpack.c.l.bf16 %v18727_v24 }
 0x2e4   : > { %v14760_v3 = vpack.c.bf16 %v5184_v36, %v5183_v43  ;;  %v14765_v61 = vpack.c.bf16 %v5186_v26, %v5185_v54  ;;  %v4932_v41 = vunpack.c.h.bf16 %v18727_v24  ;;  %v4933_v35 = vunpack.c.l.bf16 %v18729_v7  ;;  %v18732_v43 = vld [vmem:[#allocation46_spill] sm:$0xff] }
 0x2e5   : > { %v4934_v45 = vunpack.c.h.bf16 %v18729_v7  ;;  %v5187_v14 = vadd.f32 %v10590_v52, %v4931_v40  ;;  %v4283_v19 = vpack.c.bf16 %v18731_v29, %v18730_v8  ;;  %v18733_v36 = vld [vmem:[#allocation42_spill] sm:$0xff]  ;;  %vm4451_vm8 = vcmp.eq.s32.totalorder %v4353_v46, %v12081_v47  ;;  %v4383_v52 = vpop.permute.xlu2 %4382  ;;  %v18738_v8 = vld [vmem:[#allocation44_spill] sm:$0xff] }
 0x2e6   : > { %18726 = vst [vmem:[#allocation15_spill] sm:$0xff] %v14760_v3  ;;  %v4284_v62 = vpack.c.bf16 %v18733_v36, %v18732_v43  ;;  %v5188_v3 = vadd.f32 %v10591_v56, %v4932_v41  ;;  %v5189_v2 = vadd.f32 %v10592_v16, %v4933_v35  ;;  %vm4452_vm9 = vcmp.eq.s32.totalorder %v4353_v46, %v12083_v48  ;;  %v18736_v16 = vld [vmem:[#allocation81_spill] sm:$0xff]  ;;  %v18739_v43 = vld [vmem:[#allocation56_spill] sm:$0xff]  ;;  %v18740_v36 = vld [vmem:[#allocation39_spill] sm:$0xff] }
 0x2e7   : > { %18728 = vst [vmem:[#allocation85_spill] sm:$0xff] %v14765_v61  ;;  %v5190_v42 = vadd.f32 %v10593_v4, %v4934_v45  ;;  %vm4453_vm10 = vcmp.eq.s32.totalorder %v4353_v46, %v12085_v49  ;;  %vm4454_vm11 = vcmp.eq.s32.totalorder %v4353_v46, %v12091_v51  ;;  %v10558_v54 = vsel %vm4451_vm8, 1.0, %v18377_v12  ;;  %v18737_v46 = vld [vmem:[#allocation43_spill] sm:$0xff] }
 0x2e8   : > { %v10559_v26 = vsel %vm4452_vm9, 1.0, %v18377_v12  ;;  %v14780_v24 = vpack.c.bf16 %v5188_v3, %v5187_v14  ;;  %v10560_v7 = vsel %vm4453_vm10, 1.0, %v18377_v12  ;;  %v10561_v56 = vsel %vm4454_vm11, 1.0, %v18377_v12  ;;  %6336 = vperm.xlu0 %11385, %v18736_v16   ;;  %v4386_v16 = vpop.permute.xlu0 %4385 }
 0x2e9   : > { %v14782_v40 = vpack.c.bf16 %v5190_v42, %v5189_v2  ;;  %v4899_v4 = vunpack.c.l.bf16 %v4283_v19  ;;  %v4900_v41 = vunpack.c.h.bf16 %v4283_v19  ;;  %v4901_v35 = vunpack.c.l.bf16 %v4284_v62 }
 0x2ea   : > { %18734 = vst [vmem:[#allocation86_spill] sm:$0xff] %v14780_v24  ;;  %v4902_v45 = vunpack.c.h.bf16 %v4284_v62  ;;  %v4303_v29 = vpack.c.bf16 %v18738_v8, %v18737_v46  ;;  %v4304_v61 = vpack.c.bf16 %v18740_v36, %v18739_v43  ;;  %vm4491_vm12 = vcmp.eq.s32.totalorder %v4383_v52, %v12081_v47 }
 0x2eb   : > { %18735 = vst [vmem:[#allocation91_spill] sm:$0xff] %v14782_v40  ;;  %vm4492_vm13 = vcmp.eq.s32.totalorder %v4383_v52, %v12083_v48  ;;  %v5155_v42 = vadd.f32 %v10558_v54, %v4899_v4  ;;  %v5156_v2 = vadd.f32 %v10559_v26, %v4900_v41  ;;  %v5157_v3 = vadd.f32 %v10560_v7, %v4901_v35 }
 0x2ec   : > { %v5158_v14 = vadd.f32 %v10561_v56, %v4902_v45  ;;  %vm4493_vm14 = vcmp.eq.s32.totalorder %v4383_v52, %v12085_v49  ;;  %vm4494_vm15 = vcmp.eq.s32.totalorder %v4383_v52, %v12091_v51  ;;  %v10598_v62 = vsel %vm4491_vm12, 1.0, %v18377_v12 }
 0x2ed   : > { %v10599_v19 = vsel %vm4492_vm13, 1.0, %v18377_v12  ;;  %v14797_v46 = vpack.c.bf16 %v5156_v2, %v5155_v42  ;;  %v10600_v43 = vsel %vm4493_vm14, 1.0, %v18377_v12  ;;  %v10601_v54 = vsel %vm4494_vm15, 1.0, %v18377_v12  ;;  %v4362_v2 = vpop.permute.xlu1 %4361 }
 0x2ee   : > { %v14799_v8 = vpack.c.bf16 %v5158_v14, %v5157_v3  ;;  %v4939_v26 = vunpack.c.l.bf16 %v4303_v29  ;;  %v4940_v7 = vunpack.c.h.bf16 %v4303_v29  ;;  %v4941_v56 = vunpack.c.l.bf16 %v4304_v61 }
 0x2ef   : > { %18741 = vst [vmem:[#allocation92_spill] sm:$0xff] %v14797_v46  ;;  %v4942_v4 = vunpack.c.h.bf16 %v4304_v61  ;;  %vm4495_vm0 = vcmp.eq.s32.totalorder %v4386_v16, %v12081_v47  ;;  %vm4496_vm1 = vcmp.eq.s32.totalorder %v4386_v16, %v12083_v48  ;;  %vm4497_vm2 = vcmp.eq.s32.totalorder %v4386_v16, %v12085_v49 }
 0x2f0   : > { %18742 = vst [vmem:[#allocation93_spill] sm:$0xff] %v14799_v8  ;;  %vm4498_vm3 = vcmp.eq.s32.totalorder %v4386_v16, %v12091_v51  ;;  %v5195_v52 = vadd.f32 %v10598_v62, %v4939_v26  ;;  %v5196_v41 = vadd.f32 %v10599_v19, %v4940_v7  ;;  %v5197_v35 = vadd.f32 %v10600_v43, %v4941_v56  ;;  %v18745_v8 = vld [vmem:[#allocation53_spill] sm:$0xff]  ;;  %v18746_v19 = vld [vmem:[#allocation50_spill] sm:$0xff]  ;;  %v18749_v56 = vld [vmem:[#allocation51_spill] sm:$0xff] }
 0x2f1   : > { %v5198_v45 = vadd.f32 %v10601_v54, %v4942_v4  ;;  %v10602_v36 = vsel %vm4495_vm0, 1.0, %v18377_v12  ;;  %v10603_v42 = vsel %vm4496_vm1, 1.0, %v18377_v12  ;;  %v10604_v29 = vsel %vm4497_vm2, 1.0, %v18377_v12  ;;  %v18747_v54 = vld [vmem:[#allocation55_spill] sm:$0xff]  ;;  %v18748_v26 = vld [vmem:[#allocation57_spill] sm:$0xff]  ;;  %v18750_v4 = vld [vmem:[#allocation54_spill] sm:$0xff] }
 0x2f2   : > { %v10605_v61 = vsel %vm4498_vm3, 1.0, %v18377_v12  ;;  %v14811_v3 = vpack.c.bf16 %v5196_v41, %v5195_v52  ;;  %v4943_v46 = vunpack.c.l.bf16 %v18745_v8  ;;  %v4944_v62 = vunpack.c.h.bf16 %v18745_v8 }
 0x2f3   : > { %v14813_v14 = vpack.c.bf16 %v5198_v45, %v5197_v35  ;;  %v4945_v16 = vunpack.c.l.bf16 %v18746_v19  ;;  %v4946_v43 = vunpack.c.h.bf16 %v18746_v19  ;;  %v4289_v7 = vpack.c.bf16 %v18748_v26, %v18747_v54  ;;  %v18753_v54 = vld [vmem:[#allocation48_spill] sm:$0xff] }
 0x2f4   : > { %18743 = vst [vmem:[#allocation94_spill] sm:$0xff] %v14811_v3  ;;  %v4290_v40 = vpack.c.bf16 %v18750_v4, %v18749_v56  ;;  %v5199_v24 = vadd.f32 %v10602_v36, %v4943_v46  ;;  %v5200_v18 = vadd.f32 %v10603_v42, %v4944_v62  ;;  %vm4463_vm4 = vcmp.eq.s32.totalorder %v4362_v2, %v12081_v47  ;;  %v4392_v46 = vpop.permute.xlu2 %4391 }
 0x2f5   : > { %18744 = vst [vmem:[#allocation29_spill] sm:$0xff] %v14813_v14  ;;  %vm4464_vm5 = vcmp.eq.s32.totalorder %v4362_v2, %v12083_v48  ;;  %v5201_v52 = vadd.f32 %v10604_v29, %v4945_v16  ;;  %v5202_v41 = vadd.f32 %v10605_v61, %v4946_v43  ;;  %vm4465_vm6 = vcmp.eq.s32.totalorder %v4362_v2, %v12085_v49  ;;  %v18752_v43 = vld [vmem:[#allocation47_spill] sm:$0xff] }
 0x2f6   : > { %vm4466_vm7 = vcmp.eq.s32.totalorder %v4362_v2, %v12091_v51  ;;  %v14827_v8 = vpack.c.bf16 %v5200_v18, %v5199_v24  ;;  %v10570_v35 = vsel %vm4463_vm4, 1.0, %v18377_v12  ;;  %v10571_v45 = vsel %vm4464_vm5, 1.0, %v18377_v12  ;;  %v18754_v18 = vld [vmem:[#allocation49_spill] sm:$0xff]  ;;  %v18755_v24 = vld [vmem:[#allocation52_spill] sm:$0xff] }
 0x2f7   : > { %v10572_v19 = vsel %vm4465_vm6, 1.0, %v18377_v12  ;;  %v14832_v36 = vpack.c.bf16 %v5202_v41, %v5201_v52  ;;  %v10573_v42 = vsel %vm4466_vm7, 1.0, %v18377_v12  ;;  %v4911_v62 = vunpack.c.l.bf16 %v4289_v7 }
 0x2f8   : > { %v4912_v29 = vunpack.c.h.bf16 %v4289_v7  ;;  %v4913_v61 = vunpack.c.l.bf16 %v4290_v40  ;;  %v4914_v16 = vunpack.c.h.bf16 %v4290_v40  ;;  %v4309_v2 = vpack.c.bf16 %v18753_v54, %v18752_v43  ;;  %v4395_v7 = vpop.permute.xlu0 %4394 }
 0x2f9   : > { %18751 = vst [vmem:[#allocation18_spill] sm:$0xff] %v14832_v36  ;;  %v4310_v26 = vpack.c.bf16 %v18755_v24, %v18754_v18  ;;  %v5167_v56 = vadd.f32 %v10570_v35, %v4911_v62  ;;  %vm4503_vm8 = vcmp.eq.s32.totalorder %v4392_v46, %v12081_v47  ;;  %vm4504_vm9 = vcmp.eq.s32.totalorder %v4392_v46, %v12083_v48 }
 0x2fa   : > { %v5168_v4 = vadd.f32 %v10571_v45, %v4912_v29  ;;  %v5169_v52 = vadd.f32 %v10572_v19, %v4913_v61  ;;  %v5170_v41 = vadd.f32 %v10573_v42, %v4914_v16  ;;  %vm4505_vm10 = vcmp.eq.s32.totalorder %v4392_v46, %v12085_v49 }
 0x2fb   : > { %vm4506_vm11 = vcmp.eq.s32.totalorder %v4392_v46, %v12091_v51  ;;  %v10610_v43 = vsel %vm4503_vm8, 1.0, %v18377_v12  ;;  %v10611_v54 = vsel %vm4504_vm9, 1.0, %v18377_v12  ;;  %v10612_v35 = vsel %vm4505_vm10, 1.0, %v18377_v12 }
 0x2fc   : > { %v14843_v40 = vpack.c.bf16 %v5168_v4, %v5167_v56  ;;  %v14848_v45 = vpack.c.bf16 %v5170_v41, %v5169_v52  ;;  %v10613_v62 = vsel %vm4506_vm11, 1.0, %v18377_v12  ;;  %v4951_v29 = vunpack.c.l.bf16 %v4309_v2  ;;  %v4371_v52 = vpop.permute.xlu1 %4370 }
 0x2fd   : > { %v4952_v19 = vunpack.c.h.bf16 %v4309_v2  ;;  %v4953_v42 = vunpack.c.l.bf16 %v4310_v26  ;;  %v4954_v61 = vunpack.c.h.bf16 %v4310_v26  ;;  %vm4507_vm12 = vcmp.eq.s32.totalorder %v4395_v7, %v12081_v47 }
 0x2fe   : > { %18756 = vst [vmem:[#allocation23_spill] sm:$0xff] %v14843_v40  ;;  %vm4508_vm13 = vcmp.eq.s32.totalorder %v4395_v7, %v12083_v48  ;;  %v5207_v46 = vadd.f32 %v10610_v43, %v4951_v29  ;;  %vm4509_vm14 = vcmp.eq.s32.totalorder %v4395_v7, %v12085_v49  ;;  %vm4510_vm15 = vcmp.eq.s32.totalorder %v4395_v7, %v12091_v51  ;;  %v18761_v7 = vld [vmem:[#allocation61_spill] sm:$0xff] }
 0x2ff   : > { %18757 = vst [vmem:[#allocation17_spill] sm:$0xff] %v14848_v45  ;;  %v5208_v16 = vadd.f32 %v10611_v54, %v4952_v19  ;;  %v5209_v18 = vadd.f32 %v10612_v35, %v4953_v42  ;;  %v5210_v24 = vadd.f32 %v10613_v62, %v4954_v61  ;;  %v10614_v56 = vsel %vm4507_vm12, 1.0, %v18377_v12  ;;  %v18759_v45 = vld [vmem:[#allocation60_spill] sm:$0xff]  ;;  %v18762_v42 = vld [vmem:[#allocation66_spill] sm:$0xff] }
 0x300   : > { %v10615_v4 = vsel %vm4508_vm13, 1.0, %v18377_v12  ;;  %v10616_v26 = vsel %vm4509_vm14, 1.0, %v18377_v12  ;;  %v10617_v41 = vsel %vm4510_vm15, 1.0, %v18377_v12  ;;  %v4955_v43 = vunpack.c.l.bf16 %v18759_v45  ;;  %v18763_v61 = vld [vmem:[#allocation62_spill] sm:$0xff] }
 0x301   : > { %v14857_v2 = vpack.c.bf16 %v5208_v16, %v5207_v46  ;;  %v14862_v54 = vpack.c.bf16 %v5210_v24, %v5209_v18  ;;  %v4956_v29 = vunpack.c.h.bf16 %v18759_v45  ;;  %v4957_v35 = vunpack.c.l.bf16 %v18761_v7  ;;  %v18764_v46 = vld [vmem:[#allocation63_spill] sm:$0xff]  ;;  %v18765_v16 = vld [vmem:[#allocation64_spill] sm:$0xff]  ;;  %v4401_v24 = vpop.permute.xlu2 %4400 }
 0x302   : > { %v4958_v62 = vunpack.c.h.bf16 %v18761_v7  ;;  %v5211_v19 = vadd.f32 %v10614_v56, %v4955_v43  ;;  %v4295_v40 = vpack.c.bf16 %v18763_v61, %v18762_v42  ;;  %vm4475_vm0 = vcmp.eq.s32.totalorder %v4371_v52, %v12081_v47  ;;  %v18769_v42 = vld [vmem:[#allocation75_spill] sm:$0xff]  ;;  %v18770_v61 = vld [vmem:[#allocation58_spill] sm:$0xff] }
 0x303   : > { %18758 = vst [vmem:[#allocation26_spill] sm:$0xff] %v14857_v2  ;;  %v4296_v2 = vpack.c.bf16 %v18765_v16, %v18764_v46  ;;  %v5212_v14 = vadd.f32 %v10615_v4, %v4956_v29  ;;  %v5213_v3 = vadd.f32 %v10616_v26, %v4957_v35  ;;  %vm4476_vm1 = vcmp.eq.s32.totalorder %v4371_v52, %v12083_v48  ;;  %v18771_v46 = vld [vmem:[#allocation59_spill] sm:$0xff] }
 0x304   : > { %18760 = vst [vmem:[#allocation27_spill] sm:$0xff] %v14862_v54  ;;  %v5214_v36 = vadd.f32 %v10617_v41, %v4958_v62  ;;  %vm4477_vm2 = vcmp.eq.s32.totalorder %v4371_v52, %v12085_v49  ;;  %vm4478_vm3 = vcmp.eq.s32.totalorder %v4371_v52, %v12091_v51  ;;  %v10582_v45 = vsel %vm4475_vm0, 1.0, %v18377_v12  ;;  %v18768_v62 = vld [vmem:[#allocation65_spill] sm:$0xff]  ;;  %v18784_v54 = vld [vmem:[#allocation78_spill] sm:$0xff] }
 0x305   : > { %v10583_v18 = vsel %vm4476_vm1, 1.0, %v18377_v12  ;;  %v14877_v56 = vpack.c.bf16 %v5212_v14, %v5211_v19  ;;  %v10584_v7 = vsel %vm4477_vm2, 1.0, %v18377_v12  ;;  %v10585_v4 = vsel %vm4478_vm3, 1.0, %v18377_v12 }
 0x306   : > { %v14879_v43 = vpack.c.bf16 %v5214_v36, %v5213_v3  ;;  %v4923_v26 = vunpack.c.l.bf16 %v4295_v40  ;;  %v4924_v41 = vunpack.c.h.bf16 %v4295_v40  ;;  %v4925_v29 = vunpack.c.l.bf16 %v4296_v2 }
 0x307   : > { %18766 = vst [vmem:[#allocation28_spill] sm:$0xff] %v14877_v56  ;;  %v4926_v35 = vunpack.c.h.bf16 %v4296_v2  ;;  %v4315_v52 = vpack.c.bf16 %v18769_v42, %v18768_v62  ;;  %v4316_v16 = vpack.c.bf16 %v18771_v46, %v18770_v61  ;;  %vm4515_vm4 = vcmp.eq.s32.totalorder %v4401_v24, %v12081_v47  ;;  %v4404_v62 = vpop.permute.xlu0 %4403 }
 0x308   : > { %18767 = vst [vmem:[#allocation31_spill] sm:$0xff] %v14879_v43  ;;  %vm4516_vm5 = vcmp.eq.s32.totalorder %v4401_v24, %v12083_v48  ;;  %v5179_v3 = vadd.f32 %v10582_v45, %v4923_v26  ;;  %v5180_v14 = vadd.f32 %v10583_v18, %v4924_v41  ;;  %v5181_v36 = vadd.f32 %v10584_v7, %v4925_v29  ;;  %v18785_v43 = vld [vmem:[#allocation71_spill] sm:$0xff] }
 0x309   : > { %v5182_v19 = vadd.f32 %v10585_v4, %v4926_v35  ;;  %vm4517_vm6 = vcmp.eq.s32.totalorder %v4401_v24, %v12085_v49  ;;  %vm4518_vm7 = vcmp.eq.s32.totalorder %v4401_v24, %v12091_v51  ;;  %v10622_v40 = vsel %vm4515_vm4, 1.0, %v18377_v12 }
 0x30a   : > { %v10623_v2 = vsel %vm4516_vm5, 1.0, %v18377_v12  ;;  %v14893_v42 = vpack.c.bf16 %v5180_v14, %v5179_v3  ;;  %v10624_v46 = vsel %vm4517_vm6, 1.0, %v18377_v12  ;;  %v10625_v45 = vsel %vm4518_vm7, 1.0, %v18377_v12 }
 0x30b   : > { %v14895_v61 = vpack.c.bf16 %v5182_v19, %v5181_v36  ;;  %v4963_v18 = vunpack.c.l.bf16 %v4315_v52  ;;  %v4964_v7 = vunpack.c.h.bf16 %v4315_v52  ;;  %v4965_v4 = vunpack.c.l.bf16 %v4316_v16  ;;  %v14908_v36 = vld [vmem:[%s11917_s4 + $0x28] sm:$0xff]  ;;  %v4380_v19 = vpop.permute.xlu1 %4379 }
 0x30c   : > { %18772 = vst [vmem:[#allocation37_spill] sm:$0xff] %v14893_v42  ;;  %v4966_v26 = vunpack.c.h.bf16 %v4316_v16  ;;  %vm4519_vm8 = vcmp.eq.s32.totalorder %v4404_v62, %v12081_v47  ;;  %vm4520_vm9 = vcmp.eq.s32.totalorder %v4404_v62, %v12083_v48  ;;  %vm4521_vm10 = vcmp.eq.s32.totalorder %v4404_v62, %v12085_v49  ;;  %v18778_v42 = vld [vmem:[#allocation73_spill] sm:$0xff] }
 0x30d   : > { %18773 = vst [vmem:[#allocation24_spill] sm:$0xff] %v14895_v61  ;;  %v5219_v24 = vadd.f32 %v10622_v40, %v4963_v18  ;;  %v5220_v41 = vadd.f32 %v10623_v2, %v4964_v7  ;;  %v5221_v29 = vadd.f32 %v10624_v46, %v4965_v4  ;;  %v18235_v3 = vmov 7   ;;  %v18776_v46 = vld [vmem:[#allocation82_spill] sm:$0xff]  ;;  %v11528_v18 = vld [vmem:[%s11917_s4] sm:$0xff]  ;;  %v18777_v61 = vld [vmem:[#allocation72_spill] sm:$0xff] }
 0x30e   : > { %v5222_v35 = vadd.f32 %v10625_v45, %v4966_v26  ;;  %11392 = vset.pattern.permute.xlu0 %v18235_v3  ;;  %vm4522_vm11 = vcmp.eq.s32.totalorder %v4404_v62, %v12091_v51  ;;  %v10626_v52 = vsel %vm4519_vm8, 1.0, %v18377_v12  ;;  %v10627_v16 = vsel %vm4520_vm9, 1.0, %v18377_v12  ;;  %11387 = vset.pattern.permute.xlu2 %v18235_v3 }
 0x30f   : > { %v10628_v14 = vsel %vm4521_vm10, 1.0, %v18377_v12  ;;  %7331 = vperm.xlu0 %11392, %v14908_v36   ;;  %v14912_v40 = vpack.c.bf16 %v5220_v41, %v5219_v24  ;;  %v10629_v62 = vsel %vm4522_vm11, 1.0, %v18377_v12  ;;  %v4967_v45 = vunpack.c.l.bf16 %v18776_v46  ;;  %7316 = vperm.xlu2 %11387, %v11528_v18   ;;  %v11529_v41 = vld [vmem:[%s11917_s4 + $0x8] sm:$0xff] }
 0x310   : > { %v14914_v2 = vpack.c.bf16 %v5222_v35, %v5221_v29  ;;  %11388 = vset.pattern.permute.xlu1 %v18235_v3  ;;  %v4968_v7 = vunpack.c.h.bf16 %v18776_v46  ;;  %v4969_v4 = vunpack.c.l.bf16 %v14411_v38  ;;  %v4970_v26 = vunpack.c.h.bf16 %v14411_v38  ;;  %v18779_v35 = vld [vmem:[#allocation74_spill] sm:$0xff] }
 0x311   : > { %18774 = vst [vmem:[#allocation25_spill] sm:$0xff] %v14912_v40  ;;  %v4301_v24 = vpack.c.bf16 %v18778_v42, %v18777_v61  ;;  %7319 = vperm.xlu1 %11388, %v11529_v41   ;;  %v5223_v29 = vadd.f32 %v10626_v52, %v4967_v45  ;;  %vm4487_vm12 = vcmp.eq.s32.totalorder %v4380_v19, %v12081_v47  ;;  %v4410_v52 = vpop.permute.xlu2 %4409 }
 0x312   : > { %18775 = vst [vmem:[#allocation19_spill] sm:$0xff] %v14914_v2  ;;  %v18780_v2 = vld [vmem:[#allocation67_spill] sm:$0xff]  ;;  %vm4488_vm13 = vcmp.eq.s32.totalorder %v4380_v19, %v12083_v48  ;;  %v5224_v18 = vadd.f32 %v10627_v16, %v4968_v7  ;;  %v5225_v3 = vadd.f32 %v10628_v14, %v4969_v4  ;;  %v5226_v46 = vadd.f32 %v10629_v62, %v4970_v26  ;;  %v18782_v4 = vld [vmem:[#allocation76_spill] sm:$0xff] }
 0x313   : > { %v4302_v40 = vpack.c.bf16 %v18780_v2, %v18779_v35  ;;  %vm4489_vm14 = vcmp.eq.s32.totalorder %v4380_v19, %v12085_v49  ;;  %vm4490_vm15 = vcmp.eq.s32.totalorder %v4380_v19, %v12091_v51  ;;  %v10594_v38 = vsel %vm4487_vm12, 1.0, %v18377_v12  ;;  %v18783_v19 = vld [vmem:[#allocation77_spill] sm:$0xff] }
 0x314   : > { %v10595_v42 = vsel %vm4488_vm13, 1.0, %v18377_v12  ;;  %v10596_v61 = vsel %vm4489_vm14, 1.0, %v18377_v12  ;;  %v14935_v45 = vpack.c.bf16 %v5224_v18, %v5223_v29  ;;  %v14937_v2 = vpack.c.bf16 %v5226_v46, %v5225_v3 }
 0x315   : > { %v10597_v41 = vsel %vm4490_vm15, 1.0, %v18377_v12  ;;  %v4935_v16 = vunpack.c.l.bf16 %v4301_v24  ;;  %v4936_v14 = vunpack.c.h.bf16 %v4301_v24  ;;  %v4937_v62 = vunpack.c.l.bf16 %v4302_v40  ;;  %v14949_v24 = vld [vmem:[%s11917_s4 + $0x40] sm:$0xff] }
 0x316   : > { %18781 = vst [vmem:[#allocation30_spill] sm:$0xff] %v14937_v2  ;;  %v4938_v7 = vunpack.c.h.bf16 %v4302_v40  ;;  %v4321_v26 = vpack.c.bf16 %v18783_v19, %v18782_v4  ;;  %v4322_v56 = vpack.c.bf16 %v18785_v43, %v18784_v54  ;;  %vm4527_vm0 = vcmp.eq.s32.totalorder %v4410_v52, %v12081_v47  ;;  %v4413_v40 = vpop.permute.xlu0 %4412  ;;  %v14984_v2 = vld [vmem:[%s11917_s4 + $0x58] sm:$0xff] }
 0x317   : > { %v5191_v35 = vadd.f32 %v10594_v38, %v4935_v16  ;;  %vm4528_vm1 = vcmp.eq.s32.totalorder %v4410_v52, %v12083_v48  ;;  %v18786_v3 = vmov 6   ;;  %v5192_v29 = vadd.f32 %v10595_v42, %v4936_v14  ;;  %v11531_v42 = vld [vmem:[%s11917_s4 + $0x10] sm:$0xff] }
 0x318   : > { %11396 = vset.pattern.permute.xlu0 %v18786_v3  ;;  %v5193_v18 = vadd.f32 %v10596_v61, %v4937_v62  ;;  %v5194_v46 = vadd.f32 %v10597_v41, %v4938_v7  ;;  %vm4529_vm2 = vcmp.eq.s32.totalorder %v4410_v52, %v12085_v49  ;;  %vm4530_vm3 = vcmp.eq.s32.totalorder %v4410_v52, %v12091_v51 }
 0x319   : > { %6348 = vperm.xlu0 %11396, %v14949_v24   ;;  %v10634_v54 = vsel %vm4527_vm0, 1.0, %v18377_v12  ;;  %v10635_v43 = vsel %vm4528_vm1, 1.0, %v18377_v12  ;;  %v10636_v38 = vsel %vm4529_vm2, 1.0, %v18377_v12  ;;  %11389 = vset.pattern.permute.xlu2 %v18786_v3  ;;  %v14958_v61 = vpack.c.bf16 %v5192_v29, %v5191_v35 }
 0x31a   : > { %7322 = vperm.xlu1 %11388, %v11531_v42   ;;  %v14960_v41 = vpack.c.bf16 %v5194_v46, %v5193_v18  ;;  %v10637_v16 = vsel %vm4530_vm3, 1.0, %v18377_v12  ;;  %v4975_v14 = vunpack.c.l.bf16 %v4321_v26  ;;  %6330 = vperm.xlu2 %11389, %v11531_v42   ;;  %v4976_v62 = vunpack.c.h.bf16 %v4321_v26  ;;  %v4389_v42 = vpop.permute.xlu1 %4388 }
 0x31b   : > { %18787 = vst [vmem:[#allocation20_spill] sm:$0xff] %v14958_v61  ;;  %v4977_v52 = vunpack.c.l.bf16 %v4322_v56  ;;  %v4978_v7 = vunpack.c.h.bf16 %v4322_v56  ;;  %vm4531_vm4 = vcmp.eq.s32.totalorder %v4413_v40, %v12081_v47  ;;  %vm4532_vm5 = vcmp.eq.s32.totalorder %v4413_v40, %v12083_v48 }
 0x31c   : > { %18788 = vst [vmem:[#allocation21_spill] sm:$0xff] %v14960_v41  ;;  %v5231_v4 = vadd.f32 %v10634_v54, %v4975_v14  ;;  %vm4533_vm6 = vcmp.eq.s32.totalorder %v4413_v40, %v12085_v49  ;;  %vm4534_vm7 = vcmp.eq.s32.totalorder %v4413_v40, %v12091_v51  ;;  %v5232_v19 = vadd.f32 %v10635_v43, %v4976_v62 }
 0x31d   : > { %v5233_v35 = vadd.f32 %v10636_v38, %v4977_v52  ;;  %v5234_v29 = vadd.f32 %v10637_v16, %v4978_v7  ;;  %v10638_v18 = vsel %vm4531_vm4, 1.0, %v18377_v12  ;;  %v10639_v46 = vsel %vm4532_vm5, 1.0, %v18377_v12  ;;  %v18789_v52 = vld [vmem:[#allocation87_spill] sm:$0xff]  ;;  %v18790_v7 = vld [vmem:[#allocation68_spill] sm:$0xff] }
 0x31e   : > { %v10640_v26 = vsel %vm4533_vm6, 1.0, %v18377_v12  ;;  %v10641_v56 = vsel %vm4534_vm7, 1.0, %v18377_v12  ;;  %v4979_v54 = vunpack.c.l.bf16 %v14462_v17  ;;  %v14972_v14 = vpack.c.bf16 %v5232_v19, %v5231_v4 }
 0x31f   : > { %v14974_v41 = vpack.c.bf16 %v5234_v29, %v5233_v35  ;;  %v4980_v40 = vunpack.c.h.bf16 %v14462_v17  ;;  %v4981_v43 = vunpack.c.l.bf16 %v14467_v11  ;;  %v4982_v38 = vunpack.c.h.bf16 %v14467_v11 }
 0x320   : > { %v5235_v16 = vadd.f32 %v10638_v18, %v4979_v54  ;;  %v4307_v62 = vpack.c.bf16 %v14419_v55, %v14417_v20  ;;  %v4308_v61 = vpack.c.bf16 %v18790_v7, %v18789_v52  ;;  %vm4499_vm8 = vcmp.eq.s32.totalorder %v4389_v42, %v12081_v47  ;;  %v4419_v55 = vpop.permute.xlu2 %4418  ;;  %v4422_v52 = vpop.permute.xlu0 %4421 }
 0x321   : > { %6357 = vperm.xlu0 %11396, %v14984_v2   ;;  %v5236_v4 = vadd.f32 %v10639_v46, %v4980_v40  ;;  %v5237_v19 = vadd.f32 %v10640_v26, %v4981_v43  ;;  %vm4500_vm9 = vcmp.eq.s32.totalorder %v4389_v42, %v12083_v48  ;;  %v5238_v17 = vadd.f32 %v10641_v56, %v4982_v38  ;;  %v11533_v26 = vld [vmem:[%s11917_s4 + $0x18] sm:$0xff] }
 0x322   : > { %11391 = vset.pattern.permute.xlu1 %v18786_v3  ;;  %vm4501_vm10 = vcmp.eq.s32.totalorder %v4389_v42, %v12085_v49  ;;  %vm4502_vm11 = vcmp.eq.s32.totalorder %v4389_v42, %v12091_v51  ;;  %v10606_v20 = vsel %vm4499_vm8, 1.0, %v18377_v12  ;;  %v18791_v11 = vmov 7  }
 0x323   : > { %11390 = vset.pattern.permute.xlu2 %v18791_v11  ;;  %6339 = vperm.xlu1 %11391, %v14908_v36   ;;  %v14995_v35 = vpack.c.bf16 %v5236_v4, %v5235_v16  ;;  %v10607_v29 = vsel %vm4500_vm9, 1.0, %v18377_v12  ;;  %v10608_v18 = vsel %vm4501_vm10, 1.0, %v18377_v12  ;;  %v10609_v46 = vsel %vm4502_vm11, 1.0, %v18377_v12 }
 0x324   : > { %7325 = vperm.xlu2 %11390, %v11533_v26   ;;  %v15001_v56 = vpack.c.bf16 %v5238_v17, %v5237_v19  ;;  %v4947_v54 = vunpack.c.l.bf16 %v4307_v62  ;;  %v4948_v42 = vunpack.c.h.bf16 %v4307_v62  ;;  %v4949_v40 = vunpack.c.l.bf16 %v4308_v61 }
 0x325   : > { %18792 = vst [vmem:[#allocation22_spill] sm:$0xff] %v14995_v35  ;;  %v4950_v43 = vunpack.c.h.bf16 %v4308_v61  ;;  %vm4539_vm12 = vcmp.eq.s32.totalorder %v4419_v55, %v12081_v47  ;;  %vm4540_vm13 = vcmp.eq.s32.totalorder %v4419_v55, %v12083_v48  ;;  %vm4541_vm14 = vcmp.eq.s32.totalorder %v4419_v55, %v12085_v49 }
 0x326   : > { %18793 = vst [vmem:[#allocation32_spill] sm:$0xff] %v15001_v56  ;;  %v5203_v36 = vadd.f32 %v10606_v20, %v4947_v54  ;;  %v5204_v38 = vadd.f32 %v10607_v29, %v4948_v42  ;;  %v5205_v16 = vadd.f32 %v10608_v18, %v4949_v40  ;;  %vm4542_vm15 = vcmp.eq.s32.totalorder %v4419_v55, %v12091_v51  ;;  %v15016_v29 = vld [vmem:[%s11917_s4 + $0x60] sm:$0xff] }
 0x327   : > { %v5206_v7 = vadd.f32 %v10609_v46, %v4950_v43  ;;  %v10646_v4 = vsel %vm4539_vm12, 1.0, %v18377_v12  ;;  %v10647_v62 = vsel %vm4540_vm13, 1.0, %v18377_v12  ;;  %v10648_v61 = vsel %vm4541_vm14, 1.0, %v18377_v12 }
 0x328   : > { %v15010_v19 = vpack.c.bf16 %v5204_v38, %v5203_v36  ;;  %v10649_v17 = vsel %vm4542_vm15, 1.0, %v18377_v12  ;;  %v4987_v26 = vunpack.c.l.bf16 %v14445_v31  ;;  %v4988_v20 = vunpack.c.h.bf16 %v14445_v31  ;;  %v11535_v31 = vld [vmem:[%s11917_s4 + $0x30] sm:$0xff]  ;;  %v4398_v38 = vpop.permute.xlu1 %4397 }
 0x329   : > { %6360 = vperm.xlu0 %11396, %v15016_v29   ;;  %v15019_v55 = vpack.c.bf16 %v5206_v7, %v5205_v16  ;;  %v4989_v18 = vunpack.c.l.bf16 %v14450_v53  ;;  %v4990_v46 = vunpack.c.h.bf16 %v14450_v53  ;;  %vm4543_vm0 = vcmp.eq.s32.totalorder %v4422_v52, %v12081_v47  ;;  %v11536_v16 = vld [vmem:[%s11917_s4 + $0x20] sm:$0xff] }
 0x32a   : > { %v5243_v54 = vadd.f32 %v10646_v4, %v4987_v26  ;;  %v5244_v42 = vadd.f32 %v10647_v62, %v4988_v20  ;;  %vm4544_vm1 = vcmp.eq.s32.totalorder %v4422_v52, %v12083_v48  ;;  %vm4545_vm2 = vcmp.eq.s32.totalorder %v4422_v52, %v12085_v49 }
 0x32b   : > { %6342 = vperm.xlu1 %11391, %v11535_v31   ;;  %v5245_v40 = vadd.f32 %v10648_v61, %v4989_v18  ;;  %v5246_v43 = vadd.f32 %v10649_v17, %v4990_v46  ;;  %vm4546_vm3 = vcmp.eq.s32.totalorder %v4422_v52, %v12091_v51  ;;  %v10650_v36 = vsel %vm4543_vm0, 1.0, %v18377_v12  ;;  %v18796_v18 = vld [vmem:[#allocation69_spill] sm:$0xff] }
 0x32c   : > { %7328 = vperm.xlu2 %11390, %v11536_v16   ;;  %v15030_v53 = vpack.c.bf16 %v5244_v42, %v5243_v54  ;;  %v10651_v7 = vsel %vm4544_vm1, 1.0, %v18377_v12  ;;  %v10652_v4 = vsel %vm4545_vm2, 1.0, %v18377_v12  ;;  %v10653_v62 = vsel %vm4546_vm3, 1.0, %v18377_v12  ;;  %v18797_v54 = vld [vmem:[#allocation70_spill] sm:$0xff]  ;;  %v18798_v42 = vld [vmem:[#allocation79_spill] sm:$0xff] }
 0x32d   : > { %v15035_v26 = vpack.c.bf16 %v5246_v43, %v5245_v40  ;;  %v4991_v61 = vunpack.c.l.bf16 %v14520_v50  ;;  %v4992_v17 = vunpack.c.h.bf16 %v14520_v50  ;;  %v4993_v52 = vunpack.c.l.bf16 %v14526_v34 }
 0x32e   : > { %18794 = vst [vmem:[#allocation33_spill] sm:$0xff] %v15030_v53  ;;  %v4994_v20 = vunpack.c.h.bf16 %v14526_v34  ;;  %v4313_v46 = vpack.c.bf16 %v18796_v18, %v14478_v28  ;;  %v4314_v16 = vpack.c.bf16 %v18798_v42, %v18797_v54  ;;  %vm4511_vm4 = vcmp.eq.s32.totalorder %v4398_v38, %v12081_v47  ;;  %v4428_v34 = vpop.permute.xlu2 %4427  ;;  %v4431_v54 = vpop.permute.xlu0 %4430 }
 0x32f   : > { %18795 = vst [vmem:[#allocation34_spill] sm:$0xff] %v15035_v26  ;;  %v5247_v53 = vadd.f32 %v10650_v36, %v4991_v61  ;;  %v5248_v40 = vadd.f32 %v10651_v7, %v4992_v17  ;;  %v5249_v43 = vadd.f32 %v10652_v4, %v4993_v52  ;;  %vm4512_vm5 = vcmp.eq.s32.totalorder %v4398_v38, %v12083_v48  ;;  %v15057_v4 = vld [vmem:[%s11917_s4 + $0x68] sm:$0xff] }
 0x330   : > { %v5250_v26 = vadd.f32 %v10653_v62, %v4994_v20  ;;  %vm4513_vm6 = vcmp.eq.s32.totalorder %v4398_v38, %v12085_v49  ;;  %vm4514_vm7 = vcmp.eq.s32.totalorder %v4398_v38, %v12091_v51  ;;  %v10618_v50 = vsel %vm4511_vm4, 1.0, %v18377_v12 }
 0x331   : > { %11402 = vset.pattern.permute.xlu0 %v18791_v11  ;;  %v15051_v28 = vpack.c.bf16 %v5248_v40, %v5247_v53  ;;  %v10619_v18 = vsel %vm4512_vm5, 1.0, %v18377_v12  ;;  %v10620_v36 = vsel %vm4513_vm6, 1.0, %v18377_v12  ;;  %v10621_v7 = vsel %vm4514_vm7, 1.0, %v18377_v12 }
 0x332   : > { %7355 = vperm.xlu0 %11402, %v15057_v4   ;;  %v15060_v62 = vpack.c.bf16 %v5250_v26, %v5249_v43  ;;  %v4959_v38 = vunpack.c.l.bf16 %v4313_v46  ;;  %v4960_v61 = vunpack.c.h.bf16 %v4313_v46  ;;  %v4961_v17 = vunpack.c.l.bf16 %v4314_v16  ;;  %v11538_v46 = vld [vmem:[%s11917_s4 + $0x38] sm:$0xff] }
 0x333   : > { %18799 = vst [vmem:[#allocation35_spill] sm:$0xff] %v15051_v28  ;;  %11394 = vset.pattern.permute.xlu1 %v18791_v11  ;;  %v4962_v53 = vunpack.c.h.bf16 %v4314_v16  ;;  %vm4551_vm8 = vcmp.eq.s32.totalorder %v4428_v34, %v12081_v47  ;;  %vm4552_vm9 = vcmp.eq.s32.totalorder %v4428_v34, %v12083_v48  ;;  %vm4553_vm10 = vcmp.eq.s32.totalorder %v4428_v34, %v12085_v49 }
 0x334   : > { %18800 = vst [vmem:[#allocation36_spill] sm:$0xff] %v15060_v62  ;;  %11393 = vset.pattern.permute.xlu2 %v18786_v3  ;;  %7334 = vperm.xlu1 %11394, %v11535_v31   ;;  %v5215_v52 = vadd.f32 %v10618_v50, %v4959_v38  ;;  %v5216_v20 = vadd.f32 %v10619_v18, %v4960_v61  ;;  %v10658_v16 = vsel %vm4551_vm8, 1.0, %v18377_v12  ;;  %v10659_v40 = vsel %vm4552_vm9, 1.0, %v18377_v12 }
 0x335   : > { %v5217_v26 = vadd.f32 %v10620_v36, %v4961_v17  ;;  %vm4554_vm11 = vcmp.eq.s32.totalorder %v4428_v34, %v12091_v51  ;;  %6345 = vperm.xlu2 %11393, %v11538_v46   ;;  %v5218_v42 = vadd.f32 %v10621_v7, %v4962_v53  ;;  %v10660_v43 = vsel %vm4553_vm10, 1.0, %v18377_v12  ;;  %v4407_v53 = vpop.permute.xlu1 %4406 }
 0x336   : > { %v15072_v62 = vpack.c.bf16 %v5216_v20, %v5215_v52  ;;  %v10661_v28 = vsel %vm4554_vm11, 1.0, %v18377_v12  ;;  %v4999_v31 = vunpack.c.l.bf16 %v14505_v57  ;;  %v5000_v50 = vunpack.c.h.bf16 %v14505_v57 }
 0x337   : > { %v15077_v18 = vpack.c.bf16 %v5218_v42, %v5217_v26  ;;  %v5001_v34 = vunpack.c.l.bf16 %v14507_v39  ;;  %v5002_v36 = vunpack.c.h.bf16 %v14507_v39  ;;  %vm4555_vm12 = vcmp.eq.s32.totalorder %v4431_v54, %v12081_v47  ;;  %v15093_v42 = vld [vmem:[%s11917_s4 + $0x80] sm:$0xff] }
 0x338   : > { %v5255_v7 = vadd.f32 %v10658_v16, %v4999_v31  ;;  %v5256_v38 = vadd.f32 %v10659_v40, %v5000_v50  ;;  %vm4556_vm13 = vcmp.eq.s32.totalorder %v4431_v54, %v12083_v48  ;;  %vm4557_vm14 = vcmp.eq.s32.totalorder %v4431_v54, %v12085_v49  ;;  %v18803_v31 = vld [vmem:[#allocation84_spill] sm:$0xff] }
 0x339   : > { %v5257_v61 = vadd.f32 %v10660_v43, %v5001_v34  ;;  %v5258_v17 = vadd.f32 %v10661_v28, %v5002_v36  ;;  %vm4558_vm15 = vcmp.eq.s32.totalorder %v4431_v54, %v12091_v51  ;;  %v10662_v57 = vsel %vm4555_vm12, 1.0, %v18377_v12  ;;  %v18804_v34 = vld [vmem:[#allocation88_spill] sm:$0xff]  ;;  %v18805_v36 = vld [vmem:[#allocation89_spill] sm:$0xff] }
 0x33a   : > { %11406 = vset.pattern.permute.xlu0 %v18786_v3  ;;  %v15087_v52 = vpack.c.bf16 %v5256_v38, %v5255_v7  ;;  %v10663_v39 = vsel %vm4556_vm13, 1.0, %v18377_v12  ;;  %v10664_v20 = vsel %vm4557_vm14, 1.0, %v18377_v12  ;;  %v10665_v26 = vsel %vm4558_vm15, 1.0, %v18377_v12  ;;  %v11540_v38 = vld [vmem:[%s11917_s4 + $0x48] sm:$0xff] }
 0x33b   : > { %6372 = vperm.xlu0 %11406, %v15093_v42   ;;  %v15096_v28 = vpack.c.bf16 %v5258_v17, %v5257_v61  ;;  %v5003_v54 = vunpack.c.l.bf16 %v14564_v27  ;;  %v5004_v16 = vunpack.c.h.bf16 %v14564_v27  ;;  %v5005_v40 = vunpack.c.l.bf16 %v14566_v63 }
 0x33c   : > { %18801 = vst [vmem:[#allocation80_spill] sm:$0xff] %v15087_v52  ;;  %11397 = vset.pattern.permute.xlu1 %v18786_v3  ;;  %v5006_v43 = vunpack.c.h.bf16 %v14566_v63  ;;  %v4319_v50 = vpack.c.bf16 %v18803_v31, %v14532_v44  ;;  %v4320_v7 = vpack.c.bf16 %v18805_v36, %v18804_v34  ;;  %vm4523_vm0 = vcmp.eq.s32.totalorder %v4407_v53, %v12081_v47  ;;  %v5333_v63 = vpop.permute.xlu2 %5332  ;;  %v5336_v36 = vpop.permute.xlu0 %5335 }
 0x33d   : > { %18802 = vst [vmem:[#allocation40_spill] sm:$0xff] %v15096_v28  ;;  %11395 = vset.pattern.permute.xlu2 %v18791_v11  ;;  %6351 = vperm.xlu1 %11397, %v11540_v38   ;;  %v5259_v61 = vadd.f32 %v10662_v57, %v5003_v54  ;;  %v5260_v27 = vadd.f32 %v10663_v39, %v5004_v16  ;;  %v10630_v44 = vsel %vm4523_vm0, 1.0, %v18377_v12 }
 0x33e   : > { %v5261_v17 = vadd.f32 %v10664_v20, %v5005_v40  ;;  %vm4524_vm1 = vcmp.eq.s32.totalorder %v4407_v53, %v12083_v48  ;;  %7337 = vperm.xlu2 %11395, %v11538_v46   ;;  %v5262_v28 = vadd.f32 %v10665_v26, %v5006_v43  ;;  %vm4525_vm2 = vcmp.eq.s32.totalorder %v4407_v53, %v12085_v49 }
 0x33f   : > { %vm4526_vm3 = vcmp.eq.s32.totalorder %v4407_v53, %v12091_v51  ;;  %v15114_v31 = vpack.c.bf16 %v5260_v27, %v5259_v61  ;;  %v10631_v34 = vsel %vm4524_vm1, 1.0, %v18377_v12  ;;  %v10632_v57 = vsel %vm4525_vm2, 1.0, %v18377_v12  ;;  %v15126_v61 = vld [vmem:[%s11917_s4 + $0x98] sm:$0xff] }
 0x340   : > { %v10633_v39 = vsel %vm4526_vm3, 1.0, %v18377_v12  ;;  %v15119_v20 = vpack.c.bf16 %v5262_v28, %v5261_v17  ;;  %v4971_v46 = vunpack.c.l.bf16 %v4319_v50  ;;  %v4972_v26 = vunpack.c.h.bf16 %v4319_v50 }
 0x341   : > { %18806 = vst [vmem:[#allocation41_spill] sm:$0xff] %v15114_v31  ;;  %v4973_v54 = vunpack.c.l.bf16 %v4320_v7  ;;  %v4974_v16 = vunpack.c.h.bf16 %v4320_v7  ;;  %vm5427_vm4 = vcmp.eq.s32.totalorder %v5333_v63, %v12081_v47  ;;  %vm5428_vm5 = vcmp.eq.s32.totalorder %v5333_v63, %v12083_v48  ;;  %v11553_v31 = vld [vmem:[%s11917_s4 + $0x90] sm:$0xff] }
 0x342   : > { %18807 = vst [vmem:[#allocation45_spill] sm:$0xff] %v15119_v20  ;;  %vm5429_vm6 = vcmp.eq.s32.totalorder %v5333_v63, %v12085_v49  ;;  %v5227_v53 = vadd.f32 %v10630_v44, %v4971_v46  ;;  %v5228_v40 = vadd.f32 %v10631_v34, %v4972_v26  ;;  %vm5430_vm7 = vcmp.eq.s32.totalorder %v5333_v63, %v12091_v51 }
 0x343   : > { %v5229_v43 = vadd.f32 %v10632_v57, %v4973_v54  ;;  %6381 = vperm.xlu0 %11406, %v15126_v61   ;;  %v5230_v28 = vadd.f32 %v10633_v39, %v4974_v16  ;;  %v10670_v50 = vsel %vm5427_vm4, 1.0, %v18377_v12  ;;  %v10671_v7 = vsel %vm5428_vm5, 1.0, %v18377_v12 }
 0x344   : > { %v10672_v27 = vsel %vm5429_vm6, 1.0, %v18377_v12  ;;  %v15132_v17 = vpack.c.bf16 %v5228_v40, %v5227_v53  ;;  %v10673_v44 = vsel %vm5430_vm7, 1.0, %v18377_v12  ;;  %v5875_v34 = vunpack.c.l.bf16 %v14581_v9  ;;  %v4416_v40 = vpop.permute.xlu1 %4415 }
 0x345   : > { %v5876_v63 = vunpack.c.h.bf16 %v14581_v9  ;;  %11398 = vset.pattern.permute.xlu1 %v18791_v11  ;;  %v15138_v57 = vpack.c.bf16 %v5230_v28, %v5229_v43  ;;  %v5877_v39 = vunpack.c.l.bf16 %v14583_v33  ;;  %v5878_v46 = vunpack.c.h.bf16 %v14583_v33 }
 0x346   : > { %vm5431_vm8 = vcmp.eq.s32.totalorder %v5336_v36, %v12081_v47  ;;  %7340 = vperm.xlu2 %11395, %v14949_v24   ;;  %7343 = vperm.xlu1 %11398, %v11540_v38   ;;  %v6131_v26 = vadd.f32 %v10670_v50, %v5875_v34  ;;  %vm5432_vm9 = vcmp.eq.s32.totalorder %v5336_v36, %v12083_v48  ;;  %v5879_v50 = vunpack.c.l.bf16 %v14630_v6 }
 0x347   : > { %v6132_v54 = vadd.f32 %v10671_v7, %v5876_v63  ;;  %vm5433_vm10 = vcmp.eq.s32.totalorder %v5336_v36, %v12085_v49  ;;  %v6133_v9 = vadd.f32 %v10672_v27, %v5877_v39  ;;  %v6134_v16 = vadd.f32 %v10673_v44, %v5878_v46  ;;  %v15163_v44 = vld [vmem:[%s11917_s4 + $0xa0] sm:$0xff] }
 0x348   : > { %vm5434_vm11 = vcmp.eq.s32.totalorder %v5336_v36, %v12091_v51  ;;  %v10674_v53 = vsel %vm5431_vm8, 1.0, %v18377_v12  ;;  %v10675_v43 = vsel %vm5432_vm9, 1.0, %v18377_v12  ;;  %v10676_v24 = vsel %vm5433_vm10, 1.0, %v18377_v12 }
 0x349   : > { %v15148_v33 = vpack.c.bf16 %v6132_v54, %v6131_v26  ;;  %v10677_v38 = vsel %vm5434_vm11, 1.0, %v18377_v12  ;;  %v15153_v28 = vpack.c.bf16 %v6134_v16, %v6133_v9  ;;  %v5880_v7 = vunpack.c.h.bf16 %v14630_v6  ;;  %v5342_v6 = vpop.permute.xlu2 %5341 }
 0x34a   : > { %v5881_v27 = vunpack.c.l.bf16 %v14635_v37  ;;  %v5882_v36 = vunpack.c.h.bf16 %v14635_v37  ;;  %vm4535_vm12 = vcmp.eq.s32.totalorder %v4416_v40, %v12081_v47  ;;  %vm4536_vm13 = vcmp.eq.s32.totalorder %v4416_v40, %v12083_v48 }
 0x34b   : > { %vm4537_vm14 = vcmp.eq.s32.totalorder %v4416_v40, %v12085_v49  ;;  %6384 = vperm.xlu0 %11406, %v15163_v44   ;;  %v6135_v34 = vadd.f32 %v10674_v53, %v5879_v50  ;;  %v6136_v63 = vadd.f32 %v10675_v43, %v5880_v7  ;;  %vm4538_vm15 = vcmp.eq.s32.totalorder %v4416_v40, %v12091_v51  ;;  %v11543_v43 = vld [vmem:[%s11917_s4 + $0x50] sm:$0xff] }
 0x34c   : > { %v6137_v39 = vadd.f32 %v10676_v24, %v5881_v27  ;;  %v6138_v46 = vadd.f32 %v10677_v38, %v5882_v36  ;;  %v10642_v37 = vsel %vm4535_vm12, 1.0, %v18377_v12  ;;  %v10643_v26 = vsel %vm4536_vm13, 1.0, %v18377_v12 }
 0x34d   : > { %v10644_v54 = vsel %vm4537_vm14, 1.0, %v18377_v12  ;;  %v15170_v9 = vpack.c.bf16 %v6136_v63, %v6135_v34  ;;  %v10645_v16 = vsel %vm4538_vm15, 1.0, %v18377_v12  ;;  %v4983_v20 = vunpack.c.l.bf16 %v14599_v10  ;;  %v5351_v34 = vpop.permute.xlu0 %5350 }
 0x34e   : > { %v4984_v53 = vunpack.c.h.bf16 %v14599_v10  ;;  %11399 = vset.pattern.permute.xlu2 %v18786_v3  ;;  %7346 = vperm.xlu1 %11398, %v11543_v43   ;;  %v15177_v40 = vpack.c.bf16 %v6138_v46, %v6137_v39  ;;  %v4985_v24 = vunpack.c.l.bf16 %v14601_v23  ;;  %v4986_v38 = vunpack.c.h.bf16 %v14601_v23 }
 0x34f   : > { %vm5439_vm0 = vcmp.eq.s32.totalorder %v5342_v6, %v12081_v47  ;;  %6354 = vperm.xlu2 %11399, %v11543_v43   ;;  %v5239_v50 = vadd.f32 %v10642_v37, %v4983_v20  ;;  %vm5440_vm1 = vcmp.eq.s32.totalorder %v5342_v6, %v12083_v48  ;;  %vm5441_vm2 = vcmp.eq.s32.totalorder %v5342_v6, %v12085_v49 }
 0x350   : > { %v5240_v7 = vadd.f32 %v10643_v26, %v4984_v53  ;;  %v5241_v10 = vadd.f32 %v10644_v54, %v4985_v24  ;;  %v5242_v27 = vadd.f32 %v10645_v16, %v4986_v38  ;;  %vm5442_vm3 = vcmp.eq.s32.totalorder %v5342_v6, %v12091_v51  ;;  %v15202_v16 = vld [vmem:[%s11917_s4 + $0xa8] sm:$0xff] }
 0x351   : > { %v10682_v36 = vsel %vm5439_vm0, 1.0, %v18377_v12  ;;  %v10683_v23 = vsel %vm5440_vm1, 1.0, %v18377_v12  ;;  %v10684_v39 = vsel %vm5441_vm2, 1.0, %v18377_v12  ;;  %v10685_v20 = vsel %vm5442_vm3, 1.0, %v18377_v12 }
 0x352   : > { %v15186_v63 = vpack.c.bf16 %v5240_v7, %v5239_v50  ;;  %v15191_v46 = vpack.c.bf16 %v5242_v27, %v5241_v10  ;;  %v5887_v37 = vunpack.c.l.bf16 %v14613_v21  ;;  %v5888_v26 = vunpack.c.h.bf16 %v14613_v21  ;;  %v4425_v21 = vpop.permute.xlu1 %4424 }
 0x353   : > { %v5889_v6 = vunpack.c.l.bf16 %v14615_v25  ;;  %11412 = vset.pattern.permute.xlu0 %v18791_v11  ;;  %v5890_v54 = vunpack.c.h.bf16 %v14615_v25  ;;  %vm5451_vm4 = vcmp.eq.s32.totalorder %v5351_v34, %v12081_v47  ;;  %vm5452_vm5 = vcmp.eq.s32.totalorder %v5351_v34, %v12083_v48 }
 0x354   : > { %18808 = vst [vmem:[#allocation38_spill] sm:$0xff] %v15186_v63  ;;  %vm5453_vm6 = vcmp.eq.s32.totalorder %v5351_v34, %v12085_v49  ;;  %7379 = vperm.xlu0 %11412, %v15202_v16   ;;  %v6143_v53 = vadd.f32 %v10682_v36, %v5887_v37  ;;  %v6144_v43 = vadd.f32 %v10683_v23, %v5888_v26  ;;  %v10694_v50 = vsel %vm5451_vm4, 1.0, %v18377_v12 }
 0x355   : > { %18809 = vst [vmem:[#allocation46_spill] sm:$0xff] %v15191_v46  ;;  %v6145_v24 = vadd.f32 %v10684_v39, %v5889_v6  ;;  %vm5454_vm7 = vcmp.eq.s32.totalorder %v5351_v34, %v12091_v51  ;;  %v6146_v38 = vadd.f32 %v10685_v20, %v5890_v54  ;;  %v10695_v25 = vsel %vm5452_vm5, 1.0, %v18377_v12  ;;  %v5348_v54 = vpop.permute.xlu2 %5347 }
 0x356   : > { %v10696_v7 = vsel %vm5453_vm6, 1.0, %v18377_v12  ;;  %11401 = vset.pattern.permute.xlu1 %v18786_v3  ;;  %v15210_v10 = vpack.c.bf16 %v6144_v43, %v6143_v53  ;;  %v10697_v27 = vsel %vm5454_vm7, 1.0, %v18377_v12  ;;  %v5899_v36 = vunpack.c.l.bf16 %v14676_v60 }
 0x357   : > { %v5900_v23 = vunpack.c.h.bf16 %v14676_v60  ;;  %11400 = vset.pattern.permute.xlu2 %v18791_v11  ;;  %6363 = vperm.xlu1 %11401, %v15057_v4   ;;  %v15217_v34 = vpack.c.bf16 %v6146_v38, %v6145_v24  ;;  %v5901_v39 = vunpack.c.l.bf16 %v14681_v22  ;;  %v5902_v20 = vunpack.c.h.bf16 %v14681_v22 }
 0x358   : > { %vm4547_vm8 = vcmp.eq.s32.totalorder %v4425_v21, %v12081_v47  ;;  %7349 = vperm.xlu2 %11400, %v14984_v2   ;;  %v6155_v37 = vadd.f32 %v10694_v50, %v5899_v36  ;;  %vm4548_vm9 = vcmp.eq.s32.totalorder %v4425_v21, %v12083_v48  ;;  %vm4549_vm10 = vcmp.eq.s32.totalorder %v4425_v21, %v12085_v49 }
 0x359   : > { %v6156_v26 = vadd.f32 %v10695_v25, %v5900_v23  ;;  %v6157_v60 = vadd.f32 %v10696_v7, %v5901_v39  ;;  %v6158_v6 = vadd.f32 %v10697_v27, %v5902_v20  ;;  %vm4550_vm11 = vcmp.eq.s32.totalorder %v4425_v21, %v12091_v51  ;;  %v15243_v27 = vld [vmem:[%s11917_s4 + $0xc0] sm:$0xff]  ;;  %v5360_v39 = vpop.permute.xlu0 %5359 }
 0x35a   : > { %v10654_v4 = vsel %vm4547_vm8, 1.0, %v18377_v12  ;;  %v10655_v22 = vsel %vm4548_vm9, 1.0, %v18377_v12  ;;  %v10656_v2 = vsel %vm4549_vm10, 1.0, %v18377_v12  ;;  %v10657_v43 = vsel %vm4550_vm11, 1.0, %v18377_v12 }
 0x35b   : > { %v15227_v53 = vpack.c.bf16 %v6156_v26, %v6155_v37  ;;  %v15232_v24 = vpack.c.bf16 %v6158_v6, %v6157_v60  ;;  %v4995_v38 = vunpack.c.l.bf16 %v14646_v5  ;;  %v4996_v50 = vunpack.c.h.bf16 %v14646_v5  ;;  %v11546_v60 = vld [vmem:[%s11917_s4 + $0x70] sm:$0xff] }
 0x35c   : > { %v4997_v21 = vunpack.c.l.bf16 %v14651_v59  ;;  %v18812_v25 = vmov 5   ;;  %v4998_v7 = vunpack.c.h.bf16 %v14651_v59  ;;  %vm5447_vm12 = vcmp.eq.s32.totalorder %v5348_v54, %v12081_v47 }
 0x35d   : > { %18810 = vst [vmem:[#allocation42_spill] sm:$0xff] %v15227_v53  ;;  %11416 = vset.pattern.permute.xlu0 %v18812_v25  ;;  %vm5448_vm13 = vcmp.eq.s32.totalorder %v5348_v54, %v12083_v48  ;;  %vm5449_vm14 = vcmp.eq.s32.totalorder %v5348_v54, %v12085_v49  ;;  %v5251_v36 = vadd.f32 %v10654_v4, %v4995_v38  ;;  %v10690_v37 = vsel %vm5447_vm12, 1.0, %v18377_v12 }
 0x35e   : > { %18811 = vst [vmem:[#allocation81_spill] sm:$0xff] %v15232_v24  ;;  %5404 = vperm.xlu0 %11416, %v15243_v27   ;;  %v5252_v23 = vadd.f32 %v10655_v22, %v4996_v50  ;;  %v5253_v5 = vadd.f32 %v10656_v2, %v4997_v21  ;;  %vm5450_vm15 = vcmp.eq.s32.totalorder %v5348_v54, %v12091_v51  ;;  %v10691_v59 = vsel %vm5448_vm13, 1.0, %v18377_v12 }
 0x35f   : > { %v5254_v20 = vadd.f32 %v10657_v43, %v4998_v7  ;;  %v10692_v26 = vsel %vm5449_vm14, 1.0, %v18377_v12  ;;  %6366 = vperm.xlu1 %11401, %v11546_v60   ;;  %v10693_v46 = vsel %vm5450_vm15, 1.0, %v18377_v12  ;;  %v5895_v4 = vunpack.c.l.bf16 %v14660_v13 }
 0x360   : > { %v15251_v6 = vpack.c.bf16 %v5252_v23, %v5251_v36  ;;  %v5896_v22 = vunpack.c.h.bf16 %v14660_v13  ;;  %7352 = vperm.xlu2 %11400, %v15016_v29   ;;  %v5897_v2 = vunpack.c.l.bf16 %v14665_v30  ;;  %v5898_v43 = vunpack.c.h.bf16 %v14665_v30  ;;  %v4434_v29 = vpop.permute.xlu1 %4433 }
 0x361   : > { %v15257_v54 = vpack.c.bf16 %v5254_v20, %v5253_v5  ;;  %vm5463_vm0 = vcmp.eq.s32.totalorder %v5360_v39, %v12081_v47  ;;  %v6151_v38 = vadd.f32 %v10690_v37, %v5895_v4  ;;  %vm5464_vm1 = vcmp.eq.s32.totalorder %v5360_v39, %v12083_v48 }
 0x362   : > { %18813 = vst [vmem:[#allocation43_spill] sm:$0xff] %v15251_v6  ;;  %v6152_v50 = vadd.f32 %v10691_v59, %v5896_v22  ;;  %vm5465_vm2 = vcmp.eq.s32.totalorder %v5360_v39, %v12085_v49  ;;  %v6153_v21 = vadd.f32 %v10692_v26, %v5897_v2  ;;  %v6154_v7 = vadd.f32 %v10693_v46, %v5898_v43  ;;  %v15282_v26 = vld [vmem:[%s11917_s4 + $0xc8] sm:$0xff]  ;;  %v5357_v2 = vpop.permute.xlu2 %5356 }
 0x363   : > { %18814 = vst [vmem:[#allocation44_spill] sm:$0xff] %v15257_v54  ;;  %vm5466_vm3 = vcmp.eq.s32.totalorder %v5360_v39, %v12091_v51  ;;  %v10706_v13 = vsel %vm5463_vm0, 1.0, %v18377_v12  ;;  %v10707_v30 = vsel %vm5464_vm1, 1.0, %v18377_v12  ;;  %v10708_v23 = vsel %vm5465_vm2, 1.0, %v18377_v12 }
 0x364   : > { %v15266_v36 = vpack.c.bf16 %v6152_v50, %v6151_v38  ;;  %v10709_v5 = vsel %vm5466_vm3, 1.0, %v18377_v12  ;;  %v15271_v20 = vpack.c.bf16 %v6154_v7, %v6153_v21  ;;  %v5911_v37 = vunpack.c.l.bf16 %v14727_v15 }
 0x365   : > { %v5912_v46 = vunpack.c.h.bf16 %v14727_v15  ;;  %v5913_v39 = vunpack.c.l.bf16 %v14733_v58  ;;  %v5914_v59 = vunpack.c.h.bf16 %v14733_v58  ;;  %vm4559_vm4 = vcmp.eq.s32.totalorder %v4434_v29, %v12081_v47 }
 0x366   : > { %11421 = vset.pattern.permute.xlu0 %v18791_v11  ;;  %vm4560_vm5 = vcmp.eq.s32.totalorder %v4434_v29, %v12083_v48  ;;  %vm4561_vm6 = vcmp.eq.s32.totalorder %v4434_v29, %v12085_v49  ;;  %v6167_v4 = vadd.f32 %v10706_v13, %v5911_v37  ;;  %vm4562_vm7 = vcmp.eq.s32.totalorder %v4434_v29, %v12091_v51 }
 0x367   : > { %7391 = vperm.xlu0 %11421, %v15282_v26   ;;  %v6168_v22 = vadd.f32 %v10707_v30, %v5912_v46  ;;  %v6169_v15 = vadd.f32 %v10708_v23, %v5913_v39  ;;  %11404 = vset.pattern.permute.xlu1 %v18791_v11  ;;  %v6170_v58 = vadd.f32 %v10709_v5, %v5914_v59  ;;  %v10666_v43 = vsel %vm4559_vm4, 1.0, %v18377_v12  ;;  %v11548_v30 = vld [vmem:[%s11917_s4 + $0x78] sm:$0xff] }
 0x368   : > { %v10667_v38 = vsel %vm4560_vm5, 1.0, %v18377_v12  ;;  %v10668_v50 = vsel %vm4561_vm6, 1.0, %v18377_v12  ;;  %11403 = vset.pattern.permute.xlu2 %v18786_v3  ;;  %7358 = vperm.xlu1 %11404, %v11546_v60   ;;  %v10669_v7 = vsel %vm4562_vm7, 1.0, %v18377_v12  ;;  %v5007_v13 = vunpack.c.l.bf16 %v14696_v32 }
 0x369   : > { %v15291_v21 = vpack.c.bf16 %v6168_v22, %v6167_v4  ;;  %v5008_v29 = vunpack.c.h.bf16 %v14696_v32  ;;  %6369 = vperm.xlu2 %11403, %v11548_v30   ;;  %v15297_v23 = vpack.c.bf16 %v6170_v58, %v6169_v15  ;;  %v5009_v5 = vunpack.c.l.bf16 %v14698_v0  ;;  %v5369_v4 = vpop.permute.xlu0 %5368 }
 0x36a   : > { %v5010_v37 = vunpack.c.h.bf16 %v14698_v0  ;;  %vm5459_vm8 = vcmp.eq.s32.totalorder %v5357_v2, %v12081_v47  ;;  %v5263_v46 = vadd.f32 %v10666_v43, %v5007_v13  ;;  %vm5460_vm9 = vcmp.eq.s32.totalorder %v5357_v2, %v12083_v48 }
 0x36b   : > { %18815 = vst [vmem:[#allocation56_spill] sm:$0xff] %v15291_v21  ;;  %v5264_v60 = vadd.f32 %v10667_v38, %v5008_v29  ;;  %vm5461_vm10 = vcmp.eq.s32.totalorder %v5357_v2, %v12085_v49  ;;  %v5265_v39 = vadd.f32 %v10668_v50, %v5009_v5  ;;  %vm5462_vm11 = vcmp.eq.s32.totalorder %v5357_v2, %v12091_v51  ;;  %v15317_v2 = vld [vmem:[%s11917_s4 + $0xd0] sm:$0xff] }
 0x36c   : > { %18816 = vst [vmem:[#allocation39_spill] sm:$0xff] %v15297_v23  ;;  %v5266_v59 = vadd.f32 %v10669_v7, %v5010_v37  ;;  %v10702_v32 = vsel %vm5459_vm8, 1.0, %v18377_v12  ;;  %v10703_v0 = vsel %vm5460_vm9, 1.0, %v18377_v12  ;;  %v10704_v15 = vsel %vm5461_vm10, 1.0, %v18377_v12  ;;  %v18819_v7 = vld [vmem:[#allocation90_spill] sm:$0xff] }
 0x36d   : > { %v15306_v22 = vpack.c.bf16 %v5264_v60, %v5263_v46  ;;  %v10705_v58 = vsel %vm5462_vm11, 1.0, %v18377_v12  ;;  %v5907_v38 = vunpack.c.l.bf16 %v14710_v1  ;;  %v5908_v50 = vunpack.c.h.bf16 %v14710_v1  ;;  %v5339_v1 = vpop.permute.xlu1 %5338 }
 0x36e   : > { %v15311_v43 = vpack.c.bf16 %v5266_v59, %v5265_v39  ;;  %v5909_v13 = vunpack.c.l.bf16 %v18819_v7  ;;  %v5910_v29 = vunpack.c.h.bf16 %v18819_v7  ;;  %vm5475_vm12 = vcmp.eq.s32.totalorder %v5369_v4, %v12081_v47 }
 0x36f   : > { %18817 = vst [vmem:[#allocation53_spill] sm:$0xff] %v15306_v22  ;;  %7394 = vperm.xlu0 %11421, %v15317_v2   ;;  %vm5476_vm13 = vcmp.eq.s32.totalorder %v5369_v4, %v12083_v48  ;;  %vm5477_vm14 = vcmp.eq.s32.totalorder %v5369_v4, %v12085_v49  ;;  %v6163_v5 = vadd.f32 %v10702_v32, %v5907_v38  ;;  %v10718_v39 = vsel %vm5475_vm12, 1.0, %v18377_v12  ;;  %v18821_v38 = vld [vmem:[#allocation91_spill] sm:$0xff] }
 0x370   : > { %18818 = vst [vmem:[#allocation50_spill] sm:$0xff] %v15311_v43  ;;  %v6164_v37 = vadd.f32 %v10703_v0, %v5908_v50  ;;  %v6165_v46 = vadd.f32 %v10704_v15, %v5909_v13  ;;  %vm5478_vm15 = vcmp.eq.s32.totalorder %v5369_v4, %v12091_v51  ;;  %11407 = vset.pattern.permute.xlu1 %v18786_v3  ;;  %v10719_v59 = vsel %vm5476_vm13, 1.0, %v18377_v12  ;;  %v11550_v43 = vld [vmem:[%s11917_s4 + $0x88] sm:$0xff]  ;;  %v18820_v0 = vld [vmem:[#allocation86_spill] sm:$0xff] }
 0x371   : > { %v6166_v60 = vadd.f32 %v10705_v58, %v5910_v29  ;;  %v10720_v7 = vsel %vm5477_vm14, 1.0, %v18377_v12  ;;  %11405 = vset.pattern.permute.xlu2 %v18791_v11  ;;  %6375 = vperm.xlu1 %11407, %v11550_v43   ;;  %v10721_v32 = vsel %vm5478_vm15, 1.0, %v18377_v12  ;;  %v5923_v4 = vunpack.c.l.bf16 %v18820_v0 }
 0x372   : > { %v15331_v22 = vpack.c.bf16 %v6164_v37, %v6163_v5  ;;  %v5924_v15 = vunpack.c.h.bf16 %v18820_v0  ;;  %7361 = vperm.xlu2 %11405, %v11548_v30   ;;  %v5925_v50 = vunpack.c.l.bf16 %v18821_v38  ;;  %v5926_v13 = vunpack.c.h.bf16 %v18821_v38 }
 0x373   : > { %v15336_v58 = vpack.c.bf16 %v6166_v60, %v6165_v46  ;;  %vm5435_vm0 = vcmp.eq.s32.totalorder %v5339_v1, %v12081_v47  ;;  %v6179_v29 = vadd.f32 %v10718_v39, %v5923_v4  ;;  %vm5436_vm1 = vcmp.eq.s32.totalorder %v5339_v1, %v12083_v48  ;;  %v5366_v46 = vpop.permute.xlu2 %5365  ;;  %v18822_v4 = vld [vmem:[#allocation83_spill] sm:$0xff] }
 0x374   : > { %v6180_v54 = vadd.f32 %v10719_v59, %v5924_v15  ;;  %vm5437_vm2 = vcmp.eq.s32.totalorder %v5339_v1, %v12085_v49  ;;  %v6181_v5 = vadd.f32 %v10720_v7, %v5925_v50  ;;  %v6182_v37 = vadd.f32 %v10721_v32, %v5926_v13  ;;  %v11551_v50 = vld [vmem:[%s11917_s4 + $0xe8] sm:$0xff] }
 0x375   : > { %vm5438_vm3 = vcmp.eq.s32.totalorder %v5339_v1, %v12091_v51  ;;  %v10678_v30 = vsel %vm5435_vm0, 1.0, %v18377_v12  ;;  %v10679_v0 = vsel %vm5436_vm1, 1.0, %v18377_v12  ;;  %v10680_v38 = vsel %vm5437_vm2, 1.0, %v18377_v12  ;;  %v18823_v1 = vld [vmem:[#allocation16_spill] sm:$0xff] }
 0x376   : > { %v15345_v60 = vpack.c.bf16 %v6180_v54, %v6179_v29  ;;  %v10681_v39 = vsel %vm5438_vm3, 1.0, %v18377_v12  ;;  %v15351_v59 = vpack.c.bf16 %v6182_v37, %v6181_v5  ;;  %v5883_v7 = vunpack.c.l.bf16 %v18822_v4  ;;  %v5378_v37 = vpop.permute.xlu0 %5377 }
 0x377   : > { %11428 = vset.pattern.permute.xlu0 %v18812_v25  ;;  %v5884_v32 = vunpack.c.h.bf16 %v18822_v4  ;;  %v5885_v15 = vunpack.c.l.bf16 %v18823_v1  ;;  %v5886_v54 = vunpack.c.h.bf16 %v18823_v1  ;;  %vm5471_vm4 = vcmp.eq.s32.totalorder %v5366_v46, %v12081_v47 }
 0x378   : > { %5419 = vperm.xlu0 %11428, %v11551_v50   ;;  %vm5472_vm5 = vcmp.eq.s32.totalorder %v5366_v46, %v12083_v48  ;;  %vm5473_vm6 = vcmp.eq.s32.totalorder %v5366_v46, %v12085_v49  ;;  %v6139_v13 = vadd.f32 %v10678_v30, %v5883_v7  ;;  %vm5474_vm7 = vcmp.eq.s32.totalorder %v5366_v46, %v12091_v51 }
 0x379   : > { %v6140_v29 = vadd.f32 %v10679_v0, %v5884_v32  ;;  %v6141_v5 = vadd.f32 %v10680_v38, %v5885_v15  ;;  %11408 = vset.pattern.permute.xlu1 %v18791_v11  ;;  %v6142_v4 = vadd.f32 %v10681_v39, %v5886_v54  ;;  %v10714_v6 = vsel %vm5471_vm4, 1.0, %v18377_v12  ;;  %v18824_v0 = vld [vmem:[#allocation15_spill] sm:$0xff]  ;;  %v18825_v39 = vld [vmem:[#allocation85_spill] sm:$0xff] }
 0x37a   : > { %v10715_v50 = vsel %vm5472_vm5, 1.0, %v18377_v12  ;;  %v10716_v1 = vsel %vm5473_vm6, 1.0, %v18377_v12  ;;  %7364 = vperm.xlu2 %11405, %v15093_v42   ;;  %7367 = vperm.xlu1 %11408, %v11550_v43   ;;  %v10717_v30 = vsel %vm5474_vm7, 1.0, %v18377_v12  ;;  %v5919_v38 = vunpack.c.l.bf16 %v18824_v0 }
 0x37b   : > { %v15367_v63 = vpack.c.bf16 %v6140_v29, %v6139_v13  ;;  %v5920_v46 = vunpack.c.h.bf16 %v18824_v0  ;;  %v15372_v7 = vpack.c.bf16 %v6142_v4, %v6141_v5  ;;  %v5921_v32 = vunpack.c.l.bf16 %v18825_v39  ;;  %v5345_v5 = vpop.permute.xlu1 %5344 }
 0x37c   : > { %v5922_v15 = vunpack.c.h.bf16 %v18825_v39  ;;  %vm5487_vm8 = vcmp.eq.s32.totalorder %v5378_v37, %v12081_v47  ;;  %v6175_v54 = vadd.f32 %v10714_v6, %v5919_v38  ;;  %vm5488_vm9 = vcmp.eq.s32.totalorder %v5378_v37, %v12083_v48 }
 0x37d   : > { %v6176_v42 = vadd.f32 %v10715_v50, %v5920_v46  ;;  %vm5489_vm10 = vcmp.eq.s32.totalorder %v5378_v37, %v12085_v49  ;;  %v6177_v43 = vadd.f32 %v10716_v1, %v5921_v32  ;;  %vm5490_vm11 = vcmp.eq.s32.totalorder %v5378_v37, %v12091_v51  ;;  %v11552_v50 = vld [vmem:[%s11917_s4 + $0xf0] sm:$0xff]  ;;  %v18826_v37 = vld [vmem:[#allocation18_spill] sm:$0xff] }
 0x37e   : > { %v6178_v13 = vadd.f32 %v10717_v30, %v5922_v15  ;;  %v10730_v29 = vsel %vm5487_vm8, 1.0, %v18377_v12  ;;  %v10731_v0 = vsel %vm5488_vm9, 1.0, %v18377_v12  ;;  %v10732_v39 = vsel %vm5489_vm10, 1.0, %v18377_v12 }
 0x37f   : > { %v15381_v4 = vpack.c.bf16 %v6176_v42, %v6175_v54  ;;  %v10733_v6 = vsel %vm5490_vm11, 1.0, %v18377_v12  ;;  %v5935_v1 = vunpack.c.l.bf16 %v14827_v8  ;;  %v5936_v30 = vunpack.c.h.bf16 %v14827_v8 }
 0x380   : > { %5422 = vperm.xlu0 %11428, %v11552_v50   ;;  %v15387_v38 = vpack.c.bf16 %v6178_v13, %v6177_v43  ;;  %v5937_v46 = vunpack.c.l.bf16 %v18826_v37  ;;  %v5938_v32 = vunpack.c.h.bf16 %v18826_v37  ;;  %vm5443_vm12 = vcmp.eq.s32.totalorder %v5345_v5, %v12081_v47  ;;  %v5375_v43 = vpop.permute.xlu2 %5374 }
 0x381   : > { %vm5444_vm13 = vcmp.eq.s32.totalorder %v5345_v5, %v12083_v48  ;;  %vm5445_vm14 = vcmp.eq.s32.totalorder %v5345_v5, %v12085_v49  ;;  %v6191_v15 = vadd.f32 %v10730_v29, %v5935_v1  ;;  %v6192_v54 = vadd.f32 %v10731_v0, %v5936_v30  ;;  %v18828_v0 = vld [vmem:[#allocation92_spill] sm:$0xff] }
 0x382   : > { %v6193_v42 = vadd.f32 %v10732_v39, %v5937_v46  ;;  %vm5446_vm15 = vcmp.eq.s32.totalorder %v5345_v5, %v12091_v51  ;;  %11409 = vset.pattern.permute.xlu2 %v18786_v3  ;;  %v6194_v8 = vadd.f32 %v10733_v6, %v5938_v32  ;;  %v10686_v13 = vsel %vm5443_vm12, 1.0, %v18377_v12  ;;  %7370 = vperm.xlu1 %11408, %v11553_v31   ;;  %v18830_v6 = vld [vmem:[#allocation93_spill] sm:$0xff] }
 0x383   : > { %v10687_v50 = vsel %vm5444_vm13, 1.0, %v18377_v12  ;;  %v10688_v37 = vsel %vm5445_vm14, 1.0, %v18377_v12  ;;  %6378 = vperm.xlu2 %11409, %v11553_v31   ;;  %v15402_v52 = vpack.c.bf16 %v6192_v54, %v6191_v15  ;;  %v10689_v29 = vsel %vm5446_vm15, 1.0, %v18377_v12 }
 0x384   : > { %v5891_v39 = vunpack.c.l.bf16 %v18828_v0  ;;  %v5892_v5 = vunpack.c.h.bf16 %v18828_v0  ;;  %v15407_v1 = vpack.c.bf16 %v6194_v8, %v6193_v42  ;;  %v5893_v30 = vunpack.c.l.bf16 %v18830_v6  ;;  %v5387_v42 = vpop.permute.xlu0 %5386 }
 0x385   : > { %18827 = vst [vmem:[#allocation55_spill] sm:$0xff] %v15402_v52  ;;  %v5894_v46 = vunpack.c.h.bf16 %v18830_v6  ;;  %vm5483_vm0 = vcmp.eq.s32.totalorder %v5375_v43, %v12081_v47  ;;  %vm5484_vm1 = vcmp.eq.s32.totalorder %v5375_v43, %v12083_v48  ;;  %vm5485_vm2 = vcmp.eq.s32.totalorder %v5375_v43, %v12085_v49  ;;  %v18832_v6 = vld [vmem:[#allocation29_spill] sm:$0xff] }
 0x386   : > { %18829 = vst [vmem:[#allocation57_spill] sm:$0xff] %v15407_v1  ;;  %v6147_v32 = vadd.f32 %v10686_v13, %v5891_v39  ;;  %v6148_v56 = vadd.f32 %v10687_v50, %v5892_v5  ;;  %v6149_v31 = vadd.f32 %v10688_v37, %v5893_v30  ;;  %vm5486_vm3 = vcmp.eq.s32.totalorder %v5375_v43, %v12091_v51  ;;  %v11554_v39 = vld [vmem:[%s11917_s4 + $0xf8] sm:$0xff] }
 0x387   : > { %v6150_v15 = vadd.f32 %v10689_v29, %v5894_v46  ;;  %v10726_v54 = vsel %vm5483_vm0, 1.0, %v18377_v12  ;;  %v10727_v0 = vsel %vm5484_vm1, 1.0, %v18377_v12  ;;  %v10728_v13 = vsel %vm5485_vm2, 1.0, %v18377_v12  ;;  %v18831_v37 = vld [vmem:[#allocation94_spill] sm:$0xff] }
 0x388   : > { %11435 = vset.pattern.permute.xlu0 %v18786_v3  ;;  %v15417_v8 = vpack.c.bf16 %v6148_v56, %v6147_v32  ;;  %v10729_v50 = vsel %vm5486_vm3, 1.0, %v18377_v12  ;;  %v5931_v29 = vunpack.c.l.bf16 %v18831_v37  ;;  %v5932_v43 = vunpack.c.h.bf16 %v18831_v37 }
 0x389   : > { %6417 = vperm.xlu0 %11435, %v11554_v39   ;;  %v15423_v5 = vpack.c.bf16 %v6150_v15, %v6149_v31  ;;  %v5933_v30 = vunpack.c.l.bf16 %v18832_v6  ;;  %v5934_v46 = vunpack.c.h.bf16 %v18832_v6  ;;  %vm5499_vm4 = vcmp.eq.s32.totalorder %v5387_v42, %v12081_v47  ;;  %v5354_v31 = vpop.permute.xlu1 %5353 }
 0x38a   : > { %vm5500_vm5 = vcmp.eq.s32.totalorder %v5387_v42, %v12083_v48  ;;  %vm5501_vm6 = vcmp.eq.s32.totalorder %v5387_v42, %v12085_v49  ;;  %v6187_v56 = vadd.f32 %v10726_v54, %v5931_v29  ;;  %v6188_v32 = vadd.f32 %v10727_v0, %v5932_v43  ;;  %11411 = vset.pattern.permute.xlu1 %v18786_v3  ;;  %v18834_v0 = vld [vmem:[#allocation28_spill] sm:$0xff]  ;;  %v18836_v29 = vld [vmem:[#allocation31_spill] sm:$0xff] }
 0x38b   : > { %v6189_v1 = vadd.f32 %v10728_v13, %v5933_v30  ;;  %vm5502_vm7 = vcmp.eq.s32.totalorder %v5387_v42, %v12091_v51  ;;  %11410 = vset.pattern.permute.xlu2 %v18791_v11  ;;  %v6190_v15 = vadd.f32 %v10729_v50, %v5934_v46  ;;  %v10742_v39 = vsel %vm5499_vm4, 1.0, %v18377_v12  ;;  %6387 = vperm.xlu1 %11411, %v15202_v16  }
 0x38c   : > { %v10743_v37 = vsel %vm5500_vm5, 1.0, %v18377_v12  ;;  %v10744_v6 = vsel %vm5501_vm6, 1.0, %v18377_v12  ;;  %7373 = vperm.xlu2 %11410, %v15126_v61   ;;  %v15439_v52 = vpack.c.bf16 %v6188_v32, %v6187_v56  ;;  %v10745_v54 = vsel %vm5502_vm7, 1.0, %v18377_v12 }
 0x38d   : > { %v5947_v42 = vunpack.c.l.bf16 %v18834_v0  ;;  %v5948_v13 = vunpack.c.h.bf16 %v18834_v0  ;;  %v15445_v50 = vpack.c.bf16 %v6190_v15, %v6189_v1  ;;  %v5949_v43 = vunpack.c.l.bf16 %v18836_v29  ;;  %v5384_v1 = vpop.permute.xlu2 %5383 }
 0x38e   : > { %18833 = vst [vmem:[#allocation51_spill] sm:$0xff] %v15439_v52  ;;  %v5950_v30 = vunpack.c.h.bf16 %v18836_v29  ;;  %vm5455_vm8 = vcmp.eq.s32.totalorder %v5354_v31, %v12081_v47  ;;  %vm5456_vm9 = vcmp.eq.s32.totalorder %v5354_v31, %v12083_v48  ;;  %vm5457_vm10 = vcmp.eq.s32.totalorder %v5354_v31, %v12085_v49  ;;  %v18840_v29 = vld [vmem:[#allocation17_spill] sm:$0xff] }
 0x38f   : > { %18835 = vst [vmem:[#allocation54_spill] sm:$0xff] %v15445_v50  ;;  %v6203_v61 = vadd.f32 %v10742_v39, %v5947_v42  ;;  %v6204_v46 = vadd.f32 %v10743_v37, %v5948_v13  ;;  %v6205_v56 = vadd.f32 %v10744_v6, %v5949_v43  ;;  %vm5458_vm11 = vcmp.eq.s32.totalorder %v5354_v31, %v12091_v51  ;;  %v5396_v42 = vpop.permute.xlu0 %5395  ;;  %v18839_v6 = vld [vmem:[#allocation23_spill] sm:$0xff] }
 0x390   : > { %v6206_v32 = vadd.f32 %v10745_v54, %v5950_v30  ;;  %v10698_v16 = vsel %vm5455_vm8, 1.0, %v18377_v12  ;;  %v10699_v0 = vsel %vm5456_vm9, 1.0, %v18377_v12  ;;  %v10700_v39 = vsel %vm5457_vm10, 1.0, %v18377_v12 }
 0x391   : > { %11438 = vset.pattern.permute.xlu0 %v18791_v11  ;;  %v15455_v15 = vpack.c.bf16 %v6204_v46, %v6203_v61  ;;  %v10701_v37 = vsel %vm5458_vm11, 1.0, %v18377_v12  ;;  %v5903_v54 = vunpack.c.l.bf16 %v18839_v6  ;;  %v5904_v31 = vunpack.c.h.bf16 %v18839_v6 }
 0x392   : > { %v15460_v13 = vpack.c.bf16 %v6206_v32, %v6205_v56  ;;  %v5905_v43 = vunpack.c.l.bf16 %v18840_v29  ;;  %v5906_v30 = vunpack.c.h.bf16 %v18840_v29  ;;  %vm5495_vm12 = vcmp.eq.s32.totalorder %v5384_v1, %v12081_v47 }
 0x393   : > { %18837 = vst [vmem:[#allocation47_spill] sm:$0xff] %v15455_v15  ;;  %vm5496_vm13 = vcmp.eq.s32.totalorder %v5384_v1, %v12083_v48  ;;  %vm5497_vm14 = vcmp.eq.s32.totalorder %v5384_v1, %v12085_v49  ;;  %v6159_v61 = vadd.f32 %v10698_v16, %v5903_v54  ;;  %v6160_v46 = vadd.f32 %v10699_v0, %v5904_v31  ;;  %v18841_v16 = vld [vmem:[#allocation26_spill] sm:$0xff]  ;;  %v5363_v31 = vpop.permute.xlu1 %5362 }
 0x394   : > { %18838 = vst [vmem:[#allocation48_spill] sm:$0xff] %v15460_v13  ;;  %v6161_v15 = vadd.f32 %v10700_v39, %v5905_v43  ;;  %vm5498_vm15 = vcmp.eq.s32.totalorder %v5384_v1, %v12091_v51  ;;  %7376 = vperm.xlu2 %11410, %v15163_v44   ;;  %v6162_v56 = vadd.f32 %v10701_v37, %v5906_v30  ;;  %v10738_v32 = vsel %vm5495_vm12, 1.0, %v18377_v12  ;;  %v11555_v13 = vld [vmem:[%s11917_s4 + $0xb0] sm:$0xff]  ;;  %v18842_v44 = vld [vmem:[#allocation27_spill] sm:$0xff] }
 0x395   : > { %v10739_v6 = vsel %vm5496_vm13, 1.0, %v18377_v12  ;;  %v10740_v29 = vsel %vm5497_vm14, 1.0, %v18377_v12  ;;  %6390 = vperm.xlu1 %11411, %v11555_v13   ;;  %v15475_v50 = vpack.c.bf16 %v6160_v46, %v6159_v61  ;;  %v10741_v52 = vsel %vm5498_vm15, 1.0, %v18377_v12 }
 0x396   : > { %v5943_v0 = vunpack.c.l.bf16 %v18841_v16  ;;  %v5944_v39 = vunpack.c.h.bf16 %v18841_v16  ;;  %v15480_v1 = vpack.c.bf16 %v6162_v56, %v6161_v15  ;;  %v5945_v37 = vunpack.c.l.bf16 %v18842_v44 }
 0x397   : > { %v5946_v54 = vunpack.c.h.bf16 %v18842_v44  ;;  %vm5511_vm0 = vcmp.eq.s32.totalorder %v5396_v42, %v12081_v47  ;;  %vm5512_vm1 = vcmp.eq.s32.totalorder %v5396_v42, %v12083_v48  ;;  %vm5513_vm2 = vcmp.eq.s32.totalorder %v5396_v42, %v12085_v49 }
 0x398   : > { %v6199_v43 = vadd.f32 %v10738_v32, %v5943_v0  ;;  %v6200_v30 = vadd.f32 %v10739_v6, %v5944_v39  ;;  %v6201_v61 = vadd.f32 %v10740_v29, %v5945_v37  ;;  %vm5514_vm3 = vcmp.eq.s32.totalorder %v5396_v42, %v12091_v51  ;;  %v15499_v42 = vpop.permute.xlu0 %6324 }
 0x399   : > { %v6202_v46 = vadd.f32 %v10741_v52, %v5946_v54  ;;  %v10754_v15 = vsel %vm5511_vm0, 1.0, %v18377_v12  ;;  %v10755_v16 = vsel %vm5512_vm1, 1.0, %v18377_v12  ;;  %v10756_v44 = vsel %vm5513_vm2, 1.0, %v18377_v12  ;;  %v18845_v52 = vld [vmem:[#allocation30_spill] sm:$0xff] }
 0x39a   : > { %v15489_v56 = vpack.c.bf16 %v6200_v30, %v6199_v43  ;;  %v10757_v35 = vsel %vm5514_vm3, 1.0, %v18377_v12  ;;  %v5959_v6 = vunpack.c.l.bf16 %v14935_v45  ;;  %v5960_v29 = vunpack.c.h.bf16 %v14935_v45  ;;  %v5393_v45 = vpop.permute.xlu2 %5392  ;;  %v11556_v30 = vld [vmem:[%s11917_s4 + $0xb8] sm:$0xff] }
 0x39b   : > { %v15494_v32 = vpack.c.bf16 %v6202_v46, %v6201_v61  ;;  %v5961_v0 = vunpack.c.l.bf16 %v18845_v52  ;;  %v5962_v39 = vunpack.c.h.bf16 %v18845_v52  ;;  %vm5467_vm4 = vcmp.eq.s32.totalorder %v5363_v31, %v12081_v47 }
 0x39c   : > { %18843 = vst [vmem:[#allocation49_spill] sm:$0xff] %v15489_v56  ;;  %vm5468_vm5 = vcmp.eq.s32.totalorder %v5363_v31, %v12083_v48  ;;  %vm5469_vm6 = vcmp.eq.s32.totalorder %v5363_v31, %v12085_v49  ;;  %11413 = vset.pattern.permute.xlu2 %v18786_v3  ;;  %v6215_v37 = vadd.f32 %v10754_v15, %v5959_v6  ;;  %v10710_v46 = vsel %vm5467_vm4, 1.0, %v18377_v12 }
 0x39d   : > { %18844 = vst [vmem:[#allocation52_spill] sm:$0xff] %v15494_v32  ;;  %v6216_v54 = vadd.f32 %v10755_v16, %v5960_v29  ;;  %v6217_v43 = vadd.f32 %v10756_v44, %v5961_v0  ;;  %vm5470_vm7 = vcmp.eq.s32.totalorder %v5363_v31, %v12091_v51  ;;  %6393 = vperm.xlu2 %11413, %v11556_v30   ;;  %v10711_v52 = vsel %vm5468_vm5, 1.0, %v18377_v12  ;;  %v18847_v16 = vld [vmem:[#allocation37_spill] sm:$0xff] }
 0x39e   : > { %v6218_v61 = vadd.f32 %v10757_v35, %v5962_v39  ;;  %v10712_v32 = vsel %vm5469_vm6, 1.0, %v18377_v12  ;;  %11414 = vset.pattern.permute.xlu1 %v18791_v11  ;;  %v10713_v15 = vsel %vm5470_vm7, 1.0, %v18377_v12  ;;  %v5915_v44 = vunpack.c.l.bf16 %v18847_v16  ;;  %v18849_v35 = vld [vmem:[#allocation24_spill] sm:$0xff] }
 0x39f   : > { %v15512_v56 = vpack.c.bf16 %v6216_v54, %v6215_v37  ;;  %v5916_v31 = vunpack.c.h.bf16 %v18847_v16  ;;  %7382 = vperm.xlu1 %11414, %v11555_v13   ;;  %v5917_v29 = vunpack.c.l.bf16 %v18849_v35  ;;  %v5918_v0 = vunpack.c.h.bf16 %v18849_v35  ;;  %v5372_v37 = vpop.permute.xlu1 %5371 }
 0x3a0   : > { %v15517_v6 = vpack.c.bf16 %v6218_v61, %v6217_v43  ;;  %vm5507_vm8 = vcmp.eq.s32.totalorder %v5393_v45, %v12081_v47  ;;  %v6171_v39 = vadd.f32 %v10710_v46, %v5915_v44  ;;  %vm5508_vm9 = vcmp.eq.s32.totalorder %v5393_v45, %v12083_v48  ;;  %v18852_v44 = vld [vmem:[#allocation25_spill] sm:$0xff] }
 0x3a1   : > { %18846 = vst [vmem:[#allocation60_spill] sm:$0xff] %v15512_v56  ;;  %v6172_v23 = vadd.f32 %v10711_v52, %v5916_v31  ;;  %vm5509_vm10 = vcmp.eq.s32.totalorder %v5393_v45, %v12085_v49  ;;  %v6173_v54 = vadd.f32 %v10712_v32, %v5917_v29  ;;  %v6174_v56 = vadd.f32 %v10713_v15, %v5918_v0  ;;  %v18853_v32 = vld [vmem:[#allocation19_spill] sm:$0xff] }
 0x3a2   : > { %18848 = vst [vmem:[#allocation61_spill] sm:$0xff] %v15517_v6  ;;  %vm5510_vm11 = vcmp.eq.s32.totalorder %v5393_v45, %v12091_v51  ;;  %v10750_v13 = vsel %vm5507_vm8, 1.0, %v18377_v12  ;;  %v10751_v61 = vsel %vm5508_vm9, 1.0, %v18377_v12  ;;  %v10752_v16 = vsel %vm5509_vm10, 1.0, %v18377_v12  ;;  %v5402_v6 = vpop.permute.xlu2 %5401 }
 0x3a3   : > { %v15526_v43 = vpack.c.bf16 %v6172_v23, %v6171_v39  ;;  %v10753_v46 = vsel %vm5510_vm11, 1.0, %v18377_v12  ;;  %v15531_v52 = vpack.c.bf16 %v6174_v56, %v6173_v54  ;;  %v5955_v31 = vunpack.c.l.bf16 %v18852_v44  ;;  %v15543_v23 = vpop.permute.xlu0 %6333 }
 0x3a4   : > { %v5956_v35 = vunpack.c.h.bf16 %v18852_v44  ;;  %v5957_v15 = vunpack.c.l.bf16 %v18853_v32  ;;  %v5958_v45 = vunpack.c.h.bf16 %v18853_v32  ;;  %vm6419_vm12 = vcmp.eq.s32.totalorder %v15499_v42, %v12081_v47 }
 0x3a5   : > { %18850 = vst [vmem:[#allocation66_spill] sm:$0xff] %v15526_v43  ;;  %vm6420_vm13 = vcmp.eq.s32.totalorder %v15499_v42, %v12083_v48  ;;  %vm6421_vm14 = vcmp.eq.s32.totalorder %v15499_v42, %v12085_v49  ;;  %11415 = vset.pattern.permute.xlu2 %v18791_v11  ;;  %v6211_v56 = vadd.f32 %v10750_v13, %v5955_v31  ;;  %v10798_v54 = vsel %vm6419_vm12, 1.0, %v18377_v12 }
 0x3a6   : > { %18851 = vst [vmem:[#allocation62_spill] sm:$0xff] %v15531_v52  ;;  %v6212_v29 = vadd.f32 %v10751_v61, %v5956_v35  ;;  %v6213_v0 = vadd.f32 %v10752_v16, %v5957_v15  ;;  %vm6422_vm15 = vcmp.eq.s32.totalorder %v15499_v42, %v12091_v51  ;;  %7385 = vperm.xlu2 %11415, %v11556_v30   ;;  %v10799_v44 = vsel %vm6420_vm13, 1.0, %v18377_v12  ;;  %v11195_v35 = vld [vmem:[%s11927_s27 + $0x38] sm:$0xff] }
 0x3a7   : > { %v6214_v39 = vadd.f32 %v10753_v46, %v5958_v45  ;;  %v10800_v32 = vsel %vm6421_vm14, 1.0, %v18377_v12  ;;  %11417 = vset.pattern.permute.xlu1 %v18812_v25  ;;  %v10801_v61 = vsel %vm6422_vm15, 1.0, %v18377_v12  ;;  %v6867_v42 = vunpack.c.l.bf16 %v15148_v33  ;;  %v11203_v15 = vld [vmem:[%s11927_s27 + $0x78] sm:$0xff]  ;;  %v15579_v21 = vpop.permute.xlu1 %5380  ;;  %8531 = vmatpush.bf16.msra.mxu0 %v11195_v35 }
 0x3a8   : > { %v15552_v13 = vpack.c.bf16 %v6212_v29, %v6211_v56  ;;  %v6868_v30 = vunpack.c.h.bf16 %v15148_v33  ;;  %5407 = vperm.xlu1 %11417, %v15282_v26   ;;  %v6869_v46 = vunpack.c.l.bf16 %v15153_v28  ;;  %v6870_v31 = vunpack.c.h.bf16 %v15153_v28  ;;  %v11211_v45 = vld [vmem:[%s11927_s27 + $0xb8] sm:$0xff]  ;;  %8620 = vmatpush.bf16.msra.mxu1 %v11203_v15 }
 0x3a9   : > { %v15558_v16 = vpack.c.bf16 %v6214_v39, %v6213_v0  ;;  %vm5479_vm0 = vcmp.eq.s32.totalorder %v5372_v37, %v12081_v47  ;;  %v15566_v56 = vadd.f32 %v10798_v54, %v6867_v42  ;;  %vm5480_vm1 = vcmp.eq.s32.totalorder %v5372_v37, %v12083_v48  ;;  %v11219_v33 = vld [vmem:[%s11927_s27 + $0xf8] sm:$0xff]  ;;  %v11194_v54 = vld [vmem:[%s11927_s27 + $0x30] sm:$0xff]  ;;  %8709 = vmatpush.bf16.msra.mxu2 %v11211_v45 }
 0x3aa   : > { %18854 = vst [vmem:[#allocation63_spill] sm:$0xff] %v15552_v13  ;;  %v15568_v29 = vadd.f32 %v10799_v44, %v6868_v30  ;;  %vm5481_vm2 = vcmp.eq.s32.totalorder %v5372_v37, %v12085_v49  ;;  %v15573_v0 = vadd.f32 %v10800_v32, %v6869_v46  ;;  %v15575_v28 = vadd.f32 %v10801_v61, %v6870_v31  ;;  %v11202_v44 = vld [vmem:[%s11927_s27 + $0x70] sm:$0xff]  ;;  %v18856_v46 = vld [vmem:[#allocation20_spill] sm:$0xff] }
 0x3ab   : > { %18855 = vst [vmem:[#allocation64_spill] sm:$0xff] %v15558_v16  ;;  %vm5482_vm3 = vcmp.eq.s32.totalorder %v5372_v37, %v12091_v51  ;;  %v10722_v39 = vsel %vm5479_vm0, 1.0, %v18377_v12  ;;  %v10723_v42 = vsel %vm5480_vm1, 1.0, %v18377_v12  ;;  %v10724_v30 = vsel %vm5481_vm2, 1.0, %v18377_v12  ;;  %8798 = vmatpush.bf16.msra.mxu3 %v11219_v33  ;;  %v11210_v61 = vld [vmem:[%s11927_s27 + $0xb0] sm:$0xff]  ;;  %v15598_v24 = vpop.permute.xlu0 %6336  ;;  %8532 = vmatpush.bf16.msra.mxu0 %v11194_v54 }
 0x3ac   : > { %v10725_v32 = vsel %vm5482_vm3, 1.0, %v18377_v12  ;;  %v5927_v16 = vunpack.c.l.bf16 %v18856_v46  ;;  %v11218_v37 = vld [vmem:[%s11927_s27 + $0xf0] sm:$0xff]  ;;  %v5928_v31 = vunpack.c.h.bf16 %v18856_v46  ;;  %vm5519_vm4 = vcmp.eq.s32.totalorder %v5402_v6, %v12081_v47  ;;  %8621 = vmatpush.bf16.msra.mxu1 %v11202_v44 }
 0x3ad   : > { %v18857_v13 = vld [vmem:[#allocation21_spill] sm:$0xff]  ;;  %vm5520_vm5 = vcmp.eq.s32.totalorder %v5402_v6, %v12083_v48  ;;  %vm5521_vm6 = vcmp.eq.s32.totalorder %v5402_v6, %v12085_v49  ;;  %vm5522_vm7 = vcmp.eq.s32.totalorder %v5402_v6, %v12091_v51  ;;  %v10762_v43 = vsel %vm5519_vm4, 1.0, %v18377_v12  ;;  %8710 = vmatpush.bf16.msra.mxu2 %v11210_v61 }
 0x3ae   : > { %v5929_v35 = vunpack.c.l.bf16 %v18857_v13  ;;  %v5930_v15 = vunpack.c.h.bf16 %v18857_v13  ;;  %v6183_v52 = vadd.f32 %v10722_v39, %v5927_v16  ;;  %11418 = vset.pattern.permute.xlu2 %v18786_v3  ;;  %v6184_v45 = vadd.f32 %v10723_v42, %v5928_v31  ;;  %v11193_v13 = vld [vmem:[%s11927_s27 + $0x28] sm:$0xff] }
 0x3af   : > { %v10763_v16 = vsel %vm5520_vm5, 1.0, %v18377_v12  ;;  %v10764_v39 = vsel %vm5521_vm6, 1.0, %v18377_v12  ;;  %v10765_v6 = vsel %vm5522_vm7, 1.0, %v18377_v12  ;;  %v5967_v53 = vunpack.c.l.bf16 %v14972_v14  ;;  %8799 = vmatpush.bf16.msra.mxu3 %v11218_v37  ;;  %v11201_v42 = vld [vmem:[%s11927_s27 + $0x68] sm:$0xff]  ;;  %6396 = vperm.xlu2 %11418, %v15243_v27  }
 0x3b0   : > { %v6185_v33 = vadd.f32 %v10724_v30, %v5929_v35  ;;  %v6186_v46 = vadd.f32 %v10725_v32, %v5930_v15  ;;  %v11209_v30 = vld [vmem:[%s11927_s27 + $0xa8] sm:$0xff]  ;;  %v15607_v32 = vpack.c.bf16 %v6184_v45, %v6183_v52  ;;  %v5968_v54 = vunpack.c.h.bf16 %v14972_v14  ;;  %v15613_v35 = vpop.permute.xlu2 %7316  ;;  %11419 = vset.pattern.permute.xlu1 %v18786_v3  ;;  %8533 = vmatpush.bf16.msra.mxu0 %v11193_v13 }
 0x3b1   : > { %v5969_v44 = vunpack.c.l.bf16 %v14974_v41  ;;  %v11217_v15 = vld [vmem:[%s11927_s27 + $0xe8] sm:$0xff]  ;;  %v5970_v61 = vunpack.c.h.bf16 %v14974_v41  ;;  %v6223_v37 = vadd.f32 %v10762_v43, %v5967_v53  ;;  %vm6431_vm8 = vcmp.eq.s32.totalorder %v15543_v23, %v12081_v47  ;;  %6399 = vperm.xlu1 %11419, %v15282_v26   ;;  %v11192_v41 = vld [vmem:[%s11927_s27 + $0x20] sm:$0xff]  ;;  %8622 = vmatpush.bf16.msra.mxu1 %v11201_v42 }
 0x3b2   : > { %18858 = vst [vmem:[#allocation65_spill] sm:$0xff] %v15607_v32  ;;  %v15609_v31 = vpack.c.bf16 %v6186_v46, %v6185_v33  ;;  %vm6432_vm9 = vcmp.eq.s32.totalorder %v15543_v23, %v12083_v48  ;;  %v6224_v14 = vadd.f32 %v10763_v16, %v5968_v54  ;;  %vm6433_vm10 = vcmp.eq.s32.totalorder %v15543_v23, %v12085_v49  ;;  %v11200_v26 = vld [vmem:[%s11927_s27 + $0x60] sm:$0xff] }
 0x3b3   : > { %v6225_v52 = vadd.f32 %v10764_v39, %v5969_v44  ;;  %vm6434_vm11 = vcmp.eq.s32.totalorder %v15543_v23, %v12091_v51  ;;  %v6226_v53 = vadd.f32 %v10765_v6, %v5970_v61  ;;  %v10810_v43 = vsel %vm6431_vm8, 1.0, %v18377_v12  ;;  %8711 = vmatpush.bf16.msra.mxu2 %v11209_v30  ;;  %v11208_v46 = vld [vmem:[%s11927_s27 + $0xa0] sm:$0xff]  ;;  %v15639_v6 = vpop.permute.xlu1 %5389  ;;  %8800 = vmatpush.bf16.msra.mxu3 %v11217_v15  ;;  %v11191_v15 = vld [vmem:[%s11927_s27 + $0x18] sm:$0xff] }
 0x3b4   : > { %18859 = vst [vmem:[#allocation75_spill] sm:$0xff] %v15609_v31  ;;  %v10811_v45 = vsel %vm6432_vm9, 1.0, %v18377_v12  ;;  %v10812_v33 = vsel %vm6433_vm10, 1.0, %v18377_v12  ;;  %v15634_v16 = vpack.c.bf16 %v6224_v14, %v6223_v37  ;;  %v10813_v39 = vsel %vm6434_vm11, 1.0, %v18377_v12  ;;  %v11216_v54 = vld [vmem:[%s11927_s27 + $0xe0] sm:$0xff]  ;;  %8534 = vmatpush.bf16.msra.mxu0 %v11192_v41  ;;  %v11214_v31 = vld [vmem:[%s11927_s27 + $0xd0] sm:$0xff] }
 0x3b5   : > { %v6879_v23 = vunpack.c.l.bf16 %v15210_v10  ;;  %v6880_v13 = vunpack.c.h.bf16 %v15210_v10  ;;  %v15642_v44 = vpack.c.bf16 %v6226_v53, %v6225_v52  ;;  %v6881_v42 = vunpack.c.l.bf16 %v15217_v34  ;;  %v15656_v10 = vpop.permute.xlu0 %7331  ;;  %8623 = vmatpush.bf16.msra.mxu1 %v11200_v26  ;;  %v11199_v53 = vld [vmem:[%s11927_s27 + $0x58] sm:$0xff] }
 0x3b6   : > { %18860 = vst [vmem:[#allocation58_spill] sm:$0xff] %v15634_v16  ;;  %v6882_v30 = vunpack.c.h.bf16 %v15217_v34  ;;  %vm5491_vm12 = vcmp.eq.s32.totalorder %v15579_v21, %v12081_v47  ;;  %vm5492_vm13 = vcmp.eq.s32.totalorder %v15579_v21, %v12083_v48  ;;  %vm5493_vm14 = vcmp.eq.s32.totalorder %v15579_v21, %v12085_v49 }
 0x3b7   : > { %18861 = vst [vmem:[#allocation59_spill] sm:$0xff] %v15642_v44  ;;  %v15648_v61 = vadd.f32 %v10810_v43, %v6879_v23  ;;  %v15650_v37 = vadd.f32 %v10811_v45, %v6880_v13  ;;  %v15659_v34 = vadd.f32 %v10812_v33, %v6881_v42  ;;  %vm5494_vm15 = vcmp.eq.s32.totalorder %v15579_v21, %v12091_v51  ;;  %v11207_v43 = vld [vmem:[%s11927_s27 + $0x98] sm:$0xff] }
 0x3b8   : > { %18862 = vst [vmem:[#allocation82_spill] sm:$0xff] %v15656_v10  ;;  %v15661_v14 = vadd.f32 %v10813_v39, %v6882_v30  ;;  %v10734_v52 = vsel %vm5491_vm12, 1.0, %v18377_v12  ;;  %8712 = vmatpush.bf16.msra.mxu2 %v11208_v46  ;;  %v10735_v45 = vsel %vm5492_vm13, 1.0, %v18377_v12  ;;  %v10736_v23 = vsel %vm5493_vm14, 1.0, %v18377_v12  ;;  %8801 = vmatpush.bf16.msra.mxu3 %v11216_v54  ;;  %v11215_v39 = vld [vmem:[%s11927_s27 + $0xd8] sm:$0xff]  ;;  %v11204_v10 = vld [vmem:[%s11927_s27 + $0x80] sm:$0xff] }
 0x3b9   : > { %v10737_v41 = vsel %vm5494_vm15, 1.0, %v18377_v12  ;;  %v5939_v33 = vunpack.c.l.bf16 %v15010_v19  ;;  %11420 = vset.pattern.permute.xlu2 %v18791_v11  ;;  %v5940_v21 = vunpack.c.h.bf16 %v15010_v19  ;;  %v5941_v26 = vunpack.c.l.bf16 %v15019_v55  ;;  %11422 = vset.pattern.permute.xlu1 %v18812_v25  ;;  %v15687_v19 = vpop.permute.xlu2 %6330 }
 0x3ba   : > { %v5942_v46 = vunpack.c.h.bf16 %v15019_v55  ;;  %vm6435_vm0 = vcmp.eq.s32.totalorder %v15598_v24, %v12081_v47  ;;  %7388 = vperm.xlu2 %11420, %v15243_v27   ;;  %vm6436_vm1 = vcmp.eq.s32.totalorder %v15598_v24, %v12083_v48  ;;  %vm6437_vm2 = vcmp.eq.s32.totalorder %v15598_v24, %v12085_v49  ;;  %8535 = vmatpush.bf16.msra.mxu0 %v11191_v15  ;;  %v11190_v55 = vld [vmem:[%s11927_s27 + $0x10] sm:$0xff] }
 0x3bb   : > { %v6195_v13 = vadd.f32 %v10734_v52, %v5939_v33  ;;  %vm6438_vm3 = vcmp.eq.s32.totalorder %v15598_v24, %v12091_v51  ;;  %v6196_v54 = vadd.f32 %v10735_v45, %v5940_v21  ;;  %v6197_v27 = vadd.f32 %v10736_v23, %v5941_v26  ;;  %8624 = vmatpush.bf16.msra.mxu1 %v11199_v53  ;;  %v11198_v52 = vld [vmem:[%s11927_s27 + $0x50] sm:$0xff]  ;;  %v11189_v26 = vld [vmem:[%s11927_s27 + $0x8] sm:$0xff] }
 0x3bc   : > { %v6198_v42 = vadd.f32 %v10737_v41, %v5942_v46  ;;  %v10814_v30 = vsel %vm6435_vm0, 1.0, %v18377_v12  ;;  %8713 = vmatpush.bf16.msra.mxu2 %v11207_v43  ;;  %v10815_v33 = vsel %vm6436_vm1, 1.0, %v18377_v12  ;;  %v10816_v44 = vsel %vm6437_vm2, 1.0, %v18377_v12  ;;  %8802 = vmatpush.bf16.msra.mxu3 %v11215_v39  ;;  %v11206_v15 = vld [vmem:[%s11927_s27 + $0x90] sm:$0xff]  ;;  %v15712_v39 = vpop.permute.xlu1 %5398 }
 0x3bd   : > { %v10817_v24 = vsel %vm6438_vm3, 1.0, %v18377_v12  ;;  %v6883_v16 = vunpack.c.l.bf16 %v15417_v8  ;;  %5410 = vperm.xlu1 %11422, %v15317_v2   ;;  %v15699_v45 = vpack.c.bf16 %v6196_v54, %v6195_v13  ;;  %v6884_v43 = vunpack.c.h.bf16 %v15417_v8 }
 0x3be   : > { %v15701_v53 = vpack.c.bf16 %v6198_v42, %v6197_v27  ;;  %v6885_v23 = vunpack.c.l.bf16 %v15423_v5  ;;  %v6886_v41 = vunpack.c.h.bf16 %v15423_v5  ;;  %vm5503_vm4 = vcmp.eq.s32.totalorder %v15639_v6, %v12081_v47  ;;  %8536 = vmatpush.bf16.msra.mxu0 %v11190_v55  ;;  %v11197_v5 = vld [vmem:[%s11927_s27 + $0x48] sm:$0xff]  ;;  %v15729_v27 = vpop.permute.xlu0 %6348 }
 0x3bf   : > { %v15706_v21 = vadd.f32 %v10814_v30, %v6883_v16  ;;  %vm5504_vm5 = vcmp.eq.s32.totalorder %v15639_v6, %v12083_v48  ;;  %v15715_v46 = vadd.f32 %v10815_v33, %v6884_v43  ;;  %vm5505_vm6 = vcmp.eq.s32.totalorder %v15639_v6, %v12085_v49  ;;  %8625 = vmatpush.bf16.msra.mxu1 %v11198_v52  ;;  %v11213_v42 = vld [vmem:[%s11927_s27 + $0xc8] sm:$0xff] }
 0x3c0   : > { %v15717_v8 = vadd.f32 %v10816_v44, %v6885_v23  ;;  %vm5506_vm7 = vcmp.eq.s32.totalorder %v15639_v6, %v12091_v51  ;;  %v15724_v16 = vadd.f32 %v10817_v24, %v6886_v41  ;;  %v10746_v13 = vsel %vm5503_vm4, 1.0, %v18377_v12  ;;  %8714 = vmatpush.bf16.msra.mxu2 %v11206_v15  ;;  %8803 = vmatpush.bf16.msra.mxu3 %v11214_v31  ;;  %v11205_v44 = vld [vmem:[%s11927_s27 + $0x88] sm:$0xff]  ;;  %v11188_v31 = vld [vmem:[%s11927_s27] sm:$0xff] }
 0x3c1   : > { %v10747_v55 = vsel %vm5504_vm5, 1.0, %v18377_v12  ;;  %v10748_v54 = vsel %vm5505_vm6, 1.0, %v18377_v12  ;;  %v10749_v6 = vsel %vm5506_vm7, 1.0, %v18377_v12  ;;  %v5951_v30 = vunpack.c.l.bf16 %v15072_v62  ;;  %v11196_v23 = vld [vmem:[%s11927_s27 + $0x40] sm:$0xff] }
 0x3c2   : > { %18863 = vst [vmem:[#allocation72_spill] sm:$0xff] %v15717_v8  ;;  %v5952_v52 = vunpack.c.h.bf16 %v15072_v62  ;;  %v5953_v33 = vunpack.c.l.bf16 %v15077_v18  ;;  %11423 = vset.pattern.permute.xlu2 %v18812_v25  ;;  %v5954_v24 = vunpack.c.h.bf16 %v15077_v18  ;;  %vm6427_vm8 = vcmp.eq.s32.totalorder %v15687_v19, %v12081_v47  ;;  %8537 = vmatpush.bf16.msra.mxu0 %v11189_v26  ;;  %v15747_v62 = vld [vmem:[%s11917_s4 + $0xd8] sm:$0xff]  ;;  %v15756_v8 = vpop.permute.xlu2 %7325 }
 0x3c3   : > { %18864 = vst [vmem:[#allocation73_spill] sm:$0xff] %v15724_v16  ;;  %vm6428_vm9 = vcmp.eq.s32.totalorder %v15687_v19, %v12083_v48  ;;  %vm6429_vm10 = vcmp.eq.s32.totalorder %v15687_v19, %v12085_v49  ;;  %5413 = vperm.xlu2 %11423, %v15747_v62   ;;  %v6207_v15 = vadd.f32 %v10746_v13, %v5951_v30  ;;  %v10806_v32 = vsel %vm6427_vm8, 1.0, %v18377_v12  ;;  %v11212_v13 = vld [vmem:[%s11927_s27 + $0xc0] sm:$0xff] }
 0x3c4   : > { %v6208_v43 = vadd.f32 %v10747_v55, %v5952_v52  ;;  %v6209_v18 = vadd.f32 %v10748_v54, %v5953_v33  ;;  %vm6430_vm11 = vcmp.eq.s32.totalorder %v15687_v19, %v12091_v51  ;;  %8626 = vmatpush.bf16.msra.mxu1 %v11197_v5  ;;  %v6210_v41 = vadd.f32 %v10749_v6, %v5954_v24 }
 0x3c5   : > { %v10807_v26 = vsel %vm6428_vm9, 1.0, %v18377_v12  ;;  %v10808_v16 = vsel %vm6429_vm10, 1.0, %v18377_v12  ;;  %8715 = vmatpush.bf16.msra.mxu2 %v11205_v44  ;;  %8804 = vmatpush.bf16.msra.mxu3 %v11213_v42  ;;  %v10809_v54 = vsel %vm6430_vm11, 1.0, %v18377_v12  ;;  %v6875_v19 = vunpack.c.l.bf16 %v15367_v63 }
 0x3c6   : > { %v15760_v55 = vpack.c.bf16 %v6208_v43, %v6207_v15  ;;  %v6876_v5 = vunpack.c.h.bf16 %v15367_v63  ;;  %11424 = vset.pattern.permute.xlu1 %v18786_v3  ;;  %v15766_v6 = vpack.c.bf16 %v6210_v41, %v6209_v18  ;;  %v6877_v30 = vunpack.c.l.bf16 %v15372_v7  ;;  %8538 = vmatpush.bf16.msra.mxu0 %v11188_v31 }
 0x3c7   : > { %v6878_v52 = vunpack.c.h.bf16 %v15372_v7  ;;  %vm5515_vm12 = vcmp.eq.s32.totalorder %v15712_v39, %v12081_v47  ;;  %6402 = vperm.xlu1 %11424, %v15317_v2   ;;  %v15773_v44 = vadd.f32 %v10806_v32, %v6875_v19  ;;  %vm5516_vm13 = vcmp.eq.s32.totalorder %v15712_v39, %v12083_v48  ;;  %v6328_v32 = vpop.permute.xlu1 %6327 }
 0x3c8   : > { %v15775_v42 = vadd.f32 %v10807_v26, %v6876_v5  ;;  %vm5517_vm14 = vcmp.eq.s32.totalorder %v15712_v39, %v12085_v49  ;;  %8627 = vmatpush.bf16.msra.mxu1 %v11196_v23  ;;  %v15781_v63 = vadd.f32 %v10808_v16, %v6877_v30  ;;  %vm5518_vm15 = vcmp.eq.s32.totalorder %v15712_v39, %v12091_v51  ;;  %v6358_v39 = vpop.permute.xlu0 %6357 }
 0x3c9   : > { %v15783_v7 = vadd.f32 %v10809_v54, %v6878_v52  ;;  %v10758_v2 = vsel %vm5515_vm12, 1.0, %v18377_v12  ;;  %8716 = vmatpush.bf16.msra.mxu2 %v11204_v10  ;;  %8805 = vmatpush.bf16.msra.mxu3 %v11212_v13  ;;  %v10759_v33 = vsel %vm5516_vm13, 1.0, %v18377_v12  ;;  %v10760_v24 = vsel %vm5517_vm14, 1.0, %v18377_v12 }
 0x3ca   : > { %v10761_v31 = vsel %vm5518_vm15, 1.0, %v18377_v12  ;;  %v5963_v15 = vunpack.c.l.bf16 %v15132_v17  ;;  %v5964_v16 = vunpack.c.h.bf16 %v15132_v17  ;;  %v5965_v43 = vunpack.c.l.bf16 %v15138_v57 }
 0x3cb   : > { %v5966_v18 = vunpack.c.h.bf16 %v15138_v57  ;;  %vm6451_vm0 = vcmp.eq.s32.totalorder %v15729_v27, %v12081_v47  ;;  %11425 = vset.pattern.permute.xlu2 %v18786_v3  ;;  %vm6452_vm1 = vcmp.eq.s32.totalorder %v15729_v27, %v12083_v48  ;;  %vm6453_vm2 = vcmp.eq.s32.totalorder %v15729_v27, %v12085_v49 }
 0x3cc   : > { %v6219_v10 = vadd.f32 %v10758_v2, %v5963_v15  ;;  %vm6454_vm3 = vcmp.eq.s32.totalorder %v15729_v27, %v12091_v51  ;;  %6405 = vperm.xlu2 %11425, %v15747_v62   ;;  %v6220_v17 = vadd.f32 %v10759_v33, %v5964_v16  ;;  %v6221_v57 = vadd.f32 %v10760_v24, %v5965_v43  ;;  %v15816_v2 = vpop.permute.xlu2 %7328 }
 0x3cd   : > { %v6222_v23 = vadd.f32 %v10761_v31, %v5966_v18  ;;  %v10830_v41 = vsel %vm6451_vm0, 1.0, %v18377_v12  ;;  %v10831_v26 = vsel %vm6452_vm1, 1.0, %v18377_v12  ;;  %v10832_v13 = vsel %vm6453_vm2, 1.0, %v18377_v12 }
 0x3ce   : > { %v10833_v54 = vsel %vm6454_vm3, 1.0, %v18377_v12  ;;  %v6899_v19 = vunpack.c.l.bf16 %v15331_v22  ;;  %v15810_v5 = vpack.c.bf16 %v6220_v17, %v6219_v10  ;;  %v6900_v27 = vunpack.c.h.bf16 %v15331_v22 }
 0x3cf   : > { %v15812_v30 = vpack.c.bf16 %v6222_v23, %v6221_v57  ;;  %v6901_v52 = vunpack.c.l.bf16 %v15336_v58  ;;  %11426 = vset.pattern.permute.xlu1 %v18791_v11  ;;  %v6902_v33 = vunpack.c.h.bf16 %v15336_v58  ;;  %vm6423_vm4 = vcmp.eq.s32.totalorder %v6328_v32, %v12081_v47  ;;  %v15840_v57 = vpop.permute.xlu1 %7319 }
 0x3d0   : > { %18865 = vst [vmem:[#allocation74_spill] sm:$0xff] %v15810_v5  ;;  %v15820_v24 = vadd.f32 %v10830_v41, %v6899_v19  ;;  %vm6424_vm5 = vcmp.eq.s32.totalorder %v6328_v32, %v12083_v48  ;;  %7397 = vperm.xlu1 %11426, %v15747_v62   ;;  %v15825_v31 = vadd.f32 %v10831_v26, %v6900_v27  ;;  %v10802_v58 = vsel %vm6423_vm4, 1.0, %v18377_v12 }
 0x3d1   : > { %18866 = vst [vmem:[#allocation67_spill] sm:$0xff] %v15812_v30  ;;  %v15827_v15 = vadd.f32 %v10832_v13, %v6901_v52  ;;  %vm6425_vm6 = vcmp.eq.s32.totalorder %v6328_v32, %v12085_v49  ;;  %vm6426_vm7 = vcmp.eq.s32.totalorder %v6328_v32, %v12091_v51  ;;  %v15831_v22 = vadd.f32 %v10833_v54, %v6902_v33  ;;  %v11558_v13 = vld [vmem:[%s11917_s4 + $0xe0] sm:$0xff] }
 0x3d2   : > { %v10803_v16 = vsel %vm6424_vm5, 1.0, %v18377_v12  ;;  %v10804_v43 = vsel %vm6425_vm6, 1.0, %v18377_v12  ;;  %v10805_v18 = vsel %vm6426_vm7, 1.0, %v18377_v12  ;;  %v6871_v62 = vunpack.c.l.bf16 %v15170_v9 }
 0x3d3   : > { %v6872_v10 = vunpack.c.h.bf16 %v15170_v9  ;;  %v6873_v17 = vunpack.c.l.bf16 %v15177_v40  ;;  %v6874_v32 = vunpack.c.h.bf16 %v15177_v40  ;;  %vm6463_vm8 = vcmp.eq.s32.totalorder %v6358_v39, %v12081_v47  ;;  %v6361_v9 = vpop.permute.xlu0 %6360 }
 0x3d4   : > { %vm6464_vm9 = vcmp.eq.s32.totalorder %v6358_v39, %v12083_v48  ;;  %vm6465_vm10 = vcmp.eq.s32.totalorder %v6358_v39, %v12085_v49  ;;  %11427 = vset.pattern.permute.xlu2 %v18812_v25  ;;  %v7127_v23 = vadd.f32 %v10802_v58, %v6871_v62  ;;  %vm6466_vm11 = vcmp.eq.s32.totalorder %v6358_v39, %v12091_v51 }
 0x3d5   : > { %v7128_v41 = vadd.f32 %v10803_v16, %v6872_v10  ;;  %v15847_v26 = vadd.f32 %v10804_v43, %v6873_v17  ;;  %5416 = vperm.xlu2 %11427, %v11558_v13   ;;  %v15851_v54 = vadd.f32 %v10805_v18, %v6874_v32  ;;  %v10842_v40 = vsel %vm6463_vm8, 1.0, %v18377_v12 }
 0x3d6   : > { %v10843_v19 = vsel %vm6464_vm9, 1.0, %v18377_v12  ;;  %v10844_v27 = vsel %vm6465_vm10, 1.0, %v18377_v12  ;;  %v10845_v52 = vsel %vm6466_vm11, 1.0, %v18377_v12  ;;  %v6911_v33 = vunpack.c.l.bf16 %v15381_v4 }
 0x3d7   : > { %v6912_v58 = vunpack.c.h.bf16 %v15381_v4  ;;  %v6913_v16 = vunpack.c.l.bf16 %v15387_v38  ;;  %v6914_v39 = vunpack.c.h.bf16 %v15387_v38  ;;  %vm6467_vm12 = vcmp.eq.s32.totalorder %v6361_v9, %v12081_v47  ;;  %v6346_v4 = vpop.permute.xlu2 %6345 }
 0x3d8   : > { %vm6468_vm13 = vcmp.eq.s32.totalorder %v6361_v9, %v12083_v48  ;;  %vm6469_vm14 = vcmp.eq.s32.totalorder %v6361_v9, %v12085_v49  ;;  %11429 = vset.pattern.permute.xlu1 %v18786_v3  ;;  %v15865_v43 = vadd.f32 %v10842_v40, %v6911_v33  ;;  %vm6470_vm15 = vcmp.eq.s32.totalorder %v6361_v9, %v12091_v51 }
 0x3d9   : > { %v15867_v18 = vadd.f32 %v10843_v19, %v6912_v58  ;;  %v15869_v62 = vadd.f32 %v10844_v27, %v6913_v16  ;;  %6408 = vperm.xlu1 %11429, %v11558_v13   ;;  %v15872_v10 = vadd.f32 %v10845_v52, %v6914_v39  ;;  %v10846_v38 = vsel %vm6467_vm12, 1.0, %v18377_v12 }
 0x3da   : > { %v10847_v17 = vsel %vm6468_vm13, 1.0, %v18377_v12  ;;  %v10848_v32 = vsel %vm6469_vm14, 1.0, %v18377_v12  ;;  %v10849_v30 = vsel %vm6470_vm15, 1.0, %v18377_v12  ;;  %v6915_v40 = vunpack.c.l.bf16 %v15345_v60 }
 0x3db   : > { %v6916_v19 = vunpack.c.h.bf16 %v15345_v60  ;;  %v6917_v27 = vunpack.c.l.bf16 %v15351_v59  ;;  %v6918_v9 = vunpack.c.h.bf16 %v15351_v59  ;;  %vm6447_vm0 = vcmp.eq.s32.totalorder %v6346_v4, %v12081_v47  ;;  %v15892_v60 = vpop.permute.xlu1 %7322 }
 0x3dc   : > { %vm6448_vm1 = vcmp.eq.s32.totalorder %v6346_v4, %v12083_v48  ;;  %vm6449_vm2 = vcmp.eq.s32.totalorder %v6346_v4, %v12085_v49  ;;  %v15885_v52 = vadd.f32 %v10846_v38, %v6915_v40  ;;  %vm6450_vm3 = vcmp.eq.s32.totalorder %v6346_v4, %v12091_v51  ;;  %v11559_v38 = vld [vmem:[%s11917_s4 + $0xe8] sm:$0xff] }
 0x3dd   : > { %v15887_v33 = vadd.f32 %v10847_v17, %v6916_v19  ;;  %v15889_v58 = vadd.f32 %v10848_v32, %v6917_v27  ;;  %11430 = vset.pattern.permute.xlu2 %v18786_v3  ;;  %v15895_v16 = vadd.f32 %v10849_v30, %v6918_v9  ;;  %v10826_v59 = vsel %vm6447_vm0, 1.0, %v18377_v12 }
 0x3de   : > { %v10827_v39 = vsel %vm6448_vm1, 1.0, %v18377_v12  ;;  %v10828_v5 = vsel %vm6449_vm2, 1.0, %v18377_v12  ;;  %6411 = vperm.xlu2 %11430, %v11559_v38   ;;  %v10829_v17 = vsel %vm6450_vm3, 1.0, %v18377_v12  ;;  %v6895_v32 = vunpack.c.l.bf16 %v15475_v50 }
 0x3df   : > { %18867 = vst [vmem:[#allocation76_spill] sm:$0xff] %v15889_v58  ;;  %v6896_v4 = vunpack.c.h.bf16 %v15475_v50  ;;  %v6897_v40 = vunpack.c.l.bf16 %v15480_v1  ;;  %v6898_v19 = vunpack.c.h.bf16 %v15480_v1  ;;  %v7251_v30 = vpack.c.bf16 %v15568_v29, %v15566_v56  ;;  %v15918_v50 = vpop.permute.xlu0 %7355 }
 0x3e0   : > { %18868 = vst [vmem:[#allocation77_spill] sm:$0xff] %v15895_v16  ;;  %v7253_v27 = vpack.c.bf16 %v7128_v41, %v7127_v23  ;;  %vm7411_vm4 = vcmp.eq.s32.totalorder %v15613_v35, %v12081_v47  ;;  %v15910_v9 = vadd.f32 %v10826_v59, %v6895_v32  ;;  %vm7415_vm5 = vcmp.eq.s32.totalorder %v15840_v57, %v12081_v47 }
 0x3e1   : > { %v15912_v16 = vadd.f32 %v10827_v39, %v6896_v4  ;;  %v15914_v58 = vadd.f32 %v10828_v5, %v6897_v40  ;;  %18869 = vst [vmem:[#allocation78_spill] sm:$0xff] %v15918_v50  ;;  %11431 = vset.pattern.permute.xlu1 %v18791_v11  ;;  %v15921_v1 = vadd.f32 %v10829_v17, %v6898_v19  ;;  %v10926_v56 = vsel %vm7411_vm4, 1.0, %v18377_v12 }
 0x3e2   : > { %v10930_v29 = vsel %vm7415_vm5, 1.0, %v18377_v12  ;;  %v7859_v23 = vunpack.c.l.bf16 %v7251_v30  ;;  %7400 = vperm.xlu1 %11431, %v11558_v13   ;;  %v7863_v41 = vunpack.c.l.bf16 %v7253_v27  ;;  %vm7412_vm6 = vcmp.eq.s32.totalorder %v15613_v35, %v12083_v48 }
 0x3e3   : > { %vm7416_vm7 = vcmp.eq.s32.totalorder %v15840_v57, %v12083_v48  ;;  %v7860_v5 = vunpack.c.h.bf16 %v7251_v30  ;;  %v10927_v39 = vsel %vm7412_vm6, 1.0, %v18377_v12  ;;  %v7864_v32 = vunpack.c.h.bf16 %v7253_v27 }
 0x3e4   : > { %v8115_v59 = vadd.f32 %v10926_v56, %v7859_v23  ;;  %v10931_v17 = vsel %vm7416_vm7, 1.0, %v18377_v12  ;;  %v8119_v4 = vadd.f32 %v10930_v29, %v7863_v41  ;;  %v7252_v19 = vpack.c.bf16 %v15575_v28, %v15573_v0  ;;  %v6340_v56 = vpop.permute.xlu1 %6339 }
 0x3e5   : > { %v8116_v40 = vadd.f32 %v10927_v39, %v7860_v5  ;;  %v7254_v13 = vpack.c.bf16 %v15851_v54, %v15847_v26  ;;  %v8120_v50 = vadd.f32 %v10931_v17, %v7864_v32  ;;  %vm7413_vm8 = vcmp.eq.s32.totalorder %v15613_v35, %v12085_v49 }
 0x3e6   : > { %vm7417_vm9 = vcmp.eq.s32.totalorder %v15840_v57, %v12085_v49  ;;  %vm7414_vm10 = vcmp.eq.s32.totalorder %v15613_v35, %v12091_v51  ;;  %11432 = vset.pattern.permute.xlu2 %v18791_v11  ;;  %v8243_v30 = vpack.c.bf16 %v8119_v4, %v8115_v59  ;;  %v10928_v27 = vsel %vm7413_vm8, 1.0, %v18377_v12  ;;  %v15948_v59 = vpop.permute.xlu2 %7337 }
 0x3e7   : > { %v10932_v0 = vsel %vm7417_vm9, 1.0, %v18377_v12  ;;  %v7861_v28 = vunpack.c.l.bf16 %v7252_v19  ;;  %7403 = vperm.xlu2 %11432, %v11559_v38   ;;  %v8244_v26 = vpack.c.bf16 %v8120_v50, %v8116_v40  ;;  %v7865_v54 = vunpack.c.l.bf16 %v7254_v13  ;;  %v6373_v17 = vpop.permute.xlu0 %6372 }
 0x3e8   : > { %vm7418_vm11 = vcmp.eq.s32.totalorder %v15840_v57, %v12091_v51  ;;  %v10929_v29 = vsel %vm7414_vm10, 1.0, %v18377_v12  ;;  %8539 = vmatmul.bf16.vlgmr.msra.gmra.mxu0 %v8243_v30  ;;  %v7862_v41 = vunpack.c.h.bf16 %v7252_v19  ;;  %v7866_v5 = vunpack.c.h.bf16 %v7254_v13  ;;  %v15960_v13 = vld [vmem:[%s11917_s4 + $0xf8] sm:$0xff] }
 0x3e9   : > { %v8117_v23 = vadd.f32 %v10928_v27, %v7861_v28  ;;  %v10933_v35 = vsel %vm7418_vm11, 1.0, %v18377_v12  ;;  %8628 = vmatmul.bf16.vlgmr.msra.gmra.mxu1 %v8244_v26  ;;  %v8121_v39 = vadd.f32 %v10932_v0, %v7865_v54  ;;  %vm6439_vm12 = vcmp.eq.s32.totalorder %v6340_v56, %v12081_v47 }
 0x3ea   : > { %vm6440_vm13 = vcmp.eq.s32.totalorder %v6340_v56, %v12083_v48  ;;  %vm6441_vm14 = vcmp.eq.s32.totalorder %v6340_v56, %v12085_v49  ;;  %v8118_v57 = vadd.f32 %v10929_v29, %v7862_v41  ;;  %v8122_v38 = vadd.f32 %v10933_v35, %v7866_v5  ;;  %11433 = vset.pattern.permute.xlu1 %v18812_v25 }
 0x3eb   : > { %vm6442_vm15 = vcmp.eq.s32.totalorder %v6340_v56, %v12091_v51  ;;  %v10818_v50 = vsel %vm6439_vm12, 1.0, %v18377_v12  ;;  %v8245_v32 = vpack.c.bf16 %v8121_v39, %v8117_v23  ;;  %v10819_v4 = vsel %vm6440_vm13, 1.0, %v18377_v12  ;;  %5425 = vperm.xlu1 %11433, %v15960_v13  }
 0x3ec   : > { %v10820_v40 = vsel %vm6441_vm14, 1.0, %v18377_v12  ;;  %v10821_v19 = vsel %vm6442_vm15, 1.0, %v18377_v12  ;;  %v8246_v30 = vpack.c.bf16 %v8122_v38, %v8118_v57  ;;  %v6887_v27 = vunpack.c.l.bf16 %v15266_v36  ;;  %v11561_v57 = vld [vmem:[%s11917_s4 + $0xf0] sm:$0xff] }
 0x3ed   : > { %v6888_v0 = vunpack.c.h.bf16 %v15266_v36  ;;  %v6889_v28 = vunpack.c.l.bf16 %v15271_v20  ;;  %8717 = vmatmul.bf16.vlgmr.msra.gmra.mxu2 %v8245_v32  ;;  %v6890_v25 = vunpack.c.h.bf16 %v15271_v20  ;;  %vm6483_vm0 = vcmp.eq.s32.totalorder %v6373_v17, %v12081_v47 }
 0x3ee   : > { %vm6484_vm1 = vcmp.eq.s32.totalorder %v6373_v17, %v12083_v48  ;;  %vm6485_vm2 = vcmp.eq.s32.totalorder %v6373_v17, %v12085_v49  ;;  %8806 = vmatmul.bf16.vlgmr.msra.gmra.mxu3 %v8246_v30  ;;  %v15970_v56 = vadd.f32 %v10818_v50, %v6887_v27  ;;  %vm6486_vm3 = vcmp.eq.s32.totalorder %v6373_v17, %v12091_v51 }
 0x3ef   : > { %v15972_v26 = vadd.f32 %v10819_v4, %v6888_v0  ;;  %v15974_v54 = vadd.f32 %v10820_v40, %v6889_v28  ;;  %v15977_v36 = vadd.f32 %v10821_v19, %v6890_v25  ;;  %v10862_v20 = vsel %vm6483_vm0, 1.0, %v18377_v12  ;;  %11434 = vset.pattern.permute.xlu2 %v18786_v3  ;;  %v15995_v3 = vpop.permute.xlu2 %7340 }
 0x3f0   : > { %v10863_v29 = vsel %vm6484_vm1, 1.0, %v18377_v12  ;;  %v10864_v23 = vsel %vm6485_vm2, 1.0, %v18377_v12  ;;  %v10865_v35 = vsel %vm6486_vm3, 1.0, %v18377_v12  ;;  %v6931_v41 = vunpack.c.l.bf16 %v15699_v45  ;;  %6414 = vperm.xlu2 %11434, %v11561_v57  }
 0x3f1   : > { %v6932_v5 = vunpack.c.h.bf16 %v15699_v45  ;;  %v6933_v39 = vunpack.c.l.bf16 %v15701_v53  ;;  %v6934_v38 = vunpack.c.h.bf16 %v15701_v53  ;;  %v7255_v50 = vpack.c.bf16 %v15775_v42, %v15773_v44 }
 0x3f2   : > { %v7257_v17 = vpack.c.bf16 %v15650_v37, %v15648_v61  ;;  %vm7419_vm4 = vcmp.eq.s32.totalorder %v15892_v60, %v12081_v47  ;;  %v15997_v32 = vadd.f32 %v10862_v20, %v6931_v41  ;;  %vm7423_vm5 = vcmp.eq.s32.totalorder %v15756_v8, %v12081_v47 }
 0x3f3   : > { %v15999_v45 = vadd.f32 %v10863_v29, %v6932_v5  ;;  %v16001_v4 = vadd.f32 %v10864_v23, %v6933_v39  ;;  %v16005_v53 = vadd.f32 %v10865_v35, %v6934_v38  ;;  %v10934_v44 = vsel %vm7419_vm4, 1.0, %v18377_v12  ;;  %11436 = vset.pattern.permute.xlu1 %v18791_v11 }
 0x3f4   : > { %v10938_v61 = vsel %vm7423_vm5, 1.0, %v18377_v12  ;;  %v7867_v37 = vunpack.c.l.bf16 %v7255_v50  ;;  %v7871_v42 = vunpack.c.l.bf16 %v7257_v17  ;;  %vm7420_vm6 = vcmp.eq.s32.totalorder %v15892_v60, %v12083_v48  ;;  %7406 = vperm.xlu1 %11436, %v11561_v57  }
 0x3f5   : > { %vm7424_vm7 = vcmp.eq.s32.totalorder %v15756_v8, %v12083_v48  ;;  %v7868_v40 = vunpack.c.h.bf16 %v7255_v50  ;;  %v10935_v30 = vsel %vm7420_vm6, 1.0, %v18377_v12  ;;  %v7872_v0 = vunpack.c.h.bf16 %v7257_v17  ;;  %v6382_v17 = vpop.permute.xlu0 %6381 }
 0x3f6   : > { %v8123_v19 = vadd.f32 %v10934_v44, %v7867_v37  ;;  %v10939_v27 = vsel %vm7424_vm7, 1.0, %v18377_v12  ;;  %v8127_v28 = vadd.f32 %v10938_v61, %v7871_v42  ;;  %v7256_v20 = vpack.c.bf16 %v15783_v7, %v15781_v63  ;;  %v6343_v63 = vpop.permute.xlu1 %6342 }
 0x3f7   : > { %v8124_v25 = vadd.f32 %v10935_v30, %v7868_v40  ;;  %v7258_v29 = vpack.c.bf16 %v15661_v14, %v15659_v34  ;;  %v8128_v23 = vadd.f32 %v10939_v27, %v7872_v0  ;;  %vm7421_vm8 = vcmp.eq.s32.totalorder %v15892_v60, %v12085_v49  ;;  %v6355_v61 = vpop.permute.xlu2 %6354  ;;  %v18870_v27 = vld [vmem:[#allocation42_spill] sm:$0xff] }
 0x3f8   : > { %vm7425_vm9 = vcmp.eq.s32.totalorder %v15756_v8, %v12085_v49  ;;  %vm7422_vm10 = vcmp.eq.s32.totalorder %v15892_v60, %v12091_v51  ;;  %v8247_v35 = vpack.c.bf16 %v8127_v28, %v8123_v19  ;;  %v10936_v41 = vsel %vm7421_vm8, 1.0, %v18377_v12  ;;  %11437 = vset.pattern.permute.xlu2 %v18791_v11 }
 0x3f9   : > { %v10940_v5 = vsel %vm7425_vm9, 1.0, %v18377_v12  ;;  %v7869_v39 = vunpack.c.l.bf16 %v7256_v20  ;;  %v8248_v34 = vpack.c.bf16 %v8128_v23, %v8124_v25  ;;  %v7873_v14 = vunpack.c.l.bf16 %v7258_v29  ;;  %7409 = vperm.xlu2 %11437, %v15960_v13   ;;  %v18871_v25 = vld [vmem:[#allocation81_spill] sm:$0xff] }
 0x3fa   : > { %vm7426_vm11 = vcmp.eq.s32.totalorder %v15756_v8, %v12091_v51  ;;  %v10937_v7 = vsel %vm7422_vm10, 1.0, %v18377_v12  ;;  %8544 = vmatmul.bf16.gmra.mxu0 %v8247_v35  ;;  %v7870_v38 = vunpack.c.h.bf16 %v7256_v20  ;;  %v7874_v50 = vunpack.c.h.bf16 %v7258_v29 }
 0x3fb   : > { %v8125_v60 = vadd.f32 %v10936_v41, %v7869_v39  ;;  %v10941_v57 = vsel %vm7426_vm11, 1.0, %v18377_v12  ;;  %8633 = vmatmul.bf16.gmra.mxu1 %v8248_v34  ;;  %v8129_v44 = vadd.f32 %v10940_v5, %v7873_v14  ;;  %vm6443_vm12 = vcmp.eq.s32.totalorder %v6343_v63, %v12081_v47 }
 0x3fc   : > { %vm6444_vm13 = vcmp.eq.s32.totalorder %v6343_v63, %v12083_v48  ;;  %vm6445_vm14 = vcmp.eq.s32.totalorder %v6343_v63, %v12085_v49  ;;  %v8126_v11 = vadd.f32 %v10937_v7, %v7870_v38  ;;  %v8130_v8 = vadd.f32 %v10941_v57, %v7874_v50 }
 0x3fd   : > { %vm6446_vm15 = vcmp.eq.s32.totalorder %v6343_v63, %v12091_v51  ;;  %v10822_v13 = vsel %vm6443_vm12, 1.0, %v18377_v12  ;;  %v8249_v37 = vpack.c.bf16 %v8129_v44, %v8125_v60  ;;  %v10823_v42 = vsel %vm6444_vm13, 1.0, %v18377_v12 }
 0x3fe   : > { %v10824_v40 = vsel %vm6445_vm14, 1.0, %v18377_v12  ;;  %v10825_v19 = vsel %vm6446_vm15, 1.0, %v18377_v12  ;;  %v8250_v30 = vpack.c.bf16 %v8130_v8, %v8126_v11  ;;  %v6891_v0 = vunpack.c.l.bf16 %v18870_v27  ;;  %v16069_v50 = vpop.permute.xlu1 %7334 }
 0x3ff   : > { %v6892_v28 = vunpack.c.h.bf16 %v18870_v27  ;;  %v6893_v20 = vunpack.c.l.bf16 %v18871_v25  ;;  %8722 = vmatmul.bf16.gmra.mxu2 %v8249_v37  ;;  %v6894_v29 = vunpack.c.h.bf16 %v18871_v25  ;;  %vm6495_vm0 = vcmp.eq.s32.totalorder %v6382_v17, %v12081_v47  ;;  %v18875_v27 = vld [vmem:[#allocation62_spill] sm:$0xff] }
 0x400   : > { %vm6496_vm1 = vcmp.eq.s32.totalorder %v6382_v17, %v12083_v48  ;;  %vm6497_vm2 = vcmp.eq.s32.totalorder %v6382_v17, %v12085_v49  ;;  %8811 = vmatmul.bf16.gmra.mxu3 %v8250_v30  ;;  %v16049_v23 = vadd.f32 %v10822_v13, %v6891_v0  ;;  %vm6498_vm3 = vcmp.eq.s32.totalorder %v6382_v17, %v12091_v51 }
 0x401   : > { %v16051_v35 = vadd.f32 %v10823_v42, %v6892_v28  ;;  %v16053_v41 = vadd.f32 %v10824_v40, %v6893_v20  ;;  %v16056_v5 = vadd.f32 %v10825_v19, %v6894_v29  ;;  %v10874_v39 = vsel %vm6495_vm0, 1.0, %v18377_v12  ;;  %v18874_v40 = vld [vmem:[#allocation66_spill] sm:$0xff]  ;;  %v16087_v28 = vpop.permute.xlu2 %7349 }
 0x402   : > { %v10875_v63 = vsel %vm6496_vm1, 1.0, %v18377_v12  ;;  %v10876_v34 = vsel %vm6497_vm2, 1.0, %v18377_v12  ;;  %v10877_v14 = vsel %vm6498_vm3, 1.0, %v18377_v12  ;;  %v6943_v7 = vunpack.c.l.bf16 %v15760_v55 }
 0x403   : > { %v6944_v60 = vunpack.c.h.bf16 %v15760_v55  ;;  %v6945_v57 = vunpack.c.l.bf16 %v15766_v6  ;;  %v6946_v38 = vunpack.c.h.bf16 %v15766_v6  ;;  %vm6459_vm4 = vcmp.eq.s32.totalorder %v6355_v61, %v12081_v47  ;;  %v6385_v55 = vpop.permute.xlu0 %6384 }
 0x404   : > { %vm6460_vm5 = vcmp.eq.s32.totalorder %v6355_v61, %v12083_v48  ;;  %vm6461_vm6 = vcmp.eq.s32.totalorder %v6355_v61, %v12085_v49  ;;  %v16071_v17 = vadd.f32 %v10874_v39, %v6943_v7  ;;  %vm6462_vm7 = vcmp.eq.s32.totalorder %v6355_v61, %v12091_v51 }
 0x405   : > { %v16073_v44 = vadd.f32 %v10875_v63, %v6944_v60  ;;  %v16075_v11 = vadd.f32 %v10876_v34, %v6945_v57  ;;  %v16078_v8 = vadd.f32 %v10877_v14, %v6946_v38  ;;  %v10838_v6 = vsel %vm6459_vm4, 1.0, %v18377_v12  ;;  %v18876_v60 = vld [vmem:[#allocation63_spill] sm:$0xff] }
 0x406   : > { %v10839_v13 = vsel %vm6460_vm5, 1.0, %v18377_v12  ;;  %v10840_v37 = vsel %vm6461_vm6, 1.0, %v18377_v12  ;;  %v10841_v42 = vsel %vm6462_vm7, 1.0, %v18377_v12  ;;  %v6907_v19 = vunpack.c.l.bf16 %v18874_v40 }
 0x407   : > { %18872 = vst [vmem:[#allocation71_spill] sm:$0xff] %v16075_v11  ;;  %v6908_v30 = vunpack.c.h.bf16 %v18874_v40  ;;  %v6909_v0 = vunpack.c.l.bf16 %v18875_v27  ;;  %v6910_v61 = vunpack.c.h.bf16 %v18875_v27  ;;  %vm6499_vm8 = vcmp.eq.s32.totalorder %v6385_v55, %v12081_v47  ;;  %v18881_v27 = vld [vmem:[#allocation82_spill] sm:$0xff] }
 0x408   : > { %18873 = vst [vmem:[#allocation87_spill] sm:$0xff] %v16078_v8  ;;  %vm6500_vm9 = vcmp.eq.s32.totalorder %v6385_v55, %v12083_v48  ;;  %vm6501_vm10 = vcmp.eq.s32.totalorder %v6385_v55, %v12085_v49  ;;  %v16093_v25 = vadd.f32 %v10838_v6, %v6907_v19  ;;  %vm6502_vm11 = vcmp.eq.s32.totalorder %v6385_v55, %v12091_v51  ;;  %v18877_v6 = vld [vmem:[#allocation64_spill] sm:$0xff] }
 0x409   : > { %v16095_v20 = vadd.f32 %v10839_v13, %v6908_v30  ;;  %v16097_v29 = vadd.f32 %v10840_v37, %v6909_v0  ;;  %v16100_v39 = vadd.f32 %v10841_v42, %v6910_v61  ;;  %v10878_v63 = vsel %vm6499_vm8, 1.0, %v18377_v12 }
 0x40a   : > { %v10879_v34 = vsel %vm6500_vm9, 1.0, %v18377_v12  ;;  %v10880_v14 = vsel %vm6501_vm10, 1.0, %v18377_v12  ;;  %v10881_v7 = vsel %vm6502_vm11, 1.0, %v18377_v12  ;;  %v6947_v57 = vunpack.c.l.bf16 %v18876_v60 }
 0x40b   : > { %v6948_v38 = vunpack.c.h.bf16 %v18876_v60  ;;  %v6949_v13 = vunpack.c.l.bf16 %v18877_v6  ;;  %v6950_v37 = vunpack.c.h.bf16 %v18877_v6  ;;  %v7259_v55 = vpack.c.bf16 %v15715_v46, %v15706_v21  ;;  %v16124_v0 = vpop.permute.xlu0 %7379 }
 0x40c   : > { %v7261_v42 = vpack.c.bf16 %v15972_v26, %v15970_v56  ;;  %vm7427_vm12 = vcmp.eq.s32.totalorder %v15816_v2, %v12081_v47  ;;  %v16116_v40 = vadd.f32 %v10878_v63, %v6947_v57  ;;  %vm7431_vm13 = vcmp.eq.s32.totalorder %v18881_v27, %v12081_v47  ;;  %18882 = vst [vmem:[#allocation79_spill] sm:$0xff] %v16124_v0  ;;  %v6352_v26 = vpop.permute.xlu1 %6351  ;;  %v16140_v0 = vpop.permute.xlu2 %7352 }
 0x40d   : > { %v16118_v19 = vadd.f32 %v10879_v34, %v6948_v38  ;;  %v16120_v30 = vadd.f32 %v10880_v14, %v6949_v13  ;;  %v16126_v61 = vadd.f32 %v10881_v7, %v6950_v37  ;;  %v10942_v21 = vsel %vm7427_vm12, 1.0, %v18377_v12  ;;  %v18884_v13 = vld [vmem:[#allocation72_spill] sm:$0xff]  ;;  %v18885_v37 = vld [vmem:[#allocation73_spill] sm:$0xff] }
 0x40e   : > { %18878 = vst [vmem:[#allocation68_spill] sm:$0xff] %v16116_v40  ;;  %v10946_v46 = vsel %vm7431_vm13, 1.0, %v18377_v12  ;;  %v7875_v56 = vunpack.c.l.bf16 %v7259_v55  ;;  %v7879_v60 = vunpack.c.l.bf16 %v7261_v42  ;;  %vm7428_vm14 = vcmp.eq.s32.totalorder %v15816_v2, %v12083_v48  ;;  %v18890_v40 = vld [vmem:[#allocation55_spill] sm:$0xff] }
 0x40f   : > { %18879 = vst [vmem:[#allocation69_spill] sm:$0xff] %v16118_v19  ;;  %vm7432_vm15 = vcmp.eq.s32.totalorder %v18881_v27, %v12083_v48  ;;  %v7876_v63 = vunpack.c.h.bf16 %v7259_v55  ;;  %v10943_v14 = vsel %vm7428_vm14, 1.0, %v18377_v12  ;;  %v7880_v57 = vunpack.c.h.bf16 %v7261_v42 }
 0x410   : > { %18880 = vst [vmem:[#allocation70_spill] sm:$0xff] %v16120_v30  ;;  %v8131_v34 = vadd.f32 %v10942_v21, %v7875_v56  ;;  %v10947_v7 = vsel %vm7432_vm15, 1.0, %v18377_v12  ;;  %v8135_v38 = vadd.f32 %v10946_v46, %v7879_v60  ;;  %v7262_v30 = vpack.c.bf16 %v15977_v36, %v15974_v54 }
 0x411   : > { %18883 = vst [vmem:[#allocation84_spill] sm:$0xff] %v16126_v61  ;;  %v8132_v6 = vadd.f32 %v10943_v14, %v7876_v63  ;;  %v7260_v61 = vpack.c.bf16 %v18885_v37, %v18884_v13  ;;  %v8136_v19 = vadd.f32 %v10947_v7, %v7880_v57  ;;  %vm7429_vm0 = vcmp.eq.s32.totalorder %v15816_v2, %v12085_v49 }
 0x412   : > { %vm7433_vm1 = vcmp.eq.s32.totalorder %v18881_v27, %v12085_v49  ;;  %vm7430_vm2 = vcmp.eq.s32.totalorder %v15816_v2, %v12091_v51  ;;  %v8251_v55 = vpack.c.bf16 %v8135_v38, %v8131_v34  ;;  %v10944_v42 = vsel %vm7429_vm0, 1.0, %v18377_v12 }
 0x413   : > { %v10948_v21 = vsel %vm7433_vm1, 1.0, %v18377_v12  ;;  %v7877_v46 = vunpack.c.l.bf16 %v7260_v61  ;;  %v8252_v56 = vpack.c.bf16 %v8136_v19, %v8132_v6  ;;  %v7881_v54 = vunpack.c.l.bf16 %v7262_v30  ;;  %v5405_v57 = vpop.permute.xlu0 %5404 }
 0x414   : > { %vm7434_vm3 = vcmp.eq.s32.totalorder %v18881_v27, %v12091_v51  ;;  %v10945_v36 = vsel %vm7430_vm2, 1.0, %v18377_v12  ;;  %8549 = vmatmul.bf16.gmra.mxu0 %v8251_v55  ;;  %v7878_v14 = vunpack.c.h.bf16 %v7260_v61  ;;  %v7882_v7 = vunpack.c.h.bf16 %v7262_v30  ;;  %v16162_v13 = vpop.permute.xlu1 %7343  ;;  %v18886_v55 = vld [vmem:[#allocation56_spill] sm:$0xff] }
 0x415   : > { %v8133_v60 = vadd.f32 %v10944_v42, %v7877_v46  ;;  %v10949_v63 = vsel %vm7434_vm3, 1.0, %v18377_v12  ;;  %8638 = vmatmul.bf16.gmra.mxu1 %v8252_v56  ;;  %v8137_v2 = vadd.f32 %v10948_v21, %v7881_v54  ;;  %vm6455_vm4 = vcmp.eq.s32.totalorder %v6352_v26, %v12081_v47  ;;  %v18887_v46 = vld [vmem:[#allocation39_spill] sm:$0xff] }
 0x416   : > { %vm6456_vm5 = vcmp.eq.s32.totalorder %v6352_v26, %v12083_v48  ;;  %vm6457_vm6 = vcmp.eq.s32.totalorder %v6352_v26, %v12085_v49  ;;  %v8134_v19 = vadd.f32 %v10945_v36, %v7878_v14  ;;  %v8138_v34 = vadd.f32 %v10949_v63, %v7882_v7  ;;  %v6370_v63 = vpop.permute.xlu2 %6369 }
 0x417   : > { %vm6458_vm7 = vcmp.eq.s32.totalorder %v6352_v26, %v12091_v51  ;;  %v10834_v27 = vsel %vm6455_vm4, 1.0, %v18377_v12  ;;  %v8253_v38 = vpack.c.bf16 %v8137_v2, %v8133_v60  ;;  %v10835_v6 = vsel %vm6456_vm5, 1.0, %v18377_v12 }
 0x418   : > { %v10836_v30 = vsel %vm6457_vm6, 1.0, %v18377_v12  ;;  %v10837_v61 = vsel %vm6458_vm7, 1.0, %v18377_v12  ;;  %v8254_v37 = vpack.c.bf16 %v8138_v34, %v8134_v19  ;;  %v6903_v42 = vunpack.c.l.bf16 %v18886_v55 }
 0x419   : > { %v6904_v21 = vunpack.c.h.bf16 %v18886_v55  ;;  %v6905_v56 = vunpack.c.l.bf16 %v18887_v46  ;;  %8727 = vmatmul.bf16.gmra.mxu2 %v8253_v38  ;;  %v6906_v26 = vunpack.c.h.bf16 %v18887_v46  ;;  %vm5523_vm8 = vcmp.eq.s32.totalorder %v5405_v57, %v12081_v47  ;;  %v18888_v38 = vld [vmem:[#allocation22_spill] sm:$0xff] }
 0x41a   : > { %vm5524_vm9 = vcmp.eq.s32.totalorder %v5405_v57, %v12083_v48  ;;  %vm5525_vm10 = vcmp.eq.s32.totalorder %v5405_v57, %v12085_v49  ;;  %8816 = vmatmul.bf16.gmra.mxu3 %v8254_v37  ;;  %v16171_v54 = vadd.f32 %v10834_v27, %v6903_v42  ;;  %vm5526_vm11 = vcmp.eq.s32.totalorder %v5405_v57, %v12091_v51  ;;  %v18889_v37 = vld [vmem:[#allocation32_spill] sm:$0xff] }
 0x41b   : > { %v16173_v36 = vadd.f32 %v10835_v6, %v6904_v21  ;;  %v16175_v60 = vadd.f32 %v10836_v30, %v6905_v56  ;;  %v16178_v14 = vadd.f32 %v10837_v61, %v6906_v26  ;;  %v10766_v7 = vsel %vm5523_vm8, 1.0, %v18377_v12 }
 0x41c   : > { %v10767_v2 = vsel %vm5524_vm9, 1.0, %v18377_v12  ;;  %v10768_v19 = vsel %vm5525_vm10, 1.0, %v18377_v12  ;;  %v10769_v34 = vsel %vm5526_vm11, 1.0, %v18377_v12  ;;  %v5971_v27 = vunpack.c.l.bf16 %v18888_v38 }
 0x41d   : > { %v5972_v6 = vunpack.c.h.bf16 %v18888_v38  ;;  %v5973_v30 = vunpack.c.l.bf16 %v18889_v37  ;;  %v5974_v55 = vunpack.c.h.bf16 %v18889_v37  ;;  %vm6479_vm12 = vcmp.eq.s32.totalorder %v6370_v63, %v12081_v47 }
 0x41e   : > { %vm6480_vm13 = vcmp.eq.s32.totalorder %v6370_v63, %v12083_v48  ;;  %vm6481_vm14 = vcmp.eq.s32.totalorder %v6370_v63, %v12085_v49  ;;  %v6227_v57 = vadd.f32 %v10766_v7, %v5971_v27  ;;  %vm6482_vm15 = vcmp.eq.s32.totalorder %v6370_v63, %v12091_v51  ;;  %v16206_v27 = vpop.permute.xlu1 %7346 }
 0x41f   : > { %v6228_v61 = vadd.f32 %v10767_v2, %v5972_v6  ;;  %v6229_v42 = vadd.f32 %v10768_v19, %v5973_v30  ;;  %v6230_v21 = vadd.f32 %v10769_v34, %v5974_v55  ;;  %v10858_v46 = vsel %vm6479_vm12, 1.0, %v18377_v12  ;;  %v18891_v2 = vld [vmem:[#allocation57_spill] sm:$0xff] }
 0x420   : > { %v10859_v56 = vsel %vm6480_vm13, 1.0, %v18377_v12  ;;  %v10860_v26 = vsel %vm6481_vm14, 1.0, %v18377_v12  ;;  %v10861_v37 = vsel %vm6482_vm15, 1.0, %v18377_v12  ;;  %v6927_v8 = vunpack.c.l.bf16 %v18890_v40 }
 0x421   : > { %v16195_v38 = vpack.c.bf16 %v6228_v61, %v6227_v57  ;;  %v6928_v11 = vunpack.c.h.bf16 %v18890_v40  ;;  %v16200_v7 = vpack.c.bf16 %v6230_v21, %v6229_v42  ;;  %v6929_v19 = vunpack.c.l.bf16 %v18891_v2 }
 0x422   : > { %v6930_v63 = vunpack.c.h.bf16 %v18891_v2  ;;  %v7263_v34 = vpack.c.bf16 %v16051_v35, %v16049_v23  ;;  %v16208_v6 = vadd.f32 %v10858_v46, %v6927_v8  ;;  %v7265_v55 = vpack.c.bf16 %v15912_v16, %v15910_v9 }
 0x423   : > { %v16210_v30 = vadd.f32 %v10859_v56, %v6928_v11  ;;  %vm7435_vm0 = vcmp.eq.s32.totalorder %v16069_v50, %v12081_v47  ;;  %v16216_v40 = vadd.f32 %v10860_v26, %v6929_v19  ;;  %vm7439_vm1 = vcmp.eq.s32.totalorder %v15948_v59, %v12081_v47  ;;  %v7392_v26 = vpop.permute.xlu0 %7391 }
 0x424   : > { %v16218_v57 = vadd.f32 %v10861_v37, %v6930_v63  ;;  %v10950_v23 = vsel %vm7435_vm0, 1.0, %v18377_v12  ;;  %v10954_v35 = vsel %vm7439_vm1, 1.0, %v18377_v12  ;;  %v7883_v8 = vunpack.c.l.bf16 %v7263_v34 }
 0x425   : > { %v7887_v11 = vunpack.c.l.bf16 %v7265_v55  ;;  %vm7436_vm2 = vcmp.eq.s32.totalorder %v16069_v50, %v12083_v48  ;;  %vm7440_vm3 = vcmp.eq.s32.totalorder %v15948_v59, %v12083_v48  ;;  %v7884_v9 = vunpack.c.h.bf16 %v7263_v34 }
 0x426   : > { %v10951_v16 = vsel %vm7436_vm2, 1.0, %v18377_v12  ;;  %v7888_v61 = vunpack.c.h.bf16 %v7265_v55  ;;  %v8139_v42 = vadd.f32 %v10950_v23, %v7883_v8  ;;  %v10955_v46 = vsel %vm7440_vm3, 1.0, %v18377_v12 }
 0x427   : > { %v8143_v21 = vadd.f32 %v10954_v35, %v7887_v11  ;;  %v7264_v56 = vpack.c.bf16 %v16056_v5, %v16053_v41  ;;  %v8140_v37 = vadd.f32 %v10951_v16, %v7884_v9  ;;  %v7266_v19 = vpack.c.bf16 %v15921_v1, %v15914_v58  ;;  %v6364_v9 = vpop.permute.xlu1 %6363 }
 0x428   : > { %v8144_v2 = vadd.f32 %v10955_v46, %v7888_v61  ;;  %vm7437_vm4 = vcmp.eq.s32.totalorder %v16069_v50, %v12085_v49  ;;  %vm7441_vm5 = vcmp.eq.s32.totalorder %v15948_v59, %v12085_v49  ;;  %vm7438_vm6 = vcmp.eq.s32.totalorder %v16069_v50, %v12091_v51  ;;  %v16256_v46 = vpop.permute.xlu2 %7361 }
 0x429   : > { %v8255_v63 = vpack.c.bf16 %v8143_v21, %v8139_v42  ;;  %v10952_v34 = vsel %vm7437_vm4, 1.0, %v18377_v12  ;;  %v7885_v55 = vunpack.c.l.bf16 %v7264_v56  ;;  %v10956_v35 = vsel %vm7441_vm5, 1.0, %v18377_v12 }
 0x42a   : > { %v8256_v23 = vpack.c.bf16 %v8144_v2, %v8140_v37  ;;  %v7889_v41 = vunpack.c.l.bf16 %v7266_v19  ;;  %vm7442_vm7 = vcmp.eq.s32.totalorder %v15948_v59, %v12091_v51  ;;  %v10953_v58 = vsel %vm7438_vm6, 1.0, %v18377_v12 }
 0x42b   : > { %8554 = vmatmul.bf16.gmra.mxu0 %v8255_v63  ;;  %v8141_v5 = vadd.f32 %v10952_v34, %v7885_v55  ;;  %v7886_v1 = vunpack.c.h.bf16 %v7264_v56  ;;  %v10957_v11 = vsel %vm7442_vm7, 1.0, %v18377_v12  ;;  %v7890_v16 = vunpack.c.h.bf16 %v7266_v19  ;;  %v18896_v55 = vld [vmem:[#allocation65_spill] sm:$0xff] }
 0x42c   : > { %8643 = vmatmul.bf16.gmra.mxu1 %v8256_v23  ;;  %v8145_v8 = vadd.f32 %v10956_v35, %v7889_v41  ;;  %vm7511_vm8 = vcmp.eq.s32.totalorder %v7392_v26, %v12081_v47  ;;  %vm7512_vm9 = vcmp.eq.s32.totalorder %v7392_v26, %v12083_v48  ;;  %vm7513_vm10 = vcmp.eq.s32.totalorder %v7392_v26, %v12085_v49  ;;  %v7395_v35 = vpop.permute.xlu0 %7394 }
 0x42d   : > { %v8142_v61 = vadd.f32 %v10953_v58, %v7886_v1  ;;  %vm7514_vm11 = vcmp.eq.s32.totalorder %v7392_v26, %v12091_v51  ;;  %v8146_v59 = vadd.f32 %v10957_v11, %v7890_v16  ;;  %v16251_v42 = vsel %vm7511_vm8, 1.0, %v18377_v12 }
 0x42e   : > { %v8257_v50 = vpack.c.bf16 %v8145_v8, %v8141_v5  ;;  %18892 = vst [vmem:[#allocation88_spill] sm:$0xff] %v16251_v42  ;;  %v16254_v21 = vsel %vm7512_vm9, 1.0, %v18377_v12  ;;  %v16259_v56 = vsel %vm7513_vm10, 1.0, %v18377_v12  ;;  %v16262_v37 = vsel %vm7514_vm11, 1.0, %v18377_v12  ;;  %v18897_v5 = vld [vmem:[#allocation75_spill] sm:$0xff] }
 0x42f   : > { %18893 = vst [vmem:[#allocation89_spill] sm:$0xff] %v16254_v21  ;;  %vm6471_vm12 = vcmp.eq.s32.totalorder %v6364_v9, %v12081_v47  ;;  %vm6472_vm13 = vcmp.eq.s32.totalorder %v6364_v9, %v12083_v48  ;;  %v8258_v26 = vpack.c.bf16 %v8146_v59, %v8142_v61  ;;  %vm6473_vm14 = vcmp.eq.s32.totalorder %v6364_v9, %v12085_v49 }
 0x430   : > { %18894 = vst [vmem:[#allocation90_spill] sm:$0xff] %v16259_v56  ;;  %8732 = vmatmul.bf16.gmra.mxu2 %v8257_v50  ;;  %vm6474_vm15 = vcmp.eq.s32.totalorder %v6364_v9, %v12091_v51  ;;  %v10850_v2 = vsel %vm6471_vm12, 1.0, %v18377_v12  ;;  %v10851_v19 = vsel %vm6472_vm13, 1.0, %v18377_v12  ;;  %v10852_v63 = vsel %vm6473_vm14, 1.0, %v18377_v12 }
 0x431   : > { %18895 = vst [vmem:[#allocation86_spill] sm:$0xff] %v16262_v37  ;;  %v10853_v34 = vsel %vm6474_vm15, 1.0, %v18377_v12  ;;  %v6919_v23 = vunpack.c.l.bf16 %v18896_v55  ;;  %8821 = vmatmul.bf16.gmra.mxu3 %v8258_v26  ;;  %v6920_v41 = vunpack.c.h.bf16 %v18896_v55  ;;  %v6921_v58 = vunpack.c.l.bf16 %v18897_v5 }
 0x432   : > { %v6922_v1 = vunpack.c.h.bf16 %v18897_v5  ;;  %vm7515_vm0 = vcmp.eq.s32.totalorder %v7395_v35, %v12081_v47  ;;  %vm7516_vm1 = vcmp.eq.s32.totalorder %v7395_v35, %v12083_v48  ;;  %vm7517_vm2 = vcmp.eq.s32.totalorder %v7395_v35, %v12085_v49 }
 0x433   : > { %v16277_v8 = vadd.f32 %v10850_v2, %v6919_v23  ;;  %vm7518_vm3 = vcmp.eq.s32.totalorder %v7395_v35, %v12091_v51  ;;  %v16282_v11 = vadd.f32 %v10851_v19, %v6920_v41  ;;  %v16284_v16 = vadd.f32 %v10852_v63, %v6921_v58  ;;  %v16316_v23 = vpop.permute.xlu2 %7364 }
 0x434   : > { %v16286_v9 = vadd.f32 %v10853_v34, %v6922_v1  ;;  %v16289_v61 = vsel %vm7515_vm0, 1.0, %v18377_v12  ;;  %v16292_v50 = vsel %vm7516_vm1, 1.0, %v18377_v12  ;;  %v16295_v59 = vsel %vm7517_vm2, 1.0, %v18377_v12 }
 0x435   : > { %18898 = vst [vmem:[#allocation91_spill] sm:$0xff] %v16289_v61  ;;  %v16298_v26 = vsel %vm7518_vm3, 1.0, %v18377_v12  ;;  %v7267_v2 = vpack.c.bf16 %v15825_v31, %v15820_v24  ;;  %v7269_v19 = vpack.c.bf16 %v16173_v36, %v16171_v54  ;;  %vm7443_vm4 = vcmp.eq.s32.totalorder %v15995_v3, %v12081_v47 }
 0x436   : > { %18899 = vst [vmem:[#allocation83_spill] sm:$0xff] %v16292_v50  ;;  %vm7447_vm5 = vcmp.eq.s32.totalorder %v16162_v13, %v12081_v47  ;;  %vm7444_vm6 = vcmp.eq.s32.totalorder %v15995_v3, %v12083_v48  ;;  %v10958_v63 = vsel %vm7443_vm4, 1.0, %v18377_v12  ;;  %vm7448_vm7 = vcmp.eq.s32.totalorder %v16162_v13, %v12083_v48 }
 0x437   : > { %18900 = vst [vmem:[#allocation16_spill] sm:$0xff] %v16295_v59  ;;  %v10962_v34 = vsel %vm7447_vm5, 1.0, %v18377_v12  ;;  %v7891_v55 = vunpack.c.l.bf16 %v7267_v2  ;;  %v7895_v24 = vunpack.c.l.bf16 %v7269_v19  ;;  %v10959_v31 = vsel %vm7444_vm6, 1.0, %v18377_v12 }
 0x438   : > { %18901 = vst [vmem:[#allocation15_spill] sm:$0xff] %v16298_v26  ;;  %v10963_v54 = vsel %vm7448_vm7, 1.0, %v18377_v12  ;;  %v7892_v36 = vunpack.c.h.bf16 %v7267_v2  ;;  %v7896_v41 = vunpack.c.h.bf16 %v7269_v19  ;;  %v7268_v5 = vpack.c.bf16 %v15831_v22, %v15827_v15 }
 0x439   : > { %v8147_v35 = vadd.f32 %v10958_v63, %v7891_v55  ;;  %v7270_v58 = vpack.c.bf16 %v16178_v14, %v16175_v60  ;;  %v8151_v1 = vadd.f32 %v10962_v34, %v7895_v24  ;;  %vm7445_vm8 = vcmp.eq.s32.totalorder %v15995_v3, %v12085_v49  ;;  %v6367_v55 = vpop.permute.xlu1 %6366 }
 0x43a   : > { %v8148_v26 = vadd.f32 %v10959_v31, %v7892_v36  ;;  %vm7449_vm9 = vcmp.eq.s32.totalorder %v16162_v13, %v12085_v49  ;;  %v8152_v59 = vadd.f32 %v10963_v54, %v7896_v41  ;;  %v10960_v2 = vsel %vm7445_vm8, 1.0, %v18377_v12  ;;  %v5420_v36 = vpop.permute.xlu0 %5419 }
 0x43b   : > { %v10964_v63 = vsel %vm7449_vm9, 1.0, %v18377_v12  ;;  %v7893_v19 = vunpack.c.l.bf16 %v7268_v5  ;;  %v8259_v50 = vpack.c.bf16 %v8151_v1, %v8147_v35  ;;  %v7897_v15 = vunpack.c.l.bf16 %v7270_v58 }
 0x43c   : > { %vm7446_vm10 = vcmp.eq.s32.totalorder %v15995_v3, %v12091_v51  ;;  %vm7450_vm11 = vcmp.eq.s32.totalorder %v16162_v13, %v12091_v51  ;;  %v8260_v22 = vpack.c.bf16 %v8152_v59, %v8148_v26  ;;  %v7894_v31 = vunpack.c.h.bf16 %v7268_v5  ;;  %v18902_v5 = vld [vmem:[#allocation51_spill] sm:$0xff] }
 0x43d   : > { %v8149_v60 = vadd.f32 %v10960_v2, %v7893_v19  ;;  %v10961_v14 = vsel %vm7446_vm10, 1.0, %v18377_v12  ;;  %v10965_v34 = vsel %vm7450_vm11, 1.0, %v18377_v12  ;;  %8559 = vmatmul.bf16.gmra.mxu0 %v8259_v50  ;;  %v8153_v24 = vadd.f32 %v10964_v63, %v7897_v15  ;;  %v18903_v63 = vld [vmem:[#allocation54_spill] sm:$0xff] }
 0x43e   : > { %v7898_v54 = vunpack.c.h.bf16 %v7270_v58  ;;  %vm6475_vm12 = vcmp.eq.s32.totalorder %v6367_v55, %v12081_v47  ;;  %8648 = vmatmul.bf16.gmra.mxu1 %v8260_v22  ;;  %vm6476_vm13 = vcmp.eq.s32.totalorder %v6367_v55, %v12083_v48  ;;  %vm6477_vm14 = vcmp.eq.s32.totalorder %v6367_v55, %v12085_v49 }
 0x43f   : > { %vm6478_vm15 = vcmp.eq.s32.totalorder %v6367_v55, %v12091_v51  ;;  %v10854_v3 = vsel %vm6475_vm12, 1.0, %v18377_v12  ;;  %v8261_v13 = vpack.c.bf16 %v8153_v24, %v8149_v60  ;;  %v8150_v59 = vadd.f32 %v10961_v14, %v7894_v31  ;;  %v6379_v60 = vpop.permute.xlu2 %6378 }
 0x440   : > { %v8154_v26 = vadd.f32 %v10965_v34, %v7898_v54  ;;  %v10855_v50 = vsel %vm6476_vm13, 1.0, %v18377_v12  ;;  %v10856_v35 = vsel %vm6477_vm14, 1.0, %v18377_v12  ;;  %v10857_v41 = vsel %vm6478_vm15, 1.0, %v18377_v12 }
 0x441   : > { %v6923_v58 = vunpack.c.l.bf16 %v18902_v5  ;;  %v6924_v1 = vunpack.c.h.bf16 %v18902_v5  ;;  %8737 = vmatmul.bf16.gmra.mxu2 %v8261_v13  ;;  %v6925_v19 = vunpack.c.l.bf16 %v18903_v63  ;;  %v6926_v55 = vunpack.c.h.bf16 %v18903_v63  ;;  %v18904_v13 = vld [vmem:[#allocation80_spill] sm:$0xff]  ;;  %v16371_v63 = vpop.permute.xlu1 %7358 }
 0x442   : > { %v8262_v2 = vpack.c.bf16 %v8154_v26, %v8150_v59  ;;  %vm5543_vm0 = vcmp.eq.s32.totalorder %v5420_v36, %v12081_v47  ;;  %vm5544_vm1 = vcmp.eq.s32.totalorder %v5420_v36, %v12083_v48  ;;  %vm5545_vm2 = vcmp.eq.s32.totalorder %v5420_v36, %v12085_v49 }
 0x443   : > { %v16347_v15 = vadd.f32 %v10854_v3, %v6923_v58  ;;  %v16349_v22 = vadd.f32 %v10855_v50, %v6924_v1  ;;  %v16353_v14 = vadd.f32 %v10856_v35, %v6925_v19  ;;  %v16355_v34 = vadd.f32 %v10857_v41, %v6926_v55  ;;  %v18905_v50 = vld [vmem:[#allocation40_spill] sm:$0xff]  ;;  %v5423_v19 = vpop.permute.xlu0 %5422 }
 0x444   : > { %8826 = vmatmul.bf16.gmra.mxu3 %v8262_v2  ;;  %vm5546_vm3 = vcmp.eq.s32.totalorder %v5420_v36, %v12091_v51  ;;  %v10786_v24 = vsel %vm5543_vm0, 1.0, %v18377_v12  ;;  %v10787_v31 = vsel %vm5544_vm1, 1.0, %v18377_v12  ;;  %v10788_v54 = vsel %vm5545_vm2, 1.0, %v18377_v12 }
 0x445   : > { %v10789_v3 = vsel %vm5546_vm3, 1.0, %v18377_v12  ;;  %v5991_v59 = vunpack.c.l.bf16 %v18904_v13  ;;  %v5992_v26 = vunpack.c.h.bf16 %v18904_v13  ;;  %v5993_v5 = vunpack.c.l.bf16 %v18905_v50 }
 0x446   : > { %v5994_v35 = vunpack.c.h.bf16 %v18905_v50  ;;  %vm6491_vm4 = vcmp.eq.s32.totalorder %v6379_v60, %v12081_v47  ;;  %vm6492_vm5 = vcmp.eq.s32.totalorder %v6379_v60, %v12083_v48  ;;  %vm6493_vm6 = vcmp.eq.s32.totalorder %v6379_v60, %v12085_v49 }
 0x447   : > { %v6247_v41 = vadd.f32 %v10786_v24, %v5991_v59  ;;  %vm6494_vm7 = vcmp.eq.s32.totalorder %v6379_v60, %v12091_v51  ;;  %v6248_v36 = vadd.f32 %v10787_v31, %v5992_v26  ;;  %v6249_v58 = vadd.f32 %v10788_v54, %v5993_v5  ;;  %v18906_v59 = vld [vmem:[#allocation47_spill] sm:$0xff]  ;;  %v18909_v31 = vld [vmem:[#allocation48_spill] sm:$0xff] }
 0x448   : > { %v6250_v1 = vadd.f32 %v10789_v3, %v5994_v35  ;;  %v10870_v2 = vsel %vm6491_vm4, 1.0, %v18377_v12  ;;  %v10871_v55 = vsel %vm6492_vm5, 1.0, %v18377_v12  ;;  %v10872_v13 = vsel %vm6493_vm6, 1.0, %v18377_v12 }
 0x449   : > { %v10873_v24 = vsel %vm6494_vm7, 1.0, %v18377_v12  ;;  %v6939_v50 = vunpack.c.l.bf16 %v18906_v59  ;;  %v16377_v61 = vpack.c.bf16 %v6248_v36, %v6247_v41  ;;  %v6940_v60 = vunpack.c.h.bf16 %v18906_v59 }
 0x44a   : > { %v16379_v37 = vpack.c.bf16 %v6250_v1, %v6249_v58  ;;  %v6941_v54 = vunpack.c.l.bf16 %v18909_v31  ;;  %v6942_v3 = vunpack.c.h.bf16 %v18909_v31  ;;  %vm5547_vm8 = vcmp.eq.s32.totalorder %v5423_v19, %v12081_v47 }
 0x44b   : > { %18907 = vst [vmem:[#allocation85_spill] sm:$0xff] %v16377_v61  ;;  %v16384_v26 = vadd.f32 %v10870_v2, %v6939_v50  ;;  %vm5548_vm9 = vcmp.eq.s32.totalorder %v5423_v19, %v12083_v48  ;;  %v16388_v5 = vadd.f32 %v10871_v55, %v6940_v60  ;;  %vm5549_vm10 = vcmp.eq.s32.totalorder %v5423_v19, %v12085_v49  ;;  %v16399_v2 = vpop.permute.xlu2 %7373  ;;  %v18910_v55 = vld [vmem:[#allocation41_spill] sm:$0xff] }
 0x44c   : > { %18908 = vst [vmem:[#allocation18_spill] sm:$0xff] %v16379_v37  ;;  %v16390_v35 = vadd.f32 %v10872_v13, %v6941_v54  ;;  %vm5550_vm11 = vcmp.eq.s32.totalorder %v5423_v19, %v12091_v51  ;;  %v16394_v41 = vadd.f32 %v10873_v24, %v6942_v3  ;;  %v10790_v36 = vsel %vm5547_vm8, 1.0, %v18377_v12  ;;  %v18911_v60 = vld [vmem:[#allocation45_spill] sm:$0xff] }
 0x44d   : > { %v10791_v58 = vsel %vm5548_vm9, 1.0, %v18377_v12  ;;  %v10792_v1 = vsel %vm5549_vm10, 1.0, %v18377_v12  ;;  %v10793_v59 = vsel %vm5550_vm11, 1.0, %v18377_v12  ;;  %v5995_v50 = vunpack.c.l.bf16 %v18910_v55 }
 0x44e   : > { %v5996_v13 = vunpack.c.h.bf16 %v18910_v55  ;;  %v5997_v31 = vunpack.c.l.bf16 %v18911_v60  ;;  %v5998_v19 = vunpack.c.h.bf16 %v18911_v60  ;;  %v7271_v24 = vpack.c.bf16 %v16095_v20, %v16093_v25 }
 0x44f   : > { %v7273_v54 = vpack.c.bf16 %v15867_v18, %v15865_v43  ;;  %vm7451_vm12 = vcmp.eq.s32.totalorder %v16206_v27, %v12081_v47  ;;  %v6251_v3 = vadd.f32 %v10790_v36, %v5995_v50  ;;  %vm7455_vm13 = vcmp.eq.s32.totalorder %v16087_v28, %v12081_v47  ;;  %v6376_v43 = vpop.permute.xlu1 %6375 }
 0x450   : > { %v6252_v56 = vadd.f32 %v10791_v58, %v5996_v13  ;;  %v6253_v21 = vadd.f32 %v10792_v1, %v5997_v31  ;;  %v6254_v55 = vadd.f32 %v10793_v59, %v5998_v19  ;;  %v10966_v42 = vsel %vm7451_vm12, 1.0, %v18377_v12 }
 0x451   : > { %v10970_v60 = vsel %vm7455_vm13, 1.0, %v18377_v12  ;;  %v7899_v37 = vunpack.c.l.bf16 %v7271_v24  ;;  %v7903_v25 = vunpack.c.l.bf16 %v7273_v54  ;;  %vm7452_vm14 = vcmp.eq.s32.totalorder %v16206_v27, %v12083_v48 }
 0x452   : > { %v16416_v61 = vpack.c.bf16 %v6252_v56, %v6251_v3  ;;  %vm7456_vm15 = vcmp.eq.s32.totalorder %v16087_v28, %v12083_v48  ;;  %v16422_v18 = vpack.c.bf16 %v6254_v55, %v6253_v21  ;;  %v10967_v36 = vsel %vm7452_vm14, 1.0, %v18377_v12 }
 0x453   : > { %v8155_v20 = vadd.f32 %v10966_v42, %v7899_v37  ;;  %v10971_v58 = vsel %vm7456_vm15, 1.0, %v18377_v12  ;;  %v8159_v1 = vadd.f32 %v10970_v60, %v7903_v25  ;;  %v7900_v59 = vunpack.c.h.bf16 %v7271_v24 }
 0x454   : > { %v7904_v50 = vunpack.c.h.bf16 %v7273_v54  ;;  %v7272_v56 = vpack.c.bf16 %v16100_v39, %v16097_v29  ;;  %v7274_v13 = vpack.c.bf16 %v15872_v10, %v15869_v62  ;;  %vm7453_vm0 = vcmp.eq.s32.totalorder %v16206_v27, %v12085_v49  ;;  %v16440_v62 = vpop.permute.xlu2 %7376 }
 0x455   : > { %vm7457_vm1 = vcmp.eq.s32.totalorder %v16087_v28, %v12085_v49  ;;  %vm7454_vm2 = vcmp.eq.s32.totalorder %v16206_v27, %v12091_v51  ;;  %v8263_v42 = vpack.c.bf16 %v8159_v1, %v8155_v20  ;;  %v8156_v21 = vadd.f32 %v10967_v36, %v7900_v59 }
 0x456   : > { %v8160_v37 = vadd.f32 %v10971_v58, %v7904_v50  ;;  %v10968_v31 = vsel %vm7453_vm0, 1.0, %v18377_v12  ;;  %v10972_v19 = vsel %vm7457_vm1, 1.0, %v18377_v12  ;;  %v7901_v29 = vunpack.c.l.bf16 %v7272_v56  ;;  %v18912_v50 = vld [vmem:[#allocation49_spill] sm:$0xff] }
 0x457   : > { %v7905_v39 = vunpack.c.l.bf16 %v7274_v13  ;;  %vm7458_vm3 = vcmp.eq.s32.totalorder %v16087_v28, %v12091_v51  ;;  %8564 = vmatmul.bf16.gmra.mxu0 %v8263_v42  ;;  %v10969_v24 = vsel %vm7454_vm2, 1.0, %v18377_v12  ;;  %v7902_v54 = vunpack.c.h.bf16 %v7272_v56  ;;  %v16454_v42 = vpop.permute.xlu1 %7367 }
 0x458   : > { %v8264_v10 = vpack.c.bf16 %v8160_v37, %v8156_v21  ;;  %v10973_v27 = vsel %vm7458_vm3, 1.0, %v18377_v12  ;;  %v8157_v3 = vadd.f32 %v10968_v31, %v7901_v29  ;;  %v7906_v60 = vunpack.c.h.bf16 %v7274_v13  ;;  %v18913_v37 = vld [vmem:[#allocation52_spill] sm:$0xff] }
 0x459   : > { %v8161_v55 = vadd.f32 %v10972_v19, %v7905_v39  ;;  %vm6487_vm4 = vcmp.eq.s32.totalorder %v6376_v43, %v12081_v47  ;;  %v8158_v25 = vadd.f32 %v10969_v24, %v7902_v54  ;;  %vm6488_vm5 = vcmp.eq.s32.totalorder %v6376_v43, %v12083_v48  ;;  %v18914_v54 = vld [vmem:[#allocation78_spill] sm:$0xff] }
 0x45a   : > { %8653 = vmatmul.bf16.gmra.mxu1 %v8264_v10  ;;  %vm6489_vm6 = vcmp.eq.s32.totalorder %v6376_v43, %v12085_v49  ;;  %vm6490_vm7 = vcmp.eq.s32.totalorder %v6376_v43, %v12091_v51  ;;  %v8162_v20 = vadd.f32 %v10973_v27, %v7906_v60  ;;  %v10866_v36 = vsel %vm6487_vm4, 1.0, %v18377_v12 }
 0x45b   : > { %v8265_v28 = vpack.c.bf16 %v8161_v55, %v8157_v3  ;;  %v10867_v58 = vsel %vm6488_vm5, 1.0, %v18377_v12  ;;  %v10868_v1 = vsel %vm6489_vm6, 1.0, %v18377_v12  ;;  %v10869_v59 = vsel %vm6490_vm7, 1.0, %v18377_v12 }
 0x45c   : > { %v6935_v56 = vunpack.c.l.bf16 %v18912_v50  ;;  %v6936_v13 = vunpack.c.h.bf16 %v18912_v50  ;;  %v8266_v21 = vpack.c.bf16 %v8162_v20, %v8158_v25  ;;  %v6937_v43 = vunpack.c.l.bf16 %v18913_v37  ;;  %v6394_v25 = vpop.permute.xlu2 %6393 }
 0x45d   : > { %8742 = vmatmul.bf16.gmra.mxu2 %v8265_v28  ;;  %v6938_v31 = vunpack.c.h.bf16 %v18913_v37  ;;  %v7275_v19 = vpack.c.bf16 %v15887_v33, %v15885_v52  ;;  %v7277_v10 = vpack.c.bf16 %v16282_v11, %v16277_v8  ;;  %vm7459_vm8 = vcmp.eq.s32.totalorder %v16140_v0, %v12081_v47 }
 0x45e   : > { %v16460_v29 = vadd.f32 %v10866_v36, %v6935_v56  ;;  %v16462_v39 = vadd.f32 %v10867_v58, %v6936_v13  ;;  %8831 = vmatmul.bf16.gmra.mxu3 %v8266_v21  ;;  %v16468_v24 = vadd.f32 %v10868_v1, %v6937_v43  ;;  %vm7463_vm9 = vcmp.eq.s32.totalorder %v18914_v54, %v12081_v47  ;;  %v18915_v58 = vld [vmem:[#allocation76_spill] sm:$0xff]  ;;  %v18916_v1 = vld [vmem:[#allocation77_spill] sm:$0xff] }
 0x45f   : > { %v16470_v27 = vadd.f32 %v10869_v59, %v6938_v31  ;;  %v10974_v52 = vsel %vm7459_vm8, 1.0, %v18377_v12  ;;  %v10978_v33 = vsel %vm7463_vm9, 1.0, %v18377_v12  ;;  %v7907_v3 = vunpack.c.l.bf16 %v7275_v19 }
 0x460   : > { %v7911_v55 = vunpack.c.l.bf16 %v7277_v10  ;;  %vm7460_vm10 = vcmp.eq.s32.totalorder %v16140_v0, %v12083_v48  ;;  %vm7464_vm11 = vcmp.eq.s32.totalorder %v18914_v54, %v12083_v48  ;;  %v7908_v11 = vunpack.c.h.bf16 %v7275_v19 }
 0x461   : > { %v10975_v8 = vsel %vm7460_vm10, 1.0, %v18377_v12  ;;  %v7912_v60 = vunpack.c.h.bf16 %v7277_v10  ;;  %v8163_v28 = vadd.f32 %v10974_v52, %v7907_v3  ;;  %v10979_v36 = vsel %vm7464_vm11, 1.0, %v18377_v12 }
 0x462   : > { %v8167_v20 = vadd.f32 %v10978_v33, %v7911_v55  ;;  %v7276_v59 = vpack.c.bf16 %v18916_v1, %v18915_v58  ;;  %v8164_v50 = vadd.f32 %v10975_v8, %v7908_v11  ;;  %v7278_v13 = vpack.c.bf16 %v16286_v9, %v16284_v16  ;;  %v16497_v33 = vpop.permute.xlu1 %7370  ;;  %v18917_v58 = vld [vmem:[#allocation58_spill] sm:$0xff] }
 0x463   : > { %v8168_v56 = vadd.f32 %v10979_v36, %v7912_v60  ;;  %vm7461_vm12 = vcmp.eq.s32.totalorder %v16140_v0, %v12085_v49  ;;  %vm7465_vm13 = vcmp.eq.s32.totalorder %v18914_v54, %v12085_v49  ;;  %vm7462_vm14 = vcmp.eq.s32.totalorder %v16140_v0, %v12091_v51 }
 0x464   : > { %v8267_v21 = vpack.c.bf16 %v8167_v20, %v8163_v28  ;;  %v10976_v37 = vsel %vm7461_vm12, 1.0, %v18377_v12  ;;  %v7909_v43 = vunpack.c.l.bf16 %v7276_v59  ;;  %v10980_v19 = vsel %vm7465_vm13, 1.0, %v18377_v12 }
 0x465   : > { %v8268_v31 = vpack.c.bf16 %v8168_v56, %v8164_v50  ;;  %v7913_v10 = vunpack.c.l.bf16 %v7278_v13  ;;  %vm7466_vm15 = vcmp.eq.s32.totalorder %v18914_v54, %v12091_v51  ;;  %v10977_v16 = vsel %vm7462_vm14, 1.0, %v18377_v12  ;;  %v18918_v56 = vld [vmem:[#allocation59_spill] sm:$0xff] }
 0x466   : > { %v8165_v52 = vadd.f32 %v10976_v37, %v7909_v43  ;;  %v7910_v9 = vunpack.c.h.bf16 %v7276_v59  ;;  %v10981_v55 = vsel %vm7466_vm15, 1.0, %v18377_v12  ;;  %v7914_v8 = vunpack.c.h.bf16 %v7278_v13 }
 0x467   : > { %v8169_v3 = vadd.f32 %v10980_v19, %v7913_v10  ;;  %vm6511_vm0 = vcmp.eq.s32.totalorder %v6394_v25, %v12081_v47  ;;  %8569 = vmatmul.bf16.gmra.mxu0 %v8267_v21  ;;  %vm6512_vm1 = vcmp.eq.s32.totalorder %v6394_v25, %v12083_v48  ;;  %vm6513_vm2 = vcmp.eq.s32.totalorder %v6394_v25, %v12085_v49  ;;  %v16512_v21 = vpop.permute.xlu2 %7385 }
 0x468   : > { %v8166_v11 = vadd.f32 %v10977_v16, %v7910_v9  ;;  %vm6514_vm3 = vcmp.eq.s32.totalorder %v6394_v25, %v12091_v51  ;;  %v8170_v54 = vadd.f32 %v10981_v55, %v7914_v8  ;;  %v10890_v60 = vsel %vm6511_vm0, 1.0, %v18377_v12 }
 0x469   : > { %v8269_v0 = vpack.c.bf16 %v8169_v3, %v8165_v52  ;;  %v10891_v28 = vsel %vm6512_vm1, 1.0, %v18377_v12  ;;  %v10892_v20 = vsel %vm6513_vm2, 1.0, %v18377_v12  ;;  %v10893_v36 = vsel %vm6514_vm3, 1.0, %v18377_v12 }
 0x46a   : > { %8658 = vmatmul.bf16.gmra.mxu1 %v8268_v31  ;;  %v6959_v1 = vunpack.c.l.bf16 %v18917_v58  ;;  %v6960_v59 = vunpack.c.h.bf16 %v18917_v58  ;;  %v8270_v50 = vpack.c.bf16 %v8170_v54, %v8166_v11  ;;  %v6961_v13 = vunpack.c.l.bf16 %v18918_v56  ;;  %v6388_v54 = vpop.permute.xlu1 %6387 }
 0x46b   : > { %v6962_v25 = vunpack.c.h.bf16 %v18918_v56  ;;  %v7279_v37 = vpack.c.bf16 %v16349_v22, %v16347_v15  ;;  %v7281_v19 = vpack.c.bf16 %v16210_v30, %v16208_v6  ;;  %vm7467_vm4 = vcmp.eq.s32.totalorder %v16371_v63, %v12081_v47 }
 0x46c   : > { %v16516_v43 = vadd.f32 %v10890_v60, %v6959_v1  ;;  %v16518_v31 = vadd.f32 %v10891_v28, %v6960_v59  ;;  %v16524_v10 = vadd.f32 %v10892_v20, %v6961_v13  ;;  %vm7471_vm5 = vcmp.eq.s32.totalorder %v16256_v46, %v12081_v47 }
 0x46d   : > { %8747 = vmatmul.bf16.gmra.mxu2 %v8269_v0  ;;  %v16526_v52 = vadd.f32 %v10893_v36, %v6962_v25  ;;  %v10982_v15 = vsel %vm7467_vm4, 1.0, %v18377_v12  ;;  %v10986_v22 = vsel %vm7471_vm5, 1.0, %v18377_v12  ;;  %v7915_v16 = vunpack.c.l.bf16 %v7279_v37 }
 0x46e   : > { %v7919_v9 = vunpack.c.l.bf16 %v7281_v19  ;;  %vm7468_vm6 = vcmp.eq.s32.totalorder %v16371_v63, %v12083_v48  ;;  %8836 = vmatmul.bf16.gmra.mxu3 %v8270_v50  ;;  %vm7472_vm7 = vcmp.eq.s32.totalorder %v16256_v46, %v12083_v48  ;;  %v7916_v30 = vunpack.c.h.bf16 %v7279_v37 }
 0x46f   : > { %v10983_v6 = vsel %vm7468_vm6, 1.0, %v18377_v12  ;;  %v7920_v3 = vunpack.c.h.bf16 %v7281_v19  ;;  %v8171_v55 = vadd.f32 %v10982_v15, %v7915_v16  ;;  %v10987_v11 = vsel %vm7472_vm7, 1.0, %v18377_v12  ;;  %v6397_v37 = vpop.permute.xlu2 %6396 }
 0x470   : > { %v8175_v8 = vadd.f32 %v10986_v22, %v7919_v9  ;;  %v7280_v0 = vpack.c.bf16 %v16355_v34, %v16353_v14  ;;  %v8172_v60 = vadd.f32 %v10983_v6, %v7916_v30  ;;  %v7282_v20 = vpack.c.bf16 %v16218_v57, %v16216_v40  ;;  %v18919_v6 = vld [vmem:[#allocation60_spill] sm:$0xff] }
 0x471   : > { %v8176_v28 = vadd.f32 %v10987_v11, %v7920_v3  ;;  %vm7469_vm8 = vcmp.eq.s32.totalorder %v16371_v63, %v12085_v49  ;;  %vm7473_vm9 = vcmp.eq.s32.totalorder %v16256_v46, %v12085_v49  ;;  %vm7470_vm10 = vcmp.eq.s32.totalorder %v16371_v63, %v12091_v51 }
 0x472   : > { %v8271_v36 = vpack.c.bf16 %v8175_v8, %v8171_v55  ;;  %v10984_v58 = vsel %vm7469_vm8, 1.0, %v18377_v12  ;;  %v7917_v1 = vunpack.c.l.bf16 %v7280_v0  ;;  %v10988_v50 = vsel %vm7473_vm9, 1.0, %v18377_v12  ;;  %v18920_v8 = vld [vmem:[#allocation61_spill] sm:$0xff] }
 0x473   : > { %v8272_v59 = vpack.c.bf16 %v8176_v28, %v8172_v60  ;;  %v7921_v14 = vunpack.c.l.bf16 %v7282_v20  ;;  %vm7474_vm11 = vcmp.eq.s32.totalorder %v16256_v46, %v12091_v51  ;;  %v10985_v40 = vsel %vm7470_vm10, 1.0, %v18377_v12  ;;  %v6391_v28 = vpop.permute.xlu1 %6390 }
 0x474   : > { %v8173_v34 = vadd.f32 %v10984_v58, %v7917_v1  ;;  %v7918_v57 = vunpack.c.h.bf16 %v7280_v0  ;;  %v10989_v13 = vsel %vm7474_vm11, 1.0, %v18377_v12  ;;  %v7922_v25 = vunpack.c.h.bf16 %v7282_v20  ;;  %v8540_v1 = vpop.f32.mrf.mxu0 }
 0x475   : > { %v8177_v56 = vadd.f32 %v10988_v50, %v7921_v14  ;;  %vm6503_vm12 = vcmp.eq.s32.totalorder %v6388_v54, %v12081_v47  ;;  %vm6504_vm13 = vcmp.eq.s32.totalorder %v6388_v54, %v12083_v48  ;;  %vm6505_vm14 = vcmp.eq.s32.totalorder %v6388_v54, %v12085_v49 }
 0x476   : > { %v8174_v19 = vadd.f32 %v10985_v40, %v7918_v57  ;;  %vm6506_vm15 = vcmp.eq.s32.totalorder %v6388_v54, %v12091_v51  ;;  %v8178_v15 = vadd.f32 %v10989_v13, %v7922_v25  ;;  %v10882_v46 = vsel %vm6503_vm12, 1.0, %v18377_v12  ;;  %v8629_v40 = vpop.f32.mrf.mxu1 }
 0x477   : > { %v8273_v63 = vpack.c.bf16 %v8177_v56, %v8173_v34  ;;  %v10883_v22 = vsel %vm6504_vm13, 1.0, %v18377_v12  ;;  %8574 = vmatmul.bf16.gmra.mxu0 %v8271_v36  ;;  %v10884_v16 = vsel %vm6505_vm14, 1.0, %v18377_v12  ;;  %v10885_v9 = vsel %vm6506_vm15, 1.0, %v18377_v12 }
 0x478   : > { %v6951_v30 = vunpack.c.l.bf16 %v18919_v6  ;;  %v6952_v3 = vunpack.c.h.bf16 %v18919_v6  ;;  %v8274_v55 = vpack.c.bf16 %v8178_v15, %v8174_v19  ;;  %v6953_v11 = vunpack.c.l.bf16 %v18920_v8 }
 0x479   : > { %v6954_v0 = vunpack.c.h.bf16 %v18920_v8  ;;  %vm6515_vm0 = vcmp.eq.s32.totalorder %v6397_v37, %v12081_v47  ;;  %vm6516_vm1 = vcmp.eq.s32.totalorder %v6397_v37, %v12083_v48  ;;  %vm6517_vm2 = vcmp.eq.s32.totalorder %v6397_v37, %v12085_v49 }
 0x47a   : > { %8663 = vmatmul.bf16.gmra.mxu1 %v8272_v59  ;;  %v16567_v54 = vadd.f32 %v10882_v46, %v6951_v30  ;;  %v16569_v60 = vadd.f32 %v10883_v22, %v6952_v3  ;;  %v16573_v20 = vadd.f32 %v10884_v16, %v6953_v11  ;;  %vm6518_vm3 = vcmp.eq.s32.totalorder %v6397_v37, %v12091_v51  ;;  %v18921_v16 = vld [vmem:[#allocation74_spill] sm:$0xff] }
 0x47b   : > { %v16575_v36 = vadd.f32 %v10885_v9, %v6954_v0  ;;  %v10894_v58 = vsel %vm6515_vm0, 1.0, %v18377_v12  ;;  %v10895_v59 = vsel %vm6516_vm1, 1.0, %v18377_v12  ;;  %v10896_v50 = vsel %vm6517_vm2, 1.0, %v18377_v12 }
 0x47c   : > { %v10897_v14 = vsel %vm6518_vm3, 1.0, %v18377_v12  ;;  %v6963_v34 = vunpack.c.l.bf16 %v16195_v38  ;;  %v6964_v57 = vunpack.c.h.bf16 %v16195_v38  ;;  %v6965_v56 = vunpack.c.l.bf16 %v16200_v7  ;;  %v7389_v38 = vpop.permute.xlu2 %7388 }
 0x47d   : > { %8752 = vmatmul.bf16.gmra.mxu2 %v8273_v63  ;;  %v6966_v13 = vunpack.c.h.bf16 %v16200_v7  ;;  %vm6507_vm4 = vcmp.eq.s32.totalorder %v6391_v28, %v12081_v47  ;;  %vm6508_vm5 = vcmp.eq.s32.totalorder %v6391_v28, %v12083_v48  ;;  %vm6509_vm6 = vcmp.eq.s32.totalorder %v6391_v28, %v12085_v49 }
 0x47e   : > { %v7219_v25 = vadd.f32 %v10894_v58, %v6963_v34  ;;  %vm6510_vm7 = vcmp.eq.s32.totalorder %v6391_v28, %v12091_v51  ;;  %8841 = vmatmul.bf16.gmra.mxu3 %v8274_v55  ;;  %v7220_v37 = vadd.f32 %v10895_v59, %v6964_v57  ;;  %v7221_v19 = vadd.f32 %v10896_v50, %v6965_v56  ;;  %v18922_v55 = vld [vmem:[#allocation67_spill] sm:$0xff] }
 0x47f   : > { %v7222_v15 = vadd.f32 %v10897_v14, %v6966_v13  ;;  %v10886_v63 = vsel %vm6507_vm4, 1.0, %v18377_v12  ;;  %v10887_v46 = vsel %vm6508_vm5, 1.0, %v18377_v12  ;;  %v10888_v7 = vsel %vm6509_vm6, 1.0, %v18377_v12 }
 0x480   : > { %v10889_v22 = vsel %vm6510_vm7, 1.0, %v18377_v12  ;;  %v6955_v9 = vunpack.c.l.bf16 %v18921_v16  ;;  %v16595_v6 = vpack.c.bf16 %v7220_v37, %v7219_v25  ;;  %v6956_v3 = vunpack.c.h.bf16 %v18921_v16  ;;  %v8542_v37 = vpop.f32.mrf.mxu0 }
 0x481   : > { %v16597_v30 = vpack.c.bf16 %v7222_v15, %v7221_v19  ;;  %v6957_v8 = vunpack.c.l.bf16 %v18922_v55  ;;  %v6958_v11 = vunpack.c.h.bf16 %v18922_v55  ;;  %v8630_v28 = vadd.f32 %v8629_v40, %v8540_v1  ;;  %v8718_v1 = vpop.f32.mrf.mxu2  ;;  %v8807_v40 = vpop.f32.mrf.mxu3 }
 0x482   : > { %v16602_v0 = vadd.f32 %v10886_v63, %v6955_v9  ;;  %vm7507_vm8 = vcmp.eq.s32.totalorder %v7389_v38, %v12081_v47  ;;  %v16605_v58 = vadd.f32 %v10887_v46, %v6956_v3  ;;  %vm7508_vm9 = vcmp.eq.s32.totalorder %v7389_v38, %v12083_v48  ;;  %v16638_v19 = vpop.permute.xlu1 %7382  ;;  %v8631_v15 = vpop.f32.mrf.mxu1 }
 0x483   : > { %v16607_v59 = vadd.f32 %v10888_v7, %v6957_v8  ;;  %vm7509_vm10 = vcmp.eq.s32.totalorder %v7389_v38, %v12085_v49  ;;  %v16611_v50 = vadd.f32 %v10889_v22, %v6958_v11  ;;  %vm7510_vm11 = vcmp.eq.s32.totalorder %v7389_v38, %v12091_v51 }
 0x484   : > { %v16615_v14 = vsel %vm7507_vm8, 1.0, %v18377_v12  ;;  %v16618_v34 = vsel %vm7508_vm9, 1.0, %v18377_v12  ;;  %v16621_v57 = vsel %vm7509_vm10, 1.0, %v18377_v12  ;;  %v16624_v56 = vsel %vm7510_vm11, 1.0, %v18377_v12 }
 0x485   : > { %v7283_v13 = vpack.c.bf16 %v15999_v45, %v15997_v32  ;;  %v7285_v25 = vpack.c.bf16 %v16462_v39, %v16460_v29  ;;  %vm7475_vm12 = vcmp.eq.s32.totalorder %v16316_v23, %v12081_v47  ;;  %vm7479_vm13 = vcmp.eq.s32.totalorder %v16454_v42, %v12081_v47 }
 0x486   : > { %vm7476_vm14 = vcmp.eq.s32.totalorder %v16316_v23, %v12083_v48  ;;  %vm7480_vm15 = vcmp.eq.s32.totalorder %v16454_v42, %v12083_v48  ;;  %v10990_v32 = vsel %vm7475_vm12, 1.0, %v18377_v12  ;;  %v10994_v45 = vsel %vm7479_vm13, 1.0, %v18377_v12 }
 0x487   : > { %v7923_v29 = vunpack.c.l.bf16 %v7283_v13  ;;  %v7927_v39 = vunpack.c.l.bf16 %v7285_v25  ;;  %v10991_v63 = vsel %vm7476_vm14, 1.0, %v18377_v12  ;;  %v10995_v38 = vsel %vm7480_vm15, 1.0, %v18377_v12 }
 0x488   : > { %v7924_v46 = vunpack.c.h.bf16 %v7283_v13  ;;  %v7928_v7 = vunpack.c.h.bf16 %v7285_v25  ;;  %v7284_v9 = vpack.c.bf16 %v16005_v53, %v16001_v4  ;;  %v7286_v3 = vpack.c.bf16 %v16470_v27, %v16468_v24  ;;  %v5414_v4 = vpop.permute.xlu2 %5413 }
 0x489   : > { %v8179_v22 = vadd.f32 %v10990_v32, %v7923_v29  ;;  %v8183_v16 = vadd.f32 %v10994_v45, %v7927_v39  ;;  %vm7477_vm0 = vcmp.eq.s32.totalorder %v16316_v23, %v12085_v49  ;;  %vm7481_vm1 = vcmp.eq.s32.totalorder %v16454_v42, %v12085_v49 }
 0x48a   : > { %v8180_v55 = vadd.f32 %v10991_v63, %v7924_v46  ;;  %v8184_v8 = vadd.f32 %v10995_v38, %v7928_v7  ;;  %v10992_v13 = vsel %vm7477_vm0, 1.0, %v18377_v12  ;;  %v10996_v25 = vsel %vm7481_vm1, 1.0, %v18377_v12 }
 0x48b   : > { %v8275_v11 = vpack.c.bf16 %v8183_v16, %v8179_v22  ;;  %v7925_v32 = vunpack.c.l.bf16 %v7284_v9  ;;  %v7929_v29 = vunpack.c.l.bf16 %v7286_v3  ;;  %vm7478_vm2 = vcmp.eq.s32.totalorder %v16316_v23, %v12091_v51  ;;  %v8720_v22 = vpop.f32.mrf.mxu2  ;;  %v8809_v16 = vpop.f32.mrf.mxu3  ;;  %v8307_v23 = vld [vmem:[#allocation2 + $0xb0] sm:$0xff] }
 0x48c   : > { %v8276_v45 = vpack.c.bf16 %v8184_v8, %v8180_v55  ;;  %vm7482_vm3 = vcmp.eq.s32.totalorder %v16454_v42, %v12091_v51  ;;  %v10993_v24 = vsel %vm7478_vm2, 1.0, %v18377_v12  ;;  %v7926_v39 = vunpack.c.h.bf16 %v7284_v9  ;;  %v8545_v42 = vpop.f32.mrf.mxu0  ;;  %v5408_v9 = vpop.permute.xlu1 %5407 }
 0x48d   : > { %8579 = vmatmul.bf16.gmra.mxu0 %v8275_v11  ;;  %v8181_v53 = vadd.f32 %v10992_v13, %v7925_v32  ;;  %v10997_v27 = vsel %vm7482_vm3, 1.0, %v18377_v12  ;;  %v8185_v63 = vadd.f32 %v10996_v25, %v7929_v29  ;;  %v7930_v38 = vunpack.c.h.bf16 %v7286_v3  ;;  %v8634_v3 = vpop.f32.mrf.mxu1 }
 0x48e   : > { %8668 = vmatmul.bf16.gmra.mxu1 %v8276_v45  ;;  %v8719_v46 = vadd.f32 %v8718_v1, %v8630_v28  ;;  %v8632_v7 = vadd.f32 %v8631_v15, %v8542_v37  ;;  %v8182_v55 = vadd.f32 %v10993_v24, %v7926_v39  ;;  %vm5535_vm4 = vcmp.eq.s32.totalorder %v5414_v4, %v12081_v47  ;;  %v18923_v45 = vld [vmem:[#allocation35_spill] sm:$0xff] }
 0x48f   : > { %vm5536_vm5 = vcmp.eq.s32.totalorder %v5414_v4, %v12083_v48  ;;  %vm5537_vm6 = vcmp.eq.s32.totalorder %v5414_v4, %v12085_v49  ;;  %v8277_v8 = vpack.c.bf16 %v8185_v63, %v8181_v53  ;;  %v8186_v11 = vadd.f32 %v10997_v27, %v7930_v38  ;;  %v8308_v38 = vld [vmem:[#allocation2] sm:$0xff] }
 0x490   : > { %v8808_v13 = vadd.f32 %v8807_v40, %v8719_v46  ;;  %vm5538_vm7 = vcmp.eq.s32.totalorder %v5414_v4, %v12091_v51  ;;  %v10778_v28 = vsel %vm5535_vm4, 1.0, %v18377_v12  ;;  %v10779_v1 = vsel %vm5536_vm5, 1.0, %v18377_v12  ;;  %v18924_v40 = vld [vmem:[#allocation36_spill] sm:$0xff] }
 0x491   : > { %v10780_v37 = vsel %vm5537_vm6, 1.0, %v18377_v12  ;;  %v10781_v15 = vsel %vm5538_vm7, 1.0, %v18377_v12  ;;  %8757 = vmatmul.bf16.gmra.mxu2 %v8277_v8  ;;  %v8278_v25 = vpack.c.bf16 %v8186_v11, %v8182_v55  ;;  %v5983_v29 = vunpack.c.l.bf16 %v18923_v45 }
 0x492   : > { %v8887_v32 = vadd.f32 %v8808_v13, %v8307_v23  ;;  %v5984_v53 = vunpack.c.h.bf16 %v18923_v45  ;;  %v5985_v24 = vunpack.c.l.bf16 %v18924_v40  ;;  %v5986_v4 = vunpack.c.h.bf16 %v18924_v40  ;;  %v6406_v13 = vpop.permute.xlu2 %6405 }
 0x493   : > { %v8721_v27 = vadd.f32 %v8720_v22, %v8632_v7  ;;  %vm5527_vm8 = vcmp.eq.s32.totalorder %v5408_v9, %v12081_v47  ;;  %8846 = vmatmul.bf16.gmra.mxu3 %v8278_v25  ;;  %v6239_v39 = vadd.f32 %v10778_v28, %v5983_v29  ;;  %vm5528_vm9 = vcmp.eq.s32.totalorder %v5408_v9, %v12083_v48  ;;  %v16688_v40 = vpop.f32.mrf.mxu3 }
 0x494   : > { %8919 = vst [vmem:[#allocation2 + $0xb0] sm:$0xff] %v8887_v32  ;;  %v6240_v63 = vadd.f32 %v10779_v1, %v5984_v53  ;;  %v10770_v46 = vsel %vm5527_vm8, 1.0, %v18377_v12  ;;  %v6241_v55 = vadd.f32 %v10780_v37, %v5985_v24  ;;  %v6242_v23 = vadd.f32 %v10781_v15, %v5986_v4  ;;  %v18925_v32 = vld [vmem:[#allocation38_spill] sm:$0xff]  ;;  %v16693_v4 = vpop.f32.mrf.mxu0 }
 0x495   : > { %v8810_v8 = vadd.f32 %v8809_v16, %v8721_v27  ;;  %vm5529_vm10 = vcmp.eq.s32.totalorder %v5408_v9, %v12085_v49  ;;  %vm5530_vm11 = vcmp.eq.s32.totalorder %v5408_v9, %v12091_v51  ;;  %v10771_v7 = vsel %vm5528_vm9, 1.0, %v18377_v12  ;;  %v18926_v15 = vld [vmem:[#allocation46_spill] sm:$0xff]  ;;  %v16686_v9 = vpop.f32.mrf.mxu2 }
 0x496   : > { %v6313_v11 = vpack.c.bf16 %v6240_v63, %v6239_v39  ;;  %v10772_v22 = vsel %vm5529_vm10, 1.0, %v18377_v12  ;;  %v6314_v28 = vpack.c.bf16 %v6242_v23, %v6241_v55  ;;  %v10773_v25 = vsel %vm5530_vm11, 1.0, %v18377_v12 }
 0x497   : > { %v8888_v1 = vadd.f32 %v8810_v8, %v8308_v38  ;;  %v5975_v45 = vunpack.c.l.bf16 %v18925_v32  ;;  %v5976_v37 = vunpack.c.h.bf16 %v18925_v32  ;;  %v5977_v16 = vunpack.c.l.bf16 %v18926_v15 }
 0x498   : > { %v5978_v29 = vunpack.c.h.bf16 %v18926_v15  ;;  %v16684_v53 = vadd.f32 %v8634_v3, %v8545_v42  ;;  %vm6527_vm12 = vcmp.eq.s32.totalorder %v6406_v13, %v12081_v47  ;;  %vm6528_vm13 = vcmp.eq.s32.totalorder %v6406_v13, %v12083_v48  ;;  %v16696_v42 = vpop.f32.mrf.mxu1 }
 0x499   : > { %8920 = vst [vmem:[#allocation2] sm:$0xff] %v8888_v1  ;;  %v6231_v24 = vadd.f32 %v10770_v46, %v5975_v45  ;;  %vm6529_vm14 = vcmp.eq.s32.totalorder %v6406_v13, %v12085_v49  ;;  %v6232_v27 = vadd.f32 %v10771_v7, %v5976_v37  ;;  %v6233_v39 = vadd.f32 %v10772_v22, %v5977_v16 }
 0x49a   : > { %v6234_v63 = vadd.f32 %v10773_v25, %v5978_v29  ;;  %vm6530_vm15 = vcmp.eq.s32.totalorder %v6406_v13, %v12091_v51  ;;  %v10906_v3 = vsel %vm6527_vm12, 1.0, %v18377_v12  ;;  %v10907_v38 = vsel %vm6528_vm13, 1.0, %v18377_v12 }
 0x49b   : > { %v10908_v46 = vsel %vm6529_vm14, 1.0, %v18377_v12  ;;  %v10909_v55 = vsel %vm6530_vm15, 1.0, %v18377_v12  ;;  %v16702_v23 = vpack.c.bf16 %v6232_v27, %v6231_v24  ;;  %v6975_v1 = vunpack.c.l.bf16 %v6313_v11 }
 0x49c   : > { %v16704_v8 = vpack.c.bf16 %v6234_v63, %v6233_v39  ;;  %v6976_v7 = vunpack.c.h.bf16 %v6313_v11  ;;  %v6977_v22 = vunpack.c.l.bf16 %v6314_v28  ;;  %v6978_v25 = vunpack.c.h.bf16 %v6314_v28 }
 0x49d   : > { %v7287_v13 = vpack.c.bf16 %v16388_v5, %v16384_v26  ;;  %v7289_v32 = vpack.c.bf16 %v16073_v44, %v16071_v17  ;;  %v7231_v45 = vadd.f32 %v10906_v3, %v6975_v1  ;;  %vm7483_vm0 = vcmp.eq.s32.totalorder %v16497_v33, %v12081_v47 }
 0x49e   : > { %v7232_v37 = vadd.f32 %v10907_v38, %v6976_v7  ;;  %vm7487_vm1 = vcmp.eq.s32.totalorder %v16399_v2, %v12081_v47  ;;  %v7233_v15 = vadd.f32 %v10908_v46, %v6977_v22  ;;  %v7234_v16 = vadd.f32 %v10909_v55, %v6978_v25  ;;  %v16726_v38 = vpop.f32.mrf.mxu2  ;;  %v16728_v46 = vpop.f32.mrf.mxu3  ;;  %v18927_v7 = vld [vmem:[#allocation71_spill] sm:$0xff] }
 0x49f   : > { %v10998_v11 = vsel %vm7483_vm0, 1.0, %v18377_v12  ;;  %v11002_v28 = vsel %vm7487_vm1, 1.0, %v18377_v12  ;;  %v7931_v26 = vunpack.c.l.bf16 %v7287_v13  ;;  %v7935_v5 = vunpack.c.l.bf16 %v7289_v32  ;;  %v18928_v22 = vld [vmem:[#allocation87_spill] sm:$0xff] }
 0x4a0   : > { %v16716_v29 = vpack.c.bf16 %v7232_v37, %v7231_v45  ;;  %vm7484_vm2 = vcmp.eq.s32.totalorder %v16497_v33, %v12083_v48  ;;  %v16720_v17 = vpack.c.bf16 %v7234_v16, %v7233_v15  ;;  %vm7488_vm3 = vcmp.eq.s32.totalorder %v16399_v2, %v12083_v48  ;;  %v16741_v15 = vpop.f32.mrf.mxu1 }
 0x4a1   : > { %v10999_v44 = vsel %vm7484_vm2, 1.0, %v18377_v12  ;;  %v7932_v24 = vunpack.c.h.bf16 %v7287_v13  ;;  %v8187_v27 = vadd.f32 %v10998_v11, %v7931_v26  ;;  %v8191_v39 = vadd.f32 %v11002_v28, %v7935_v5  ;;  %v16736_v13 = vpop.f32.mrf.mxu0  ;;  %v6400_v11 = vpop.permute.xlu1 %6399 }
 0x4a2   : > { %v11003_v63 = vsel %vm7488_vm3, 1.0, %v18377_v12  ;;  %v7936_v3 = vunpack.c.h.bf16 %v7289_v32  ;;  %v7288_v1 = vpack.c.bf16 %v16394_v41, %v16390_v35  ;;  %v7290_v25 = vpack.c.bf16 %v18928_v22, %v18927_v7 }
 0x4a3   : > { %v8188_v55 = vadd.f32 %v10999_v44, %v7932_v24  ;;  %vm7485_vm4 = vcmp.eq.s32.totalorder %v16497_v33, %v12085_v49  ;;  %v8279_v45 = vpack.c.bf16 %v8191_v39, %v8187_v27  ;;  %vm7489_vm5 = vcmp.eq.s32.totalorder %v16399_v2, %v12085_v49 }
 0x4a4   : > { %v8192_v37 = vadd.f32 %v11003_v63, %v7936_v3  ;;  %v11000_v32 = vsel %vm7485_vm4, 1.0, %v18377_v12  ;;  %v11004_v16 = vsel %vm7489_vm5, 1.0, %v18377_v12  ;;  %v7933_v35 = vunpack.c.l.bf16 %v7288_v1 }
 0x4a5   : > { %v7937_v41 = vunpack.c.l.bf16 %v7290_v25  ;;  %vm7486_vm6 = vcmp.eq.s32.totalorder %v16497_v33, %v12091_v51  ;;  %8584 = vmatmul.bf16.gmra.mxu0 %v8279_v45  ;;  %vm7490_vm7 = vcmp.eq.s32.totalorder %v16399_v2, %v12091_v51  ;;  %v7934_v5 = vunpack.c.h.bf16 %v7288_v1  ;;  %v8309_v2 = vld [vmem:[#allocation2 + $0xd8] sm:$0xff] }
 0x4a6   : > { %v8280_v28 = vpack.c.bf16 %v8192_v37, %v8188_v55  ;;  %v11001_v26 = vsel %vm7486_vm6, 1.0, %v18377_v12  ;;  %v8189_v44 = vadd.f32 %v11000_v32, %v7933_v35  ;;  %v11005_v27 = vsel %vm7490_vm7, 1.0, %v18377_v12 }
 0x4a7   : > { %v8193_v24 = vadd.f32 %v11004_v16, %v7937_v41  ;;  %v7938_v39 = vunpack.c.h.bf16 %v7290_v25  ;;  %v8190_v63 = vadd.f32 %v11001_v26, %v7934_v5  ;;  %v8724_v3 = vadd.f32 %v16686_v9, %v16684_v53  ;;  %v5417_v53 = vpop.permute.xlu2 %5416 }
 0x4a8   : > { %8673 = vmatmul.bf16.gmra.mxu1 %v8280_v28  ;;  %vm6519_vm8 = vcmp.eq.s32.totalorder %v6400_v11, %v12081_v47  ;;  %vm6520_vm9 = vcmp.eq.s32.totalorder %v6400_v11, %v12083_v48  ;;  %vm6521_vm10 = vcmp.eq.s32.totalorder %v6400_v11, %v12085_v49  ;;  %vm6522_vm11 = vcmp.eq.s32.totalorder %v6400_v11, %v12091_v51  ;;  %v16767_v11 = vpop.f32.mrf.mxu2  ;;  %v16769_v28 = vpop.f32.mrf.mxu3 }
 0x4a9   : > { %v8281_v33 = vpack.c.bf16 %v8193_v24, %v8189_v44  ;;  %v8194_v55 = vadd.f32 %v11005_v27, %v7938_v39  ;;  %v8813_v1 = vadd.f32 %v16688_v40, %v8724_v3  ;;  %v10898_v7 = vsel %vm6519_vm8, 1.0, %v18377_v12 }
 0x4aa   : > { %v10899_v22 = vsel %vm6520_vm9, 1.0, %v18377_v12  ;;  %v10900_v25 = vsel %vm6521_vm10, 1.0, %v18377_v12  ;;  %v10901_v45 = vsel %vm6522_vm11, 1.0, %v18377_v12  ;;  %v6967_v37 = vunpack.c.l.bf16 %v16702_v23 }
 0x4ab   : > { %8762 = vmatmul.bf16.gmra.mxu2 %v8281_v33  ;;  %v8282_v9 = vpack.c.bf16 %v8194_v55, %v8190_v63  ;;  %v6968_v32 = vunpack.c.h.bf16 %v16702_v23  ;;  %v8889_v16 = vadd.f32 %v8813_v1, %v8309_v2  ;;  %v6969_v35 = vunpack.c.l.bf16 %v16704_v8  ;;  %v16773_v23 = vpop.f32.mrf.mxu0  ;;  %v5411_v63 = vpop.permute.xlu1 %5410  ;;  %v18929_v55 = vld [vmem:[#allocation43_spill] sm:$0xff] }
 0x4ac   : > { %v6970_v40 = vunpack.c.h.bf16 %v16704_v8  ;;  %v8637_v41 = vadd.f32 %v16696_v42, %v16693_v4  ;;  %v7223_v26 = vadd.f32 %v10898_v7, %v6967_v37  ;;  %vm5539_vm12 = vcmp.eq.s32.totalorder %v5417_v53, %v12081_v47  ;;  %v16777_v4 = vpop.f32.mrf.mxu1  ;;  %v18930_v7 = vld [vmem:[#allocation44_spill] sm:$0xff] }
 0x4ad   : > { %8851 = vmatmul.bf16.gmra.mxu3 %v8282_v9  ;;  %v7224_v5 = vadd.f32 %v10899_v22, %v6968_v32  ;;  %vm5540_vm13 = vcmp.eq.s32.totalorder %v5417_v53, %v12083_v48  ;;  %8921 = vst [vmem:[#allocation2 + $0xd8] sm:$0xff] %v8889_v16  ;;  %v7225_v44 = vadd.f32 %v10900_v25, %v6969_v35  ;;  %v10782_v8 = vsel %vm5539_vm12, 1.0, %v18377_v12  ;;  %v8310_v32 = vld [vmem:[#allocation2 + $0x18] sm:$0xff] }
 0x4ae   : > { %v7226_v24 = vadd.f32 %v10901_v45, %v6970_v40  ;;  %vm5541_vm14 = vcmp.eq.s32.totalorder %v5417_v53, %v12085_v49  ;;  %vm5542_vm15 = vcmp.eq.s32.totalorder %v5417_v53, %v12091_v51  ;;  %v10783_v27 = vsel %vm5540_vm13, 1.0, %v18377_v12 }
 0x4af   : > { %v16779_v42 = vpack.c.bf16 %v7224_v5, %v7223_v26  ;;  %v10784_v39 = vsel %vm5541_vm14, 1.0, %v18377_v12  ;;  %v10785_v33 = vsel %vm5542_vm15, 1.0, %v18377_v12  ;;  %v5987_v2 = vunpack.c.l.bf16 %v18929_v55 }
 0x4b0   : > { %v16784_v3 = vpack.c.bf16 %v7226_v24, %v7225_v44  ;;  %v5988_v1 = vunpack.c.h.bf16 %v18929_v55  ;;  %v5989_v22 = vunpack.c.l.bf16 %v18930_v7  ;;  %v5990_v25 = vunpack.c.h.bf16 %v18930_v7  ;;  %v18931_v24 = vld [vmem:[#allocation33_spill] sm:$0xff]  ;;  %v16815_v55 = vpop.f32.mrf.mxu3 }
 0x4b1   : > { %v8726_v53 = vadd.f32 %v16726_v38, %v8637_v41  ;;  %v16794_v9 = vadd.f32 %v16741_v15, %v16736_v13  ;;  %v6243_v45 = vadd.f32 %v10782_v8, %v5987_v2  ;;  %vm5531_vm0 = vcmp.eq.s32.totalorder %v5411_v63, %v12081_v47  ;;  %v18933_v2 = vld [vmem:[#allocation68_spill] sm:$0xff] }
 0x4b2   : > { %v6244_v37 = vadd.f32 %v10783_v27, %v5988_v1  ;;  %vm5532_vm1 = vcmp.eq.s32.totalorder %v5411_v63, %v12083_v48  ;;  %v6245_v16 = vadd.f32 %v10784_v39, %v5989_v22  ;;  %v6246_v35 = vadd.f32 %v10785_v33, %v5990_v25  ;;  %v18932_v27 = vld [vmem:[#allocation34_spill] sm:$0xff]  ;;  %v18934_v1 = vld [vmem:[#allocation69_spill] sm:$0xff]  ;;  %v18935_v25 = vld [vmem:[#allocation79_spill] sm:$0xff] }
 0x4b3   : > { %v8815_v40 = vadd.f32 %v16728_v46, %v8726_v53  ;;  %vm5533_vm2 = vcmp.eq.s32.totalorder %v5411_v63, %v12085_v49  ;;  %vm5534_vm3 = vcmp.eq.s32.totalorder %v5411_v63, %v12091_v51  ;;  %v10774_v38 = vsel %vm5531_vm0, 1.0, %v18377_v12  ;;  %v16813_v63 = vpop.f32.mrf.mxu2  ;;  %v16825_v53 = vpop.f32.mrf.mxu0 }
 0x4b4   : > { %v16800_v26 = vpack.c.bf16 %v6244_v37, %v6243_v45  ;;  %v10775_v13 = vsel %vm5532_vm1, 1.0, %v18377_v12  ;;  %v16805_v15 = vpack.c.bf16 %v6246_v35, %v6245_v16  ;;  %v10776_v5 = vsel %vm5533_vm2, 1.0, %v18377_v12  ;;  %v16827_v35 = vpop.f32.mrf.mxu1 }
 0x4b5   : > { %v8890_v41 = vadd.f32 %v8815_v40, %v8310_v32  ;;  %v10777_v44 = vsel %vm5534_vm3, 1.0, %v18377_v12  ;;  %v5979_v8 = vunpack.c.l.bf16 %v18931_v24  ;;  %v5980_v46 = vunpack.c.h.bf16 %v18931_v24 }
 0x4b6   : > { %v5981_v39 = vunpack.c.l.bf16 %v18932_v27  ;;  %v5982_v33 = vunpack.c.h.bf16 %v18932_v27  ;;  %v7291_v7 = vpack.c.bf16 %v18934_v1, %v18933_v2  ;;  %v7293_v22 = vpack.c.bf16 %v16569_v60, %v16567_v54 }
 0x4b7   : > { %8922 = vst [vmem:[#allocation2 + $0x18] sm:$0xff] %v8890_v41  ;;  %vm7491_vm4 = vcmp.eq.s32.totalorder %v16440_v62, %v12081_v47  ;;  %vm7495_vm5 = vcmp.eq.s32.totalorder %v18935_v25, %v12081_v47  ;;  %v6235_v45 = vadd.f32 %v10774_v38, %v5979_v8  ;;  %v6236_v37 = vadd.f32 %v10775_v13, %v5980_v46 }
 0x4b8   : > { %v6237_v32 = vadd.f32 %v10776_v5, %v5981_v39  ;;  %v6238_v16 = vadd.f32 %v10777_v44, %v5982_v33  ;;  %v11006_v40 = vsel %vm7491_vm4, 1.0, %v18377_v12  ;;  %v11010_v41 = vsel %vm7495_vm5, 1.0, %v18377_v12  ;;  %v18936_v39 = vld [vmem:[#allocation70_spill] sm:$0xff]  ;;  %v18937_v33 = vld [vmem:[#allocation84_spill] sm:$0xff] }
 0x4b9   : > { %v7939_v24 = vunpack.c.l.bf16 %v7291_v7  ;;  %v7943_v54 = vunpack.c.l.bf16 %v7293_v22  ;;  %v16831_v60 = vpack.c.bf16 %v6236_v37, %v6235_v45  ;;  %vm7492_vm6 = vcmp.eq.s32.totalorder %v16440_v62, %v12083_v48  ;;  %v6412_v37 = vpop.permute.xlu2 %6411 }
 0x4ba   : > { %v16833_v27 = vpack.c.bf16 %v6238_v16, %v6237_v32  ;;  %vm7496_vm7 = vcmp.eq.s32.totalorder %v18935_v25, %v12083_v48  ;;  %v11007_v5 = vsel %vm7492_vm6, 1.0, %v18377_v12  ;;  %v7940_v8 = vunpack.c.h.bf16 %v7291_v7 }
 0x4bb   : > { %v8195_v38 = vadd.f32 %v11006_v40, %v7939_v24  ;;  %v8199_v13 = vadd.f32 %v11010_v41, %v7943_v54  ;;  %v11011_v44 = vsel %vm7496_vm7, 1.0, %v18377_v12  ;;  %v7944_v46 = vunpack.c.h.bf16 %v7293_v22 }
 0x4bc   : > { %v7292_v2 = vpack.c.bf16 %v18937_v33, %v18936_v39  ;;  %v7294_v1 = vpack.c.bf16 %v16575_v36, %v16573_v20  ;;  %vm7493_vm8 = vcmp.eq.s32.totalorder %v16440_v62, %v12085_v49  ;;  %vm7497_vm9 = vcmp.eq.s32.totalorder %v18935_v25, %v12085_v49  ;;  %v6403_v39 = vpop.permute.xlu1 %6402  ;;  %v16867_v33 = vpop.f32.mrf.mxu1 }
 0x4bd   : > { %v8283_v45 = vpack.c.bf16 %v8199_v13, %v8195_v38  ;;  %vm7494_vm10 = vcmp.eq.s32.totalorder %v16440_v62, %v12091_v51  ;;  %v8196_v32 = vadd.f32 %v11007_v5, %v7940_v8  ;;  %v8200_v7 = vadd.f32 %v11011_v44, %v7944_v46  ;;  %v16857_v38 = vpop.f32.mrf.mxu2  ;;  %v16859_v13 = vpop.f32.mrf.mxu3 }
 0x4be   : > { %v11008_v22 = vsel %vm7493_vm8, 1.0, %v18377_v12  ;;  %v11012_v16 = vsel %vm7497_vm9, 1.0, %v18377_v12  ;;  %v7941_v40 = vunpack.c.l.bf16 %v7292_v2  ;;  %v7945_v20 = vunpack.c.l.bf16 %v7294_v1  ;;  %v16863_v8 = vpop.f32.mrf.mxu0 }
 0x4bf   : > { %8589 = vmatmul.bf16.gmra.mxu0 %v8283_v45  ;;  %vm7498_vm11 = vcmp.eq.s32.totalorder %v18935_v25, %v12091_v51  ;;  %v11009_v36 = vsel %vm7494_vm10, 1.0, %v18377_v12  ;;  %v8284_v41 = vpack.c.bf16 %v8200_v7, %v8196_v32  ;;  %v7942_v54 = vunpack.c.h.bf16 %v7292_v2 }
 0x4c0   : > { %v11013_v24 = vsel %vm7498_vm11, 1.0, %v18377_v12  ;;  %v7946_v62 = vunpack.c.h.bf16 %v7294_v1  ;;  %v8197_v5 = vadd.f32 %v11008_v22, %v7941_v40  ;;  %v8201_v44 = vadd.f32 %v11012_v16, %v7945_v20  ;;  %v18938_v16 = vld [vmem:[#allocation85_spill] sm:$0xff] }
 0x4c1   : > { %vm6535_vm12 = vcmp.eq.s32.totalorder %v6412_v37, %v12081_v47  ;;  %vm6536_vm13 = vcmp.eq.s32.totalorder %v6412_v37, %v12083_v48  ;;  %8678 = vmatmul.bf16.gmra.mxu1 %v8284_v41  ;;  %v8198_v25 = vadd.f32 %v11009_v36, %v7942_v54  ;;  %vm6537_vm14 = vcmp.eq.s32.totalorder %v6412_v37, %v12085_v49  ;;  %v18939_v36 = vld [vmem:[#allocation18_spill] sm:$0xff] }
 0x4c2   : > { %v8202_v46 = vadd.f32 %v11013_v24, %v7946_v62  ;;  %vm6538_vm15 = vcmp.eq.s32.totalorder %v6412_v37, %v12091_v51  ;;  %v8285_v2 = vpack.c.bf16 %v8201_v44, %v8197_v5  ;;  %v10914_v1 = vsel %vm6535_vm12, 1.0, %v18377_v12  ;;  %v8311_v44 = vld [vmem:[#allocation2 + $0x50] sm:$0xff] }
 0x4c3   : > { %v10915_v45 = vsel %vm6536_vm13, 1.0, %v18377_v12  ;;  %v10916_v32 = vsel %vm6537_vm14, 1.0, %v18377_v12  ;;  %v10917_v22 = vsel %vm6538_vm15, 1.0, %v18377_v12  ;;  %v6983_v40 = vunpack.c.l.bf16 %v18938_v16 }
 0x4c4   : > { %v8286_v7 = vpack.c.bf16 %v8202_v46, %v8198_v25  ;;  %v6984_v20 = vunpack.c.h.bf16 %v18938_v16  ;;  %8767 = vmatmul.bf16.gmra.mxu2 %v8285_v2  ;;  %v6985_v37 = vunpack.c.l.bf16 %v18939_v36  ;;  %v6986_v41 = vunpack.c.h.bf16 %v18939_v36  ;;  %v7404_v16 = vpop.permute.xlu2 %7403 }
 0x4c5   : > { %v8729_v24 = vadd.f32 %v16767_v11, %v16794_v9  ;;  %v8642_v54 = vadd.f32 %v16777_v4, %v16773_v23  ;;  %v7239_v62 = vadd.f32 %v10914_v1, %v6983_v40  ;;  %vm6523_vm0 = vcmp.eq.s32.totalorder %v6403_v39, %v12081_v47  ;;  %v16890_v4 = vpop.f32.mrf.mxu2  ;;  %v16892_v9 = vpop.f32.mrf.mxu3 }
 0x4c6   : > { %8856 = vmatmul.bf16.gmra.mxu3 %v8286_v7  ;;  %v7240_v5 = vadd.f32 %v10915_v45, %v6984_v20  ;;  %vm6524_vm1 = vcmp.eq.s32.totalorder %v6403_v39, %v12083_v48  ;;  %v7241_v25 = vadd.f32 %v10916_v32, %v6985_v37  ;;  %v7242_v46 = vadd.f32 %v10917_v22, %v6986_v41  ;;  %v16898_v7 = vpop.f32.mrf.mxu0  ;;  %v16904_v37 = vpop.f32.mrf.mxu1 }
 0x4c7   : > { %v8818_v2 = vadd.f32 %v16769_v28, %v8729_v24  ;;  %vm6525_vm2 = vcmp.eq.s32.totalorder %v6403_v39, %v12085_v49  ;;  %vm6526_vm3 = vcmp.eq.s32.totalorder %v6403_v39, %v12091_v51  ;;  %v10902_v11 = vsel %vm6523_vm0, 1.0, %v18377_v12 }
 0x4c8   : > { %v16885_v36 = vpack.c.bf16 %v7240_v5, %v7239_v62  ;;  %v10903_v23 = vsel %vm6524_vm1, 1.0, %v18377_v12  ;;  %v16894_v1 = vpack.c.bf16 %v7242_v46, %v7241_v25  ;;  %v10904_v28 = vsel %vm6525_vm2, 1.0, %v18377_v12 }
 0x4c9   : > { %v8891_v45 = vadd.f32 %v8818_v2, %v8311_v44  ;;  %v10905_v32 = vsel %vm6526_vm3, 1.0, %v18377_v12  ;;  %v6971_v22 = vunpack.c.l.bf16 %v16831_v60  ;;  %v6972_v39 = vunpack.c.h.bf16 %v16831_v60  ;;  %v7398_v60 = vpop.permute.xlu1 %7397 }
 0x4ca   : > { %18940 = vst [vmem:[#allocation92_spill] sm:$0xff] %v16894_v1  ;;  %v6973_v40 = vunpack.c.l.bf16 %v16833_v27  ;;  %v6974_v20 = vunpack.c.h.bf16 %v16833_v27  ;;  %vm7527_vm4 = vcmp.eq.s32.totalorder %v7404_v16, %v12081_v47  ;;  %vm7528_vm5 = vcmp.eq.s32.totalorder %v7404_v16, %v12083_v48 }
 0x4cb   : > { %8923 = vst [vmem:[#allocation2 + $0x50] sm:$0xff] %v8891_v45  ;;  %vm7529_vm6 = vcmp.eq.s32.totalorder %v7404_v16, %v12085_v49  ;;  %vm7530_vm7 = vcmp.eq.s32.totalorder %v7404_v16, %v12091_v51  ;;  %v7227_v41 = vadd.f32 %v10902_v11, %v6971_v22  ;;  %v7228_v24 = vadd.f32 %v10903_v23, %v6972_v39  ;;  %v8312_v45 = vld [vmem:[#allocation2 + $0x68] sm:$0xff] }
 0x4cc   : > { %v7229_v62 = vadd.f32 %v10904_v28, %v6973_v40  ;;  %v7230_v5 = vadd.f32 %v10905_v32, %v6974_v20  ;;  %v16911_v44 = vsel %vm7527_vm4, 1.0, %v18377_v12  ;;  %v16914_v27 = vsel %vm7528_vm5, 1.0, %v18377_v12 }
 0x4cd   : > { %18941 = vst [vmem:[#allocation93_spill] sm:$0xff] %v16914_v27  ;;  %v16917_v25 = vsel %vm7529_vm6, 1.0, %v18377_v12  ;;  %v16920_v46 = vsel %vm7530_vm7, 1.0, %v18377_v12  ;;  %v16922_v2 = vpack.c.bf16 %v7228_v24, %v7227_v41  ;;  %v8731_v11 = vadd.f32 %v16813_v63, %v8642_v54  ;;  %v16954_v39 = vpop.f32.mrf.mxu3 }
 0x4ce   : > { %18942 = vst [vmem:[#allocation94_spill] sm:$0xff] %v16917_v25  ;;  %v16924_v16 = vpack.c.bf16 %v7230_v5, %v7229_v62  ;;  %v8645_v23 = vadd.f32 %v16827_v35, %v16825_v53  ;;  %vm7519_vm8 = vcmp.eq.s32.totalorder %v7398_v60, %v12081_v47  ;;  %vm7520_vm9 = vcmp.eq.s32.totalorder %v7398_v60, %v12083_v48  ;;  %v16943_v53 = vpop.f32.mrf.mxu2  ;;  %v16961_v41 = vpop.f32.mrf.mxu0 }
 0x4cf   : > { %18943 = vst [vmem:[#allocation29_spill] sm:$0xff] %v16920_v46  ;;  %vm7521_vm10 = vcmp.eq.s32.totalorder %v7398_v60, %v12085_v49  ;;  %vm7522_vm11 = vcmp.eq.s32.totalorder %v7398_v60, %v12091_v51  ;;  %v8820_v28 = vadd.f32 %v16815_v55, %v8731_v11  ;;  %v16935_v32 = vsel %vm7519_vm8, 1.0, %v18377_v12 }
 0x4d0   : > { %v16938_v22 = vsel %vm7520_vm9, 1.0, %v18377_v12  ;;  %v16941_v63 = vsel %vm7521_vm10, 1.0, %v18377_v12  ;;  %v16946_v35 = vsel %vm7522_vm11, 1.0, %v18377_v12  ;;  %v7295_v54 = vpack.c.bf16 %v16605_v58, %v16602_v0  ;;  %v16963_v0 = vpop.f32.mrf.mxu1 }
 0x4d1   : > { %v7297_v55 = vpack.c.bf16 %v16518_v31, %v16516_v43  ;;  %vm7499_vm12 = vcmp.eq.s32.totalorder %v16638_v19, %v12081_v47  ;;  %v8892_v40 = vadd.f32 %v8820_v28, %v8312_v45  ;;  %vm7503_vm13 = vcmp.eq.s32.totalorder %v16512_v21, %v12081_v47 }
 0x4d2   : > { %v11014_v20 = vsel %vm7499_vm12, 1.0, %v18377_v12  ;;  %vm7500_vm14 = vcmp.eq.s32.totalorder %v16638_v19, %v12083_v48  ;;  %v11018_v43 = vsel %vm7503_vm13, 1.0, %v18377_v12  ;;  %v7947_v31 = vunpack.c.l.bf16 %v7295_v54 }
 0x4d3   : > { %v7951_v58 = vunpack.c.l.bf16 %v7297_v55  ;;  %vm7504_vm15 = vcmp.eq.s32.totalorder %v16512_v21, %v12083_v48  ;;  %8924 = vst [vmem:[#allocation2 + $0x68] sm:$0xff] %v8892_v40  ;;  %v11015_v24 = vsel %vm7500_vm14, 1.0, %v18377_v12  ;;  %v7948_v5 = vunpack.c.h.bf16 %v7295_v54  ;;  %v6409_v40 = vpop.permute.xlu1 %6408 }
 0x4d4   : > { %v11019_v62 = vsel %vm7504_vm15, 1.0, %v18377_v12  ;;  %v7952_v60 = vunpack.c.h.bf16 %v7297_v55  ;;  %v8203_v11 = vadd.f32 %v11014_v20, %v7947_v31  ;;  %v7296_v28 = vpack.c.bf16 %v16611_v50, %v16607_v59 }
 0x4d5   : > { %v8207_v45 = vadd.f32 %v11018_v43, %v7951_v58  ;;  %v7298_v46 = vpack.c.bf16 %v16526_v52, %v16524_v10  ;;  %v8204_v25 = vadd.f32 %v11015_v24, %v7948_v5  ;;  %vm7501_vm0 = vcmp.eq.s32.totalorder %v16638_v19, %v12085_v49  ;;  %v6415_v43 = vpop.permute.xlu2 %6414 }
 0x4d6   : > { %v8208_v27 = vadd.f32 %v11019_v62, %v7952_v60  ;;  %vm7505_vm1 = vcmp.eq.s32.totalorder %v16512_v21, %v12085_v49  ;;  %v11016_v54 = vsel %vm7501_vm0, 1.0, %v18377_v12  ;;  %v7949_v20 = vunpack.c.l.bf16 %v7296_v28  ;;  %v16984_v10 = vpop.f32.mrf.mxu2  ;;  %v16988_v62 = vpop.f32.mrf.mxu3  ;;  %v8313_v60 = vld [vmem:[#allocation2 + $0x30] sm:$0xff] }
 0x4d7   : > { %v8287_v1 = vpack.c.bf16 %v8207_v45, %v8203_v11  ;;  %v11020_v55 = vsel %vm7505_vm1, 1.0, %v18377_v12  ;;  %v7953_v50 = vunpack.c.l.bf16 %v7298_v46  ;;  %vm7502_vm2 = vcmp.eq.s32.totalorder %v16638_v19, %v12091_v51  ;;  %v16992_v19 = vpop.f32.mrf.mxu0 }
 0x4d8   : > { %v8288_v59 = vpack.c.bf16 %v8208_v27, %v8204_v25  ;;  %vm7506_vm3 = vcmp.eq.s32.totalorder %v16512_v21, %v12091_v51  ;;  %v8205_v52 = vadd.f32 %v11016_v54, %v7949_v20  ;;  %v11017_v31 = vsel %vm7502_vm2, 1.0, %v18377_v12  ;;  %v16994_v21 = vpop.f32.mrf.mxu1 }
 0x4d9   : > { %8594 = vmatmul.bf16.gmra.mxu0 %v8287_v1  ;;  %v11021_v58 = vsel %vm7506_vm3, 1.0, %v18377_v12  ;;  %v7950_v24 = vunpack.c.h.bf16 %v7296_v28  ;;  %v8209_v27 = vadd.f32 %v11020_v55, %v7953_v50  ;;  %v7954_v25 = vunpack.c.h.bf16 %v7298_v46 }
 0x4da   : > { %8683 = vmatmul.bf16.gmra.mxu1 %v8288_v59  ;;  %v8734_v5 = vadd.f32 %v16857_v38, %v8645_v23  ;;  %vm6539_vm4 = vcmp.eq.s32.totalorder %v6415_v43, %v12081_v47  ;;  %vm6540_vm5 = vcmp.eq.s32.totalorder %v6415_v43, %v12083_v48  ;;  %vm6541_vm6 = vcmp.eq.s32.totalorder %v6415_v43, %v12085_v49 }
 0x4db   : > { %v8206_v1 = vadd.f32 %v11017_v31, %v7950_v24  ;;  %vm6542_vm7 = vcmp.eq.s32.totalorder %v6415_v43, %v12091_v51  ;;  %v8289_v11 = vpack.c.bf16 %v8209_v27, %v8205_v52  ;;  %v8210_v45 = vadd.f32 %v11021_v58, %v7954_v25  ;;  %v7401_v27 = vpop.permute.xlu1 %7400 }
 0x4dc   : > { %v8823_v46 = vadd.f32 %v16859_v13, %v8734_v5  ;;  %v10918_v38 = vsel %vm6539_vm4, 1.0, %v18377_v12  ;;  %v10919_v23 = vsel %vm6540_vm5, 1.0, %v18377_v12  ;;  %v10920_v28 = vsel %vm6541_vm6, 1.0, %v18377_v12 }
 0x4dd   : > { %v10921_v54 = vsel %vm6542_vm7, 1.0, %v18377_v12  ;;  %v6987_v55 = vunpack.c.l.bf16 %v16416_v61  ;;  %8772 = vmatmul.bf16.gmra.mxu2 %v8289_v11  ;;  %v8290_v20 = vpack.c.bf16 %v8210_v45, %v8206_v1  ;;  %v6988_v50 = vunpack.c.h.bf16 %v16416_v61 }
 0x4de   : > { %v8893_v59 = vadd.f32 %v8823_v46, %v8313_v60  ;;  %v6989_v43 = vunpack.c.l.bf16 %v16422_v18  ;;  %v6990_v52 = vunpack.c.h.bf16 %v16422_v18  ;;  %v8647_v31 = vadd.f32 %v16867_v33, %v16863_v8 }
 0x4df   : > { %v17008_v13 = vadd.f32 %v10918_v38, %v6987_v55  ;;  %vm6531_vm8 = vcmp.eq.s32.totalorder %v6409_v40, %v12081_v47  ;;  %8861 = vmatmul.bf16.gmra.mxu3 %v8290_v20  ;;  %v17013_v58 = vadd.f32 %v10919_v23, %v6988_v50  ;;  %vm6532_vm9 = vcmp.eq.s32.totalorder %v6409_v40, %v12083_v48  ;;  %v17037_v23 = vpop.f32.mrf.mxu0  ;;  %v8314_v20 = vld [vmem:[#allocation2 + $0x48] sm:$0xff] }
 0x4e0   : > { %8925 = vst [vmem:[#allocation2 + $0x30] sm:$0xff] %v8893_v59  ;;  %v17015_v24 = vadd.f32 %v10920_v28, %v6989_v43  ;;  %v10910_v61 = vsel %vm6531_vm8, 1.0, %v18377_v12  ;;  %v17019_v25 = vpop.f32.mrf.mxu2  ;;  %v17021_v18 = vadd.f32 %v10921_v54, %v6990_v52  ;;  %vm6533_vm10 = vcmp.eq.s32.totalorder %v6409_v40, %v12085_v49  ;;  %v17039_v28 = vpop.f32.mrf.mxu1 }
 0x4e1   : > { %vm6534_vm11 = vcmp.eq.s32.totalorder %v6409_v40, %v12091_v51  ;;  %v10911_v8 = vsel %vm6532_vm9, 1.0, %v18377_v12  ;;  %v10912_v33 = vsel %vm6533_vm10, 1.0, %v18377_v12  ;;  %v6979_v1 = vunpack.c.l.bf16 %v16800_v26  ;;  %v17030_v11 = vpop.f32.mrf.mxu3 }
 0x4e2   : > { %v10913_v5 = vsel %vm6534_vm11, 1.0, %v18377_v12  ;;  %v6980_v60 = vunpack.c.h.bf16 %v16800_v26  ;;  %v6981_v45 = vunpack.c.l.bf16 %v16805_v15  ;;  %v6982_v46 = vunpack.c.h.bf16 %v16805_v15 }
 0x4e3   : > { %v8736_v38 = vadd.f32 %v16890_v4, %v8647_v31  ;;  %v8650_v40 = vadd.f32 %v16904_v37, %v16898_v7  ;;  %v7235_v54 = vadd.f32 %v10910_v61, %v6979_v1  ;;  %v7955_v26 = vunpack.c.l.bf16 %v16595_v6  ;;  %v18944_v37 = vld [vmem:[#allocation88_spill] sm:$0xff] }
 0x4e4   : > { %v7236_v55 = vadd.f32 %v10911_v8, %v6980_v60  ;;  %v7959_v59 = vunpack.c.l.bf16 %v16779_v42  ;;  %v7237_v50 = vadd.f32 %v10912_v33, %v6981_v45  ;;  %v7238_v43 = vadd.f32 %v10913_v5, %v6982_v46  ;;  %v18945_v45 = vld [vmem:[#allocation89_spill] sm:$0xff] }
 0x4e5   : > { %v8825_v15 = vadd.f32 %v16892_v9, %v8736_v38  ;;  %v7956_v4 = vunpack.c.h.bf16 %v16595_v6  ;;  %v8211_v7 = vadd.f32 %v16615_v14, %v7955_v26  ;;  %v7960_v61 = vunpack.c.h.bf16 %v16779_v42 }
 0x4e6   : > { %v17045_v52 = vpack.c.bf16 %v7236_v55, %v7235_v54  ;;  %v8215_v31 = vadd.f32 %v18944_v37, %v7959_v59  ;;  %v17050_v8 = vpack.c.bf16 %v7238_v43, %v7237_v50  ;;  %v7957_v33 = vunpack.c.l.bf16 %v16597_v30  ;;  %v18946_v54 = vld [vmem:[#allocation90_spill] sm:$0xff] }
 0x4e7   : > { %v8894_v1 = vadd.f32 %v8825_v15, %v8314_v20  ;;  %v8212_v60 = vadd.f32 %v16618_v34, %v7956_v4  ;;  %v8216_v9 = vadd.f32 %v18945_v45, %v7960_v61  ;;  %v7961_v6 = vunpack.c.l.bf16 %v16784_v3  ;;  %v18947_v59 = vld [vmem:[#allocation86_spill] sm:$0xff]  ;;  %v17076_v43 = vpop.f32.mrf.mxu0 }
 0x4e8   : > { %v8291_v5 = vpack.c.bf16 %v8215_v31, %v8211_v7  ;;  %v7958_v46 = vunpack.c.h.bf16 %v16597_v30  ;;  %v17057_v38 = vpop.f32.mrf.mxu2  ;;  %v8213_v14 = vadd.f32 %v16621_v57, %v7957_v33  ;;  %v7962_v42 = vunpack.c.h.bf16 %v16784_v3  ;;  %v5426_v30 = vpop.permute.xlu1 %5425  ;;  %v8315_v31 = vld [vmem:[#allocation2 + $0x80] sm:$0xff] }
 0x4e9   : > { %8926 = vst [vmem:[#allocation2 + $0x48] sm:$0xff] %v8894_v1  ;;  %vm7523_vm12 = vcmp.eq.s32.totalorder %v7401_v27, %v12081_v47  ;;  %vm7524_vm13 = vcmp.eq.s32.totalorder %v7401_v27, %v12083_v48  ;;  %v8292_v34 = vpack.c.bf16 %v8216_v9, %v8212_v60  ;;  %v8217_v55 = vadd.f32 %v18946_v54, %v7961_v6  ;;  %v17066_v26 = vpop.f32.mrf.mxu3  ;;  %v17078_v15 = vpop.f32.mrf.mxu1  ;;  %v18949_v9 = vld [vmem:[#allocation50_spill] sm:$0xff] }
 0x4ea   : > { %8599 = vmatmul.bf16.gmra.mxu0 %v8291_v5  ;;  %v8214_v20 = vadd.f32 %v16624_v56, %v7958_v46  ;;  %vm7525_vm14 = vcmp.eq.s32.totalorder %v7401_v27, %v12085_v49  ;;  %v8218_v50 = vadd.f32 %v18947_v59, %v7962_v42  ;;  %vm7526_vm15 = vcmp.eq.s32.totalorder %v7401_v27, %v12091_v51  ;;  %v8316_v59 = vld [vmem:[#allocation2 + $0x88] sm:$0xff] }
 0x4eb   : > { %v17071_v57 = vsel %vm7523_vm12, 1.0, %v18377_v12  ;;  %v17074_v3 = vsel %vm7524_vm13, 1.0, %v18377_v12  ;;  %8688 = vmatmul.bf16.gmra.mxu1 %v8292_v34  ;;  %v8293_v56 = vpack.c.bf16 %v8217_v55, %v8213_v14  ;;  %v17081_v4 = vsel %vm7525_vm14, 1.0, %v18377_v12 }
 0x4ec   : > { %v17084_v7 = vsel %vm7526_vm15, 1.0, %v18377_v12  ;;  %v8739_v27 = vadd.f32 %v16943_v53, %v8650_v40  ;;  %v8294_v37 = vpack.c.bf16 %v8218_v50, %v8214_v20  ;;  %v8652_v61 = vadd.f32 %v16963_v0, %v16961_v41  ;;  %v18948_v41 = vld [vmem:[#allocation53_spill] sm:$0xff] }
 0x4ed   : > { %vm5551_vm0 = vcmp.eq.s32.totalorder %v5426_v30, %v12081_v47  ;;  %vm5552_vm1 = vcmp.eq.s32.totalorder %v5426_v30, %v12083_v48  ;;  %8777 = vmatmul.bf16.gmra.mxu2 %v8293_v56  ;;  %vm5553_vm2 = vcmp.eq.s32.totalorder %v5426_v30, %v12085_v49  ;;  %vm5554_vm3 = vcmp.eq.s32.totalorder %v5426_v30, %v12091_v51 }
 0x4ee   : > { %v8828_v1 = vadd.f32 %v16954_v39, %v8739_v27  ;;  %v10794_v60 = vsel %vm5551_vm0, 1.0, %v18377_v12  ;;  %v10795_v53 = vsel %vm5552_vm1, 1.0, %v18377_v12  ;;  %v10796_v40 = vsel %vm5553_vm2, 1.0, %v18377_v12 }
 0x4ef   : > { %v10797_v33 = vsel %vm5554_vm3, 1.0, %v18377_v12  ;;  %v5999_v0 = vunpack.c.l.bf16 %v18948_v41  ;;  %8866 = vmatmul.bf16.gmra.mxu3 %v8294_v37  ;;  %v6000_v45 = vunpack.c.h.bf16 %v18948_v41  ;;  %v6001_v39 = vunpack.c.l.bf16 %v18949_v9  ;;  %v18950_v37 = vld [vmem:[#allocation91_spill] sm:$0xff] }
 0x4f0   : > { %v8895_v5 = vadd.f32 %v8828_v1, %v8315_v31  ;;  %v6002_v6 = vunpack.c.h.bf16 %v18949_v9  ;;  %v17102_v46 = vpop.f32.mrf.mxu2  ;;  %v8741_v42 = vadd.f32 %v16984_v10, %v8652_v61  ;;  %v8655_v34 = vadd.f32 %v16994_v21, %v16992_v19  ;;  %v17115_v19 = vpop.f32.mrf.mxu0 }
 0x4f1   : > { %v6255_v14 = vadd.f32 %v10794_v60, %v5999_v0  ;;  %v7963_v54 = vunpack.c.l.bf16 %v16922_v2  ;;  %v6256_v55 = vadd.f32 %v10795_v53, %v6000_v45  ;;  %v6257_v20 = vadd.f32 %v10796_v40, %v6001_v39  ;;  %v17109_v56 = vpop.f32.mrf.mxu3  ;;  %v17117_v21 = vpop.f32.mrf.mxu1  ;;  %v18952_v45 = vld [vmem:[#allocation16_spill] sm:$0xff] }
 0x4f2   : > { %8927 = vst [vmem:[#allocation2 + $0x80] sm:$0xff] %v8895_v5  ;;  %v6258_v30 = vadd.f32 %v10797_v33, %v6002_v6  ;;  %v7967_v50 = vunpack.c.l.bf16 %v16716_v29  ;;  %v8830_v27 = vadd.f32 %v16988_v62, %v8741_v42  ;;  %v7964_v10 = vunpack.c.h.bf16 %v16922_v2  ;;  %v18951_v62 = vld [vmem:[#allocation83_spill] sm:$0xff] }
 0x4f3   : > { %v8219_v31 = vadd.f32 %v18950_v37, %v7963_v54  ;;  %v7968_v61 = vunpack.c.h.bf16 %v16716_v29  ;;  %v7965_v60 = vunpack.c.l.bf16 %v16924_v16  ;;  %v7969_v53 = vunpack.c.l.bf16 %v16720_v17  ;;  %v6418_v29 = vpop.permute.xlu0 %6417  ;;  %v7407_v37 = vpop.permute.xlu1 %7406 }
 0x4f4   : > { %v8223_v1 = vadd.f32 %v16935_v32, %v7967_v50  ;;  %v7966_v40 = vunpack.c.h.bf16 %v16924_v16  ;;  %v8896_v33 = vadd.f32 %v8830_v27, %v8316_v59  ;;  %v8220_v41 = vadd.f32 %v18951_v62, %v7964_v10  ;;  %v18953_v32 = vld [vmem:[#allocation15_spill] sm:$0xff]  ;;  %v8317_v62 = vld [vmem:[#allocation2 + $0xe8] sm:$0xff] }
 0x4f5   : > { %v8224_v0 = vadd.f32 %v16938_v22, %v7968_v61  ;;  %v7970_v2 = vunpack.c.h.bf16 %v16720_v17  ;;  %v8221_v9 = vadd.f32 %v18952_v45, %v7965_v60  ;;  %v8225_v39 = vadd.f32 %v16941_v63, %v7969_v53 }
 0x4f6   : > { %v8295_v5 = vpack.c.bf16 %v8223_v1, %v8219_v31  ;;  %v8222_v6 = vadd.f32 %v18953_v32, %v7966_v40  ;;  %8928 = vst [vmem:[#allocation2 + $0x88] sm:$0xff] %v8896_v33  ;;  %v6321_v16 = vpack.c.bf16 %v6256_v55, %v6255_v14  ;;  %v6322_v59 = vpack.c.bf16 %v6258_v30, %v6257_v20 }
 0x4f7   : > { %v8296_v42 = vpack.c.bf16 %v8224_v0, %v8220_v41  ;;  %v8226_v54 = vadd.f32 %v16946_v35, %v7970_v2  ;;  %v8297_v50 = vpack.c.bf16 %v8225_v39, %v8221_v9  ;;  %vm6543_vm4 = vcmp.eq.s32.totalorder %v6418_v29, %v12081_v47 }
 0x4f8   : > { %vm6544_vm5 = vcmp.eq.s32.totalorder %v6418_v29, %v12083_v48  ;;  %vm6545_vm6 = vcmp.eq.s32.totalorder %v6418_v29, %v12085_v49  ;;  %v17133_v17 = vpop.f32.mrf.mxu2  ;;  %vm6546_vm7 = vcmp.eq.s32.totalorder %v6418_v29, %v12091_v51  ;;  %v10922_v63 = vsel %vm6543_vm4, 1.0, %v18377_v12  ;;  %v17145_v60 = vpop.f32.mrf.mxu0 }
 0x4f9   : > { %v8298_v22 = vpack.c.bf16 %v8226_v54, %v8222_v6  ;;  %v10923_v27 = vsel %vm6544_vm5, 1.0, %v18377_v12  ;;  %v10924_v35 = vsel %vm6545_vm6, 1.0, %v18377_v12  ;;  %v10925_v14 = vsel %vm6546_vm7, 1.0, %v18377_v12  ;;  %v17140_v30 = vpop.f32.mrf.mxu3  ;;  %v17147_v53 = vpop.f32.mrf.mxu1 }
 0x4fa   : > { %8604 = vmatmul.bf16.gmra.mxu0 %v8295_v5  ;;  %v6991_v55 = vunpack.c.l.bf16 %v6321_v16  ;;  %v6992_v20 = vunpack.c.h.bf16 %v6321_v16  ;;  %v6993_v31 = vunpack.c.l.bf16 %v6322_v59  ;;  %v6994_v10 = vunpack.c.h.bf16 %v6322_v59 }
 0x4fb   : > { %v8744_v61 = vadd.f32 %v17019_v25, %v8655_v34  ;;  %v7311_v1 = vpack.c.bf16 %v17013_v58, %v17008_v13  ;;  %8693 = vmatmul.bf16.gmra.mxu1 %v8296_v42  ;;  %v7312_v41 = vpack.c.bf16 %v17021_v18, %v17015_v24  ;;  %vm7531_vm8 = vcmp.eq.s32.totalorder %v7407_v37, %v12081_v47  ;;  %v7410_v34 = vpop.permute.xlu2 %7409 }
 0x4fc   : > { %v7247_v40 = vadd.f32 %v10922_v63, %v6991_v55  ;;  %v7248_v33 = vadd.f32 %v10923_v27, %v6992_v20  ;;  %v7249_v0 = vadd.f32 %v10924_v35, %v6993_v31  ;;  %v7250_v2 = vadd.f32 %v10925_v14, %v6994_v10  ;;  %v8318_v10 = vld [vmem:[#allocation2 + $0xb8] sm:$0xff] }
 0x4fd   : > { %v8833_v25 = vadd.f32 %v17030_v11, %v8744_v61  ;;  %vm7532_vm9 = vcmp.eq.s32.totalorder %v7407_v37, %v12083_v48  ;;  %8782 = vmatmul.bf16.gmra.mxu2 %v8297_v50  ;;  %vm7533_vm10 = vcmp.eq.s32.totalorder %v7407_v37, %v12085_v49  ;;  %vm7534_vm11 = vcmp.eq.s32.totalorder %v7407_v37, %v12091_v51 }
 0x4fe   : > { %v7313_v13 = vpack.c.bf16 %v7248_v33, %v7247_v40  ;;  %v11046_v58 = vsel %vm7531_vm8, 1.0, %v18377_v12  ;;  %v7314_v29 = vpack.c.bf16 %v7250_v2, %v7249_v0  ;;  %v11047_v24 = vsel %vm7532_vm9, 1.0, %v18377_v12 }
 0x4ff   : > { %v8897_v5 = vadd.f32 %v8833_v25, %v8317_v62  ;;  %v11048_v18 = vsel %vm7533_vm10, 1.0, %v18377_v12  ;;  %8871 = vmatmul.bf16.gmra.mxu3 %v8298_v22  ;;  %v11049_v11 = vsel %vm7534_vm11, 1.0, %v18377_v12  ;;  %v7979_v45 = vunpack.c.l.bf16 %v7311_v1  ;;  %v18954_v25 = vld [vmem:[#allocation92_spill] sm:$0xff] }
 0x500   : > { %v7980_v9 = vunpack.c.h.bf16 %v7311_v1  ;;  %v7981_v39 = vunpack.c.l.bf16 %v7312_v41  ;;  %v7982_v32 = vunpack.c.h.bf16 %v7312_v41  ;;  %v8657_v6 = vadd.f32 %v17039_v28, %v17037_v23  ;;  %v17164_v42 = vpop.f32.mrf.mxu2 }
 0x501   : > { %8929 = vst [vmem:[#allocation2 + $0xe8] sm:$0xff] %v8897_v5  ;;  %vm7535_vm12 = vcmp.eq.s32.totalorder %v7410_v34, %v12081_v47  ;;  %vm7536_vm13 = vcmp.eq.s32.totalorder %v7410_v34, %v12083_v48  ;;  %v17166_v54 = vadd.f32 %v11046_v58, %v7979_v45  ;;  %vm7537_vm14 = vcmp.eq.s32.totalorder %v7410_v34, %v12085_v49  ;;  %v17178_v28 = vpop.f32.mrf.mxu3  ;;  %v8666_v55 = vpop.f32.mrf.mxu1 }
 0x502   : > { %v17168_v16 = vadd.f32 %v11047_v24, %v7980_v9  ;;  %v17170_v59 = vadd.f32 %v11048_v18, %v7981_v39  ;;  %v17173_v50 = vadd.f32 %v11049_v11, %v7982_v32  ;;  %vm7538_vm15 = vcmp.eq.s32.totalorder %v7410_v34, %v12091_v51  ;;  %v8577_v51 = vpop.f32.mrf.mxu0  ;;  %v18957_v11 = vld [vmem:[#allocation29_spill] sm:$0xff]  ;;  %v8319_v9 = vld [vmem:[#allocation2 + $0x60] sm:$0xff] }
 0x503   : > { %v11050_v23 = vsel %vm7535_vm12, 1.0, %v18377_v12  ;;  %v11051_v47 = vsel %vm7536_vm13, 1.0, %v18377_v12  ;;  %v11052_v48 = vsel %vm7537_vm14, 1.0, %v18377_v12  ;;  %v11053_v22 = vsel %vm7538_vm15, 1.0, %v18377_v12 }
 0x504   : > { %v7983_v63 = vunpack.c.l.bf16 %v7313_v13  ;;  %v7984_v27 = vunpack.c.h.bf16 %v7313_v13  ;;  %v7985_v37 = vunpack.c.l.bf16 %v7314_v29  ;;  %v7986_v35 = vunpack.c.h.bf16 %v7314_v29  ;;  %v18955_v29 = vld [vmem:[#allocation93_spill] sm:$0xff] }
 0x505   : > { %v8746_v49 = vadd.f32 %v17057_v38, %v8657_v6  ;;  %v8660_v14 = vadd.f32 %v17078_v15, %v17076_v43  ;;  %v7971_v61 = vunpack.c.l.bf16 %v17045_v52  ;;  %v7975_v12 = vunpack.c.l.bf16 %v16885_v36 }
 0x506   : > { %v17185_v20 = vadd.f32 %v11050_v23, %v7983_v63  ;;  %v17187_v31 = vadd.f32 %v11051_v47, %v7984_v27  ;;  %v17191_v1 = vadd.f32 %v11052_v48, %v7985_v37  ;;  %v17193_v40 = vadd.f32 %v11053_v22, %v7986_v35  ;;  %v8320_v23 = vld [vmem:[#allocation2 + $0xf0] sm:$0xff]  ;;  %v8322_v35 = vld [vmem:[#allocation2 + $0x78] sm:$0xff] }
 0x507   : > { %v8835_v38 = vadd.f32 %v17066_v26, %v8746_v49  ;;  %v7972_v33 = vunpack.c.h.bf16 %v17045_v52  ;;  %v8227_v43 = vadd.f32 %v17071_v57, %v7971_v61  ;;  %v8231_v15 = vadd.f32 %v16911_v44, %v7975_v12  ;;  %v18956_v44 = vld [vmem:[#allocation94_spill] sm:$0xff] }
 0x508   : > { %v7976_v62 = vunpack.c.h.bf16 %v16885_v36  ;;  %v7973_v41 = vunpack.c.l.bf16 %v17050_v8  ;;  %v7977_v13 = vunpack.c.l.bf16 %v18954_v25  ;;  %v7974_v58 = vunpack.c.h.bf16 %v17050_v8  ;;  %v8755_v18 = vpop.f32.mrf.mxu2 }
 0x509   : > { %v8898_v0 = vadd.f32 %v8835_v38, %v8318_v10  ;;  %v8228_v2 = vadd.f32 %v17074_v3, %v7972_v33  ;;  %v8299_v34 = vpack.c.bf16 %v8231_v15, %v8227_v43  ;;  %v7978_v57 = vunpack.c.h.bf16 %v18954_v25  ;;  %v8325_v25 = vld [vmem:[#allocation2 + $0x40] sm:$0xff] }
 0x50a   : > { %v8232_v26 = vadd.f32 %v18955_v29, %v7976_v62  ;;  %v8229_v52 = vadd.f32 %v17081_v4, %v7973_v41  ;;  %v8233_v5 = vadd.f32 %v18956_v44, %v7977_v13  ;;  %v8230_v36 = vadd.f32 %v17084_v7, %v7974_v58  ;;  %v8580_v22 = vpop.f32.mrf.mxu0 }
 0x50b   : > { %8930 = vst [vmem:[#allocation2 + $0xb8] sm:$0xff] %v8898_v0  ;;  %v8749_v24 = vadd.f32 %v17102_v46, %v8660_v14  ;;  %v8662_v3 = vadd.f32 %v17117_v21, %v17115_v19  ;;  %8609 = vmatmul.bf16.gmra.mxu0 %v8299_v34  ;;  %v8234_v45 = vadd.f32 %v18957_v11, %v7978_v57  ;;  %v8844_v21 = vpop.f32.mrf.mxu3 }
 0x50c   : > { %v8300_v8 = vpack.c.bf16 %v8232_v26, %v8228_v2  ;;  %v8665_v4 = vadd.f32 %v17147_v53, %v17145_v60  ;;  %v8303_v39 = vpack.c.bf16 %v17185_v20, %v17166_v54  ;;  %v8301_v32 = vpack.c.bf16 %v8233_v5, %v8229_v52  ;;  %v8326_v5 = vld [vmem:[#allocation2 + $0xc8] sm:$0xff] }
 0x50d   : > { %v8838_v7 = vadd.f32 %v17109_v56, %v8749_v24  ;;  %v8751_v46 = vadd.f32 %v17133_v17, %v8662_v3  ;;  %v8304_v19 = vpack.c.bf16 %v17187_v31, %v17168_v16  ;;  %v8302_v6 = vpack.c.bf16 %v8234_v45, %v8230_v36  ;;  %v8321_v17 = vld [vmem:[#allocation2 + $0x8] sm:$0xff]  ;;  %v8669_v16 = vpop.f32.mrf.mxu1 }
 0x50e   : > { %8698 = vmatmul.bf16.gmra.mxu1 %v8300_v8  ;;  %v8305_v47 = vpack.c.bf16 %v17191_v1, %v17170_v59  ;;  %v8306_v60 = vpack.c.bf16 %v17193_v40, %v17173_v50  ;;  %v8754_v53 = vadd.f32 %v17164_v42, %v8665_v4  ;;  %8787 = vmatmul.bf16.gmra.mxu2 %v8301_v32  ;;  %v8324_v40 = vld [vmem:[#allocation2 + $0x58] sm:$0xff] }
 0x50f   : > { %v8899_v54 = vadd.f32 %v8838_v7, %v8319_v9  ;;  %v8840_v56 = vadd.f32 %v17140_v30, %v8751_v46  ;;  %v8667_v48 = vadd.f32 %v8666_v55, %v8577_v51  ;;  %8876 = vmatmul.bf16.gmra.mxu3 %v8302_v6  ;;  %v8670_v42 = vadd.f32 %v8669_v16, %v8580_v22  ;;  %v8323_v30 = vld [vmem:[#allocation2 + $0x38] sm:$0xff] }
 0x510   : > { %v8843_v63 = vadd.f32 %v17178_v28, %v8754_v53 }
 0x511   : > { %8931 = vst [vmem:[#allocation2 + $0x60] sm:$0xff] %v8899_v54  ;;  %v8900_v27 = vadd.f32 %v8840_v56, %v8320_v23  ;;  %v8756_v37 = vadd.f32 %v8755_v18, %v8667_v48 }
 0x512   : > { %v8901_v59 = vadd.f32 %v8843_v63, %v8321_v17  ;;  %v8582_v31 = vpop.f32.mrf.mxu0 }
 0x513   : > { %8932 = vst [vmem:[#allocation2 + $0xf0] sm:$0xff] %v8900_v27  ;;  %v8845_v50 = vadd.f32 %v8844_v21, %v8756_v37  ;;  %v8329_v37 = vld [vmem:[#allocation2 + $0x70] sm:$0xff] }
 0x514   : > { %8933 = vst [vmem:[#allocation2 + $0x8] sm:$0xff] %v8901_v59  ;;  %v8758_v14 = vpop.f32.mrf.mxu2 }
 0x515   : > { %v8902_v49 = vadd.f32 %v8845_v50, %v8322_v35  ;;  %v8759_v20 = vadd.f32 %v8758_v14, %v8670_v42  ;;  %v8671_v10 = vpop.f32.mrf.mxu1 }
 0x516   : > { %v8847_v51 = vpop.f32.mrf.mxu3  ;;  %v8672_v28 = vadd.f32 %v8671_v10, %v8582_v31 }
 0x517   : > { %8934 = vst [vmem:[#allocation2 + $0x78] sm:$0xff] %v8902_v49  ;;  %v8848_v55 = vadd.f32 %v8847_v51, %v8759_v20  ;;  %v8330_v51 = vld [vmem:[#allocation2 + $0xc0] sm:$0xff] }
 0x519   : > { %v8903_v61 = vadd.f32 %v8848_v55, %v8323_v30 }
 0x51b   : > { %8614 = vmatmul.bf16.gmra.mxu0 %v8303_v39  ;;  %8935 = vst [vmem:[#allocation2 + $0x38] sm:$0xff] %v8903_v61  ;;  %v8327_v39 = vld [vmem:[#allocation2 + $0xe0] sm:$0xff] }
 0x51c   : > { %v8760_v12 = vpop.f32.mrf.mxu2 }
 0x51d   : > { %v8761_v1 = vadd.f32 %v8760_v12, %v8672_v28 }
 0x51e   : > { %8703 = vmatmul.bf16.gmra.mxu1 %v8304_v19  ;;  %8792 = vmatmul.bf16.gmra.mxu2 %v8305_v47  ;;  %v8849_v38 = vpop.f32.mrf.mxu3  ;;  %v8328_v47 = vld [vmem:[#allocation2 + $0x90] sm:$0xff] }
 0x51f   : > { %8881 = vmatmul.bf16.gmra.mxu3 %v8306_v60  ;;  %v8850_v33 = vadd.f32 %v8849_v38, %v8761_v1  ;;  %v8331_v38 = vld [vmem:[#allocation2 + $0xa8] sm:$0xff] }
 0x521   : > { %v8904_v43 = vadd.f32 %v8850_v33, %v8324_v40 }
 0x522   : > { %v8585_v15 = vpop.f32.mrf.mxu0 }
 0x523   : > { %8936 = vst [vmem:[#allocation2 + $0x58] sm:$0xff] %v8904_v43 }
 0x525   : > { %v8674_v62 = vpop.f32.mrf.mxu1 }
 0x526   : > { %v8675_v41 = vadd.f32 %v8674_v62, %v8585_v15 }
 0x52a   : > { %v8587_v34 = vpop.f32.mrf.mxu0 }
 0x52d   : > { %v8676_v29 = vpop.f32.mrf.mxu1 }
 0x52e   : > { %v8763_v0 = vpop.f32.mrf.mxu2  ;;  %v8677_v52 = vadd.f32 %v8676_v29, %v8587_v34 }
 0x52f   : > { %v8764_v2 = vadd.f32 %v8763_v0, %v8675_v41 }
 0x530   : > { %v8852_v13 = vpop.f32.mrf.mxu3 }
 0x531   : > { %v8853_v58 = vadd.f32 %v8852_v13, %v8764_v2  ;;  %v8332_v13 = vld [vmem:[#allocation2 + $0xd0] sm:$0xff] }
 0x533   : > { %v8905_v26 = vadd.f32 %v8853_v58, %v8325_v25 }
 0x535   : > { %8937 = vst [vmem:[#allocation2 + $0x40] sm:$0xff] %v8905_v26 }
 0x536   : > { %v8765_v57 = vpop.f32.mrf.mxu2 }
 0x537   : > { %v8766_v44 = vadd.f32 %v8765_v57, %v8677_v52 }
 0x538   : > { %v8854_v36 = vpop.f32.mrf.mxu3 }
 0x539   : > { %v8855_v24 = vadd.f32 %v8854_v36, %v8766_v44  ;;  %v8333_v36 = vld [vmem:[#allocation2 + $0x10] sm:$0xff] }
 0x53b   : > { %v8906_v3 = vadd.f32 %v8855_v24, %v8326_v5 }
 0x53c   : > { %v8590_v18 = vpop.f32.mrf.mxu0 }
 0x53d   : > { %8938 = vst [vmem:[#allocation2 + $0xc8] sm:$0xff] %v8906_v3 }
 0x53e   : > { %v8679_v8 = vpop.f32.mrf.mxu1 }
 0x53f   : > { %v8680_v11 = vadd.f32 %v8679_v8, %v8590_v18 }
 0x544   : > { %v8592_v7 = vpop.f32.mrf.mxu0 }
 0x546   : > { %v8681_v46 = vpop.f32.mrf.mxu1 }
 0x547   : > { %v8768_v45 = vpop.f32.mrf.mxu2  ;;  %v8682_v21 = vadd.f32 %v8681_v46, %v8592_v7 }
 0x548   : > { %v8769_v9 = vadd.f32 %v8768_v45, %v8680_v11 }
 0x549   : > { %v8857_v4 = vpop.f32.mrf.mxu3 }
 0x54a   : > { %v8858_v32 = vadd.f32 %v8857_v4, %v8769_v9  ;;  %v8334_v4 = vld [vmem:[#allocation2 + $0x28] sm:$0xff] }
 0x54c   : > { %v8907_v19 = vadd.f32 %v8858_v32, %v8327_v39 }
 0x54e   : > { %8939 = vst [vmem:[#allocation2 + $0xe0] sm:$0xff] %v8907_v19 }
 0x54f   : > { %v8770_v6 = vpop.f32.mrf.mxu2 }
 0x550   : > { %v8771_v23 = vadd.f32 %v8770_v6, %v8682_v21 }
 0x551   : > { %v8859_v60 = vpop.f32.mrf.mxu3 }
 0x552   : > { %v8860_v53 = vadd.f32 %v8859_v60, %v8771_v23 }
 0x554   : > { %v8908_v54 = vadd.f32 %v8860_v53, %v8328_v47  ;;  %v8335_v53 = vld [vmem:[#allocation2 + $0xa0] sm:$0xff] }
 0x556   : > { %v8595_v56 = vpop.f32.mrf.mxu0  ;;  %8940 = vst [vmem:[#allocation2 + $0x90] sm:$0xff] %v8908_v54 }
 0x557   : > { %v8684_v17 = vpop.f32.mrf.mxu1 }
 0x558   : > { %v8685_v16 = vadd.f32 %v8684_v17, %v8595_v56 }
 0x55e   : > { %v8597_v48 = vpop.f32.mrf.mxu0 }
 0x55f   : > { %v8686_v22 = vpop.f32.mrf.mxu1 }
 0x560   : > { %v8773_v63 = vpop.f32.mrf.mxu2  ;;  %v8687_v49 = vadd.f32 %v8686_v22, %v8597_v48 }
 0x561   : > { %v8774_v27 = vadd.f32 %v8773_v63, %v8685_v16  ;;  %v8336_v63 = vld [vmem:[#allocation2 + $0xf8] sm:$0xff] }
 0x562   : > { %v8862_v59 = vpop.f32.mrf.mxu3 }
 0x563   : > { %v8863_v35 = vadd.f32 %v8862_v59, %v8774_v27 }
 0x565   : > { %v8909_v50 = vadd.f32 %v8863_v35, %v8329_v37 }
 0x567   : > { %v8600_v42 = vpop.f32.mrf.mxu0  ;;  %8941 = vst [vmem:[#allocation2 + $0x70] sm:$0xff] %v8909_v50 }
 0x568   : > { %v8775_v14 = vpop.f32.mrf.mxu2  ;;  %v8689_v20 = vpop.f32.mrf.mxu1 }
 0x569   : > { %v8776_v30 = vadd.f32 %v8775_v14, %v8687_v49  ;;  %v8690_v28 = vadd.f32 %v8689_v20, %v8600_v42  ;;  %v8337_v20 = vld [vmem:[#allocation2 + $0x20] sm:$0xff] }
 0x56a   : > { %v8864_v55 = vpop.f32.mrf.mxu3 }
 0x56b   : > { %v8865_v31 = vadd.f32 %v8864_v55, %v8776_v30 }
 0x56d   : > { %v8910_v10 = vadd.f32 %v8865_v31, %v8330_v51 }
 0x56f   : > { %v8602_v61 = vpop.f32.mrf.mxu0  ;;  %8942 = vst [vmem:[#allocation2 + $0xc0] sm:$0xff] %v8910_v10 }
 0x570   : > { %v8778_v12 = vpop.f32.mrf.mxu2  ;;  %v8691_v1 = vpop.f32.mrf.mxu1 }
 0x571   : > { %v8779_v40 = vadd.f32 %v8778_v12, %v8690_v28  ;;  %v8692_v41 = vadd.f32 %v8691_v1, %v8602_v61  ;;  %v8338_v12 = vld [vmem:[#allocation2 + $0x98] sm:$0xff] }
 0x572   : > { %v8867_v33 = vpop.f32.mrf.mxu3 }
 0x573   : > { %v8868_v43 = vadd.f32 %v8867_v33, %v8779_v40 }
 0x575   : > { %v8911_v15 = vadd.f32 %v8868_v43, %v8331_v38 }
 0x577   : > { %v8605_v62 = vpop.f32.mrf.mxu0  ;;  %8943 = vst [vmem:[#allocation2 + $0xa8] sm:$0xff] %v8911_v15 }
 0x578   : > { %v8780_v0 = vpop.f32.mrf.mxu2  ;;  %v8694_v2 = vpop.f32.mrf.mxu1 }
 0x579   : > { %v8781_v25 = vadd.f32 %v8780_v0, %v8692_v41  ;;  %v8695_v52 = vadd.f32 %v8694_v2, %v8605_v62 }
 0x57a   : > { %v8869_v58 = vpop.f32.mrf.mxu3 }
 0x57b   : > { %v8870_v34 = vadd.f32 %v8869_v58, %v8781_v25 }
 0x57d   : > { %v8912_v29 = vadd.f32 %v8870_v34, %v8332_v13 }
 0x57f   : > { %v8607_v26 = vpop.f32.mrf.mxu0  ;;  %8944 = vst [vmem:[#allocation2 + $0xd0] sm:$0xff] %v8912_v29 }
 0x580   : > { %v8783_v57 = vpop.f32.mrf.mxu2  ;;  %v8696_v44 = vpop.f32.mrf.mxu1 }
 0x581   : > { %v8784_v5 = vadd.f32 %v8783_v57, %v8695_v52  ;;  %v8697_v8 = vadd.f32 %v8696_v44, %v8607_v26 }
 0x582   : > { %v8872_v24 = vpop.f32.mrf.mxu3 }
 0x583   : > { %v8873_v3 = vadd.f32 %v8872_v24, %v8784_v5 }
 0x585   : > { %v8913_v18 = vadd.f32 %v8873_v3, %v8333_v36 }
 0x587   : > { %8945 = vst [vmem:[#allocation2 + $0x10] sm:$0xff] %v8913_v18 }
 0x588   : > { %v8785_v11 = vpop.f32.mrf.mxu2  ;;  %v8610_v45 = vpop.f32.mrf.mxu0 }
 0x589   : > { %v8786_v9 = vadd.f32 %v8785_v11, %v8697_v8 }
 0x58a   : > { %v8874_v39 = vpop.f32.mrf.mxu3 }
 0x58b   : > { %v8699_v32 = vpop.f32.mrf.mxu1  ;;  %v8875_v7 = vadd.f32 %v8874_v39, %v8786_v9 }
 0x58c   : > { %v8700_v19 = vadd.f32 %v8699_v32, %v8610_v45 }
 0x58d   : > { %v8914_v46 = vadd.f32 %v8875_v7, %v8334_v4 }
 0x58f   : > { %8946 = vst [vmem:[#allocation2 + $0x28] sm:$0xff] %v8914_v46 }
 0x590   : > { %v8612_v6 = vpop.f32.mrf.mxu0 }
 0x591   : > { %v8788_v21 = vpop.f32.mrf.mxu2 }
 0x592   : > { %v8789_v23 = vadd.f32 %v8788_v21, %v8700_v19  ;;  %v8877_v47 = vpop.f32.mrf.mxu3 }
 0x593   : > { %v8701_v60 = vpop.f32.mrf.mxu1 }
 0x594   : > { %v8878_v54 = vadd.f32 %v8877_v47, %v8789_v23  ;;  %v8702_v17 = vadd.f32 %v8701_v60, %v8612_v6 }
 0x596   : > { %v8915_v56 = vadd.f32 %v8878_v54, %v8335_v53 }
 0x598   : > { %8947 = vst [vmem:[#allocation2 + $0xa0] sm:$0xff] %v8915_v56  ;;  %v8615_v27 = vpop.f32.mrf.mxu0 }
 0x599   : > { %v8790_v48 = vpop.f32.mrf.mxu2 }
 0x59a   : > { %v8791_v22 = vadd.f32 %v8790_v48, %v8702_v17  ;;  %v8879_v16 = vpop.f32.mrf.mxu3 }
 0x59b   : > { %v8704_v37 = vpop.f32.mrf.mxu1 }
 0x59c   : > { %v8880_v59 = vadd.f32 %v8879_v16, %v8791_v22  ;;  %v8705_v50 = vadd.f32 %v8704_v37, %v8615_v27 }
 0x59e   : > { %v8916_v35 = vadd.f32 %v8880_v59, %v8336_v63 }
 0x5a0   : > { %8948 = vst [vmem:[#allocation2 + $0xf8] sm:$0xff] %v8916_v35  ;;  %v8617_v51 = vpop.f32.mrf.mxu0 }
 0x5a1   : > { %v8793_v42 = vpop.f32.mrf.mxu2 }
 0x5a2   : > { %v8794_v49 = vadd.f32 %v8793_v42, %v8705_v50  ;;  %v8882_v14 = vpop.f32.mrf.mxu3 }
 0x5a3   : > { %v8706_v55 = vpop.f32.mrf.mxu1 }
 0x5a4   : > { %v8883_v30 = vadd.f32 %v8882_v14, %v8794_v49  ;;  %v8707_v10 = vadd.f32 %v8706_v55, %v8617_v51 }
 0x5a6   : > { %v8917_v31 = vadd.f32 %v8883_v30, %v8337_v20 }
 0x5a8   : > { %8949 = vst [vmem:[#allocation2 + $0x20] sm:$0xff] %v8917_v31 }
 0x5a9   : > { %v8795_v61 = vpop.f32.mrf.mxu2 }
 0x5aa   : > { %v8796_v28 = vadd.f32 %v8795_v61, %v8707_v10  ;;  %v8884_v1 = vpop.f32.mrf.mxu3 }
 0x5ac   : > { %v8885_v40 = vadd.f32 %v8884_v1, %v8796_v28 }
 0x5ae   : > { %v8918_v38 = vadd.f32 %v8885_v40, %v8338_v12 }
 0x5b0   : > { %8950 = vst [vmem:[#allocation2 + $0x98] sm:$0xff] %v8918_v38 }
 0x5b1 PF: > { %p11182_p6 = scmp.ne.s32.totalorder %s11755_s25, 3 }
 0x5b3   : > { %8954 = sbr.rel (%p11182_p6) target bundleno = 1826 (0x722), region = 52 }
 0x5b8   : > { %v9004_v33 = vld [vmem:[%s11922_s30 + $0x88] sm:$0xff]  ;;  %v9003_v43 = vld [vmem:[%s11922_s30 + $0x80] sm:$0xff]  ;;  %v11787_v62 = vmov 0   ;;  %v9005_v3 = vld [vmem:[%s11922_s30 + $0x90] sm:$0xff] }
 0x5b9   : > { %v8987_v15 = vld [vmem:[%s11922_s30] sm:$0xff]  ;;  %11564 = vset.pattern.permute.xlu2 %v11787_v62  ;;  %11563 = vset.pattern.permute.xlu1 %v11787_v62  ;;  %v9036_v41 = vcvt.s32.f32 %v9004_v33  ;;  %v9035_v0 = vcvt.s32.f32 %v9003_v43  ;;  %v9012_v25 = vld [vmem:[%s11922_s30 + $0xc8] sm:$0xff]  ;;  %v9037_v11 = vcvt.s32.f32 %v9005_v3  ;;  %v8997_v7 = vld [vmem:[%s11922_s30 + $0x50] sm:$0xff] }
 0x5ba   : > { %v9019_v2 = vcvt.s32.f32 %v8987_v15  ;;  %11562 = vset.pattern.permute.xlu0 %v11787_v62  ;;  %v9011_v13 = vld [vmem:[%s11922_s30 + $0xc0] sm:$0xff]  ;;  %v9044_v52 = vcvt.s32.f32 %v9012_v25  ;;  %v8988_v18 = vld [vmem:[%s11922_s30 + $0x8] sm:$0xff]  ;;  %v9013_v46 = vld [vmem:[%s11922_s30 + $0xd0] sm:$0xff]  ;;  %v9029_v21 = vcvt.s32.f32 %v8997_v7 }
 0x5bb   : > { %v8995_v58 = vld [vmem:[%s11922_s30 + $0x40] sm:$0xff]  ;;  %v9068_v34 = vadd.f32 1e-10, %v9036_v41  ;;  %v9067_v29 = vadd.f32 1e-10, %v9035_v0  ;;  %v9043_v57 = vcvt.s32.f32 %v9011_v13  ;;  %v8996_v8 = vld [vmem:[%s11922_s30 + $0x48] sm:$0xff]  ;;  %v9020_v45 = vcvt.s32.f32 %v8988_v18 }
 0x5bc   : > { %v9051_v26 = vadd.f32 1e-10, %v9019_v2  ;;  %v9027_v44 = vcvt.s32.f32 %v8995_v58  ;;  %v9076_v5 = vadd.f32 1e-10, %v9044_v52  ;;  %v9028_v9 = vcvt.s32.f32 %v8996_v8  ;;  %v8989_v19 = vld [vmem:[%s11922_s30 + $0x10] sm:$0xff]  ;;  %v8990_v54 = vld [vmem:[%s11922_s30 + $0x18] sm:$0xff] }
 0x5bd   : > { %9170 = vperm.xlu2 %11564, %v9068_v34   ;;  %9165 = vperm.xlu0 %11562, %v9067_v29   ;;  %v9075_v36 = vadd.f32 1e-10, %v9043_v57  ;;  %v9069_v4 = vadd.f32 1e-10, %v9037_v11  ;;  %v9052_v39 = vadd.f32 1e-10, %v9020_v45  ;;  %v9045_v6 = vcvt.s32.f32 %v9013_v46 }
 0x5be   : > { %9085 = vperm.xlu1 %11563, %v9051_v26   ;;  %v9059_v24 = vadd.f32 1e-10, %v9027_v44  ;;  %v9060_v32 = vadd.f32 1e-10, %v9028_v9  ;;  %v9021_v23 = vcvt.s32.f32 %v8989_v19  ;;  %v9061_v47 = vadd.f32 1e-10, %v9029_v21 }
 0x5bf   : > { %v9077_v60 = vadd.f32 1e-10, %v9045_v6  ;;  %v9006_v56 = vld [vmem:[%s11922_s30 + $0x98] sm:$0xff]  ;;  %v9022_v48 = vcvt.s32.f32 %v8990_v54  ;;  %v9015_v59 = vld [vmem:[%s11922_s30 + $0xe0] sm:$0xff]  ;;  %v9008_v55 = vld [vmem:[%s11922_s30 + $0xa8] sm:$0xff] }
 0x5c0   : > { %v9053_v53 = vadd.f32 1e-10, %v9021_v23  ;;  %v9014_v17 = vld [vmem:[%s11922_s30 + $0xd8] sm:$0xff]  ;;  %v9038_v22 = vcvt.s32.f32 %v9006_v56  ;;  %v9007_v50 = vld [vmem:[%s11922_s30 + $0xa0] sm:$0xff]  ;;  %v9047_v42 = vcvt.s32.f32 %v9015_v59  ;;  %v9040_v61 = vcvt.s32.f32 %v9008_v55  ;;  %v9000_v33 = vld [vmem:[%s11922_s30 + $0x68] sm:$0xff] }
 0x5c1   : > { %v9046_v16 = vcvt.s32.f32 %v9014_v17  ;;  %v9054_v63 = vadd.f32 1e-10, %v9022_v48  ;;  %v8998_v35 = vld [vmem:[%s11922_s30 + $0x58] sm:$0xff]  ;;  %v9039_v14 = vcvt.s32.f32 %v9007_v50  ;;  %v8991_v31 = vld [vmem:[%s11922_s30 + $0x20] sm:$0xff]  ;;  %v9016_v43 = vld [vmem:[%s11922_s30 + $0xe8] sm:$0xff]  ;;  %v9032_v62 = vcvt.s32.f32 %v9000_v33 }
 0x5c2   : > { %v9070_v27 = vadd.f32 1e-10, %v9038_v22  ;;  %v9030_v49 = vcvt.s32.f32 %v8998_v35  ;;  %v9079_v20 = vadd.f32 1e-10, %v9047_v42  ;;  %v8999_v10 = vld [vmem:[%s11922_s30 + $0x60] sm:$0xff]  ;;  %v9023_v28 = vcvt.s32.f32 %v8991_v31  ;;  %v8992_v15 = vld [vmem:[%s11922_s30 + $0x28] sm:$0xff] }
 0x5c3   : > { %v9078_v37 = vadd.f32 1e-10, %v9046_v16  ;;  %v9071_v51 = vadd.f32 1e-10, %v9039_v14  ;;  %v9031_v12 = vcvt.s32.f32 %v8999_v10  ;;  %v9072_v1 = vadd.f32 1e-10, %v9040_v61 }
 0x5c4   : > { %v9062_v30 = vadd.f32 1e-10, %v9030_v49  ;;  %v9055_v40 = vadd.f32 1e-10, %v9023_v28  ;;  %v9048_v41 = vcvt.s32.f32 %v9016_v43  ;;  %v9024_v0 = vcvt.s32.f32 %v8992_v15  ;;  %v8993_v58 = vld [vmem:[%s11922_s30 + $0x30] sm:$0xff]  ;;  %v9010_v18 = vld [vmem:[%s11922_s30 + $0xb8] sm:$0xff] }
 0x5c5   : > { %9210 = vperm.xlu2 %11564, %v9076_v5   ;;  %9205 = vperm.xlu0 %11562, %v9075_v36   ;;  %v9063_v38 = vadd.f32 1e-10, %v9031_v12  ;;  %v9064_v2 = vadd.f32 1e-10, %v9032_v62  ;;  %v9009_v34 = vld [vmem:[%s11922_s30 + $0xb0] sm:$0xff]  ;;  %v9025_v26 = vcvt.s32.f32 %v8993_v58  ;;  %v9042_v45 = vcvt.s32.f32 %v9010_v18  ;;  %v9002_v7 = vld [vmem:[%s11922_s30 + $0x78] sm:$0xff] }
 0x5c6   : > { %9125 = vperm.xlu1 %11563, %v9059_v24   ;;  %v9080_v25 = vadd.f32 1e-10, %v9048_v41  ;;  %v9056_v13 = vadd.f32 1e-10, %v9024_v0  ;;  %v9017_v29 = vld [vmem:[%s11922_s30 + $0xf0] sm:$0xff]  ;;  %v9041_v52 = vcvt.s32.f32 %v9009_v34  ;;  %v9018_v24 = vld [vmem:[%s11922_s30 + $0xf8] sm:$0xff]  ;;  %v9034_v21 = vcvt.s32.f32 %v9002_v7 }
 0x5c7   : > { %v9049_v57 = vcvt.s32.f32 %v9017_v29  ;;  %v9057_v44 = vadd.f32 1e-10, %v9025_v26  ;;  %v9001_v3 = vld [vmem:[%s11922_s30 + $0x70] sm:$0xff]  ;;  %v9050_v8 = vcvt.s32.f32 %v9018_v24  ;;  %v9738_v46 = vld [vmem:[#allocation5 + $0x78] sm:$0xff]  ;;  %v9736_v23 = vld [vmem:[#allocation5 + $0x68] sm:$0xff] }
 0x5c8   : > { %v9073_v5 = vadd.f32 1e-10, %v9041_v52  ;;  %v9033_v11 = vcvt.s32.f32 %v9001_v3  ;;  %9739 = vmatpush.msra.mxu0 %v9738_v46  ;;  %v9737_v6 = vld [vmem:[#allocation5 + $0x70] sm:$0xff]  ;;  %11222 = vmatpush.msra.mxu2 %v9738_v46  ;;  %v9734_v54 = vld [vmem:[#allocation5 + $0x58] sm:$0xff]  ;;  %v9732_v17 = vld [vmem:[#allocation5 + $0x48] sm:$0xff] }
 0x5c9   : > { %v9081_v36 = vadd.f32 1e-10, %v9049_v57  ;;  %v9082_v9 = vadd.f32 1e-10, %v9050_v8  ;;  %11221 = vmatpush.msra.mxu1 %v9738_v46  ;;  %11223 = vmatpush.msra.mxu3 %v9738_v46  ;;  %v9733_v56 = vld [vmem:[#allocation5 + $0x50] sm:$0xff]  ;;  %v9731_v48 = vld [vmem:[#allocation5 + $0x40] sm:$0xff] }
 0x5ca   : > { %9740 = vmatpush.msra.mxu0 %v9737_v6  ;;  %11225 = vmatpush.msra.mxu2 %v9737_v6  ;;  %v9730_v22 = vld [vmem:[#allocation5 + $0x38] sm:$0xff]  ;;  %v9725_v49 = vld [vmem:[#allocation5 + $0x10] sm:$0xff]  ;;  %v9724_v14 = vld [vmem:[#allocation5 + $0x8] sm:$0xff] }
 0x5cb   : > { %11224 = vmatpush.msra.mxu1 %v9737_v6  ;;  %11226 = vmatpush.msra.mxu3 %v9737_v6  ;;  %v9726_v59 = vld [vmem:[#allocation5 + $0x18] sm:$0xff]  ;;  %v8973_v24 = vld [vmem:[#allocation2 + $0x40] sm:$0xff] }
 0x5cc   : > { %9741 = vmatpush.msra.mxu0 %v9736_v23  ;;  %11228 = vmatpush.msra.mxu2 %v9736_v23  ;;  %v8972_v52 = vld [vmem:[#allocation2 + $0x58] sm:$0xff] }
 0x5cd   : > { %9175 = vperm.xlu2 %11564, %v9069_v4   ;;  %9090 = vperm.xlu0 %11562, %v9052_v39   ;;  %v9065_v4 = vadd.f32 1e-10, %v9033_v11  ;;  %v9074_v39 = vadd.f32 1e-10, %v9042_v45 }
 0x5ce   : > { %9130 = vperm.xlu1 %11563, %v9060_v32   ;;  %v8994_v32 = vld [vmem:[%s11922_s30 + $0x38] sm:$0xff]  ;;  %11227 = vmatpush.msra.mxu1 %v9736_v23 }
 0x5cf   : > { %v9026_v19 = vcvt.s32.f32 %v8994_v32  ;;  %11229 = vmatpush.msra.mxu3 %v9736_v23 }
 0x5d5   : > { %9135 = vperm.xlu2 %11564, %v9061_v47   ;;  %9215 = vperm.xlu0 %11562, %v9077_v60   ;;  %v9058_v47 = vadd.f32 1e-10, %v9026_v19  ;;  %v9066_v60 = vadd.f32 1e-10, %v9034_v21 }
 0x5d6   : > { %9095 = vperm.xlu1 %11563, %v9053_v53   ;;  %v9735_v53 = vld [vmem:[#allocation5 + $0x60] sm:$0xff] }
 0x5d7   : > { %9742 = vmatpush.msra.mxu0 %v9735_v53  ;;  %11231 = vmatpush.msra.mxu2 %v9735_v53 }
 0x5d8   : > { %11230 = vmatpush.msra.mxu1 %v9735_v53  ;;  %11232 = vmatpush.msra.mxu3 %v9735_v53 }
 0x5d9   : > { %9743 = vmatpush.msra.mxu0 %v9734_v54  ;;  %11234 = vmatpush.msra.mxu2 %v9734_v54 }
 0x5da   : > { %11233 = vmatpush.msra.mxu1 %v9734_v54  ;;  %11235 = vmatpush.msra.mxu3 %v9734_v54 }
 0x5db   : > { %9744 = vmatpush.msra.mxu0 %v9733_v56  ;;  %11237 = vmatpush.msra.mxu2 %v9733_v56 }
 0x5dc   : > { %11236 = vmatpush.msra.mxu1 %v9733_v56  ;;  %11238 = vmatpush.msra.mxu3 %v9733_v56 }
 0x5dd   : > { %9100 = vperm.xlu2 %11564, %v9054_v63   ;;  %9180 = vperm.xlu0 %11562, %v9070_v27   ;;  %v9729_v63 = vld [vmem:[#allocation5 + $0x30] sm:$0xff]  ;;  %v9728_v27 = vld [vmem:[#allocation5 + $0x28] sm:$0xff] }
 0x5de   : > { %9220 = vperm.xlu1 %11563, %v9078_v37   ;;  %9745 = vmatpush.msra.mxu0 %v9732_v17  ;;  %v9727_v37 = vld [vmem:[#allocation5 + $0x20] sm:$0xff] }
 0x5df   : > { %11240 = vmatpush.msra.mxu2 %v9732_v17  ;;  %11239 = vmatpush.msra.mxu1 %v9732_v17 }
 0x5e0   : > { %9746 = vmatpush.msra.mxu0 %v9731_v48  ;;  %11241 = vmatpush.msra.mxu3 %v9732_v17 }
 0x5e1   : > { %11243 = vmatpush.msra.mxu2 %v9731_v48  ;;  %11242 = vmatpush.msra.mxu1 %v9731_v48 }
 0x5e2   : > { %9747 = vmatpush.msra.mxu0 %v9730_v22  ;;  %11244 = vmatpush.msra.mxu3 %v9731_v48 }
 0x5e3   : > { %11246 = vmatpush.msra.mxu2 %v9730_v22  ;;  %11245 = vmatpush.msra.mxu1 %v9730_v22 }
 0x5e4   : > { %9748 = vmatpush.msra.mxu0 %v9729_v63  ;;  %11247 = vmatpush.msra.mxu3 %v9730_v22 }
 0x5e5   : > { %9225 = vperm.xlu2 %11564, %v9079_v20   ;;  %9140 = vperm.xlu0 %11562, %v9062_v30   ;;  %v9723_v30 = vld [vmem:[#allocation5] sm:$0xff] }
 0x5e6   : > { %9185 = vperm.xlu1 %11563, %v9071_v51   ;;  %11249 = vmatpush.msra.mxu2 %v9729_v63 }
 0x5e7   : > { %9749 = vmatpush.msra.mxu0 %v9728_v27  ;;  %11248 = vmatpush.msra.mxu1 %v9729_v63 }
 0x5e8   : > { %11252 = vmatpush.msra.mxu2 %v9728_v27  ;;  %11250 = vmatpush.msra.mxu3 %v9729_v63 }
 0x5e9   : > { %9750 = vmatpush.msra.mxu0 %v9727_v37  ;;  %11251 = vmatpush.msra.mxu1 %v9728_v27 }
 0x5ea   : > { %11255 = vmatpush.msra.mxu2 %v9727_v37  ;;  %11253 = vmatpush.msra.mxu3 %v9728_v27  ;;  %v8979_v27 = vld [vmem:[#allocation2 + $0xa8] sm:$0xff] }
 0x5eb   : > { %9751 = vmatpush.msra.mxu0 %v9726_v59  ;;  %11254 = vmatpush.msra.mxu1 %v9727_v37 }
 0x5ec   : > { %11258 = vmatpush.msra.mxu2 %v9726_v59  ;;  %11256 = vmatpush.msra.mxu3 %v9727_v37 }
 0x5ed   : > { %9190 = vperm.xlu2 %11564, %v9072_v1   ;;  %9105 = vperm.xlu0 %11562, %v9055_v40  }
 0x5ee   : > { %9145 = vperm.xlu1 %11563, %v9063_v38   ;;  %9752 = vmatpush.msra.mxu0 %v9725_v49 }
 0x5ef   : > { %11261 = vmatpush.msra.mxu2 %v9725_v49  ;;  %11257 = vmatpush.msra.mxu1 %v9726_v59 }
 0x5f0   : > { %9753 = vmatpush.msra.mxu0 %v9724_v14  ;;  %11259 = vmatpush.msra.mxu3 %v9726_v59 }
 0x5f1   : > { %11264 = vmatpush.msra.mxu2 %v9724_v14  ;;  %11260 = vmatpush.msra.mxu1 %v9725_v49 }
 0x5f2   : > { %9754 = vmatpush.msra.mxu0 %v9723_v30  ;;  %11262 = vmatpush.msra.mxu3 %v9725_v49 }
 0x5f3   : > { %11267 = vmatpush.msra.mxu2 %v9723_v30  ;;  %11263 = vmatpush.msra.mxu1 %v9724_v14 }
 0x5f4   : > { %11265 = vmatpush.msra.mxu3 %v9724_v14 }
 0x5f5   : > { %9150 = vperm.xlu2 %11564, %v9064_v2   ;;  %9230 = vperm.xlu0 %11562, %v9080_v25  }
 0x5f6   : > { %9110 = vperm.xlu1 %11563, %v9056_v13   ;;  %11266 = vmatpush.msra.mxu1 %v9723_v30 }
 0x5f7   : > { %11268 = vmatpush.msra.mxu3 %v9723_v30 }
 0x5fd   : > { %9115 = vperm.xlu2 %11564, %v9057_v44   ;;  %9195 = vperm.xlu0 %11562, %v9073_v5  }
 0x5fe   : > { %9235 = vperm.xlu1 %11563, %v9081_v36  }
 0x605   : > { %9240 = vperm.xlu2 %11564, %v9082_v9   ;;  %9155 = vperm.xlu0 %11562, %v9065_v4  }
 0x606   : > { %9200 = vperm.xlu1 %11563, %v9074_v39  }
 0x60d   : > { %9120 = vperm.xlu0 %11562, %v9058_v47  }
 0x60e   : > { %9160 = vperm.xlu1 %11563, %v9066_v60  }
 0x617   : > { %v9171_v16 = vpop.permute.xlu2 %9170 }
 0x618   : > { %11565 = vrcp.f32 %v9171_v16  ;;  %vm9503_vm0 = vweird.f32 %v9171_v16  ;;  %v9507_v28 = vand.u32 2147483647, %v9171_v16  ;;  %v9509_v12 = vand.u32 2147483648, %v9171_v16 }
 0x61a   : > { %vm17274_vm3 = vcmp.eq.f32.partialorder %v9507_v28, 8.507059e+37  ;;  %v9510_v15 = vor.u32 1.1754944e-38, %v9509_v12 }
 0x61e   : > { %v11566_v35 = vpop.eup %11565 }
 0x61f   : > { %v9499_v50 = vmul.f32 %v11566_v35, %v9171_v16  ;;  %v9211_v42 = vpop.permute.xlu2 %9210  ;;  %vm9504_vm1 = vweird.f32 %v11566_v35  ;;  %v8980_v16 = vld [vmem:[#allocation2 + $0xd0] sm:$0xff] }
 0x620   : > { %11567 = vrcp.f32 %v9211_v42  ;;  %vm17267_vm2 = vmor %vm9503_vm0, %vm9504_vm1  ;;  %vm9623_vm4 = vweird.f32 %v9211_v42  ;;  %v9627_v13 = vand.u32 2147483647, %v9211_v42  ;;  %v9629_v58 = vand.u32 2147483648, %v9211_v42 }
 0x621   : > { %v9500_v20 = vsub.f32 1.0, %v9499_v50 }
 0x622   : > { %vm17303_vm8 = vcmp.eq.f32.partialorder %v9627_v13, 8.507059e+37  ;;  %v9630_v3 = vor.u32 1.1754944e-38, %v9629_v58 }
 0x623   : > { %v9501_v55 = vmul.f32 %v11566_v35, %v9500_v20 }
 0x625   : > { %v9502_v1 = vadd.f32 %v11566_v35, %v9501_v55 }
 0x626   : > { %v17261_v51 = vpop.eup %11567 }
 0x627   : > { %v9619_v31 = vmul.f32 %v17261_v51, %v9211_v42  ;;  %v17264_v10 = vpop.permute.xlu2 %9175  ;;  %v9506_v2 = vsel %vm17267_vm2, %v11566_v35, %v9502_v1  ;;  %vm9624_vm5 = vweird.f32 %v17261_v51 }
 0x628   : > { %11569 = vrcp.f32 %v17264_v10  ;;  %v9524_v29 = vand.u32 2147483648, %v17264_v10  ;;  %v9511_v57 = vsel %vm17274_vm3, %v9510_v15, %v9506_v2  ;;  %vm17296_vm6 = vmor %vm9623_vm4, %vm9624_vm5  ;;  %v9522_v36 = vand.u32 2147483647, %v17264_v10 }
 0x629   : > { %v9620_v61 = vsub.f32 1.0, %v9619_v31  ;;  %vm9518_vm7 = vweird.f32 %v17264_v10  ;;  %v17308_v8 = vmul.f32 %v9511_v57, %v8972_v52 }
 0x62a   : > { %v17310_v11 = vor.u32 1.1754944e-38, %v9524_v29  ;;  %vm17335_vm13 = vcmp.eq.f32.partialorder %v9522_v36, 8.507059e+37 }
 0x62b   : > { %v9621_v38 = vmul.f32 %v17261_v51, %v9620_v61 }
 0x62d   : > { %v9622_v26 = vadd.f32 %v17261_v51, %v9621_v38 }
 0x62e   : > { %v17272_v33 = vpop.eup %11569 }
 0x62f   : > { %v9514_v62 = vmul.f32 %v17272_v33, %v17264_v10  ;;  %v17280_v41 = vpop.permute.xlu0 %9165  ;;  %v17282_v0 = vpop.permute.xlu2 %9135  ;;  %v9626_v45 = vsel %vm17296_vm6, %v17261_v51, %v9622_v26  ;;  %vm9519_vm10 = vweird.f32 %v17272_v33  ;;  %v8955_v26 = vld [vmem:[#allocation2 + $0xb0] sm:$0xff] }
 0x630   : > { %11571 = vrcp.f32 %v17280_v41  ;;  %v17288_v25 = vpop.permute.xlu1 %9085  ;;  %v9492_v5 = vand.u32 2147483647, %v17280_v41  ;;  %vm9488_vm9 = vweird.f32 %v17280_v41  ;;  %v9494_v39 = vand.u32 2147483648, %v17280_v41  ;;  %vm17362_vm0 = vmor %vm9518_vm7, %vm9519_vm10 }
 0x631   : > { %v9515_v34 = vsub.f32 1.0, %v9514_v62  ;;  %11573 = vrcp.f32 %v17282_v0  ;;  %v9252_v4 = vand.u32 2147483647, %v17288_v25  ;;  %vm9248_vm11 = vweird.f32 %v17288_v25  ;;  %v8971_v62 = vld [vmem:[#allocation2 + $0x38] sm:$0xff] }
 0x632   : > { %11575 = vrcp.f32 %v17288_v25  ;;  %v9254_v21 = vand.u32 2147483648, %v17288_v25  ;;  %vm17331_vm12 = vcmp.eq.f32.partialorder %v9492_v5, 8.507059e+37  ;;  %v9631_v54 = vsel %vm17303_vm8, %v9630_v3, %v9626_v45 }
 0x633   : > { %v9516_v18 = vmul.f32 %v17272_v33, %v9515_v34  ;;  %v9404_v56 = vand.u32 2147483648, %v17282_v0  ;;  %vm17351_vm14 = vcmp.eq.f32.partialorder %v9252_v4, 8.507059e+37  ;;  %v9495_v37 = vor.u32 1.1754944e-38, %v9494_v39 }
 0x634   : > { %v9255_v42 = vor.u32 1.1754944e-38, %v9254_v21  ;;  %v17366_v14 = vmul.f32 %v9631_v54, %v8980_v16  ;;  %v9402_v20 = vand.u32 2147483647, %v17282_v0  ;;  %vm9398_vm7 = vweird.f32 %v17282_v0 }
 0x635   : > { %v9517_v22 = vadd.f32 %v17272_v33, %v9516_v18  ;;  %v17369_v30 = vor.u32 1.1754944e-38, %v9404_v56 }
 0x636   : > { %v17315_v9 = vpop.eup %11571 }
 0x637   : > { %v17321_v32 = vpop.eup %11573  ;;  %v9484_v7 = vmul.f32 %v17315_v9, %v17280_v41  ;;  %v17325_v46 = vpop.permute.xlu0 %9205  ;;  %vm9489_vm15 = vweird.f32 %v17315_v9  ;;  %v9521_v31 = vsel %vm17362_vm0, %v17272_v33, %v9517_v22 }
 0x638   : > { %v17327_v19 = vpop.permute.xlu2 %9100  ;;  %v11576_v47 = vpop.eup %11575  ;;  %v9394_v60 = vmul.f32 %v17321_v32, %v17282_v0  ;;  %11577 = vrcp.f32 %v17325_v46  ;;  %v9612_v50 = vand.u32 2147483647, %v17325_v46  ;;  %vm17380_vm2 = vmor %vm9488_vm9, %vm9489_vm15  ;;  %vm9608_vm3 = vweird.f32 %v17325_v46 }
 0x639   : > { %v17342_v53 = vpop.permute.xlu1 %9125  ;;  %v9485_v17 = vsub.f32 1.0, %v9484_v7  ;;  %v9244_v48 = vmul.f32 %v11576_v47, %v17288_v25  ;;  %11579 = vrcp.f32 %v17327_v19  ;;  %vm9249_vm1 = vweird.f32 %v11576_v47 }
 0x63a   : > { %v9395_v63 = vsub.f32 1.0, %v9394_v60  ;;  %11581 = vrcp.f32 %v17342_v53  ;;  %v9372_v12 = vand.u32 2147483647, %v17342_v53  ;;  %v9374_v1 = vand.u32 2147483648, %v17342_v53  ;;  %vm9250_vm6 = vmor %vm9248_vm11, %vm9249_vm1 }
 0x63b   : > { %v9486_v59 = vmul.f32 %v17315_v9, %v9485_v17  ;;  %v9245_v35 = vsub.f32 1.0, %v9244_v48  ;;  %vm9368_vm4 = vweird.f32 %v17342_v53  ;;  %vm17399_vm5 = vcmp.eq.f32.partialorder %v9612_v50, 8.507059e+37 }
 0x63c   : > { %v9396_v10 = vmul.f32 %v17321_v32, %v9395_v63  ;;  %v9614_v13 = vand.u32 2147483648, %v17325_v46  ;;  %v9526_v57 = vsel %vm17335_vm13, %v17310_v11, %v9521_v31  ;;  %vm17428_vm9 = vcmp.eq.f32.partialorder %v9372_v12, 8.507059e+37 }
 0x63d   : > { %v9246_v51 = vmul.f32 %v11576_v47, %v9245_v35  ;;  %v9487_v55 = vadd.f32 %v17315_v9, %v9486_v59  ;;  %v9375_v39 = vor.u32 1.1754944e-38, %v9374_v1  ;;  %v17432_v21 = vmul.f32 %v9526_v57, %v8973_v24  ;;  %v8956_v24 = vld [vmem:[#allocation2] sm:$0xff] }
 0x63e   : > { %v17375_v61 = vpop.eup %11577  ;;  %v9615_v7 = vor.u32 1.1754944e-38, %v9614_v13  ;;  %vm9399_vm13 = vweird.f32 %v17321_v32 }
 0x63f   : > { %v17387_v40 = vpop.eup %11579  ;;  %v9604_v38 = vmul.f32 %v17375_v61, %v17325_v46  ;;  %v17393_v43 = vpop.permute.xlu0 %9090  ;;  %v9247_v15 = vadd.f32 %v11576_v47, %v9246_v51  ;;  %v9491_v41 = vsel %vm17380_vm2, %v17315_v9, %v9487_v55  ;;  %vm9609_vm8 = vweird.f32 %v17375_v61  ;;  %vm17502_vm2 = vmor %vm9398_vm7, %vm9399_vm13 }
 0x640   : > { %v17391_v33 = vpop.permute.xlu2 %9225  ;;  %v17404_v58 = vpop.eup %11581  ;;  %v9289_v34 = vmul.f32 %v17387_v40, %v17327_v19  ;;  %v9496_v52 = vsel %vm17331_vm12, %v9495_v37, %v9491_v41  ;;  %vm17445_vm11 = vmor %vm9608_vm3, %vm9609_vm8  ;;  %vm9263_vm12 = vweird.f32 %v17393_v43  ;;  %v9267_v17 = vand.u32 2147483647, %v17393_v43 }
 0x641   : > { %11583 = vrcp.f32 %v17391_v33  ;;  %v17409_v29 = vpop.permute.xlu1 %9130  ;;  %v9605_v44 = vsub.f32 1.0, %v9604_v38  ;;  %v9364_v5 = vmul.f32 %v17404_v58, %v17342_v53  ;;  %v9251_v36 = vsel %vm9250_vm6, %v11576_v47, %v9247_v15 }
 0x642   : > { %11585 = vrcp.f32 %v17393_v43  ;;  %v9290_v3 = vsub.f32 1.0, %v9289_v34  ;;  %v9256_v25 = vsel %vm17351_vm14, %v9255_v42, %v9251_v36  ;;  %v9497_v18 = vmul.f32 %v9496_v52, %v8971_v62  ;;  %v8957_v62 = vld [vmem:[#allocation2 + $0xd8] sm:$0xff] }
 0x643   : > { %11587 = vrcp.f32 %v17409_v29  ;;  %v9606_v45 = vmul.f32 %v17375_v61, %v9605_v44  ;;  %v9365_v11 = vsub.f32 1.0, %v9364_v5  ;;  %v9257_v9 = vmul.f32 %v9256_v25, %v8955_v26 }
 0x644   : > { %9803 = vmatmul.f32.vlgmr.msra.gmra.mxu2 %v9497_v18  ;;  %vm9369_vm10 = vweird.f32 %v17404_v58  ;;  %v17438_v47 = vadd.f32 %v17321_v32, %v9396_v10  ;;  %v9291_v54 = vmul.f32 %v17387_v40, %v9290_v3  ;;  %vm17452_vm14 = vcmp.eq.f32.partialorder %v9402_v20, 8.507059e+37  ;;  %v8963_v20 = vld [vmem:[#allocation2 + $0x80] sm:$0xff] }
 0x645   : > { %v9366_v6 = vmul.f32 %v17404_v58, %v9365_v11  ;;  %9755 = vmatmul.f32.vlgmr.msra.gmra.mxu0 %v9257_v9  ;;  %v9607_v23 = vadd.f32 %v17375_v61, %v9606_v45  ;;  %v9269_v59 = vand.u32 2147483648, %v17393_v43  ;;  %v9387_v35 = vand.u32 2147483647, %v17409_v29  ;;  %vm9370_vm15 = vmor %vm9368_vm4, %vm9369_vm10 }
 0x646   : > { %v9389_v55 = vand.u32 2147483648, %v17409_v29  ;;  %vm17493_vm0 = vcmp.eq.f32.partialorder %v9267_v17, 8.507059e+37  ;;  %vm9383_vm1 = vweird.f32 %v17409_v29  ;;  %v9401_v13 = vsel %vm17502_vm2, %v17321_v32, %v17438_v47 }
 0x647   : > { %v17440_v60 = vpop.eup %11583  ;;  %v17460_v63 = vpop.permute.xlu0 %9215  ;;  %v9367_v46 = vadd.f32 %v17404_v58, %v9366_v6  ;;  %v9611_v37 = vsel %vm17445_vm11, %v17375_v61, %v9607_v23  ;;  %v9270_v2 = vor.u32 1.1754944e-38, %v9269_v59  ;;  %vm17515_vm4 = vcmp.eq.f32.partialorder %v9387_v35, 8.507059e+37  ;;  %v8964_v6 = vld [vmem:[#allocation2 + $0x88] sm:$0xff] }
 0x648   : > { %v17456_v22 = vpop.eup %11585  ;;  %v17458_v16 = vpop.permute.xlu2 %9190  ;;  %v9616_v51 = vsel %vm17399_vm5, %v9615_v7, %v9611_v37  ;;  %v17484_v31 = vmul.f32 %v17440_v60, %v17391_v33  ;;  %v9390_v57 = vor.u32 1.1754944e-38, %v9389_v55  ;;  %v17543_v18 = vsel %vm17452_vm14, %v17369_v30, %v9401_v13 }
 0x649   : > { %v17468_v50 = vpop.eup %11587  ;;  %v9259_v42 = vmul.f32 %v17456_v22, %v17393_v43  ;;  %11589 = vrcp.f32 %v17458_v16  ;;  %v17473_v49 = vpop.permute.xlu1 %9095  ;;  %v9371_v10 = vsel %vm9370_vm15, %v17404_v58, %v9367_v46  ;;  %v9617_v12 = vmul.f32 %v9616_v51, %v8979_v27 }
 0x64a   : > { %v9379_v61 = vmul.f32 %v17468_v50, %v17409_v29  ;;  %11591 = vrcp.f32 %v17460_v63  ;;  %v9376_v53 = vsel %vm17428_vm9, %v9375_v39, %v9371_v10  ;;  %vm9264_vm3 = vweird.f32 %v17456_v22 }
 0x64b   : > { %v9260_v28 = vsub.f32 1.0, %v9259_v42  ;;  %11593 = vrcp.f32 %v17473_v49  ;;  %v9377_v38 = vmul.f32 %v9376_v53, %v8963_v20  ;;  %9827 = vmatmul.f32.vlgmr.msra.gmra.mxu3 %v9617_v12  ;;  %v9665_v58 = vsub.f32 1.0, %v17484_v31  ;;  %vm9265_vm6 = vmor %vm9263_vm12, %vm9264_vm3 }
 0x64c   : > { %v9380_v1 = vsub.f32 1.0, %v9379_v61  ;;  %9806 = vmatmul.f32.gmra.mxu2 %v17308_v8  ;;  %v17520_v8 = vadd.f32 %v17387_v40, %v9291_v54  ;;  %vm9384_vm5 = vweird.f32 %v17468_v50  ;;  %v9282_v32 = vand.u32 2147483647, %v17473_v49 }
 0x64d   : > { %v9261_v41 = vmul.f32 %v17456_v22, %v9260_v28  ;;  %9779 = vmatmul.f32.vlgmr.msra.gmra.mxu1 %v9377_v38  ;;  %vm9278_vm7 = vweird.f32 %v17473_v49  ;;  %v9284_v25 = vand.u32 2147483648, %v17473_v49  ;;  %v9642_v45 = vand.u32 2147483647, %v17460_v63  ;;  %vm9385_vm8 = vmor %vm9383_vm1, %vm9384_vm5 }
 0x64e   : > { %v9381_v0 = vmul.f32 %v17468_v50, %v9380_v1  ;;  %v9644_v23 = vand.u32 2147483648, %v17460_v63  ;;  %vm9293_vm9 = vweird.f32 %v17327_v19  ;;  %vm17573_vm10 = vcmp.eq.f32.partialorder %v9282_v32, 8.507059e+37 }
 0x64f   : > { %v17522_v26 = vpop.eup %11589  ;;  %v9262_v52 = vadd.f32 %v17456_v22, %v9261_v41  ;;  %v17531_v36 = vpop.permute.xlu0 %9180  ;;  %vm9638_vm11 = vweird.f32 %v17460_v63  ;;  %v9285_v27 = vor.u32 1.1754944e-38, %v9284_v25  ;;  %vm17585_vm14 = vcmp.eq.f32.partialorder %v9642_v45, 8.507059e+37 }
 0x650   : > { %v17527_v44 = vpop.eup %11591  ;;  %v17529_v5 = vpop.permute.xlu2 %9150  ;;  %v9382_v3 = vadd.f32 %v17468_v50, %v9381_v0  ;;  %v17550_v9 = vmul.f32 %v17522_v26, %v17458_v16  ;;  %v9645_v42 = vor.u32 1.1754944e-38, %v9644_v23  ;;  %vm9294_vm15 = vweird.f32 %v17387_v40 }
 0x651   : > { %v17546_v11 = vpop.eup %11593  ;;  %v9634_v43 = vmul.f32 %v17527_v44, %v17460_v63  ;;  %11595 = vrcp.f32 %v17529_v5  ;;  %v17555_v4 = vpop.permute.xlu1 %9220  ;;  %v9266_v39 = vsel %vm9265_vm6, %v17456_v22, %v9262_v52  ;;  %vm9639_vm12 = vweird.f32 %v17527_v44  ;;  %v8981_v63 = vld [vmem:[#allocation2 + $0x10] sm:$0xff]  ;;  %v8965_v52 = vld [vmem:[#allocation2 + $0xe8] sm:$0xff]  ;;  %vm17641_vm2 = vmor %vm9293_vm9, %vm9294_vm15 }
 0x652   : > { %v9274_v30 = vmul.f32 %v17546_v11, %v17473_v49  ;;  %11597 = vrcp.f32 %v17531_v36  ;;  %v9271_v7 = vsel %vm17493_vm0, %v9270_v2, %v9266_v39  ;;  %v9386_v56 = vsel %vm9385_vm8, %v17468_v50, %v9382_v3  ;;  %vm17607_vm0 = vmor %vm9638_vm11, %vm9639_vm12 }
 0x653   : > { %v9635_v47 = vsub.f32 1.0, %v9634_v43  ;;  %11599 = vrcp.f32 %v17555_v4  ;;  %v9272_v54 = vmul.f32 %v9271_v7, %v8956_v24  ;;  %v9391_v48 = vsel %vm17515_vm4, %v9390_v57, %v9386_v56  ;;  %9830 = vmatmul.f32.gmra.mxu3 %v17366_v14 }
 0x654   : > { %v9275_v17 = vsub.f32 1.0, %v9274_v30  ;;  %v9392_v46 = vmul.f32 %v9391_v48, %v8964_v6  ;;  %9809 = vmatmul.f32.gmra.mxu2 %v17432_v21  ;;  %v9560_v37 = vsub.f32 1.0, %v17550_v9  ;;  %vm9279_vm13 = vweird.f32 %v17546_v11  ;;  %v8974_v48 = vld [vmem:[#allocation2 + $0xc8] sm:$0xff] }
 0x655   : > { %v9636_v29 = vmul.f32 %v17527_v44, %v9635_v47  ;;  %9758 = vmatmul.f32.gmra.mxu0 %v9272_v54  ;;  %v9297_v20 = vand.u32 2147483647, %v17327_v19  ;;  %v9299_v53 = vand.u32 2147483648, %v17327_v19  ;;  %v9537_v12 = vand.u32 2147483647, %v17531_v36  ;;  %vm9280_vm1 = vmor %vm9278_vm7, %vm9279_vm13 }
 0x656   : > { %v9276_v59 = vmul.f32 %v17546_v11, %v9275_v17  ;;  %9782 = vmatmul.f32.gmra.mxu1 %v9392_v46  ;;  %v9539_v2 = vand.u32 2147483648, %v17531_v36  ;;  %v9296_v45 = vsel %vm17641_vm2, %v17387_v40, %v17520_v8  ;;  %v9407_v19 = vmul.f32 %v17543_v18, %v8965_v52 }
 0x657   : > { %v17589_v50 = vpop.eup %11595  ;;  %v9637_v21 = vadd.f32 %v17527_v44, %v9636_v29  ;;  %v17600_v61 = vpop.permute.xlu0 %9140  ;;  %v9300_v43 = vor.u32 1.1754944e-38, %v9299_v53  ;;  %v17657_v39 = vmul.f32 %v17522_v26, %v9560_v37  ;;  %vm9298_vm3 = vcmp.eq.f32.partialorder %v9297_v20, 8.507059e+37  ;;  %v8982_v53 = vld [vmem:[#allocation2 + $0x28] sm:$0xff] }
 0x658   : > { %v17594_v51 = vpop.eup %11597  ;;  %v9439_v14 = vmul.f32 %v17589_v50, %v17529_v5  ;;  %v17598_v55 = vpop.permute.xlu2 %9115  ;;  %v9277_v10 = vadd.f32 %v17546_v11, %v9276_v59  ;;  %vm9533_vm5 = vweird.f32 %v17531_v36  ;;  %vm17672_vm6 = vcmp.eq.f32.partialorder %v9537_v12, 8.507059e+37 }
 0x659   : > { %v17613_v1 = vpop.eup %11599  ;;  %v9529_v38 = vmul.f32 %v17594_v51, %v17531_v36  ;;  %11601 = vrcp.f32 %v17598_v55  ;;  %v17618_v15 = vpop.permute.xlu1 %9185  ;;  %v9641_v41 = vsel %vm17607_vm0, %v17527_v44, %v9637_v21  ;;  %vm9534_vm4 = vweird.f32 %v17594_v51  ;;  %v8958_v36 = vld [vmem:[#allocation2 + $0x18] sm:$0xff] }
 0x65a   : > { %v9440_v13 = vsub.f32 1.0, %v9439_v14  ;;  %v9649_v0 = vmul.f32 %v17613_v1, %v17555_v4  ;;  %11603 = vrcp.f32 %v17600_v61  ;;  %v9281_v34 = vsel %vm9280_vm1, %v17546_v11, %v9277_v10  ;;  %vm9535_vm8 = vmor %vm9533_vm5, %vm9534_vm4 }
 0x65b   : > { %v9530_v57 = vsub.f32 1.0, %v9529_v38  ;;  %11605 = vrcp.f32 %v17618_v15  ;;  %v9286_v49 = vsel %vm17573_vm10, %v9285_v27, %v9281_v34  ;;  %v9646_v32 = vsel %vm17585_vm14, %v9645_v42, %v9641_v41 }
 0x65c   : > { %v9650_v24 = vsub.f32 1.0, %v9649_v0  ;;  %v9287_v3 = vmul.f32 %v9286_v49, %v8957_v62  ;;  %v9647_v25 = vmul.f32 %v9646_v32, %v8981_v63  ;;  %v17652_v11 = vmul.f32 %v17440_v60, %v9665_v58 }
 0x65d   : > { %v9531_v9 = vmul.f32 %v17594_v51, %v9530_v57  ;;  %v17664_v31 = vmul.f32 %v17589_v50, %v9440_v13  ;;  %v9301_v58 = vsel %vm9298_vm3, %v9300_v43, %v9296_v45  ;;  %v9540_v23 = vor.u32 1.1754944e-38, %v9539_v2  ;;  %v8966_v57 = vld [vmem:[#allocation2 + $0xb8] sm:$0xff] }
 0x65e   : > { %v9651_v30 = vmul.f32 %v17613_v1, %v9650_v24  ;;  %9761 = vmatmul.f32.gmra.mxu0 %v9287_v3  ;;  %9833 = vmatmul.f32.gmra.mxu3 %v9647_v25  ;;  %vm9654_vm7 = vweird.f32 %v17613_v1  ;;  %vm9653_vm9 = vweird.f32 %v17555_v4  ;;  %v9657_v22 = vand.u32 2147483647, %v17555_v4 }
 0x65f   : > { %v17661_v40 = vpop.eup %11601  ;;  %9785 = vmatmul.f32.gmra.mxu1 %v9407_v19  ;;  %v9532_v8 = vadd.f32 %v17594_v51, %v9531_v9  ;;  %v17670_v7 = vpop.permute.xlu0 %9105  ;;  %v9659_v29 = vand.u32 2147483648, %v17555_v4  ;;  %vm17704_vm10 = vmor %vm9653_vm9, %vm9654_vm7  ;;  %v9417_v42 = vand.u32 2147483647, %v17600_v61  ;;  %v9302_v14 = vmul.f32 %v9301_v58, %v8958_v36  ;;  %v8983_v4 = vld [vmem:[#allocation2 + $0xa0] sm:$0xff] }
 0x660   : > { %v17668_v18 = vpop.eup %11603  ;;  %v9652_v47 = vadd.f32 %v17613_v1, %v9651_v30  ;;  %v17691_v46 = vmul.f32 %v17661_v40, %v17598_v55  ;;  %11607 = vrcp.f32 %v17670_v7  ;;  %v17697_v35 = vpop.permute.xlu2 %9240  ;;  %vm9413_vm11 = vweird.f32 %v17600_v61 }
 0x661   : > { %v17678_v54 = vpop.eup %11605  ;;  %v9409_v56 = vmul.f32 %v17668_v18, %v17600_v61  ;;  %v17682_v17 = vpop.permute.xlu1 %9145  ;;  %v9536_v37 = vsel %vm9535_vm8, %v17594_v51, %v9532_v8  ;;  %v9660_v12 = vor.u32 1.1754944e-38, %v9659_v29  ;;  %vm9414_vm12 = vweird.f32 %v17668_v18 }
 0x662   : > { %v9544_v27 = vmul.f32 %v17678_v54, %v17618_v15  ;;  %11609 = vrcp.f32 %v17682_v17  ;;  %v9541_v21 = vsel %vm17672_vm6, %v9540_v23, %v9536_v37  ;;  %v9656_v51 = vsel %vm17704_vm10, %v17613_v1, %v9652_v47  ;;  %vm9415_vm15 = vmor %vm9413_vm11, %vm9414_vm12 }
 0x663   : > { %v9410_v59 = vsub.f32 1.0, %v9409_v56  ;;  %v9542_v10 = vmul.f32 %v9541_v21, %v8974_v48  ;;  %v9719_v62 = vand.u32 2147483648, %v17697_v35  ;;  %vm9658_vm13 = vcmp.eq.f32.partialorder %v9657_v22, 8.507059e+37  ;;  %v8975_v48 = vld [vmem:[#allocation2 + $0xe0] sm:$0xff] }
 0x664   : > { %v9545_v20 = vsub.f32 1.0, %v9544_v27  ;;  %v9419_v63 = vand.u32 2147483648, %v17600_v61  ;;  %v9335_v41 = vsub.f32 1.0, %v17691_v46  ;;  %v9661_v1 = vsel %vm9658_vm13, %v9660_v12, %v9656_v51 }
 0x665   : > { %v9411_v28 = vmul.f32 %v17668_v18, %v9410_v59  ;;  %9812 = vmatmul.f32.gmra.mxu2 %v9542_v10  ;;  %vm17720_vm14 = vcmp.eq.f32.partialorder %v9417_v42, 8.507059e+37  ;;  %v9662_v34 = vmul.f32 %v9661_v1, %v8982_v53  ;;  %vm9548_vm0 = vweird.f32 %v17618_v15 }
 0x666   : > { %v9546_v38 = vmul.f32 %v17678_v54, %v9545_v20  ;;  %9764 = vmatmul.f32.gmra.mxu0 %v9302_v14  ;;  %v17724_v0 = vpop.eup %11607  ;;  %v9420_v49 = vor.u32 1.1754944e-38, %v9419_v63  ;;  %vm9549_vm1 = vweird.f32 %v17678_v54  ;;  %v9552_v9 = vand.u32 2147483647, %v17618_v15 }
 0x667   : > { %v9412_v2 = vadd.f32 %v17668_v18, %v9411_v28  ;;  %v17726_v52 = vpop.permute.xlu0 %9230  ;;  %v9304_v44 = vmul.f32 %v17724_v0, %v17670_v7  ;;  %9836 = vmatmul.f32.gmra.mxu3 %v9662_v34  ;;  %v17750_v19 = vor.u32 1.1754944e-38, %v9719_v62  ;;  %vm17756_vm2 = vmor %vm9548_vm0, %vm9549_vm1  ;;  %v9554_v6 = vand.u32 2147483648, %v17618_v15 }
 0x668   : > { %v17734_v32 = vpop.eup %11609  ;;  %11611 = vrcp.f32 %v17726_v52  ;;  %v9547_v25 = vadd.f32 %v17678_v54, %v9546_v38  ;;  %v9667_v23 = vadd.f32 %v17440_v60, %v17652_v11  ;;  %vm9668_vm3 = vweird.f32 %v17391_v33 }
 0x669   : > { %v17739_v24 = vpop.permute.xlu1 %9110  ;;  %v9416_v3 = vsel %vm9415_vm15, %v17668_v18, %v9412_v2  ;;  %v9424_v61 = vmul.f32 %v17734_v32, %v17682_v17  ;;  %v9305_v43 = vsub.f32 1.0, %v9304_v44  ;;  %vm9669_vm4 = vweird.f32 %v17440_v60 }
 0x66a   : > { %11613 = vrcp.f32 %v17739_v24  ;;  %v9421_v45 = vsel %vm17720_vm14, %v9420_v49, %v9416_v3  ;;  %v9551_v18 = vsel %vm17756_vm2, %v17678_v54, %v9547_v25  ;;  %v9672_v56 = vand.u32 2147483647, %v17391_v33  ;;  %vm17773_vm6 = vmor %vm9668_vm3, %vm9669_vm4 }
 0x66b   : > { %11615 = vrcp.f32 %v17697_v35  ;;  %v9422_v30 = vmul.f32 %v9421_v45, %v8966_v57  ;;  %v9425_v8 = vsub.f32 1.0, %v9424_v61  ;;  %v9306_v47 = vmul.f32 %v17724_v0, %v9305_v43  ;;  %v8967_v61 = vld [vmem:[#allocation2 + $0x60] sm:$0xff] }
 0x66c   : > { %v17771_v36 = vmul.f32 %v17661_v40, %v9335_v41  ;;  %vm9553_vm5 = vcmp.eq.f32.partialorder %v9552_v9, 8.507059e+37  ;;  %v9555_v54 = vor.u32 1.1754944e-38, %v9554_v6  ;;  %v9674_v11 = vand.u32 2147483648, %v17391_v33  ;;  %v8984_v9 = vld [vmem:[#allocation2 + $0xf8] sm:$0xff] }
 0x66d   : > { %9788 = vmatmul.f32.gmra.mxu1 %v9422_v30  ;;  %v9426_v29 = vmul.f32 %v17734_v32, %v9425_v8  ;;  %v9671_v46 = vsel %vm17773_vm6, %v17440_v60, %v9667_v23  ;;  %v9307_v27 = vadd.f32 %v17724_v0, %v9306_v47  ;;  %vm9309_vm7 = vweird.f32 %v17724_v0  ;;  %v8976_v23 = vld [vmem:[#allocation2 + $0x90] sm:$0xff] }
 0x66e   : > { %v17778_v22 = vpop.eup %11611  ;;  %v9556_v21 = vsel %vm9553_vm5, %v9555_v54, %v9551_v18  ;;  %v9675_v33 = vor.u32 1.1754944e-38, %v9674_v11  ;;  %vm9308_vm8 = vweird.f32 %v17670_v7  ;;  %vm9673_vm9 = vcmp.eq.f32.partialorder %v9672_v56, 8.507059e+37 }
 0x66f   : > { %v9679_v59 = vmul.f32 %v17778_v22, %v17726_v52  ;;  %v17790_v42 = vpop.permute.xlu0 %9195  ;;  %v9557_v14 = vmul.f32 %v9556_v21, %v8975_v48  ;;  %vm17800_vm10 = vmor %vm9308_vm8, %vm9309_vm7  ;;  %v9312_v12 = vand.u32 2147483647, %v17670_v7  ;;  %v9314_v63 = vand.u32 2147483648, %v17670_v7 }
 0x670   : > { %v17786_v37 = vpop.eup %11613  ;;  %11617 = vrcp.f32 %v17790_v42  ;;  %v9676_v28 = vsel %vm9673_vm9, %v9675_v33, %v9671_v46  ;;  %v9311_v53 = vsel %vm17800_vm10, %v17724_v0, %v9307_v27  ;;  %v9427_v41 = vadd.f32 %v17734_v32, %v9426_v29  ;;  %v8959_v0 = vld [vmem:[#allocation2 + $0x50] sm:$0xff] }
 0x671   : > { %v17793_v20 = vpop.eup %11615  ;;  %v9319_v60 = vmul.f32 %v17786_v37, %v17739_v24  ;;  %v17798_v10 = vpop.permute.xlu1 %9235  ;;  %9815 = vmatmul.f32.gmra.mxu2 %v9557_v14  ;;  %v9677_v62 = vmul.f32 %v9676_v28, %v8983_v4  ;;  %v9680_v1 = vsub.f32 1.0, %v9679_v59  ;;  %vm9428_vm11 = vweird.f32 %v17682_v17 }
 0x672   : > { %11619 = vrcp.f32 %v17798_v10  ;;  %vm9429_vm12 = vweird.f32 %v17734_v32  ;;  %v9432_v2 = vand.u32 2147483647, %v17682_v17  ;;  %v9315_v34 = vor.u32 1.1754944e-38, %v9314_v63 }
 0x673   : > { %v9320_v38 = vsub.f32 1.0, %v9319_v60  ;;  %9839 = vmatmul.f32.gmra.mxu3 %v9677_v62  ;;  %vm17815_vm13 = vmor %vm9428_vm11, %vm9429_vm12  ;;  %v9434_v7 = vand.u32 2147483648, %v17682_v17  ;;  %v9562_v49 = vadd.f32 %v17522_v26, %v17657_v39  ;;  %vm9313_vm14 = vcmp.eq.f32.partialorder %v9312_v12, 8.507059e+37  ;;  %v8960_v60 = vld [vmem:[#allocation2 + $0x68] sm:$0xff] }
 0x674   : > { %v9431_v44 = vsel %vm17815_vm13, %v17734_v32, %v9427_v41  ;;  %vm9563_vm15 = vweird.f32 %v17458_v16  ;;  %vm9564_vm0 = vweird.f32 %v17522_v26  ;;  %v9316_v25 = vsel %vm9313_vm14, %v9315_v34, %v9311_v53 }
 0x675   : > { %v9321_v13 = vmul.f32 %v17786_v37, %v9320_v38  ;;  %v9435_v45 = vor.u32 1.1754944e-38, %v9434_v7  ;;  %vm17829_vm1 = vmor %vm9563_vm15, %vm9564_vm0  ;;  %v9567_v39 = vand.u32 2147483647, %v17458_v16  ;;  %v9569_v17 = vand.u32 2147483648, %v17458_v16 }
 0x676   : > { %v17827_v3 = vpop.eup %11617  ;;  %v17839_v32 = vmul.f32 %v17793_v20, %v17697_v35  ;;  %v9317_v30 = vmul.f32 %v9316_v25, %v8959_v0  ;;  %vm9433_vm2 = vcmp.eq.f32.partialorder %v9432_v2, 8.507059e+37  ;;  %v9566_v58 = vsel %vm17829_vm1, %v17522_v26, %v9562_v49 }
 0x677   : > { %v17844_v8 = vpop.permute.xlu0 %9155  ;;  %v9574_v18 = vmul.f32 %v17827_v3, %v17790_v42  ;;  %v9436_v6 = vsel %vm9433_vm2, %v9435_v45, %v9431_v44  ;;  %v9570_v16 = vor.u32 1.1754944e-38, %v9569_v17  ;;  %v9322_v56 = vadd.f32 %v17786_v37, %v9321_v13 }
 0x678   : > { %v17835_v43 = vpop.eup %11619  ;;  %v9681_v48 = vmul.f32 %v17778_v22, %v9680_v1  ;;  %9767 = vmatmul.f32.gmra.mxu0 %v9317_v30  ;;  %v9437_v54 = vmul.f32 %v9436_v6, %v8967_v61  ;;  %vm9568_vm3 = vcmp.eq.f32.partialorder %v9567_v39, 8.507059e+37  ;;  %11621 = vrcp.f32 %v17844_v8  ;;  %v8968_v1 = vld [vmem:[#allocation2 + $0xf0] sm:$0xff] }
 0x679   : > { %v17848_v47 = vpop.permute.xlu1 %9200  ;;  %v9571_v26 = vsel %vm9568_vm3, %v9570_v16, %v9566_v58  ;;  %vm9323_vm4 = vweird.f32 %v17739_v24  ;;  %vm9324_vm5 = vweird.f32 %v17786_v37  ;;  %v9694_v15 = vmul.f32 %v17835_v43, %v17798_v10 }
 0x67a   : > { %11623 = vrcp.f32 %v17848_v47  ;;  %9791 = vmatmul.f32.gmra.mxu1 %v9437_v54  ;;  %v9572_v11 = vmul.f32 %v9571_v26, %v8976_v23  ;;  %vm17858_vm6 = vmor %vm9323_vm4, %vm9324_vm5  ;;  %v9327_v46 = vand.u32 2147483647, %v17739_v24  ;;  %v9329_v27 = vand.u32 2147483648, %v17739_v24 }
 0x67b   : > { %v9710_v59 = vsub.f32 1.0, %v17839_v32  ;;  %v9575_v21 = vsub.f32 1.0, %v9574_v18  ;;  %v9326_v4 = vsel %vm17858_vm6, %v17786_v37, %v9322_v56  ;;  %v9442_v33 = vadd.f32 %v17589_v50, %v17664_v31 }
 0x67c   : > { %9818 = vmatmul.f32.gmra.mxu2 %v9572_v11  ;;  %v9330_v14 = vor.u32 1.1754944e-38, %v9329_v27  ;;  %vm9443_vm7 = vweird.f32 %v17529_v5  ;;  %vm9444_vm8 = vweird.f32 %v17589_v50  ;;  %v9447_v51 = vand.u32 2147483647, %v17529_v5 }
 0x67d   : > { %vm9328_vm9 = vcmp.eq.f32.partialorder %v9327_v46, 8.507059e+37  ;;  %vm17873_vm10 = vmor %vm9443_vm7, %vm9444_vm8  ;;  %v9449_v28 = vand.u32 2147483648, %v17529_v5  ;;  %v9682_v37 = vadd.f32 %v17778_v22, %v9681_v48  ;;  %vm9684_vm11 = vweird.f32 %v17778_v22 }
 0x67e   : > { %v17880_v31 = vpop.eup %11621  ;;  %v9695_v53 = vsub.f32 1.0, %v9694_v15  ;;  %v9331_v12 = vsel %vm9328_vm9, %v9330_v14, %v9326_v4  ;;  %v9446_v38 = vsel %vm17873_vm10, %v17589_v50, %v9442_v33  ;;  %vm9683_vm12 = vweird.f32 %v17726_v52 }
 0x67f   : > { %v17886_v62 = vpop.permute.xlu0 %9120  ;;  %v9454_v5 = vmul.f32 %v17880_v31, %v17844_v8  ;;  %v9332_v41 = vmul.f32 %v9331_v12, %v8960_v60  ;;  %v9450_v2 = vor.u32 1.1754944e-38, %v9449_v28  ;;  %v9687_v13 = vand.u32 2147483647, %v17726_v52  ;;  %vm17899_vm14 = vmor %vm9683_vm12, %vm9684_vm11 }
 0x680   : > { %v17888_v63 = vpop.eup %11623  ;;  %vm9448_vm13 = vcmp.eq.f32.partialorder %v9447_v51, 8.507059e+37  ;;  %v9689_v57 = vand.u32 2147483648, %v17726_v52  ;;  %11625 = vrcp.f32 %v17886_v62  ;;  %v9686_v44 = vsel %vm17899_vm14, %v17778_v22, %v9682_v37  ;;  %v8977_v51 = vld [vmem:[#allocation2 + $0x70] sm:$0xff] }
 0x681   : > { %v17893_v0 = vpop.permute.xlu1 %9160  ;;  %v9589_v34 = vmul.f32 %v17888_v63, %v17848_v47  ;;  %v9455_v7 = vsub.f32 1.0, %v9454_v5  ;;  %9770 = vmatmul.f32.gmra.mxu0 %v9332_v41  ;;  %v9451_v49 = vsel %vm9448_vm13, %v9450_v2, %v9446_v38  ;;  %v9359_v25 = vand.u32 2147483648, %v17886_v62 }
 0x682   : > { %v9576_v61 = vmul.f32 %v17827_v3, %v9575_v21  ;;  %v9452_v45 = vmul.f32 %v9451_v49, %v8968_v1  ;;  %v9690_v39 = vor.u32 1.1754944e-38, %v9689_v57  ;;  %11627 = vrcp.f32 %v17893_v0 }
 0x683   : > { %v17912_v52 = vmul.f32 %v17793_v20, %v9710_v59  ;;  %v9696_v17 = vmul.f32 %v17835_v43, %v9695_v53  ;;  %v9590_v32 = vsub.f32 1.0, %v9589_v34  ;;  %vm9688_vm15 = vcmp.eq.f32.partialorder %v9687_v13, 8.507059e+37  ;;  %v8985_v13 = vld [vmem:[#allocation2 + $0x20] sm:$0xff] }
 0x684   : > { %v9456_v30 = vmul.f32 %v17880_v31, %v9455_v7  ;;  %9794 = vmatmul.f32.gmra.mxu1 %v9452_v45  ;;  %v9691_v22 = vsel %vm9688_vm15, %v9690_v39, %v9686_v44  ;;  %v17916_v58 = vor.u32 1.1754944e-38, %v9359_v25  ;;  %v9337_v18 = vadd.f32 %v17661_v40, %v17771_v36 }
 0x685   : > { %v9692_v6 = vmul.f32 %v9691_v22, %v8984_v9  ;;  %vm9338_vm0 = vweird.f32 %v17598_v55  ;;  %vm9339_vm1 = vweird.f32 %v17661_v40  ;;  %v9342_v23 = vand.u32 2147483647, %v17598_v55 }
 0x686   : > { %v17923_v16 = vpop.eup %11625  ;;  %v9479_v56 = vand.u32 2147483648, %v17893_v0  ;;  %vm17926_vm2 = vmor %vm9338_vm0, %vm9339_vm1  ;;  %v9344_v54 = vand.u32 2147483648, %v17598_v55  ;;  %v9577_v26 = vadd.f32 %v17827_v3, %v9576_v61  ;;  %vm9579_vm3 = vweird.f32 %v17827_v3  ;;  %v8961_v55 = vld [vmem:[#allocation2 + $0x30] sm:$0xff] }
 0x687   : > { %vm9714_vm4 = vweird.f32 %v17793_v20  ;;  %v9591_v36 = vmul.f32 %v17888_v63, %v9590_v32  ;;  %9842 = vmatmul.f32.gmra.mxu3 %v9692_v6  ;;  %v9349_v15 = vmul.f32 %v17923_v16, %v17886_v62  ;;  %v9341_v11 = vsel %vm17926_vm2, %v17661_v40, %v9337_v18  ;;  %v8978_v18 = vld [vmem:[#allocation2 + $0xc0] sm:$0xff] }
 0x688   : > { %vm9578_vm5 = vweird.f32 %v17790_v42  ;;  %v17941_v29 = vpop.eup %11627  ;;  %vm9354_vm6 = vweird.f32 %v17923_v16  ;;  %vm9343_vm7 = vcmp.eq.f32.partialorder %v9342_v23, 8.507059e+37  ;;  %v9345_v46 = vor.u32 1.1754944e-38, %v9344_v54  ;;  %v8962_v54 = vld [vmem:[#allocation2 + $0x48] sm:$0xff] }
 0x689   : > { %vm17944_vm8 = vmor %vm9578_vm5, %vm9579_vm3  ;;  %v9582_v59 = vand.u32 2147483647, %v17790_v42  ;;  %v9584_v21 = vand.u32 2147483648, %v17790_v42  ;;  %vm9713_vm9 = vweird.f32 %v17697_v35  ;;  %v9350_v40 = vsub.f32 1.0, %v9349_v15 }
 0x68a   : > { %v9469_v4 = vmul.f32 %v17941_v29, %v17893_v0  ;;  %v9581_v33 = vsel %vm17944_vm8, %v17827_v3, %v9577_v26  ;;  %v9697_v60 = vadd.f32 %v17835_v43, %v9696_v17  ;;  %vm9353_vm10 = vweird.f32 %v17886_v62 }
 0x68b   : > { %vm9474_vm11 = vweird.f32 %v17941_v29  ;;  %v9346_v14 = vsel %vm9343_vm7, %v9345_v46, %v9341_v11  ;;  %vm9583_vm12 = vcmp.eq.f32.partialorder %v9582_v59, 8.507059e+37  ;;  %v9585_v42 = vor.u32 1.1754944e-38, %v9584_v21  ;;  %v8986_v11 = vld [vmem:[#allocation2 + $0x98] sm:$0xff] }
 0x68c   : > { %vm9698_vm13 = vweird.f32 %v17798_v10  ;;  %v9351_v24 = vmul.f32 %v17923_v16, %v9350_v40  ;;  %v9470_v28 = vsub.f32 1.0, %v9469_v4  ;;  %v9347_v37 = vmul.f32 %v9346_v14, %v8961_v55 }
 0x68d   : > { %vm9699_vm14 = vweird.f32 %v17835_v43  ;;  %vm9473_vm15 = vweird.f32 %v17893_v0  ;;  %v9586_v3 = vsel %vm9583_vm12, %v9585_v42, %v9581_v33  ;;  %v9702_v12 = vand.u32 2147483647, %v17798_v10 }
 0x68e   : > { %vm17963_vm0 = vmor %vm9698_vm13, %vm9699_vm14  ;;  %v9704_v38 = vand.u32 2147483648, %v17798_v10  ;;  %v9457_v5 = vadd.f32 %v17880_v31, %v9456_v30  ;;  %v9471_v41 = vmul.f32 %v17941_v29, %v9470_v28  ;;  %9773 = vmatmul.f32.gmra.mxu0 %v9347_v37  ;;  %v9587_v1 = vmul.f32 %v9586_v3, %v8977_v51 }
 0x68f   : > { %v9701_v2 = vsel %vm17963_vm0, %v17835_v43, %v9697_v60  ;;  %vm9458_vm1 = vweird.f32 %v17844_v8  ;;  %vm9703_vm2 = vcmp.eq.f32.partialorder %v9702_v12, 8.507059e+37  ;;  %vm9459_vm3 = vweird.f32 %v17880_v31  ;;  %vm18001_vm14 = vmor %vm9713_vm9, %vm9714_vm4 }
 0x690   : > { %v9705_v34 = vor.u32 1.1754944e-38, %v9704_v38  ;;  %v9462_v50 = vand.u32 2147483647, %v17844_v8  ;;  %9821 = vmatmul.f32.gmra.mxu2 %v9587_v1  ;;  %vm17977_vm5 = vmor %vm9458_vm1, %vm9459_vm3  ;;  %v9464_v57 = vand.u32 2147483648, %v17844_v8  ;;  %v9592_v7 = vadd.f32 %v17888_v63, %v9591_v36  ;;  %v8969_v8 = vld [vmem:[#allocation2 + $0x8] sm:$0xff] }
 0x691   : > { %vm9593_vm7 = vweird.f32 %v17848_v47  ;;  %vm9594_vm8 = vweird.f32 %v17888_v63  ;;  %v9461_v49 = vsel %vm17977_vm5, %v17880_v31, %v9457_v5  ;;  %v9597_v25 = vand.u32 2147483647, %v17848_v47  ;;  %vm18017_vm1 = vmor %vm9353_vm10, %vm9354_vm6 }
 0x692   : > { %v9706_v43 = vsel %vm9703_vm2, %v9705_v34, %v9701_v2  ;;  %vm9463_vm12 = vcmp.eq.f32.partialorder %v9462_v50, 8.507059e+37  ;;  %vm17988_vm13 = vmor %vm9593_vm7, %vm9594_vm8  ;;  %v9465_v45 = vor.u32 1.1754944e-38, %v9464_v57  ;;  %v9599_v39 = vand.u32 2147483648, %v17848_v47 }
 0x693   : > { %v9707_v61 = vmul.f32 %v9706_v43, %v8985_v13  ;;  %v9596_v9 = vsel %vm17988_vm13, %v17888_v63, %v9592_v7  ;;  %vm18005_vm0 = vcmp.eq.f32.partialorder %v9597_v25, 8.507059e+37  ;;  %v9712_v32 = vadd.f32 %v17793_v20, %v17912_v52  ;;  %vm18033_vm6 = vmor %vm9473_vm15, %vm9474_vm11 }
 0x694   : > { %v9717_v30 = vand.u32 2147483647, %v17697_v35  ;;  %v9352_v63 = vadd.f32 %v17923_v16, %v9351_v24  ;;  %v9466_v22 = vsel %vm9463_vm12, %v9465_v45, %v9461_v49  ;;  %v9600_v6 = vor.u32 1.1754944e-38, %v9599_v39 }
 0x695   : > { %9845 = vmatmul.f32.gmra.mxu3 %v9707_v61  ;;  %v9357_v23 = vand.u32 2147483647, %v17886_v62  ;;  %v9472_v52 = vadd.f32 %v17941_v29, %v9471_v41  ;;  %v9467_v48 = vmul.f32 %v9466_v22, %v8969_v8  ;;  %v9716_v35 = vsel %vm18001_vm14, %v17793_v20, %v9712_v32 }
 0x696   : > { %vm9718_vm4 = vcmp.eq.f32.partialorder %v9717_v30, 8.507059e+37  ;;  %v9356_v26 = vsel %vm18017_vm1, %v17923_v16, %v9352_v63  ;;  %v9601_v62 = vsel %vm18005_vm0, %v9600_v6, %v9596_v9  ;;  %v9477_v46 = vand.u32 2147483647, %v17893_v0 }
 0x697   : > { %v9721_v15 = vsel %vm9718_vm4, %v17750_v19, %v9716_v35  ;;  %vm9358_vm9 = vcmp.eq.f32.partialorder %v9357_v23, 8.507059e+37  ;;  %9797 = vmatmul.f32.gmra.mxu1 %v9467_v48  ;;  %v9602_v20 = vmul.f32 %v9601_v62, %v8978_v18  ;;  %v9476_v55 = vsel %vm18033_vm6, %v17941_v29, %v9472_v52  ;;  %v8970_v19 = vld [vmem:[#allocation2 + $0x78] sm:$0xff] }
 0x698   : > { %v9361_v16 = vsel %vm9358_vm9, %v17916_v58, %v9356_v26  ;;  %v9480_v27 = vor.u32 1.1754944e-38, %v9479_v56  ;;  %vm9478_vm10 = vcmp.eq.f32.partialorder %v9477_v46, 8.507059e+37  ;;  %v9722_v21 = vmul.f32 %v9721_v15, %v8986_v11 }
 0x699   : > { %v9362_v59 = vmul.f32 %v9361_v16, %v8962_v54  ;;  %9824 = vmatmul.f32.gmra.mxu2 %v9602_v20 }
 0x69a   : > { %v9481_v58 = vsel %vm9478_vm10, %v9480_v27, %v9476_v55 }
 0x69b   : > { %9776 = vmatmul.f32.gmra.mxu0 %v9362_v59  ;;  %v9482_v40 = vmul.f32 %v9481_v58, %v8970_v19 }
 0x69d   : > { %9848 = vmatmul.f32.gmra.mxu3 %v9722_v21 }
 0x69f   : > { %9800 = vmatmul.f32.gmra.mxu1 %v9482_v40 }
 0x6c2   : > { %v9756_v29 = vpop.f32.mrf.mxu0 }
 0x6c3   : > { %9852 = vst [vmem:[%s11929_s11] sm:$0xff] %v9756_v29 }
 0x6c7   : > { %v9804_v0 = vpop.f32.mrf.mxu2 }
 0x6c8   : > { %9868 = vst [vmem:[%s11929_s11 + $0x80] sm:$0xff] %v9804_v0 }
 0x6ca   : > { %v9780_v56 = vpop.f32.mrf.mxu1 }
 0x6cb   : > { %9860 = vst [vmem:[%s11929_s11 + $0x40] sm:$0xff] %v9780_v56 }
 0x6ce   : > { %v9828_v33 = vpop.f32.mrf.mxu3 }
 0x6cf   : > { %v9807_v4 = vpop.f32.mrf.mxu2  ;;  %9876 = vst [vmem:[%s11929_s11 + $0xc0] sm:$0xff] %v9828_v33 }
 0x6d0   : > { %9869 = vst [vmem:[%s11929_s11 + $0x88] sm:$0xff] %v9807_v4 }
 0x6d2   : > { %v9759_v60 = vpop.f32.mrf.mxu0 }
 0x6d3   : > { %9853 = vst [vmem:[%s11929_s11 + $0x8] sm:$0xff] %v9759_v60  ;;  %v9783_v14 = vpop.f32.mrf.mxu1 }
 0x6d4   : > { %9861 = vst [vmem:[%s11929_s11 + $0x48] sm:$0xff] %v9783_v14 }
 0x6d6   : > { %v9831_v42 = vpop.f32.mrf.mxu3 }
 0x6d7   : > { %v9810_v51 = vpop.f32.mrf.mxu2  ;;  %9877 = vst [vmem:[%s11929_s11 + $0xc8] sm:$0xff] %v9831_v42 }
 0x6d8   : > { %9870 = vst [vmem:[%s11929_s11 + $0x90] sm:$0xff] %v9810_v51 }
 0x6db   : > { %v9762_v24 = vpop.f32.mrf.mxu0 }
 0x6dc   : > { %9854 = vst [vmem:[%s11929_s11 + $0x10] sm:$0xff] %v9762_v24  ;;  %v9786_v28 = vpop.f32.mrf.mxu1 }
 0x6dd   : > { %9862 = vst [vmem:[%s11929_s11 + $0x50] sm:$0xff] %v9786_v28 }
 0x6e1   : > { %v9834_v37 = vpop.f32.mrf.mxu3 }
 0x6e2   : > { %9878 = vst [vmem:[%s11929_s11 + $0xd0] sm:$0xff] %v9834_v37 }
 0x6e3   : > { %v9765_v3 = vpop.f32.mrf.mxu0 }
 0x6e4   : > { %9855 = vst [vmem:[%s11929_s11 + $0x18] sm:$0xff] %v9765_v3 }
 0x6e8   : > { %v9813_v53 = vpop.f32.mrf.mxu2 }
 0x6e9   : > { %9871 = vst [vmem:[%s11929_s11 + $0x98] sm:$0xff] %v9813_v53 }
 0x6ea   : > { %v9789_v12 = vpop.f32.mrf.mxu1  ;;  %v9837_v38 = vpop.f32.mrf.mxu3 }
 0x6eb   : > { %9863 = vst [vmem:[%s11929_s11 + $0x58] sm:$0xff] %v9789_v12 }
 0x6ec   : > { %9879 = vst [vmem:[%s11929_s11 + $0xd8] sm:$0xff] %v9837_v38 }
 0x6f4   : > { %v9816_v5 = vpop.f32.mrf.mxu2 }
 0x6f5   : > { %9872 = vst [vmem:[%s11929_s11 + $0xa0] sm:$0xff] %v9816_v5  ;;  %v9768_v41 = vpop.f32.mrf.mxu0 }
 0x6f6   : > { %v9840_v1 = vpop.f32.mrf.mxu3  ;;  %9856 = vst [vmem:[%s11929_s11 + $0x20] sm:$0xff] %v9768_v41 }
 0x6f7   : > { %9880 = vst [vmem:[%s11929_s11 + $0xe0] sm:$0xff] %v9840_v1  ;;  %v9792_v2 = vpop.f32.mrf.mxu1 }
 0x6f8   : > { %9864 = vst [vmem:[%s11929_s11 + $0x60] sm:$0xff] %v9792_v2 }
 0x6fe   : > { %v9771_v13 = vpop.f32.mrf.mxu0 }
 0x6ff   : > { %v9819_v34 = vpop.f32.mrf.mxu2  ;;  %9857 = vst [vmem:[%s11929_s11 + $0x28] sm:$0xff] %v9771_v13 }
 0x700   : > { %9873 = vst [vmem:[%s11929_s11 + $0xa8] sm:$0xff] %v9819_v34 }
 0x701   : > { %v9795_v50 = vpop.f32.mrf.mxu1 }
 0x702   : > { %9865 = vst [vmem:[%s11929_s11 + $0x68] sm:$0xff] %v9795_v50 }
 0x70a   : > { %v9843_v10 = vpop.f32.mrf.mxu3 }
 0x70b   : > { %v9774_v57 = vpop.f32.mrf.mxu0  ;;  %9881 = vst [vmem:[%s11929_s11 + $0xe8] sm:$0xff] %v9843_v10 }
 0x70c   : > { %9858 = vst [vmem:[%s11929_s11 + $0x30] sm:$0xff] %v9774_v57 }
 0x713   : > { %v9822_v7 = vpop.f32.mrf.mxu2 }
 0x714   : > { %9874 = vst [vmem:[%s11929_s11 + $0xb0] sm:$0xff] %v9822_v7  ;;  %v9798_v43 = vpop.f32.mrf.mxu1 }
 0x715   : > { %9866 = vst [vmem:[%s11929_s11 + $0x70] sm:$0xff] %v9798_v43 }
 0x718   : > { %v9846_v49 = vpop.f32.mrf.mxu3  ;;  %v9777_v44 = vpop.f32.mrf.mxu0 }
 0x719   : > { %9882 = vst [vmem:[%s11929_s11 + $0xf0] sm:$0xff] %v9846_v49 }
 0x71a   : > { %9859 = vst [vmem:[%s11929_s11 + $0x38] sm:$0xff] %v9777_v44 }
 0x71c   : > { %v9825_v25 = vpop.f32.mrf.mxu2  ;;  %v9801_v61 = vpop.f32.mrf.mxu1 }
 0x71d   : > { %9875 = vst [vmem:[%s11929_s11 + $0xb8] sm:$0xff] %v9825_v25 }
 0x71e   : > { %9867 = vst [vmem:[%s11929_s11 + $0x78] sm:$0xff] %v9801_v61 }
 0x720   : > { %v9849_v8 = vpop.f32.mrf.mxu3 }
 0x721   : > { %9883 = vst [vmem:[%s11929_s11 + $0xf8] sm:$0xff] %v9849_v8 }
 0x722 PF: > { %s11220_s4 = sshll.u32 %s11759_s26, 8  ;;  %s9897_s13 = sshll.u32 %s11929_s11, 4  ;;  %s9898_s13 = int_to_ptr.vmem [resolvable:$true] %s9897_s13 }
 0x723   : > { %s9896_s8 = scalar_lea.hbm %s18129_s5, %s11220_s4  ;;  %s19038_s15 = sand.u32 1, %s11747_s23  }
 0x724   : > { %s9899_s14 = sshll.u32 %s9896_s8, 4  ;;  %s9885_s17 = scalar_lea.sflag [#allocation7], %s19038_s15  ;;  %s9900_s14 = int_to_ptr.hbm [resolvable:$true] %s9899_s14 }
 0x725   : > { %s11685_s18 = sshra.s32 %s9900_s14, 4  ;;  %s11691_s26 = scalar_lea.hbm %s18129_s5, 512  ;;  %s11686_s18 = int_to_ptr.hbm [resolvable:$true] %s11685_s18 }
 0x726   : > { %s11687_s19 = scalar_lea.hbm %s11686_s18, 256  ;;  %p11692_p11 = scmp.lt.s32.totalorder %s11686_s18, %s18129_s5 }
 0x727   : > { %p11688_p7 = scmp.ne.s32.totalorder %s11686_s18, %s11687_s19  ;;  %p11693_p12 = scmp.lt.s32.totalorder %s11691_s26, %s11687_s19 }
 0x729   : > { %p11689_p8 = pnand %p11688_p7, %p11873_p3  ;;  %p11694_p13 = por %p11693_p12, %p11692_p11 }
 0x72b   : > { %p11690_p10 = pneg %p11689_p8 }
 0x72d   : > { %p11695_p0 = pnand %p11694_p13, %p11690_p10 }
 0x72f   : > { %11698 = shalt.err (!%p11695_p0)
}
 0x730   : > { %s11788_s12 = smov 128   ;;  %s11789_s11 = smov 8  }
 0x731   : > { %11273 = dma.vmem_to_hbm [thread:$0]  (%p11873_p3), %s9898_s13, 4096, %s9900_s14, %s9885_s17, %s11788_s12, %s11788_s12, %s11789_s11  }
 0x732 PF: > { %p11285_p1 = scmp.ge.s32.totalorder %s11771_s28, 2  ;;  %s9914_s6 = sand.u32 1, %s11743_s22  }
 0x733   : > { %s9915_s7 = scalar_lea.sflag [#allocation7], %s9914_s6 }
 0x734   : > { %p11280_p2 = pnand %p11285_p1, %p11883_p9 }
 0x736   : > { %p11281_p4 = pneg %p11280_p2 }
 0x738   : > { %11738 = dma.done.wait (%p11281_p4), %s9915_s7, 4096  }
 0x739   : > { %11740 = vsyncadd (%p11281_p4), %s9915_s7, 4294963200  ;;  %s27_s28 = sadd.s32 1, %s11771_s28   ;;  %s19039_s26 = sld [smem:[#allocation12_spill]] }
 0x73a   : > { %p24_p5 = scmp.ge.s32.totalorder %s27_s28, 10   ;;  %s19040_s9 = sld [smem:[#allocation13_spill]] }
 0x73b   : > { %s19041_s27 = sld [smem:[#allocation14_spill]]  ;;  %s19042_s22 = smov %s11747_s23 }
 0x73c   : > { %s19043_s23 = smov %s11751_s24  ;;  %s19044_s24 = smov %s11899_s16 }
 0x73d   : > { %s19045_s25 = smov %s11763_s0  ;;  %26 = sbr.rel (!%p24_p5) target bundleno = 12 (0xc), region = 94 }
 0x740   : > { %s19046_s0 = smov %s19040_s9 }
 0x742   :  { %9921 = vsyncpa [#allocation6], 1 }
 0x743   :  { %9923 = vsyncpa [#allocation6 + $0x1], 1 }
 0x744   :  { %9924 = vsyncpa [#allocation7], 1 }
 0x745   :  { %9926 = vsyncpa [#allocation7 + $0x1], 1 }

</bundles_post_ra>
